<compile_context>
chip_gen: v5e
topology: v5e:2x2
jax: 0.10.0
libtpu: 0.0.40
codegen_flags: <defaults>
</compile_context>

<pallas_src>
import numpy as np
import jax
import jax.numpy as jnp
from jax import lax
from jax.experimental import pallas as pl
from jax.experimental.pallas import tpu as pltpu


def _round_up(x, m):
    return (x + m - 1) // m * m


# ---------------------------------------------------------------------------
# Pallas kernel: fused bidirectional masked LSTM over one time tile.
# Layouts (kernel side, time-major):
#   x      : (T, B, E)        bf16   (streamed twice: forward tile i, backward tile N-1-i)
#   mask   : (T, B, 1)        f32    (1.0 inside each sequence, 0.0 on padding)
#   W_ih^T : (E, 4*Hp)        bf16   gate blocks [i, f, g, o], each padded to 128 lanes
#   W_hh^T : (Hp, 4*Hp)       f32    padded rows/cols zero -> padded lanes stay exactly 0
#   bias   : (1, 4*Hp)        f32    b_ih + b_hh, folded into the hoisted projection
#   out_f/out_b : (T, B, Hp)  f32    per-direction, lane-dense (Hp = 128)
#   h_n/c_n     : (2, B, Hp)  f32    resident accumulator blocks (also the carried state)
# ---------------------------------------------------------------------------
def bilstm_kernel(xf_ref, xb_ref, mf_ref, mb_ref,
                  wih_f_ref, whh_f_ref, b_f_ref,
                  wih_b_ref, whh_b_ref, b_b_ref,
                  outf_ref, outb_ref, hn_ref, cn_ref,
                  gxf_ref, gxb_ref):
    tile_T, B, E = xf_ref.shape
    Hp = whh_f_ref.shape[0]          # lane-padded per-direction hidden (multiple of 128)

    # init carried state (resident output blocks) on the first time tile
    @pl.when(pl.program_id(0) == 0)
    def _():
        hn_ref[...] = jnp.zeros_like(hn_ref)
        cn_ref[...] = jnp.zeros_like(cn_ref)

    # ---- hoisted input projection: one big lane-dense bf16 matmul per direction ----
    xf = xf_ref[...].reshape(tile_T * B, E)
    xb = xb_ref[...].reshape(tile_T * B, E)
    gxf_ref[...] = (jnp.dot(xf, wih_f_ref[...], preferred_element_type=jnp.float32)
                    + b_f_ref[...])
    gxb_ref[...] = (jnp.dot(xb, wih_b_ref[...], preferred_element_type=jnp.float32)
                    + b_b_ref[...])

    whh_f = whh_f_ref[...]
    whh_b = whh_b_ref[...]

    def step(gx, m, h, c, whh):
        # only the small recurrent matmul remains on the serial path (f32 for accuracy)
        gates = gx + jnp.dot(h, whh, preferred_element_type=jnp.float32)
        i_g = jax.nn.sigmoid(gates[:, 0 * Hp:1 * Hp])      # 128-aligned lane slices
        f_g = jax.nn.sigmoid(gates[:, 1 * Hp:2 * Hp])
        g_g = jnp.tanh(gates[:, 2 * Hp:3 * Hp])
        o_g = jax.nn.sigmoid(gates[:, 3 * Hp:4 * Hp])
        c_new = f_g * c + i_g * g_g
        h_new = o_g * jnp.tanh(c_new)
        keep = m > 0.5                                     # packed-seq: hold state on pads
        return jnp.where(keep, h_new, h), jnp.where(keep, c_new, c)

    def body(s, carry):
        h_f, c_f, h_b, c_b = carry
        # forward direction: local step s of the forward tile
        rf = pl.multiple_of(s * B, B)
        m_f = mf_ref[s]
        h_f, c_f = step(gxf_ref[pl.ds(rf, B), :], m_f, h_f, c_f, whh_f)
        outf_ref[s] = (m_f * h_f).astype(outf_ref.dtype)
        # backward direction: local step tile_T-1-s of the (reversed) backward tile
        sb = tile_T - 1 - s
        rb = pl.multiple_of(sb * B, B)
        m_b = mb_ref[sb]
        h_b, c_b = step(gxb_ref[pl.ds(rb, B), :], m_b, h_b, c_b, whh_b)
        outb_ref[sb] = (m_b * h_b).astype(outb_ref.dtype)
        return h_f, c_f, h_b, c_b

    carry0 = (hn_ref[0], cn_ref[0], hn_ref[1], cn_ref[1])
    h_f, c_f, h_b, c_b = lax.fori_loop(0, tile_T, body, carry0, unroll=True)

    hn_ref[0] = h_f
    cn_ref[0] = c_f
    hn_ref[1] = h_b
    cn_ref[1] = c_b


def run_bilstm(x_tbe, m_tb1, params, *, tile_T):
    """x_tbe: (T, B, E) bf16, m_tb1: (T, B, 1) f32; T % tile_T == 0, B % 8 == 0."""
    wih_f, whh_f, b_f, wih_b, whh_b, b_b = params
    T, B, E = x_tbe.shape
    Hp = whh_f.shape[0]
    assert T % tile_T == 0 and B % 8 == 0 and Hp % 128 == 0
    n_t = T // tile_T

    def full(shape):
        return pl.BlockSpec(shape, lambda i, _s=shape: (0,) * len(_s))

    grid_spec = pltpu.PrefetchScalarGridSpec(
        num_scalar_prefetch=0,
        grid=(n_t,),
        in_specs=[
            pl.BlockSpec((tile_T, B, E), lambda i: (i, 0, 0)),             # x, fwd tile
            pl.BlockSpec((tile_T, B, E), lambda i: (n_t - 1 - i, 0, 0)),   # x, bwd tile
            pl.BlockSpec((tile_T, B, 1), lambda i: (i, 0, 0)),             # mask, fwd
            pl.BlockSpec((tile_T, B, 1), lambda i: (n_t - 1 - i, 0, 0)),   # mask, bwd
            full(wih_f.shape), full(whh_f.shape), full(b_f.shape),
            full(wih_b.shape), full(whh_b.shape), full(b_b.shape),
        ],
        out_specs=(
            pl.BlockSpec((tile_T, B, Hp), lambda i: (i, 0, 0)),            # out fwd
            pl.BlockSpec((tile_T, B, Hp), lambda i: (n_t - 1 - i, 0, 0)),  # out bwd
            pl.BlockSpec((2, B, Hp), lambda i: (0, 0, 0)),                 # h_n (resident)
            pl.BlockSpec((2, B, Hp), lambda i: (0, 0, 0)),                 # c_n (resident)
        ),
        scratch_shapes=[
            pltpu.VMEM((tile_T * B, 4 * Hp), jnp.float32),                 # hoisted gates fwd
            pltpu.VMEM((tile_T * B, 4 * Hp), jnp.float32),                 # hoisted gates bwd
        ],
    )
    # tile_T sizing note: per time tile VMEM ~ 2*(2 x-bufs) + 2*(2 out-bufs) + gates
    # scratch + weights; re-derive for v7x's 64 MiB VMEM at realistic (T,B,E).
    return pl.pallas_call(
        bilstm_kernel,
        out_shape=(
            jax.ShapeDtypeStruct((T, B, Hp), jnp.float32),
            jax.ShapeDtypeStruct((T, B, Hp), jnp.float32),
            jax.ShapeDtypeStruct((2, B, Hp), jnp.float32),
            jax.ShapeDtypeStruct((2, B, Hp), jnp.float32),
        ),
        grid_spec=grid_spec,
        compiler_params=pltpu.CompilerParams(
            dimension_semantics=("arbitrary",)),   # recurrence carried across T tiles
    )(x_tbe, x_tbe, m_tb1, m_tb1, wih_f, whh_f, b_f, wih_b, whh_b, b_b)


# ---------------------------------------------------------------------------
# Parameter construction / packing
# ---------------------------------------------------------------------------
def init_lstm_params(key, E, Hc):
    """nn.LSTM default init: U(-1/sqrt(Hc), 1/sqrt(Hc)); raw PyTorch-layout params."""
    bound = 1.0 / float(np.sqrt(Hc))
    ks = jax.random.split(key, 8)
    u = lambda k, shape: jax.random.uniform(k, shape, jnp.float32, -bound, bound)
    return dict(
        w_ih_f=u(ks[0], (4 * Hc, E)), w_hh_f=u(ks[1], (4 * Hc, Hc)),
        b_ih_f=u(ks[2], (4 * Hc,)), b_hh_f=u(ks[3], (4 * Hc,)),
        w_ih_b=u(ks[4], (4 * Hc, E)), w_hh_b=u(ks[5], (4 * Hc, Hc)),
        b_ih_b=u(ks[6], (4 * Hc,)), b_hh_b=u(ks[7], (4 * Hc,)),
    )


def pack_kernel_params(raw, E, Hc, Hp):
    """Transpose for the MXU and pad each gate block [i,f,g,o] to its own 128-lane slot.

    Padded gate columns / W_hh pad rows are zero, so padded hidden lanes stay exactly
    0 through the whole recurrence (g=tanh(0)=0 and c starts at 0)."""
    def pad_cols(w_t):                               # (rows, 4*Hc) -> (rows, 4*Hp)
        rows = w_t.shape[0]
        out = np.zeros((rows, 4 * Hp), np.float32)
        for g in range(4):
            out[:, g * Hp:g * Hp + Hc] = w_t[:, g * Hc:(g + 1) * Hc]
        return out

    def one_dir(w_ih, w_hh, b_ih, b_hh):
        wih_t = pad_cols(np.asarray(w_ih, np.float32).T)           # (E, 4*Hp)
        whh_t = np.zeros((Hp, 4 * Hp), np.float32)
        whh_t[:Hc] = pad_cols(np.asarray(w_hh, np.float32).T)      # (Hp, 4*Hp)
        b = pad_cols((np.asarray(b_ih) + np.asarray(b_hh))[None, :].astype(np.float32))
        return (jnp.asarray(wih_t, jnp.bfloat16),                  # bf16 input projection
                jnp.asarray(whh_t, jnp.float32),                   # f32 recurrent matmul
                jnp.asarray(b, jnp.float32))

    f = one_dir(raw["w_ih_f"], raw["w_hh_f"], raw["b_ih_f"], raw["b_hh_f"])
    b = one_dir(raw["w_ih_b"], raw["w_hh_b"], raw["b_ih_b"], raw["b_hh_b"])
    return f + b


# ---------------------------------------------------------------------------
# Module-level forward (glue: embedding gather, sort_lengths, pack/pad bookkeeping)
# ---------------------------------------------------------------------------
def _prepare(batch, emb_table, tile_T):
    input_ids, input_mask = batch[0], batch[1]
    B, T = input_ids.shape
    E = emb_table.shape[-1]

    # embeddings(*batch): token-embedding lookup -> (B, T, E)
    emb = jnp.take(emb_table, input_ids, axis=0)

    # lens = input_mask.sum(-1).tolist(); sort_lengths with first-occurrence .index()
    # semantics of the reference module (inherently host-side Python-list behaviour).
    # TODO(synk): duplicate lengths select the same row twice, exactly like the
    # reference module; this stage stays outside jit because of .tolist()/.index().
    lens = np.asarray(input_mask).sum(-1).astype(np.int64).tolist()
    sorted_lens = sorted(lens, reverse=True)
    sorted_ids = [lens.index(l) for l in sorted_lens]
    emb_sorted = emb[np.asarray(sorted_ids, dtype=np.int32)]       # (B, T, E)

    # pad batch to >=8 sublanes; truncate/pad T to round_up(max_len, tile_T) so the
    # recurrence never runs over fully-padded trailing time tiles.
    max_len = int(sorted_lens[0])
    B_pad = max(8, _round_up(B, 8))
    T_eff = _round_up(max(max_len, 1), tile_T)
    T_copy = min(T, T_eff)

    lens_pad = np.asarray(sorted_lens + [0] * (B_pad - B))
    valid = (np.arange(T_eff)[None, :] < lens_pad[:, None]).astype(np.float32)

    x = jnp.zeros((B_pad, T_eff, E), jnp.bfloat16)
    x = x.at[:B, :T_copy].set(emb_sorted[:, :T_copy].astype(jnp.bfloat16))
    x_tbe = jnp.transpose(x, (1, 0, 2))                            # (T_eff, B_pad, E)
    m_tb1 = jnp.asarray(valid.T[:, :, None], jnp.float32)          # (T_eff, B_pad, 1)
    return x_tbe, m_tb1, sorted_lens, B


def bert_bilstm_encoder_forward(batch, emb_table, kernel_params, Hc, *, tile_T=8):
    x_tbe, m_tb1, sorted_lens, B = _prepare(batch, emb_table, tile_T)
    out_f, out_b, h_n, c_n = run_bilstm(x_tbe, m_tb1, kernel_params, tile_T=tile_T)

    max_len = int(sorted_lens[0])
    out = jnp.concatenate([out_f[..., :Hc], out_b[..., :Hc]], axis=-1)  # (T, B_pad, 2*Hc)
    output = jnp.transpose(out, (1, 0, 2))[:B, :max_len, :]             # (B, max_len, 2*Hc)
    return output, (h_n[:, :B, :Hc], c_n[:, :B, :Hc])


# ---------------------------------------------------------------------------
# Pure numpy reference of the same masked bidirectional recurrence (f32, unpadded)
# ---------------------------------------------------------------------------
def _bilstm_ref_np(x_tbe, m_tb1, raw, Hc):
    x = np.asarray(jnp.asarray(x_tbe, jnp.float32))
    m = np.asarray(m_tb1, np.float32)
    T, B, _ = x.shape

    def sig(z):
        return 1.0 / (1.0 + np.exp(-z))

    def run_dir(w_ih, w_hh, b_ih, b_hh, reverse):
        wih_t = np.asarray(w_ih, np.float32).T
        whh_t = np.asarray(w_hh, np.float32).T
        bias = (np.asarray(b_ih) + np.asarray(b_hh))[None, :].astype(np.float32)
        h = np.zeros((B, Hc), np.float32)
        c = np.zeros((B, Hc), np.float32)
        out = np.zeros((T, B, Hc), np.float32)
        order = range(T - 1, -1, -1) if reverse else range(T)
        for t in order:
            g = x[t] @ wih_t + h @ whh_t + bias
            i, f = sig(g[:, :Hc]), sig(g[:, Hc:2 * Hc])
            gg, o = np.tanh(g[:, 2 * Hc:3 * Hc]), sig(g[:, 3 * Hc:])
            cn = f * c + i * gg
            hn = o * np.tanh(cn)
            h = np.where(m[t] > 0.5, hn, h)
            c = np.where(m[t] > 0.5, cn, c)
            out[t] = m[t] * h
        return out, h, c

    of, hf, cf = run_dir(raw["w_ih_f"], raw["w_hh_f"], raw["b_ih_f"], raw["b_hh_f"], False)
    ob, hb, cb = run_dir(raw["w_ih_b"], raw["w_hh_b"], raw["b_ih_b"], raw["b_hh_b"], True)
    return np.concatenate([of, ob], -1), np.stack([hf, hb]), np.stack([cf, cb])


if __name__ == "__main__":
    # Small, deterministic configuration
    B, T, E = 4, 16, 32          # batch, seq, embedding_dim
    hidden_dim = 32              # -> Hc = 16 per direction
    Hc = hidden_dim // 2
    Hp = 128                     # lane-padded per-direction hidden (multiple of 128)
    vocab = 50
    tile_T = 8                   # time tile -> grid of 2 (exercises carried state)

    key = jax.random.PRNGKey(0)
    k_emb, k_ids, k_lstm = jax.random.split(key, 3)

    emb_table = jax.random.normal(k_emb, (vocab, E), jnp.float32)
    input_ids = jax.random.randint(k_ids, (B, T), 0, vocab, jnp.int32)

    # distinct lengths (the module's sort_lengths uses first-occurrence .index())
    lens_true = [16, 11, 7, 3]
    input_mask = jnp.asarray(
        (np.arange(T)[None, :] < np.array(lens_true)[:, None]).astype(np.int32))

    raw_params = init_lstm_params(k_lstm, E, Hc)
    kernel_params = pack_kernel_params(raw_params, E, Hc, Hp)

    output, (h_n, c_n) = bert_bilstm_encoder_forward(
        (input_ids, input_mask), emb_table, kernel_params, Hc, tile_T=tile_T)
    output = jax.block_until_ready(output)
    h_n = jax.block_until_ready(h_n)
    c_n = jax.block_until_ready(c_n)

    # Cross-check the Pallas kernel against a pure numpy f32 recurrence on the
    # identical (sorted, padded, bf16-quantized) inputs.
    x_tbe, m_tb1, sorted_lens, _ = _prepare((input_ids, input_mask), emb_table, tile_T)
    out_ref, hn_ref, cn_ref = _bilstm_ref_np(x_tbe, m_tb1, raw_params, Hc)
    max_len = int(sorted_lens[0])
    out_ref = np.transpose(out_ref, (1, 0, 2))[:B, :max_len, :]

    assert np.allclose(np.asarray(output), out_ref, atol=3e-2, rtol=3e-2)
    assert np.allclose(np.asarray(h_n), hn_ref[:, :B], atol=3e-2, rtol=3e-2)
    assert np.allclose(np.asarray(c_n), cn_ref[:, :B], atol=3e-2, rtol=3e-2)

    print("KERNEL_OK")
</pallas_src>

<mosaic_0001>
module attributes {stable_mosaic.version = 11 : i64} {
  func.func @bilstm_kernel(%arg0: i32, %arg1: memref<8x8x32xbf16, #tpu.memory_space<vmem>>, %arg2: memref<8x8x32xbf16, #tpu.memory_space<vmem>>, %arg3: memref<8x8x1xf32, #tpu.memory_space<vmem>>, %arg4: memref<8x8x1xf32, #tpu.memory_space<vmem>>, %arg5: memref<32x512xbf16, #tpu.memory_space<vmem>>, %arg6: memref<128x512xf32, #tpu.memory_space<vmem>>, %arg7: memref<1x512xf32, #tpu.memory_space<vmem>>, %arg8: memref<32x512xbf16, #tpu.memory_space<vmem>>, %arg9: memref<128x512xf32, #tpu.memory_space<vmem>>, %arg10: memref<1x512xf32, #tpu.memory_space<vmem>>, %arg11: memref<8x8x128xf32, #tpu.memory_space<vmem>>, %arg12: memref<8x8x128xf32, #tpu.memory_space<vmem>>, %arg13: memref<2x8x128xf32, #tpu.memory_space<vmem>>, %arg14: memref<2x8x128xf32, #tpu.memory_space<vmem>>, %arg15: memref<64x512xf32, #tpu.memory_space<vmem>>, %arg16: memref<64x512xf32, #tpu.memory_space<vmem>>) attributes {dimension_semantics = [#tpu.dimension_semantics<arbitrary>], iteration_bounds = array<i64: 2>, scalar_prefetch = 0 : i64, scratch_operands = 2 : i64, tpu.core_type = #tpu.core_type<tc>, window_params = [{transform_indices = @transform_0, window_bounds = array<i64: 8, 8, 32>}, {transform_indices = @transform_1, window_bounds = array<i64: 8, 8, 32>}, {transform_indices = @transform_2, window_bounds = array<i64: 8, 8, 1>}, {transform_indices = @transform_3, window_bounds = array<i64: 8, 8, 1>}, {pipeline_mode = #tpu.pipeline_mode<synchronous>, transform_indices = @transform_4, window_bounds = array<i64: 32, 512>}, {pipeline_mode = #tpu.pipeline_mode<synchronous>, transform_indices = @transform_5, window_bounds = array<i64: 128, 512>}, {pipeline_mode = #tpu.pipeline_mode<synchronous>, transform_indices = @transform_6, window_bounds = array<i64: 1, 512>}, {pipeline_mode = #tpu.pipeline_mode<synchronous>, transform_indices = @transform_7, window_bounds = array<i64: 32, 512>}, {pipeline_mode = #tpu.pipeline_mode<synchronous>, transform_indices = @transform_8, window_bounds = array<i64: 128, 512>}, {pipeline_mode = #tpu.pipeline_mode<synchronous>, transform_indices = @transform_9, window_bounds = array<i64: 1, 512>}, {transform_indices = @transform_10, window_bounds = array<i64: 8, 8, 128>}, {transform_indices = @transform_11, window_bounds = array<i64: 8, 8, 128>}, {pipeline_mode = #tpu.pipeline_mode<synchronous>, transform_indices = @transform_12, window_bounds = array<i64: 2, 8, 128>}, {pipeline_mode = #tpu.pipeline_mode<synchronous>, transform_indices = @transform_13, window_bounds = array<i64: 2, 8, 128>}]} {
    %c0_i32 = arith.constant 0 : i32
    %0 = arith.cmpi eq, %arg0, %c0_i32 : i32
    %1 = arith.extui %0 : i1 to i32
    %c0_i32_0 = arith.constant 0 : i32
    %2 = arith.cmpi ne, %1, %c0_i32_0 : i32
    scf.if %2 {
      %cst_231 = arith.constant 0.000000e+00 : f32
      %817 = vector.broadcast %cst_231 : f32 to vector<2x8x128xf32>
      %c0_232 = arith.constant 0 : index
      %c0_233 = arith.constant 0 : index
      %c0_234 = arith.constant 0 : index
      %818 = vector.load %arg13[%c0_232, %c0_233, %c0_234] : memref<2x8x128xf32, #tpu.memory_space<vmem>>, vector<2x8x128xf32>
      tpu.vector_store %arg13[%c0_232, %c0_233, %c0_234], %817 {strides = array<i32>} : memref<2x8x128xf32, #tpu.memory_space<vmem>>, vector<2x8x128xf32>,
      %cst_235 = arith.constant 0.000000e+00 : f32
      %819 = vector.broadcast %cst_235 : f32 to vector<2x8x128xf32>
      %c0_236 = arith.constant 0 : index
      %c0_237 = arith.constant 0 : index
      %c0_238 = arith.constant 0 : index
      %820 = vector.load %arg14[%c0_236, %c0_237, %c0_238] : memref<2x8x128xf32, #tpu.memory_space<vmem>>, vector<2x8x128xf32>
      tpu.vector_store %arg14[%c0_236, %c0_237, %c0_238], %819 {strides = array<i32>} : memref<2x8x128xf32, #tpu.memory_space<vmem>>, vector<2x8x128xf32>,
    } else {
    }
    %c0 = arith.constant 0 : index
    %c0_1 = arith.constant 0 : index
    %c0_2 = arith.constant 0 : index
    %3 = vector.load %arg1[%c0, %c0_1, %c0_2] : memref<8x8x32xbf16, #tpu.memory_space<vmem>>, vector<8x8x32xbf16>
    %4 = vector.shape_cast %3 : vector<8x8x32xbf16> to vector<64x32xbf16>
    %c0_3 = arith.constant 0 : index
    %c0_4 = arith.constant 0 : index
    %c0_5 = arith.constant 0 : index
    %5 = vector.load %arg2[%c0_3, %c0_4, %c0_5] : memref<8x8x32xbf16, #tpu.memory_space<vmem>>, vector<8x8x32xbf16>
    %6 = vector.shape_cast %5 : vector<8x8x32xbf16> to vector<64x32xbf16>
    %c0_6 = arith.constant 0 : index
    %c0_7 = arith.constant 0 : index
    %7 = vector.load %arg5[%c0_6, %c0_7] : memref<32x512xbf16, #tpu.memory_space<vmem>>, vector<32x512xbf16>
    %cst = arith.constant dense<0.000000e+00> : vector<64x512xf32>
    %8 = tpu.matmul %4, %7, %cst {dimension_numbers = #tpu.dot_dimension_numbers<[1], [0], [0], [1], [0, 0, 1, 1], [], []>} : vector<64x32xbf16>, vector<32x512xbf16>, vector<64x512xf32> -> vector<64x512xf32>
    %c0_8 = arith.constant 0 : index
    %c0_9 = arith.constant 0 : index
    %9 = vector.load %arg7[%c0_8, %c0_9] : memref<1x512xf32, #tpu.memory_space<vmem>>, vector<1x512xf32>
    %10 = vector.broadcast %9 : vector<1x512xf32> to vector<64x512xf32>
    %11 = arith.addf %8, %10 : vector<64x512xf32>
    %c0_10 = arith.constant 0 : index
    %c0_11 = arith.constant 0 : index
    %12 = vector.load %arg15[%c0_10, %c0_11] : memref<64x512xf32, #tpu.memory_space<vmem>>, vector<64x512xf32>
    tpu.vector_store %arg15[%c0_10, %c0_11], %11 {strides = array<i32>} : memref<64x512xf32, #tpu.memory_space<vmem>>, vector<64x512xf32>,
    %c0_12 = arith.constant 0 : index
    %c0_13 = arith.constant 0 : index
    %13 = vector.load %arg8[%c0_12, %c0_13] : memref<32x512xbf16, #tpu.memory_space<vmem>>, vector<32x512xbf16>
    %cst_14 = arith.constant dense<0.000000e+00> : vector<64x512xf32>
    %14 = tpu.matmul %6, %13, %cst_14 {dimension_numbers = #tpu.dot_dimension_numbers<[1], [0], [0], [1], [0, 0, 1, 1], [], []>} : vector<64x32xbf16>, vector<32x512xbf16>, vector<64x512xf32> -> vector<64x512xf32>
    %c0_15 = arith.constant 0 : index
    %c0_16 = arith.constant 0 : index
    %15 = vector.load %arg10[%c0_15, %c0_16] : memref<1x512xf32, #tpu.memory_space<vmem>>, vector<1x512xf32>
    %16 = vector.broadcast %15 : vector<1x512xf32> to vector<64x512xf32>
    %17 = arith.addf %14, %16 : vector<64x512xf32>
    %c0_17 = arith.constant 0 : index
    %c0_18 = arith.constant 0 : index
    %18 = vector.load %arg16[%c0_17, %c0_18] : memref<64x512xf32, #tpu.memory_space<vmem>>, vector<64x512xf32>
    tpu.vector_store %arg16[%c0_17, %c0_18], %17 {strides = array<i32>} : memref<64x512xf32, #tpu.memory_space<vmem>>, vector<64x512xf32>,
    %c0_19 = arith.constant 0 : index
    %c0_20 = arith.constant 0 : index
    %19 = vector.load %arg6[%c0_19, %c0_20] : memref<128x512xf32, #tpu.memory_space<vmem>>, vector<128x512xf32>
    %c0_21 = arith.constant 0 : index
    %c0_22 = arith.constant 0 : index
    %20 = vector.load %arg9[%c0_21, %c0_22] : memref<128x512xf32, #tpu.memory_space<vmem>>, vector<128x512xf32>
    %c0_23 = arith.constant 0 : index
    %c0_24 = arith.constant 0 : index
    %c0_25 = arith.constant 0 : index
    %21 = vector.load %arg13[%c0_23, %c0_24, %c0_25] : memref<2x8x128xf32, #tpu.memory_space<vmem>>, vector<1x8x128xf32>
    %22 = vector.shape_cast %21 : vector<1x8x128xf32> to vector<8x128xf32>
    %c0_26 = arith.constant 0 : index
    %c0_27 = arith.constant 0 : index
    %c0_28 = arith.constant 0 : index
    %23 = vector.load %arg14[%c0_26, %c0_27, %c0_28] : memref<2x8x128xf32, #tpu.memory_space<vmem>>, vector<1x8x128xf32>
    %24 = vector.shape_cast %23 : vector<1x8x128xf32> to vector<8x128xf32>
    %c1 = arith.constant 1 : index
    %c0_29 = arith.constant 0 : index
    %c0_30 = arith.constant 0 : index
    %25 = vector.load %arg13[%c1, %c0_29, %c0_30] : memref<2x8x128xf32, #tpu.memory_space<vmem>>, vector<1x8x128xf32>
    %26 = vector.shape_cast %25 : vector<1x8x128xf32> to vector<8x128xf32>
    %c1_31 = arith.constant 1 : index
    %c0_32 = arith.constant 0 : index
    %c0_33 = arith.constant 0 : index
    %27 = vector.load %arg14[%c1_31, %c0_32, %c0_33] : memref<2x8x128xf32, #tpu.memory_space<vmem>>, vector<1x8x128xf32>
    %28 = vector.shape_cast %27 : vector<1x8x128xf32> to vector<8x128xf32>
    %c0_i32_34 = arith.constant 0 : i32
    %c8_i32 = arith.constant 8 : i32
    %29 = arith.muli %c0_i32_34, %c8_i32 : i32
    %30 = tpu.assume_multiple %29, 8 : i32
    %31 = arith.index_cast %c0_i32_34 : i32 to index
    %c0_35 = arith.constant 0 : index
    %c0_36 = arith.constant 0 : index
    %32 = vector.load %arg3[%31, %c0_35, %c0_36] : memref<8x8x1xf32, #tpu.memory_space<vmem>>, vector<1x8x1xf32>
    %33 = vector.shape_cast %32 : vector<1x8x1xf32> to vector<8x1xf32>
    %34 = arith.index_cast %30 : i32 to index
    %c0_37 = arith.constant 0 : index
    %35 = vector.load %arg15[%34, %c0_37] : memref<64x512xf32, #tpu.memory_space<vmem>>, vector<8x512xf32>
    %cst_38 = arith.constant dense<0.000000e+00> : vector<8x512xf32>
    %36 = tpu.matmul %22, %19, %cst_38 {dimension_numbers = #tpu.dot_dimension_numbers<[1], [0], [0], [1], [0, 0, 1, 1], [], []>} : vector<8x128xf32>, vector<128x512xf32>, vector<8x512xf32> -> vector<8x512xf32>
    %37 = arith.addf %35, %36 : vector<8x512xf32>
    %38 = vector.extract_strided_slice %37 {offsets = [0, 0], sizes = [8, 128], strides = [1, 1]} : vector<8x512xf32> to vector<8x128xf32>
    %39 = arith.negf %38 : vector<8x128xf32>
    %40 = math.exp %39 : vector<8x128xf32>
    %cst_39 = arith.constant 1.000000e+00 : f32
    %41 = vector.broadcast %cst_39 : f32 to vector<8x128xf32>
    %42 = arith.addf %41, %40 : vector<8x128xf32>
    %43 = arith.divf %41, %42 : vector<8x128xf32>
    %44 = vector.extract_strided_slice %37 {offsets = [0, 128], sizes = [8, 128], strides = [1, 1]} : vector<8x512xf32> to vector<8x128xf32>
    %45 = arith.negf %44 : vector<8x128xf32>
    %46 = math.exp %45 : vector<8x128xf32>
    %cst_40 = arith.constant 1.000000e+00 : f32
    %47 = vector.broadcast %cst_40 : f32 to vector<8x128xf32>
    %48 = arith.addf %47, %46 : vector<8x128xf32>
    %49 = arith.divf %47, %48 : vector<8x128xf32>
    %50 = vector.extract_strided_slice %37 {offsets = [0, 256], sizes = [8, 128], strides = [1, 1]} : vector<8x512xf32> to vector<8x128xf32>
    %51 = math.tanh %50 : vector<8x128xf32>
    %52 = vector.extract_strided_slice %37 {offsets = [0, 384], sizes = [8, 128], strides = [1, 1]} : vector<8x512xf32> to vector<8x128xf32>
    %53 = arith.negf %52 : vector<8x128xf32>
    %54 = math.exp %53 : vector<8x128xf32>
    %cst_41 = arith.constant 1.000000e+00 : f32
    %55 = vector.broadcast %cst_41 : f32 to vector<8x128xf32>
    %56 = arith.addf %55, %54 : vector<8x128xf32>
    %57 = arith.divf %55, %56 : vector<8x128xf32>
    %58 = arith.mulf %49, %24 : vector<8x128xf32>
    %59 = arith.mulf %43, %51 : vector<8x128xf32>
    %60 = arith.addf %58, %59 : vector<8x128xf32>
    %61 = math.tanh %60 : vector<8x128xf32>
    %62 = arith.mulf %57, %61 : vector<8x128xf32>
    %cst_42 = arith.constant 5.000000e-01 : f32
    %63 = vector.broadcast %cst_42 : f32 to vector<8x1xf32>
    %64 = arith.cmpf ogt, %33, %63 : vector<8x1xf32>
    %65 = vector.shape_cast %64 : vector<8x1xi1> to vector<8x1xi1>
    %66 = vector.broadcast %65 : vector<8x1xi1> to vector<8x128xi1>
    %67 = arith.select %66, %62, %22 : vector<8x128xi1>, vector<8x128xf32>
    %68 = vector.shape_cast %64 : vector<8x1xi1> to vector<8x1xi1>
    %69 = vector.broadcast %68 : vector<8x1xi1> to vector<8x128xi1>
    %70 = arith.select %69, %60, %24 : vector<8x128xi1>, vector<8x128xf32>
    %71 = vector.broadcast %33 : vector<8x1xf32> to vector<8x128xf32>
    %72 = arith.mulf %71, %67 : vector<8x128xf32>
    %73 = arith.index_cast %c0_i32_34 : i32 to index
    %c0_43 = arith.constant 0 : index
    %c0_44 = arith.constant 0 : index
    %74 = vector.load %arg11[%73, %c0_43, %c0_44] : memref<8x8x128xf32, #tpu.memory_space<vmem>>, vector<1x8x128xf32>
    %75 = vector.shape_cast %74 : vector<1x8x128xf32> to vector<8x128xf32>
    %76 = vector.shape_cast %72 : vector<8x128xf32> to vector<1x8x128xf32>
    tpu.vector_store %arg11[%73, %c0_43, %c0_44], %76 {strides = array<i32>} : memref<8x8x128xf32, #tpu.memory_space<vmem>>, vector<1x8x128xf32>,
    %c7_i32 = arith.constant 7 : i32
    %77 = arith.subi %c7_i32, %c0_i32_34 : i32
    %c8_i32_45 = arith.constant 8 : i32
    %78 = arith.muli %77, %c8_i32_45 : i32
    %79 = tpu.assume_multiple %78, 8 : i32
    %80 = arith.index_cast %77 : i32 to index
    %c0_46 = arith.constant 0 : index
    %c0_47 = arith.constant 0 : index
    %81 = vector.load %arg4[%80, %c0_46, %c0_47] : memref<8x8x1xf32, #tpu.memory_space<vmem>>, vector<1x8x1xf32>
    %82 = vector.shape_cast %81 : vector<1x8x1xf32> to vector<8x1xf32>
    %83 = arith.index_cast %79 : i32 to index
    %c0_48 = arith.constant 0 : index
    %84 = vector.load %arg16[%83, %c0_48] : memref<64x512xf32, #tpu.memory_space<vmem>>, vector<8x512xf32>
    %cst_49 = arith.constant dense<0.000000e+00> : vector<8x512xf32>
    %85 = tpu.matmul %26, %20, %cst_49 {dimension_numbers = #tpu.dot_dimension_numbers<[1], [0], [0], [1], [0, 0, 1, 1], [], []>} : vector<8x128xf32>, vector<128x512xf32>, vector<8x512xf32> -> vector<8x512xf32>
    %86 = arith.addf %84, %85 : vector<8x512xf32>
    %87 = vector.extract_strided_slice %86 {offsets = [0, 0], sizes = [8, 128], strides = [1, 1]} : vector<8x512xf32> to vector<8x128xf32>
    %88 = arith.negf %87 : vector<8x128xf32>
    %89 = math.exp %88 : vector<8x128xf32>
    %cst_50 = arith.constant 1.000000e+00 : f32
    %90 = vector.broadcast %cst_50 : f32 to vector<8x128xf32>
    %91 = arith.addf %90, %89 : vector<8x128xf32>
    %92 = arith.divf %90, %91 : vector<8x128xf32>
    %93 = vector.extract_strided_slice %86 {offsets = [0, 128], sizes = [8, 128], strides = [1, 1]} : vector<8x512xf32> to vector<8x128xf32>
    %94 = arith.negf %93 : vector<8x128xf32>
    %95 = math.exp %94 : vector<8x128xf32>
    %cst_51 = arith.constant 1.000000e+00 : f32
    %96 = vector.broadcast %cst_51 : f32 to vector<8x128xf32>
    %97 = arith.addf %96, %95 : vector<8x128xf32>
    %98 = arith.divf %96, %97 : vector<8x128xf32>
    %99 = vector.extract_strided_slice %86 {offsets = [0, 256], sizes = [8, 128], strides = [1, 1]} : vector<8x512xf32> to vector<8x128xf32>
    %100 = math.tanh %99 : vector<8x128xf32>
    %101 = vector.extract_strided_slice %86 {offsets = [0, 384], sizes = [8, 128], strides = [1, 1]} : vector<8x512xf32> to vector<8x128xf32>
    %102 = arith.negf %101 : vector<8x128xf32>
    %103 = math.exp %102 : vector<8x128xf32>
    %cst_52 = arith.constant 1.000000e+00 : f32
    %104 = vector.broadcast %cst_52 : f32 to vector<8x128xf32>
    %105 = arith.addf %104, %103 : vector<8x128xf32>
    %106 = arith.divf %104, %105 : vector<8x128xf32>
    %107 = arith.mulf %98, %28 : vector<8x128xf32>
    %108 = arith.mulf %92, %100 : vector<8x128xf32>
    %109 = arith.addf %107, %108 : vector<8x128xf32>
    %110 = math.tanh %109 : vector<8x128xf32>
    %111 = arith.mulf %106, %110 : vector<8x128xf32>
    %cst_53 = arith.constant 5.000000e-01 : f32
    %112 = vector.broadcast %cst_53 : f32 to vector<8x1xf32>
    %113 = arith.cmpf ogt, %82, %112 : vector<8x1xf32>
    %114 = vector.shape_cast %113 : vector<8x1xi1> to vector<8x1xi1>
    %115 = vector.broadcast %114 : vector<8x1xi1> to vector<8x128xi1>
    %116 = arith.select %115, %111, %26 : vector<8x128xi1>, vector<8x128xf32>
    %117 = vector.shape_cast %113 : vector<8x1xi1> to vector<8x1xi1>
    %118 = vector.broadcast %117 : vector<8x1xi1> to vector<8x128xi1>
    %119 = arith.select %118, %109, %28 : vector<8x128xi1>, vector<8x128xf32>
    %120 = vector.broadcast %82 : vector<8x1xf32> to vector<8x128xf32>
    %121 = arith.mulf %120, %116 : vector<8x128xf32>
    %122 = arith.index_cast %77 : i32 to index
    %c0_54 = arith.constant 0 : index
    %c0_55 = arith.constant 0 : index
    %123 = vector.load %arg12[%122, %c0_54, %c0_55] : memref<8x8x128xf32, #tpu.memory_space<vmem>>, vector<1x8x128xf32>
    %124 = vector.shape_cast %123 : vector<1x8x128xf32> to vector<8x128xf32>
    %125 = vector.shape_cast %121 : vector<8x128xf32> to vector<1x8x128xf32>
    tpu.vector_store %arg12[%122, %c0_54, %c0_55], %125 {strides = array<i32>} : memref<8x8x128xf32, #tpu.memory_space<vmem>>, vector<1x8x128xf32>,
    %c1_i32 = arith.constant 1 : i32
    %c8_i32_56 = arith.constant 8 : i32
    %126 = arith.muli %c1_i32, %c8_i32_56 : i32
    %127 = tpu.assume_multiple %126, 8 : i32
    %128 = arith.index_cast %c1_i32 : i32 to index
    %c0_57 = arith.constant 0 : index
    %c0_58 = arith.constant 0 : index
    %129 = vector.load %arg3[%128, %c0_57, %c0_58] : memref<8x8x1xf32, #tpu.memory_space<vmem>>, vector<1x8x1xf32>
    %130 = vector.shape_cast %129 : vector<1x8x1xf32> to vector<8x1xf32>
    %131 = arith.index_cast %127 : i32 to index
    %c0_59 = arith.constant 0 : index
    %132 = vector.load %arg15[%131, %c0_59] : memref<64x512xf32, #tpu.memory_space<vmem>>, vector<8x512xf32>
    %cst_60 = arith.constant dense<0.000000e+00> : vector<8x512xf32>
    %133 = tpu.matmul %67, %19, %cst_60 {dimension_numbers = #tpu.dot_dimension_numbers<[1], [0], [0], [1], [0, 0, 1, 1], [], []>} : vector<8x128xf32>, vector<128x512xf32>, vector<8x512xf32> -> vector<8x512xf32>
    %134 = arith.addf %132, %133 : vector<8x512xf32>
    %135 = vector.extract_strided_slice %134 {offsets = [0, 0], sizes = [8, 128], strides = [1, 1]} : vector<8x512xf32> to vector<8x128xf32>
    %136 = arith.negf %135 : vector<8x128xf32>
    %137 = math.exp %136 : vector<8x128xf32>
    %cst_61 = arith.constant 1.000000e+00 : f32
    %138 = vector.broadcast %cst_61 : f32 to vector<8x128xf32>
    %139 = arith.addf %138, %137 : vector<8x128xf32>
    %140 = arith.divf %138, %139 : vector<8x128xf32>
    %141 = vector.extract_strided_slice %134 {offsets = [0, 128], sizes = [8, 128], strides = [1, 1]} : vector<8x512xf32> to vector<8x128xf32>
    %142 = arith.negf %141 : vector<8x128xf32>
    %143 = math.exp %142 : vector<8x128xf32>
    %cst_62 = arith.constant 1.000000e+00 : f32
    %144 = vector.broadcast %cst_62 : f32 to vector<8x128xf32>
    %145 = arith.addf %144, %143 : vector<8x128xf32>
    %146 = arith.divf %144, %145 : vector<8x128xf32>
    %147 = vector.extract_strided_slice %134 {offsets = [0, 256], sizes = [8, 128], strides = [1, 1]} : vector<8x512xf32> to vector<8x128xf32>
    %148 = math.tanh %147 : vector<8x128xf32>
    %149 = vector.extract_strided_slice %134 {offsets = [0, 384], sizes = [8, 128], strides = [1, 1]} : vector<8x512xf32> to vector<8x128xf32>
    %150 = arith.negf %149 : vector<8x128xf32>
    %151 = math.exp %150 : vector<8x128xf32>
    %cst_63 = arith.constant 1.000000e+00 : f32
    %152 = vector.broadcast %cst_63 : f32 to vector<8x128xf32>
    %153 = arith.addf %152, %151 : vector<8x128xf32>
    %154 = arith.divf %152, %153 : vector<8x128xf32>
    %155 = arith.mulf %146, %70 : vector<8x128xf32>
    %156 = arith.mulf %140, %148 : vector<8x128xf32>
    %157 = arith.addf %155, %156 : vector<8x128xf32>
    %158 = math.tanh %157 : vector<8x128xf32>
    %159 = arith.mulf %154, %158 : vector<8x128xf32>
    %cst_64 = arith.constant 5.000000e-01 : f32
    %160 = vector.broadcast %cst_64 : f32 to vector<8x1xf32>
    %161 = arith.cmpf ogt, %130, %160 : vector<8x1xf32>
    %162 = vector.shape_cast %161 : vector<8x1xi1> to vector<8x1xi1>
    %163 = vector.broadcast %162 : vector<8x1xi1> to vector<8x128xi1>
    %164 = arith.select %163, %159, %67 : vector<8x128xi1>, vector<8x128xf32>
    %165 = vector.shape_cast %161 : vector<8x1xi1> to vector<8x1xi1>
    %166 = vector.broadcast %165 : vector<8x1xi1> to vector<8x128xi1>
    %167 = arith.select %166, %157, %70 : vector<8x128xi1>, vector<8x128xf32>
    %168 = vector.broadcast %130 : vector<8x1xf32> to vector<8x128xf32>
    %169 = arith.mulf %168, %164 : vector<8x128xf32>
    %170 = arith.index_cast %c1_i32 : i32 to index
    %c0_65 = arith.constant 0 : index
    %c0_66 = arith.constant 0 : index
    %171 = vector.load %arg11[%170, %c0_65, %c0_66] : memref<8x8x128xf32, #tpu.memory_space<vmem>>, vector<1x8x128xf32>
    %172 = vector.shape_cast %171 : vector<1x8x128xf32> to vector<8x128xf32>
    %173 = vector.shape_cast %169 : vector<8x128xf32> to vector<1x8x128xf32>
    tpu.vector_store %arg11[%170, %c0_65, %c0_66], %173 {strides = array<i32>} : memref<8x8x128xf32, #tpu.memory_space<vmem>>, vector<1x8x128xf32>,
    %c7_i32_67 = arith.constant 7 : i32
    %174 = arith.subi %c7_i32_67, %c1_i32 : i32
    %c8_i32_68 = arith.constant 8 : i32
    %175 = arith.muli %174, %c8_i32_68 : i32
    %176 = tpu.assume_multiple %175, 8 : i32
    %177 = arith.index_cast %174 : i32 to index
    %c0_69 = arith.constant 0 : index
    %c0_70 = arith.constant 0 : index
    %178 = vector.load %arg4[%177, %c0_69, %c0_70] : memref<8x8x1xf32, #tpu.memory_space<vmem>>, vector<1x8x1xf32>
    %179 = vector.shape_cast %178 : vector<1x8x1xf32> to vector<8x1xf32>
    %180 = arith.index_cast %176 : i32 to index
    %c0_71 = arith.constant 0 : index
    %181 = vector.load %arg16[%180, %c0_71] : memref<64x512xf32, #tpu.memory_space<vmem>>, vector<8x512xf32>
    %cst_72 = arith.constant dense<0.000000e+00> : vector<8x512xf32>
    %182 = tpu.matmul %116, %20, %cst_72 {dimension_numbers = #tpu.dot_dimension_numbers<[1], [0], [0], [1], [0, 0, 1, 1], [], []>} : vector<8x128xf32>, vector<128x512xf32>, vector<8x512xf32> -> vector<8x512xf32>
    %183 = arith.addf %181, %182 : vector<8x512xf32>
    %184 = vector.extract_strided_slice %183 {offsets = [0, 0], sizes = [8, 128], strides = [1, 1]} : vector<8x512xf32> to vector<8x128xf32>
    %185 = arith.negf %184 : vector<8x128xf32>
    %186 = math.exp %185 : vector<8x128xf32>
    %cst_73 = arith.constant 1.000000e+00 : f32
    %187 = vector.broadcast %cst_73 : f32 to vector<8x128xf32>
    %188 = arith.addf %187, %186 : vector<8x128xf32>
    %189 = arith.divf %187, %188 : vector<8x128xf32>
    %190 = vector.extract_strided_slice %183 {offsets = [0, 128], sizes = [8, 128], strides = [1, 1]} : vector<8x512xf32> to vector<8x128xf32>
    %191 = arith.negf %190 : vector<8x128xf32>
    %192 = math.exp %191 : vector<8x128xf32>
    %cst_74 = arith.constant 1.000000e+00 : f32
    %193 = vector.broadcast %cst_74 : f32 to vector<8x128xf32>
    %194 = arith.addf %193, %192 : vector<8x128xf32>
    %195 = arith.divf %193, %194 : vector<8x128xf32>
    %196 = vector.extract_strided_slice %183 {offsets = [0, 256], sizes = [8, 128], strides = [1, 1]} : vector<8x512xf32> to vector<8x128xf32>
    %197 = math.tanh %196 : vector<8x128xf32>
    %198 = vector.extract_strided_slice %183 {offsets = [0, 384], sizes = [8, 128], strides = [1, 1]} : vector<8x512xf32> to vector<8x128xf32>
    %199 = arith.negf %198 : vector<8x128xf32>
    %200 = math.exp %199 : vector<8x128xf32>
    %cst_75 = arith.constant 1.000000e+00 : f32
    %201 = vector.broadcast %cst_75 : f32 to vector<8x128xf32>
    %202 = arith.addf %201, %200 : vector<8x128xf32>
    %203 = arith.divf %201, %202 : vector<8x128xf32>
    %204 = arith.mulf %195, %119 : vector<8x128xf32>
    %205 = arith.mulf %189, %197 : vector<8x128xf32>
    %206 = arith.addf %204, %205 : vector<8x128xf32>
    %207 = math.tanh %206 : vector<8x128xf32>
    %208 = arith.mulf %203, %207 : vector<8x128xf32>
    %cst_76 = arith.constant 5.000000e-01 : f32
    %209 = vector.broadcast %cst_76 : f32 to vector<8x1xf32>
    %210 = arith.cmpf ogt, %179, %209 : vector<8x1xf32>
    %211 = vector.shape_cast %210 : vector<8x1xi1> to vector<8x1xi1>
    %212 = vector.broadcast %211 : vector<8x1xi1> to vector<8x128xi1>
    %213 = arith.select %212, %208, %116 : vector<8x128xi1>, vector<8x128xf32>
    %214 = vector.shape_cast %210 : vector<8x1xi1> to vector<8x1xi1>
    %215 = vector.broadcast %214 : vector<8x1xi1> to vector<8x128xi1>
    %216 = arith.select %215, %206, %119 : vector<8x128xi1>, vector<8x128xf32>
    %217 = vector.broadcast %179 : vector<8x1xf32> to vector<8x128xf32>
    %218 = arith.mulf %217, %213 : vector<8x128xf32>
    %219 = arith.index_cast %174 : i32 to index
    %c0_77 = arith.constant 0 : index
    %c0_78 = arith.constant 0 : index
    %220 = vector.load %arg12[%219, %c0_77, %c0_78] : memref<8x8x128xf32, #tpu.memory_space<vmem>>, vector<1x8x128xf32>
    %221 = vector.shape_cast %220 : vector<1x8x128xf32> to vector<8x128xf32>
    %222 = vector.shape_cast %218 : vector<8x128xf32> to vector<1x8x128xf32>
    tpu.vector_store %arg12[%219, %c0_77, %c0_78], %222 {strides = array<i32>} : memref<8x8x128xf32, #tpu.memory_space<vmem>>, vector<1x8x128xf32>,
    %c2_i32 = arith.constant 2 : i32
    %c8_i32_79 = arith.constant 8 : i32
    %223 = arith.muli %c2_i32, %c8_i32_79 : i32
    %224 = tpu.assume_multiple %223, 8 : i32
    %225 = arith.index_cast %c2_i32 : i32 to index
    %c0_80 = arith.constant 0 : index
    %c0_81 = arith.constant 0 : index
    %226 = vector.load %arg3[%225, %c0_80, %c0_81] : memref<8x8x1xf32, #tpu.memory_space<vmem>>, vector<1x8x1xf32>
    %227 = vector.shape_cast %226 : vector<1x8x1xf32> to vector<8x1xf32>
    %228 = arith.index_cast %224 : i32 to index
    %c0_82 = arith.constant 0 : index
    %229 = vector.load %arg15[%228, %c0_82] : memref<64x512xf32, #tpu.memory_space<vmem>>, vector<8x512xf32>
    %cst_83 = arith.constant dense<0.000000e+00> : vector<8x512xf32>
    %230 = tpu.matmul %164, %19, %cst_83 {dimension_numbers = #tpu.dot_dimension_numbers<[1], [0], [0], [1], [0, 0, 1, 1], [], []>} : vector<8x128xf32>, vector<128x512xf32>, vector<8x512xf32> -> vector<8x512xf32>
    %231 = arith.addf %229, %230 : vector<8x512xf32>
    %232 = vector.extract_strided_slice %231 {offsets = [0, 0], sizes = [8, 128], strides = [1, 1]} : vector<8x512xf32> to vector<8x128xf32>
    %233 = arith.negf %232 : vector<8x128xf32>
    %234 = math.exp %233 : vector<8x128xf32>
    %cst_84 = arith.constant 1.000000e+00 : f32
    %235 = vector.broadcast %cst_84 : f32 to vector<8x128xf32>
    %236 = arith.addf %235, %234 : vector<8x128xf32>
    %237 = arith.divf %235, %236 : vector<8x128xf32>
    %238 = vector.extract_strided_slice %231 {offsets = [0, 128], sizes = [8, 128], strides = [1, 1]} : vector<8x512xf32> to vector<8x128xf32>
    %239 = arith.negf %238 : vector<8x128xf32>
    %240 = math.exp %239 : vector<8x128xf32>
    %cst_85 = arith.constant 1.000000e+00 : f32
    %241 = vector.broadcast %cst_85 : f32 to vector<8x128xf32>
    %242 = arith.addf %241, %240 : vector<8x128xf32>
    %243 = arith.divf %241, %242 : vector<8x128xf32>
    %244 = vector.extract_strided_slice %231 {offsets = [0, 256], sizes = [8, 128], strides = [1, 1]} : vector<8x512xf32> to vector<8x128xf32>
    %245 = math.tanh %244 : vector<8x128xf32>
    %246 = vector.extract_strided_slice %231 {offsets = [0, 384], sizes = [8, 128], strides = [1, 1]} : vector<8x512xf32> to vector<8x128xf32>
    %247 = arith.negf %246 : vector<8x128xf32>
    %248 = math.exp %247 : vector<8x128xf32>
    %cst_86 = arith.constant 1.000000e+00 : f32
    %249 = vector.broadcast %cst_86 : f32 to vector<8x128xf32>
    %250 = arith.addf %249, %248 : vector<8x128xf32>
    %251 = arith.divf %249, %250 : vector<8x128xf32>
    %252 = arith.mulf %243, %167 : vector<8x128xf32>
    %253 = arith.mulf %237, %245 : vector<8x128xf32>
    %254 = arith.addf %252, %253 : vector<8x128xf32>
    %255 = math.tanh %254 : vector<8x128xf32>
    %256 = arith.mulf %251, %255 : vector<8x128xf32>
    %cst_87 = arith.constant 5.000000e-01 : f32
    %257 = vector.broadcast %cst_87 : f32 to vector<8x1xf32>
    %258 = arith.cmpf ogt, %227, %257 : vector<8x1xf32>
    %259 = vector.shape_cast %258 : vector<8x1xi1> to vector<8x1xi1>
    %260 = vector.broadcast %259 : vector<8x1xi1> to vector<8x128xi1>
    %261 = arith.select %260, %256, %164 : vector<8x128xi1>, vector<8x128xf32>
    %262 = vector.shape_cast %258 : vector<8x1xi1> to vector<8x1xi1>
    %263 = vector.broadcast %262 : vector<8x1xi1> to vector<8x128xi1>
    %264 = arith.select %263, %254, %167 : vector<8x128xi1>, vector<8x128xf32>
    %265 = vector.broadcast %227 : vector<8x1xf32> to vector<8x128xf32>
    %266 = arith.mulf %265, %261 : vector<8x128xf32>
    %267 = arith.index_cast %c2_i32 : i32 to index
    %c0_88 = arith.constant 0 : index
    %c0_89 = arith.constant 0 : index
    %268 = vector.load %arg11[%267, %c0_88, %c0_89] : memref<8x8x128xf32, #tpu.memory_space<vmem>>, vector<1x8x128xf32>
    %269 = vector.shape_cast %268 : vector<1x8x128xf32> to vector<8x128xf32>
    %270 = vector.shape_cast %266 : vector<8x128xf32> to vector<1x8x128xf32>
    tpu.vector_store %arg11[%267, %c0_88, %c0_89], %270 {strides = array<i32>} : memref<8x8x128xf32, #tpu.memory_space<vmem>>, vector<1x8x128xf32>,
    %c7_i32_90 = arith.constant 7 : i32
    %271 = arith.subi %c7_i32_90, %c2_i32 : i32
    %c8_i32_91 = arith.constant 8 : i32
    %272 = arith.muli %271, %c8_i32_91 : i32
    %273 = tpu.assume_multiple %272, 8 : i32
    %274 = arith.index_cast %271 : i32 to index
    %c0_92 = arith.constant 0 : index
    %c0_93 = arith.constant 0 : index
    %275 = vector.load %arg4[%274, %c0_92, %c0_93] : memref<8x8x1xf32, #tpu.memory_space<vmem>>, vector<1x8x1xf32>
    %276 = vector.shape_cast %275 : vector<1x8x1xf32> to vector<8x1xf32>
    %277 = arith.index_cast %273 : i32 to index
    %c0_94 = arith.constant 0 : index
    %278 = vector.load %arg16[%277, %c0_94] : memref<64x512xf32, #tpu.memory_space<vmem>>, vector<8x512xf32>
    %cst_95 = arith.constant dense<0.000000e+00> : vector<8x512xf32>
    %279 = tpu.matmul %213, %20, %cst_95 {dimension_numbers = #tpu.dot_dimension_numbers<[1], [0], [0], [1], [0, 0, 1, 1], [], []>} : vector<8x128xf32>, vector<128x512xf32>, vector<8x512xf32> -> vector<8x512xf32>
    %280 = arith.addf %278, %279 : vector<8x512xf32>
    %281 = vector.extract_strided_slice %280 {offsets = [0, 0], sizes = [8, 128], strides = [1, 1]} : vector<8x512xf32> to vector<8x128xf32>
    %282 = arith.negf %281 : vector<8x128xf32>
    %283 = math.exp %282 : vector<8x128xf32>
    %cst_96 = arith.constant 1.000000e+00 : f32
    %284 = vector.broadcast %cst_96 : f32 to vector<8x128xf32>
    %285 = arith.addf %284, %283 : vector<8x128xf32>
    %286 = arith.divf %284, %285 : vector<8x128xf32>
    %287 = vector.extract_strided_slice %280 {offsets = [0, 128], sizes = [8, 128], strides = [1, 1]} : vector<8x512xf32> to vector<8x128xf32>
    %288 = arith.negf %287 : vector<8x128xf32>
    %289 = math.exp %288 : vector<8x128xf32>
    %cst_97 = arith.constant 1.000000e+00 : f32
    %290 = vector.broadcast %cst_97 : f32 to vector<8x128xf32>
    %291 = arith.addf %290, %289 : vector<8x128xf32>
    %292 = arith.divf %290, %291 : vector<8x128xf32>
    %293 = vector.extract_strided_slice %280 {offsets = [0, 256], sizes = [8, 128], strides = [1, 1]} : vector<8x512xf32> to vector<8x128xf32>
    %294 = math.tanh %293 : vector<8x128xf32>
    %295 = vector.extract_strided_slice %280 {offsets = [0, 384], sizes = [8, 128], strides = [1, 1]} : vector<8x512xf32> to vector<8x128xf32>
    %296 = arith.negf %295 : vector<8x128xf32>
    %297 = math.exp %296 : vector<8x128xf32>
    %cst_98 = arith.constant 1.000000e+00 : f32
    %298 = vector.broadcast %cst_98 : f32 to vector<8x128xf32>
    %299 = arith.addf %298, %297 : vector<8x128xf32>
    %300 = arith.divf %298, %299 : vector<8x128xf32>
    %301 = arith.mulf %292, %216 : vector<8x128xf32>
    %302 = arith.mulf %286, %294 : vector<8x128xf32>
    %303 = arith.addf %301, %302 : vector<8x128xf32>
    %304 = math.tanh %303 : vector<8x128xf32>
    %305 = arith.mulf %300, %304 : vector<8x128xf32>
    %cst_99 = arith.constant 5.000000e-01 : f32
    %306 = vector.broadcast %cst_99 : f32 to vector<8x1xf32>
    %307 = arith.cmpf ogt, %276, %306 : vector<8x1xf32>
    %308 = vector.shape_cast %307 : vector<8x1xi1> to vector<8x1xi1>
    %309 = vector.broadcast %308 : vector<8x1xi1> to vector<8x128xi1>
    %310 = arith.select %309, %305, %213 : vector<8x128xi1>, vector<8x128xf32>
    %311 = vector.shape_cast %307 : vector<8x1xi1> to vector<8x1xi1>
    %312 = vector.broadcast %311 : vector<8x1xi1> to vector<8x128xi1>
    %313 = arith.select %312, %303, %216 : vector<8x128xi1>, vector<8x128xf32>
    %314 = vector.broadcast %276 : vector<8x1xf32> to vector<8x128xf32>
    %315 = arith.mulf %314, %310 : vector<8x128xf32>
    %316 = arith.index_cast %271 : i32 to index
    %c0_100 = arith.constant 0 : index
    %c0_101 = arith.constant 0 : index
    %317 = vector.load %arg12[%316, %c0_100, %c0_101] : memref<8x8x128xf32, #tpu.memory_space<vmem>>, vector<1x8x128xf32>
    %318 = vector.shape_cast %317 : vector<1x8x128xf32> to vector<8x128xf32>
    %319 = vector.shape_cast %315 : vector<8x128xf32> to vector<1x8x128xf32>
    tpu.vector_store %arg12[%316, %c0_100, %c0_101], %319 {strides = array<i32>} : memref<8x8x128xf32, #tpu.memory_space<vmem>>, vector<1x8x128xf32>,
    %c3_i32 = arith.constant 3 : i32
    %c8_i32_102 = arith.constant 8 : i32
    %320 = arith.muli %c3_i32, %c8_i32_102 : i32
    %321 = tpu.assume_multiple %320, 8 : i32
    %322 = arith.index_cast %c3_i32 : i32 to index
    %c0_103 = arith.constant 0 : index
    %c0_104 = arith.constant 0 : index
    %323 = vector.load %arg3[%322, %c0_103, %c0_104] : memref<8x8x1xf32, #tpu.memory_space<vmem>>, vector<1x8x1xf32>
    %324 = vector.shape_cast %323 : vector<1x8x1xf32> to vector<8x1xf32>
    %325 = arith.index_cast %321 : i32 to index
    %c0_105 = arith.constant 0 : index
    %326 = vector.load %arg15[%325, %c0_105] : memref<64x512xf32, #tpu.memory_space<vmem>>, vector<8x512xf32>
    %cst_106 = arith.constant dense<0.000000e+00> : vector<8x512xf32>
    %327 = tpu.matmul %261, %19, %cst_106 {dimension_numbers = #tpu.dot_dimension_numbers<[1], [0], [0], [1], [0, 0, 1, 1], [], []>} : vector<8x128xf32>, vector<128x512xf32>, vector<8x512xf32> -> vector<8x512xf32>
    %328 = arith.addf %326, %327 : vector<8x512xf32>
    %329 = vector.extract_strided_slice %328 {offsets = [0, 0], sizes = [8, 128], strides = [1, 1]} : vector<8x512xf32> to vector<8x128xf32>
    %330 = arith.negf %329 : vector<8x128xf32>
    %331 = math.exp %330 : vector<8x128xf32>
    %cst_107 = arith.constant 1.000000e+00 : f32
    %332 = vector.broadcast %cst_107 : f32 to vector<8x128xf32>
    %333 = arith.addf %332, %331 : vector<8x128xf32>
    %334 = arith.divf %332, %333 : vector<8x128xf32>
    %335 = vector.extract_strided_slice %328 {offsets = [0, 128], sizes = [8, 128], strides = [1, 1]} : vector<8x512xf32> to vector<8x128xf32>
    %336 = arith.negf %335 : vector<8x128xf32>
    %337 = math.exp %336 : vector<8x128xf32>
    %cst_108 = arith.constant 1.000000e+00 : f32
    %338 = vector.broadcast %cst_108 : f32 to vector<8x128xf32>
    %339 = arith.addf %338, %337 : vector<8x128xf32>
    %340 = arith.divf %338, %339 : vector<8x128xf32>
    %341 = vector.extract_strided_slice %328 {offsets = [0, 256], sizes = [8, 128], strides = [1, 1]} : vector<8x512xf32> to vector<8x128xf32>
    %342 = math.tanh %341 : vector<8x128xf32>
    %343 = vector.extract_strided_slice %328 {offsets = [0, 384], sizes = [8, 128], strides = [1, 1]} : vector<8x512xf32> to vector<8x128xf32>
    %344 = arith.negf %343 : vector<8x128xf32>
    %345 = math.exp %344 : vector<8x128xf32>
    %cst_109 = arith.constant 1.000000e+00 : f32
    %346 = vector.broadcast %cst_109 : f32 to vector<8x128xf32>
    %347 = arith.addf %346, %345 : vector<8x128xf32>
    %348 = arith.divf %346, %347 : vector<8x128xf32>
    %349 = arith.mulf %340, %264 : vector<8x128xf32>
    %350 = arith.mulf %334, %342 : vector<8x128xf32>
    %351 = arith.addf %349, %350 : vector<8x128xf32>
    %352 = math.tanh %351 : vector<8x128xf32>
    %353 = arith.mulf %348, %352 : vector<8x128xf32>
    %cst_110 = arith.constant 5.000000e-01 : f32
    %354 = vector.broadcast %cst_110 : f32 to vector<8x1xf32>
    %355 = arith.cmpf ogt, %324, %354 : vector<8x1xf32>
    %356 = vector.shape_cast %355 : vector<8x1xi1> to vector<8x1xi1>
    %357 = vector.broadcast %356 : vector<8x1xi1> to vector<8x128xi1>
    %358 = arith.select %357, %353, %261 : vector<8x128xi1>, vector<8x128xf32>
    %359 = vector.shape_cast %355 : vector<8x1xi1> to vector<8x1xi1>
    %360 = vector.broadcast %359 : vector<8x1xi1> to vector<8x128xi1>
    %361 = arith.select %360, %351, %264 : vector<8x128xi1>, vector<8x128xf32>
    %362 = vector.broadcast %324 : vector<8x1xf32> to vector<8x128xf32>
    %363 = arith.mulf %362, %358 : vector<8x128xf32>
    %364 = arith.index_cast %c3_i32 : i32 to index
    %c0_111 = arith.constant 0 : index
    %c0_112 = arith.constant 0 : index
    %365 = vector.load %arg11[%364, %c0_111, %c0_112] : memref<8x8x128xf32, #tpu.memory_space<vmem>>, vector<1x8x128xf32>
    %366 = vector.shape_cast %365 : vector<1x8x128xf32> to vector<8x128xf32>
    %367 = vector.shape_cast %363 : vector<8x128xf32> to vector<1x8x128xf32>
    tpu.vector_store %arg11[%364, %c0_111, %c0_112], %367 {strides = array<i32>} : memref<8x8x128xf32, #tpu.memory_space<vmem>>, vector<1x8x128xf32>,
    %c7_i32_113 = arith.constant 7 : i32
    %368 = arith.subi %c7_i32_113, %c3_i32 : i32
    %c8_i32_114 = arith.constant 8 : i32
    %369 = arith.muli %368, %c8_i32_114 : i32
    %370 = tpu.assume_multiple %369, 8 : i32
    %371 = arith.index_cast %368 : i32 to index
    %c0_115 = arith.constant 0 : index
    %c0_116 = arith.constant 0 : index
    %372 = vector.load %arg4[%371, %c0_115, %c0_116] : memref<8x8x1xf32, #tpu.memory_space<vmem>>, vector<1x8x1xf32>
    %373 = vector.shape_cast %372 : vector<1x8x1xf32> to vector<8x1xf32>
    %374 = arith.index_cast %370 : i32 to index
    %c0_117 = arith.constant 0 : index
    %375 = vector.load %arg16[%374, %c0_117] : memref<64x512xf32, #tpu.memory_space<vmem>>, vector<8x512xf32>
    %cst_118 = arith.constant dense<0.000000e+00> : vector<8x512xf32>
    %376 = tpu.matmul %310, %20, %cst_118 {dimension_numbers = #tpu.dot_dimension_numbers<[1], [0], [0], [1], [0, 0, 1, 1], [], []>} : vector<8x128xf32>, vector<128x512xf32>, vector<8x512xf32> -> vector<8x512xf32>
    %377 = arith.addf %375, %376 : vector<8x512xf32>
    %378 = vector.extract_strided_slice %377 {offsets = [0, 0], sizes = [8, 128], strides = [1, 1]} : vector<8x512xf32> to vector<8x128xf32>
    %379 = arith.negf %378 : vector<8x128xf32>
    %380 = math.exp %379 : vector<8x128xf32>
    %cst_119 = arith.constant 1.000000e+00 : f32
    %381 = vector.broadcast %cst_119 : f32 to vector<8x128xf32>
    %382 = arith.addf %381, %380 : vector<8x128xf32>
    %383 = arith.divf %381, %382 : vector<8x128xf32>
    %384 = vector.extract_strided_slice %377 {offsets = [0, 128], sizes = [8, 128], strides = [1, 1]} : vector<8x512xf32> to vector<8x128xf32>
    %385 = arith.negf %384 : vector<8x128xf32>
    %386 = math.exp %385 : vector<8x128xf32>
    %cst_120 = arith.constant 1.000000e+00 : f32
    %387 = vector.broadcast %cst_120 : f32 to vector<8x128xf32>
    %388 = arith.addf %387, %386 : vector<8x128xf32>
    %389 = arith.divf %387, %388 : vector<8x128xf32>
    %390 = vector.extract_strided_slice %377 {offsets = [0, 256], sizes = [8, 128], strides = [1, 1]} : vector<8x512xf32> to vector<8x128xf32>
    %391 = math.tanh %390 : vector<8x128xf32>
    %392 = vector.extract_strided_slice %377 {offsets = [0, 384], sizes = [8, 128], strides = [1, 1]} : vector<8x512xf32> to vector<8x128xf32>
    %393 = arith.negf %392 : vector<8x128xf32>
    %394 = math.exp %393 : vector<8x128xf32>
    %cst_121 = arith.constant 1.000000e+00 : f32
    %395 = vector.broadcast %cst_121 : f32 to vector<8x128xf32>
    %396 = arith.addf %395, %394 : vector<8x128xf32>
    %397 = arith.divf %395, %396 : vector<8x128xf32>
    %398 = arith.mulf %389, %313 : vector<8x128xf32>
    %399 = arith.mulf %383, %391 : vector<8x128xf32>
    %400 = arith.addf %398, %399 : vector<8x128xf32>
    %401 = math.tanh %400 : vector<8x128xf32>
    %402 = arith.mulf %397, %401 : vector<8x128xf32>
    %cst_122 = arith.constant 5.000000e-01 : f32
    %403 = vector.broadcast %cst_122 : f32 to vector<8x1xf32>
    %404 = arith.cmpf ogt, %373, %403 : vector<8x1xf32>
    %405 = vector.shape_cast %404 : vector<8x1xi1> to vector<8x1xi1>
    %406 = vector.broadcast %405 : vector<8x1xi1> to vector<8x128xi1>
    %407 = arith.select %406, %402, %310 : vector<8x128xi1>, vector<8x128xf32>
    %408 = vector.shape_cast %404 : vector<8x1xi1> to vector<8x1xi1>
    %409 = vector.broadcast %408 : vector<8x1xi1> to vector<8x128xi1>
    %410 = arith.select %409, %400, %313 : vector<8x128xi1>, vector<8x128xf32>
    %411 = vector.broadcast %373 : vector<8x1xf32> to vector<8x128xf32>
    %412 = arith.mulf %411, %407 : vector<8x128xf32>
    %413 = arith.index_cast %368 : i32 to index
    %c0_123 = arith.constant 0 : index
    %c0_124 = arith.constant 0 : index
    %414 = vector.load %arg12[%413, %c0_123, %c0_124] : memref<8x8x128xf32, #tpu.memory_space<vmem>>, vector<1x8x128xf32>
    %415 = vector.shape_cast %414 : vector<1x8x128xf32> to vector<8x128xf32>
    %416 = vector.shape_cast %412 : vector<8x128xf32> to vector<1x8x128xf32>
    tpu.vector_store %arg12[%413, %c0_123, %c0_124], %416 {strides = array<i32>} : memref<8x8x128xf32, #tpu.memory_space<vmem>>, vector<1x8x128xf32>,
    %c4_i32 = arith.constant 4 : i32
    %c8_i32_125 = arith.constant 8 : i32
    %417 = arith.muli %c4_i32, %c8_i32_125 : i32
    %418 = tpu.assume_multiple %417, 8 : i32
    %419 = arith.index_cast %c4_i32 : i32 to index
    %c0_126 = arith.constant 0 : index
    %c0_127 = arith.constant 0 : index
    %420 = vector.load %arg3[%419, %c0_126, %c0_127] : memref<8x8x1xf32, #tpu.memory_space<vmem>>, vector<1x8x1xf32>
    %421 = vector.shape_cast %420 : vector<1x8x1xf32> to vector<8x1xf32>
    %422 = arith.index_cast %418 : i32 to index
    %c0_128 = arith.constant 0 : index
    %423 = vector.load %arg15[%422, %c0_128] : memref<64x512xf32, #tpu.memory_space<vmem>>, vector<8x512xf32>
    %cst_129 = arith.constant dense<0.000000e+00> : vector<8x512xf32>
    %424 = tpu.matmul %358, %19, %cst_129 {dimension_numbers = #tpu.dot_dimension_numbers<[1], [0], [0], [1], [0, 0, 1, 1], [], []>} : vector<8x128xf32>, vector<128x512xf32>, vector<8x512xf32> -> vector<8x512xf32>
    %425 = arith.addf %423, %424 : vector<8x512xf32>
    %426 = vector.extract_strided_slice %425 {offsets = [0, 0], sizes = [8, 128], strides = [1, 1]} : vector<8x512xf32> to vector<8x128xf32>
    %427 = arith.negf %426 : vector<8x128xf32>
    %428 = math.exp %427 : vector<8x128xf32>
    %cst_130 = arith.constant 1.000000e+00 : f32
    %429 = vector.broadcast %cst_130 : f32 to vector<8x128xf32>
    %430 = arith.addf %429, %428 : vector<8x128xf32>
    %431 = arith.divf %429, %430 : vector<8x128xf32>
    %432 = vector.extract_strided_slice %425 {offsets = [0, 128], sizes = [8, 128], strides = [1, 1]} : vector<8x512xf32> to vector<8x128xf32>
    %433 = arith.negf %432 : vector<8x128xf32>
    %434 = math.exp %433 : vector<8x128xf32>
    %cst_131 = arith.constant 1.000000e+00 : f32
    %435 = vector.broadcast %cst_131 : f32 to vector<8x128xf32>
    %436 = arith.addf %435, %434 : vector<8x128xf32>
    %437 = arith.divf %435, %436 : vector<8x128xf32>
    %438 = vector.extract_strided_slice %425 {offsets = [0, 256], sizes = [8, 128], strides = [1, 1]} : vector<8x512xf32> to vector<8x128xf32>
    %439 = math.tanh %438 : vector<8x128xf32>
    %440 = vector.extract_strided_slice %425 {offsets = [0, 384], sizes = [8, 128], strides = [1, 1]} : vector<8x512xf32> to vector<8x128xf32>
    %441 = arith.negf %440 : vector<8x128xf32>
    %442 = math.exp %441 : vector<8x128xf32>
    %cst_132 = arith.constant 1.000000e+00 : f32
    %443 = vector.broadcast %cst_132 : f32 to vector<8x128xf32>
    %444 = arith.addf %443, %442 : vector<8x128xf32>
    %445 = arith.divf %443, %444 : vector<8x128xf32>
    %446 = arith.mulf %437, %361 : vector<8x128xf32>
    %447 = arith.mulf %431, %439 : vector<8x128xf32>
    %448 = arith.addf %446, %447 : vector<8x128xf32>
    %449 = math.tanh %448 : vector<8x128xf32>
    %450 = arith.mulf %445, %449 : vector<8x128xf32>
    %cst_133 = arith.constant 5.000000e-01 : f32
    %451 = vector.broadcast %cst_133 : f32 to vector<8x1xf32>
    %452 = arith.cmpf ogt, %421, %451 : vector<8x1xf32>
    %453 = vector.shape_cast %452 : vector<8x1xi1> to vector<8x1xi1>
    %454 = vector.broadcast %453 : vector<8x1xi1> to vector<8x128xi1>
    %455 = arith.select %454, %450, %358 : vector<8x128xi1>, vector<8x128xf32>
    %456 = vector.shape_cast %452 : vector<8x1xi1> to vector<8x1xi1>
    %457 = vector.broadcast %456 : vector<8x1xi1> to vector<8x128xi1>
    %458 = arith.select %457, %448, %361 : vector<8x128xi1>, vector<8x128xf32>
    %459 = vector.broadcast %421 : vector<8x1xf32> to vector<8x128xf32>
    %460 = arith.mulf %459, %455 : vector<8x128xf32>
    %461 = arith.index_cast %c4_i32 : i32 to index
    %c0_134 = arith.constant 0 : index
    %c0_135 = arith.constant 0 : index
    %462 = vector.load %arg11[%461, %c0_134, %c0_135] : memref<8x8x128xf32, #tpu.memory_space<vmem>>, vector<1x8x128xf32>
    %463 = vector.shape_cast %462 : vector<1x8x128xf32> to vector<8x128xf32>
    %464 = vector.shape_cast %460 : vector<8x128xf32> to vector<1x8x128xf32>
    tpu.vector_store %arg11[%461, %c0_134, %c0_135], %464 {strides = array<i32>} : memref<8x8x128xf32, #tpu.memory_space<vmem>>, vector<1x8x128xf32>,
    %c7_i32_136 = arith.constant 7 : i32
    %465 = arith.subi %c7_i32_136, %c4_i32 : i32
    %c8_i32_137 = arith.constant 8 : i32
    %466 = arith.muli %465, %c8_i32_137 : i32
    %467 = tpu.assume_multiple %466, 8 : i32
    %468 = arith.index_cast %465 : i32 to index
    %c0_138 = arith.constant 0 : index
    %c0_139 = arith.constant 0 : index
    %469 = vector.load %arg4[%468, %c0_138, %c0_139] : memref<8x8x1xf32, #tpu.memory_space<vmem>>, vector<1x8x1xf32>
    %470 = vector.shape_cast %469 : vector<1x8x1xf32> to vector<8x1xf32>
    %471 = arith.index_cast %467 : i32 to index
    %c0_140 = arith.constant 0 : index
    %472 = vector.load %arg16[%471, %c0_140] : memref<64x512xf32, #tpu.memory_space<vmem>>, vector<8x512xf32>
    %cst_141 = arith.constant dense<0.000000e+00> : vector<8x512xf32>
    %473 = tpu.matmul %407, %20, %cst_141 {dimension_numbers = #tpu.dot_dimension_numbers<[1], [0], [0], [1], [0, 0, 1, 1], [], []>} : vector<8x128xf32>, vector<128x512xf32>, vector<8x512xf32> -> vector<8x512xf32>
    %474 = arith.addf %472, %473 : vector<8x512xf32>
    %475 = vector.extract_strided_slice %474 {offsets = [0, 0], sizes = [8, 128], strides = [1, 1]} : vector<8x512xf32> to vector<8x128xf32>
    %476 = arith.negf %475 : vector<8x128xf32>
    %477 = math.exp %476 : vector<8x128xf32>
    %cst_142 = arith.constant 1.000000e+00 : f32
    %478 = vector.broadcast %cst_142 : f32 to vector<8x128xf32>
    %479 = arith.addf %478, %477 : vector<8x128xf32>
    %480 = arith.divf %478, %479 : vector<8x128xf32>
    %481 = vector.extract_strided_slice %474 {offsets = [0, 128], sizes = [8, 128], strides = [1, 1]} : vector<8x512xf32> to vector<8x128xf32>
    %482 = arith.negf %481 : vector<8x128xf32>
    %483 = math.exp %482 : vector<8x128xf32>
    %cst_143 = arith.constant 1.000000e+00 : f32
    %484 = vector.broadcast %cst_143 : f32 to vector<8x128xf32>
    %485 = arith.addf %484, %483 : vector<8x128xf32>
    %486 = arith.divf %484, %485 : vector<8x128xf32>
    %487 = vector.extract_strided_slice %474 {offsets = [0, 256], sizes = [8, 128], strides = [1, 1]} : vector<8x512xf32> to vector<8x128xf32>
    %488 = math.tanh %487 : vector<8x128xf32>
    %489 = vector.extract_strided_slice %474 {offsets = [0, 384], sizes = [8, 128], strides = [1, 1]} : vector<8x512xf32> to vector<8x128xf32>
    %490 = arith.negf %489 : vector<8x128xf32>
    %491 = math.exp %490 : vector<8x128xf32>
    %cst_144 = arith.constant 1.000000e+00 : f32
    %492 = vector.broadcast %cst_144 : f32 to vector<8x128xf32>
    %493 = arith.addf %492, %491 : vector<8x128xf32>
    %494 = arith.divf %492, %493 : vector<8x128xf32>
    %495 = arith.mulf %486, %410 : vector<8x128xf32>
    %496 = arith.mulf %480, %488 : vector<8x128xf32>
    %497 = arith.addf %495, %496 : vector<8x128xf32>
    %498 = math.tanh %497 : vector<8x128xf32>
    %499 = arith.mulf %494, %498 : vector<8x128xf32>
    %cst_145 = arith.constant 5.000000e-01 : f32
    %500 = vector.broadcast %cst_145 : f32 to vector<8x1xf32>
    %501 = arith.cmpf ogt, %470, %500 : vector<8x1xf32>
    %502 = vector.shape_cast %501 : vector<8x1xi1> to vector<8x1xi1>
    %503 = vector.broadcast %502 : vector<8x1xi1> to vector<8x128xi1>
    %504 = arith.select %503, %499, %407 : vector<8x128xi1>, vector<8x128xf32>
    %505 = vector.shape_cast %501 : vector<8x1xi1> to vector<8x1xi1>
    %506 = vector.broadcast %505 : vector<8x1xi1> to vector<8x128xi1>
    %507 = arith.select %506, %497, %410 : vector<8x128xi1>, vector<8x128xf32>
    %508 = vector.broadcast %470 : vector<8x1xf32> to vector<8x128xf32>
    %509 = arith.mulf %508, %504 : vector<8x128xf32>
    %510 = arith.index_cast %465 : i32 to index
    %c0_146 = arith.constant 0 : index
    %c0_147 = arith.constant 0 : index
    %511 = vector.load %arg12[%510, %c0_146, %c0_147] : memref<8x8x128xf32, #tpu.memory_space<vmem>>, vector<1x8x128xf32>
    %512 = vector.shape_cast %511 : vector<1x8x128xf32> to vector<8x128xf32>
    %513 = vector.shape_cast %509 : vector<8x128xf32> to vector<1x8x128xf32>
    tpu.vector_store %arg12[%510, %c0_146, %c0_147], %513 {strides = array<i32>} : memref<8x8x128xf32, #tpu.memory_space<vmem>>, vector<1x8x128xf32>,
    %c5_i32 = arith.constant 5 : i32
    %c8_i32_148 = arith.constant 8 : i32
    %514 = arith.muli %c5_i32, %c8_i32_148 : i32
    %515 = tpu.assume_multiple %514, 8 : i32
    %516 = arith.index_cast %c5_i32 : i32 to index
    %c0_149 = arith.constant 0 : index
    %c0_150 = arith.constant 0 : index
    %517 = vector.load %arg3[%516, %c0_149, %c0_150] : memref<8x8x1xf32, #tpu.memory_space<vmem>>, vector<1x8x1xf32>
    %518 = vector.shape_cast %517 : vector<1x8x1xf32> to vector<8x1xf32>
    %519 = arith.index_cast %515 : i32 to index
    %c0_151 = arith.constant 0 : index
    %520 = vector.load %arg15[%519, %c0_151] : memref<64x512xf32, #tpu.memory_space<vmem>>, vector<8x512xf32>
    %cst_152 = arith.constant dense<0.000000e+00> : vector<8x512xf32>
    %521 = tpu.matmul %455, %19, %cst_152 {dimension_numbers = #tpu.dot_dimension_numbers<[1], [0], [0], [1], [0, 0, 1, 1], [], []>} : vector<8x128xf32>, vector<128x512xf32>, vector<8x512xf32> -> vector<8x512xf32>
    %522 = arith.addf %520, %521 : vector<8x512xf32>
    %523 = vector.extract_strided_slice %522 {offsets = [0, 0], sizes = [8, 128], strides = [1, 1]} : vector<8x512xf32> to vector<8x128xf32>
    %524 = arith.negf %523 : vector<8x128xf32>
    %525 = math.exp %524 : vector<8x128xf32>
    %cst_153 = arith.constant 1.000000e+00 : f32
    %526 = vector.broadcast %cst_153 : f32 to vector<8x128xf32>
    %527 = arith.addf %526, %525 : vector<8x128xf32>
    %528 = arith.divf %526, %527 : vector<8x128xf32>
    %529 = vector.extract_strided_slice %522 {offsets = [0, 128], sizes = [8, 128], strides = [1, 1]} : vector<8x512xf32> to vector<8x128xf32>
    %530 = arith.negf %529 : vector<8x128xf32>
    %531 = math.exp %530 : vector<8x128xf32>
    %cst_154 = arith.constant 1.000000e+00 : f32
    %532 = vector.broadcast %cst_154 : f32 to vector<8x128xf32>
    %533 = arith.addf %532, %531 : vector<8x128xf32>
    %534 = arith.divf %532, %533 : vector<8x128xf32>
    %535 = vector.extract_strided_slice %522 {offsets = [0, 256], sizes = [8, 128], strides = [1, 1]} : vector<8x512xf32> to vector<8x128xf32>
    %536 = math.tanh %535 : vector<8x128xf32>
    %537 = vector.extract_strided_slice %522 {offsets = [0, 384], sizes = [8, 128], strides = [1, 1]} : vector<8x512xf32> to vector<8x128xf32>
    %538 = arith.negf %537 : vector<8x128xf32>
    %539 = math.exp %538 : vector<8x128xf32>
    %cst_155 = arith.constant 1.000000e+00 : f32
    %540 = vector.broadcast %cst_155 : f32 to vector<8x128xf32>
    %541 = arith.addf %540, %539 : vector<8x128xf32>
    %542 = arith.divf %540, %541 : vector<8x128xf32>
    %543 = arith.mulf %534, %458 : vector<8x128xf32>
    %544 = arith.mulf %528, %536 : vector<8x128xf32>
    %545 = arith.addf %543, %544 : vector<8x128xf32>
    %546 = math.tanh %545 : vector<8x128xf32>
    %547 = arith.mulf %542, %546 : vector<8x128xf32>
    %cst_156 = arith.constant 5.000000e-01 : f32
    %548 = vector.broadcast %cst_156 : f32 to vector<8x1xf32>
    %549 = arith.cmpf ogt, %518, %548 : vector<8x1xf32>
    %550 = vector.shape_cast %549 : vector<8x1xi1> to vector<8x1xi1>
    %551 = vector.broadcast %550 : vector<8x1xi1> to vector<8x128xi1>
    %552 = arith.select %551, %547, %455 : vector<8x128xi1>, vector<8x128xf32>
    %553 = vector.shape_cast %549 : vector<8x1xi1> to vector<8x1xi1>
    %554 = vector.broadcast %553 : vector<8x1xi1> to vector<8x128xi1>
    %555 = arith.select %554, %545, %458 : vector<8x128xi1>, vector<8x128xf32>
    %556 = vector.broadcast %518 : vector<8x1xf32> to vector<8x128xf32>
    %557 = arith.mulf %556, %552 : vector<8x128xf32>
    %558 = arith.index_cast %c5_i32 : i32 to index
    %c0_157 = arith.constant 0 : index
    %c0_158 = arith.constant 0 : index
    %559 = vector.load %arg11[%558, %c0_157, %c0_158] : memref<8x8x128xf32, #tpu.memory_space<vmem>>, vector<1x8x128xf32>
    %560 = vector.shape_cast %559 : vector<1x8x128xf32> to vector<8x128xf32>
    %561 = vector.shape_cast %557 : vector<8x128xf32> to vector<1x8x128xf32>
    tpu.vector_store %arg11[%558, %c0_157, %c0_158], %561 {strides = array<i32>} : memref<8x8x128xf32, #tpu.memory_space<vmem>>, vector<1x8x128xf32>,
    %c7_i32_159 = arith.constant 7 : i32
    %562 = arith.subi %c7_i32_159, %c5_i32 : i32
    %c8_i32_160 = arith.constant 8 : i32
    %563 = arith.muli %562, %c8_i32_160 : i32
    %564 = tpu.assume_multiple %563, 8 : i32
    %565 = arith.index_cast %562 : i32 to index
    %c0_161 = arith.constant 0 : index
    %c0_162 = arith.constant 0 : index
    %566 = vector.load %arg4[%565, %c0_161, %c0_162] : memref<8x8x1xf32, #tpu.memory_space<vmem>>, vector<1x8x1xf32>
    %567 = vector.shape_cast %566 : vector<1x8x1xf32> to vector<8x1xf32>
    %568 = arith.index_cast %564 : i32 to index
    %c0_163 = arith.constant 0 : index
    %569 = vector.load %arg16[%568, %c0_163] : memref<64x512xf32, #tpu.memory_space<vmem>>, vector<8x512xf32>
    %cst_164 = arith.constant dense<0.000000e+00> : vector<8x512xf32>
    %570 = tpu.matmul %504, %20, %cst_164 {dimension_numbers = #tpu.dot_dimension_numbers<[1], [0], [0], [1], [0, 0, 1, 1], [], []>} : vector<8x128xf32>, vector<128x512xf32>, vector<8x512xf32> -> vector<8x512xf32>
    %571 = arith.addf %569, %570 : vector<8x512xf32>
    %572 = vector.extract_strided_slice %571 {offsets = [0, 0], sizes = [8, 128], strides = [1, 1]} : vector<8x512xf32> to vector<8x128xf32>
    %573 = arith.negf %572 : vector<8x128xf32>
    %574 = math.exp %573 : vector<8x128xf32>
    %cst_165 = arith.constant 1.000000e+00 : f32
    %575 = vector.broadcast %cst_165 : f32 to vector<8x128xf32>
    %576 = arith.addf %575, %574 : vector<8x128xf32>
    %577 = arith.divf %575, %576 : vector<8x128xf32>
    %578 = vector.extract_strided_slice %571 {offsets = [0, 128], sizes = [8, 128], strides = [1, 1]} : vector<8x512xf32> to vector<8x128xf32>
    %579 = arith.negf %578 : vector<8x128xf32>
    %580 = math.exp %579 : vector<8x128xf32>
    %cst_166 = arith.constant 1.000000e+00 : f32
    %581 = vector.broadcast %cst_166 : f32 to vector<8x128xf32>
    %582 = arith.addf %581, %580 : vector<8x128xf32>
    %583 = arith.divf %581, %582 : vector<8x128xf32>
    %584 = vector.extract_strided_slice %571 {offsets = [0, 256], sizes = [8, 128], strides = [1, 1]} : vector<8x512xf32> to vector<8x128xf32>
    %585 = math.tanh %584 : vector<8x128xf32>
    %586 = vector.extract_strided_slice %571 {offsets = [0, 384], sizes = [8, 128], strides = [1, 1]} : vector<8x512xf32> to vector<8x128xf32>
    %587 = arith.negf %586 : vector<8x128xf32>
    %588 = math.exp %587 : vector<8x128xf32>
    %cst_167 = arith.constant 1.000000e+00 : f32
    %589 = vector.broadcast %cst_167 : f32 to vector<8x128xf32>
    %590 = arith.addf %589, %588 : vector<8x128xf32>
    %591 = arith.divf %589, %590 : vector<8x128xf32>
    %592 = arith.mulf %583, %507 : vector<8x128xf32>
    %593 = arith.mulf %577, %585 : vector<8x128xf32>
    %594 = arith.addf %592, %593 : vector<8x128xf32>
    %595 = math.tanh %594 : vector<8x128xf32>
    %596 = arith.mulf %591, %595 : vector<8x128xf32>
    %cst_168 = arith.constant 5.000000e-01 : f32
    %597 = vector.broadcast %cst_168 : f32 to vector<8x1xf32>
    %598 = arith.cmpf ogt, %567, %597 : vector<8x1xf32>
    %599 = vector.shape_cast %598 : vector<8x1xi1> to vector<8x1xi1>
    %600 = vector.broadcast %599 : vector<8x1xi1> to vector<8x128xi1>
    %601 = arith.select %600, %596, %504 : vector<8x128xi1>, vector<8x128xf32>
    %602 = vector.shape_cast %598 : vector<8x1xi1> to vector<8x1xi1>
    %603 = vector.broadcast %602 : vector<8x1xi1> to vector<8x128xi1>
    %604 = arith.select %603, %594, %507 : vector<8x128xi1>, vector<8x128xf32>
    %605 = vector.broadcast %567 : vector<8x1xf32> to vector<8x128xf32>
    %606 = arith.mulf %605, %601 : vector<8x128xf32>
    %607 = arith.index_cast %562 : i32 to index
    %c0_169 = arith.constant 0 : index
    %c0_170 = arith.constant 0 : index
    %608 = vector.load %arg12[%607, %c0_169, %c0_170] : memref<8x8x128xf32, #tpu.memory_space<vmem>>, vector<1x8x128xf32>
    %609 = vector.shape_cast %608 : vector<1x8x128xf32> to vector<8x128xf32>
    %610 = vector.shape_cast %606 : vector<8x128xf32> to vector<1x8x128xf32>
    tpu.vector_store %arg12[%607, %c0_169, %c0_170], %610 {strides = array<i32>} : memref<8x8x128xf32, #tpu.memory_space<vmem>>, vector<1x8x128xf32>,
    %c6_i32 = arith.constant 6 : i32
    %c8_i32_171 = arith.constant 8 : i32
    %611 = arith.muli %c6_i32, %c8_i32_171 : i32
    %612 = tpu.assume_multiple %611, 8 : i32
    %613 = arith.index_cast %c6_i32 : i32 to index
    %c0_172 = arith.constant 0 : index
    %c0_173 = arith.constant 0 : index
    %614 = vector.load %arg3[%613, %c0_172, %c0_173] : memref<8x8x1xf32, #tpu.memory_space<vmem>>, vector<1x8x1xf32>
    %615 = vector.shape_cast %614 : vector<1x8x1xf32> to vector<8x1xf32>
    %616 = arith.index_cast %612 : i32 to index
    %c0_174 = arith.constant 0 : index
    %617 = vector.load %arg15[%616, %c0_174] : memref<64x512xf32, #tpu.memory_space<vmem>>, vector<8x512xf32>
    %cst_175 = arith.constant dense<0.000000e+00> : vector<8x512xf32>
    %618 = tpu.matmul %552, %19, %cst_175 {dimension_numbers = #tpu.dot_dimension_numbers<[1], [0], [0], [1], [0, 0, 1, 1], [], []>} : vector<8x128xf32>, vector<128x512xf32>, vector<8x512xf32> -> vector<8x512xf32>
    %619 = arith.addf %617, %618 : vector<8x512xf32>
    %620 = vector.extract_strided_slice %619 {offsets = [0, 0], sizes = [8, 128], strides = [1, 1]} : vector<8x512xf32> to vector<8x128xf32>
    %621 = arith.negf %620 : vector<8x128xf32>
    %622 = math.exp %621 : vector<8x128xf32>
    %cst_176 = arith.constant 1.000000e+00 : f32
    %623 = vector.broadcast %cst_176 : f32 to vector<8x128xf32>
    %624 = arith.addf %623, %622 : vector<8x128xf32>
    %625 = arith.divf %623, %624 : vector<8x128xf32>
    %626 = vector.extract_strided_slice %619 {offsets = [0, 128], sizes = [8, 128], strides = [1, 1]} : vector<8x512xf32> to vector<8x128xf32>
    %627 = arith.negf %626 : vector<8x128xf32>
    %628 = math.exp %627 : vector<8x128xf32>
    %cst_177 = arith.constant 1.000000e+00 : f32
    %629 = vector.broadcast %cst_177 : f32 to vector<8x128xf32>
    %630 = arith.addf %629, %628 : vector<8x128xf32>
    %631 = arith.divf %629, %630 : vector<8x128xf32>
    %632 = vector.extract_strided_slice %619 {offsets = [0, 256], sizes = [8, 128], strides = [1, 1]} : vector<8x512xf32> to vector<8x128xf32>
    %633 = math.tanh %632 : vector<8x128xf32>
    %634 = vector.extract_strided_slice %619 {offsets = [0, 384], sizes = [8, 128], strides = [1, 1]} : vector<8x512xf32> to vector<8x128xf32>
    %635 = arith.negf %634 : vector<8x128xf32>
    %636 = math.exp %635 : vector<8x128xf32>
    %cst_178 = arith.constant 1.000000e+00 : f32
    %637 = vector.broadcast %cst_178 : f32 to vector<8x128xf32>
    %638 = arith.addf %637, %636 : vector<8x128xf32>
    %639 = arith.divf %637, %638 : vector<8x128xf32>
    %640 = arith.mulf %631, %555 : vector<8x128xf32>
    %641 = arith.mulf %625, %633 : vector<8x128xf32>
    %642 = arith.addf %640, %641 : vector<8x128xf32>
    %643 = math.tanh %642 : vector<8x128xf32>
    %644 = arith.mulf %639, %643 : vector<8x128xf32>
    %cst_179 = arith.constant 5.000000e-01 : f32
    %645 = vector.broadcast %cst_179 : f32 to vector<8x1xf32>
    %646 = arith.cmpf ogt, %615, %645 : vector<8x1xf32>
    %647 = vector.shape_cast %646 : vector<8x1xi1> to vector<8x1xi1>
    %648 = vector.broadcast %647 : vector<8x1xi1> to vector<8x128xi1>
    %649 = arith.select %648, %644, %552 : vector<8x128xi1>, vector<8x128xf32>
    %650 = vector.shape_cast %646 : vector<8x1xi1> to vector<8x1xi1>
    %651 = vector.broadcast %650 : vector<8x1xi1> to vector<8x128xi1>
    %652 = arith.select %651, %642, %555 : vector<8x128xi1>, vector<8x128xf32>
    %653 = vector.broadcast %615 : vector<8x1xf32> to vector<8x128xf32>
    %654 = arith.mulf %653, %649 : vector<8x128xf32>
    %655 = arith.index_cast %c6_i32 : i32 to index
    %c0_180 = arith.constant 0 : index
    %c0_181 = arith.constant 0 : index
    %656 = vector.load %arg11[%655, %c0_180, %c0_181] : memref<8x8x128xf32, #tpu.memory_space<vmem>>, vector<1x8x128xf32>
    %657 = vector.shape_cast %656 : vector<1x8x128xf32> to vector<8x128xf32>
    %658 = vector.shape_cast %654 : vector<8x128xf32> to vector<1x8x128xf32>
    tpu.vector_store %arg11[%655, %c0_180, %c0_181], %658 {strides = array<i32>} : memref<8x8x128xf32, #tpu.memory_space<vmem>>, vector<1x8x128xf32>,
    %c7_i32_182 = arith.constant 7 : i32
    %659 = arith.subi %c7_i32_182, %c6_i32 : i32
    %c8_i32_183 = arith.constant 8 : i32
    %660 = arith.muli %659, %c8_i32_183 : i32
    %661 = tpu.assume_multiple %660, 8 : i32
    %662 = arith.index_cast %659 : i32 to index
    %c0_184 = arith.constant 0 : index
    %c0_185 = arith.constant 0 : index
    %663 = vector.load %arg4[%662, %c0_184, %c0_185] : memref<8x8x1xf32, #tpu.memory_space<vmem>>, vector<1x8x1xf32>
    %664 = vector.shape_cast %663 : vector<1x8x1xf32> to vector<8x1xf32>
    %665 = arith.index_cast %661 : i32 to index
    %c0_186 = arith.constant 0 : index
    %666 = vector.load %arg16[%665, %c0_186] : memref<64x512xf32, #tpu.memory_space<vmem>>, vector<8x512xf32>
    %cst_187 = arith.constant dense<0.000000e+00> : vector<8x512xf32>
    %667 = tpu.matmul %601, %20, %cst_187 {dimension_numbers = #tpu.dot_dimension_numbers<[1], [0], [0], [1], [0, 0, 1, 1], [], []>} : vector<8x128xf32>, vector<128x512xf32>, vector<8x512xf32> -> vector<8x512xf32>
    %668 = arith.addf %666, %667 : vector<8x512xf32>
    %669 = vector.extract_strided_slice %668 {offsets = [0, 0], sizes = [8, 128], strides = [1, 1]} : vector<8x512xf32> to vector<8x128xf32>
    %670 = arith.negf %669 : vector<8x128xf32>
    %671 = math.exp %670 : vector<8x128xf32>
    %cst_188 = arith.constant 1.000000e+00 : f32
    %672 = vector.broadcast %cst_188 : f32 to vector<8x128xf32>
    %673 = arith.addf %672, %671 : vector<8x128xf32>
    %674 = arith.divf %672, %673 : vector<8x128xf32>
    %675 = vector.extract_strided_slice %668 {offsets = [0, 128], sizes = [8, 128], strides = [1, 1]} : vector<8x512xf32> to vector<8x128xf32>
    %676 = arith.negf %675 : vector<8x128xf32>
    %677 = math.exp %676 : vector<8x128xf32>
    %cst_189 = arith.constant 1.000000e+00 : f32
    %678 = vector.broadcast %cst_189 : f32 to vector<8x128xf32>
    %679 = arith.addf %678, %677 : vector<8x128xf32>
    %680 = arith.divf %678, %679 : vector<8x128xf32>
    %681 = vector.extract_strided_slice %668 {offsets = [0, 256], sizes = [8, 128], strides = [1, 1]} : vector<8x512xf32> to vector<8x128xf32>
    %682 = math.tanh %681 : vector<8x128xf32>
    %683 = vector.extract_strided_slice %668 {offsets = [0, 384], sizes = [8, 128], strides = [1, 1]} : vector<8x512xf32> to vector<8x128xf32>
    %684 = arith.negf %683 : vector<8x128xf32>
    %685 = math.exp %684 : vector<8x128xf32>
    %cst_190 = arith.constant 1.000000e+00 : f32
    %686 = vector.broadcast %cst_190 : f32 to vector<8x128xf32>
    %687 = arith.addf %686, %685 : vector<8x128xf32>
    %688 = arith.divf %686, %687 : vector<8x128xf32>
    %689 = arith.mulf %680, %604 : vector<8x128xf32>
    %690 = arith.mulf %674, %682 : vector<8x128xf32>
    %691 = arith.addf %689, %690 : vector<8x128xf32>
    %692 = math.tanh %691 : vector<8x128xf32>
    %693 = arith.mulf %688, %692 : vector<8x128xf32>
    %cst_191 = arith.constant 5.000000e-01 : f32
    %694 = vector.broadcast %cst_191 : f32 to vector<8x1xf32>
    %695 = arith.cmpf ogt, %664, %694 : vector<8x1xf32>
    %696 = vector.shape_cast %695 : vector<8x1xi1> to vector<8x1xi1>
    %697 = vector.broadcast %696 : vector<8x1xi1> to vector<8x128xi1>
    %698 = arith.select %697, %693, %601 : vector<8x128xi1>, vector<8x128xf32>
    %699 = vector.shape_cast %695 : vector<8x1xi1> to vector<8x1xi1>
    %700 = vector.broadcast %699 : vector<8x1xi1> to vector<8x128xi1>
    %701 = arith.select %700, %691, %604 : vector<8x128xi1>, vector<8x128xf32>
    %702 = vector.broadcast %664 : vector<8x1xf32> to vector<8x128xf32>
    %703 = arith.mulf %702, %698 : vector<8x128xf32>
    %704 = arith.index_cast %659 : i32 to index
    %c0_192 = arith.constant 0 : index
    %c0_193 = arith.constant 0 : index
    %705 = vector.load %arg12[%704, %c0_192, %c0_193] : memref<8x8x128xf32, #tpu.memory_space<vmem>>, vector<1x8x128xf32>
    %706 = vector.shape_cast %705 : vector<1x8x128xf32> to vector<8x128xf32>
    %707 = vector.shape_cast %703 : vector<8x128xf32> to vector<1x8x128xf32>
    tpu.vector_store %arg12[%704, %c0_192, %c0_193], %707 {strides = array<i32>} : memref<8x8x128xf32, #tpu.memory_space<vmem>>, vector<1x8x128xf32>,
    %c7_i32_194 = arith.constant 7 : i32
    %c8_i32_195 = arith.constant 8 : i32
    %708 = arith.muli %c7_i32_194, %c8_i32_195 : i32
    %709 = tpu.assume_multiple %708, 8 : i32
    %710 = arith.index_cast %c7_i32_194 : i32 to index
    %c0_196 = arith.constant 0 : index
    %c0_197 = arith.constant 0 : index
    %711 = vector.load %arg3[%710, %c0_196, %c0_197] : memref<8x8x1xf32, #tpu.memory_space<vmem>>, vector<1x8x1xf32>
    %712 = vector.shape_cast %711 : vector<1x8x1xf32> to vector<8x1xf32>
    %713 = arith.index_cast %709 : i32 to index
    %c0_198 = arith.constant 0 : index
    %714 = vector.load %arg15[%713, %c0_198] : memref<64x512xf32, #tpu.memory_space<vmem>>, vector<8x512xf32>
    %cst_199 = arith.constant dense<0.000000e+00> : vector<8x512xf32>
    %715 = tpu.matmul %649, %19, %cst_199 {dimension_numbers = #tpu.dot_dimension_numbers<[1], [0], [0], [1], [0, 0, 1, 1], [], []>} : vector<8x128xf32>, vector<128x512xf32>, vector<8x512xf32> -> vector<8x512xf32>
    %716 = arith.addf %714, %715 : vector<8x512xf32>
    %717 = vector.extract_strided_slice %716 {offsets = [0, 0], sizes = [8, 128], strides = [1, 1]} : vector<8x512xf32> to vector<8x128xf32>
    %718 = arith.negf %717 : vector<8x128xf32>
    %719 = math.exp %718 : vector<8x128xf32>
    %cst_200 = arith.constant 1.000000e+00 : f32
    %720 = vector.broadcast %cst_200 : f32 to vector<8x128xf32>
    %721 = arith.addf %720, %719 : vector<8x128xf32>
    %722 = arith.divf %720, %721 : vector<8x128xf32>
    %723 = vector.extract_strided_slice %716 {offsets = [0, 128], sizes = [8, 128], strides = [1, 1]} : vector<8x512xf32> to vector<8x128xf32>
    %724 = arith.negf %723 : vector<8x128xf32>
    %725 = math.exp %724 : vector<8x128xf32>
    %cst_201 = arith.constant 1.000000e+00 : f32
    %726 = vector.broadcast %cst_201 : f32 to vector<8x128xf32>
    %727 = arith.addf %726, %725 : vector<8x128xf32>
    %728 = arith.divf %726, %727 : vector<8x128xf32>
    %729 = vector.extract_strided_slice %716 {offsets = [0, 256], sizes = [8, 128], strides = [1, 1]} : vector<8x512xf32> to vector<8x128xf32>
    %730 = math.tanh %729 : vector<8x128xf32>
    %731 = vector.extract_strided_slice %716 {offsets = [0, 384], sizes = [8, 128], strides = [1, 1]} : vector<8x512xf32> to vector<8x128xf32>
    %732 = arith.negf %731 : vector<8x128xf32>
    %733 = math.exp %732 : vector<8x128xf32>
    %cst_202 = arith.constant 1.000000e+00 : f32
    %734 = vector.broadcast %cst_202 : f32 to vector<8x128xf32>
    %735 = arith.addf %734, %733 : vector<8x128xf32>
    %736 = arith.divf %734, %735 : vector<8x128xf32>
    %737 = arith.mulf %728, %652 : vector<8x128xf32>
    %738 = arith.mulf %722, %730 : vector<8x128xf32>
    %739 = arith.addf %737, %738 : vector<8x128xf32>
    %740 = math.tanh %739 : vector<8x128xf32>
    %741 = arith.mulf %736, %740 : vector<8x128xf32>
    %cst_203 = arith.constant 5.000000e-01 : f32
    %742 = vector.broadcast %cst_203 : f32 to vector<8x1xf32>
    %743 = arith.cmpf ogt, %712, %742 : vector<8x1xf32>
    %744 = vector.shape_cast %743 : vector<8x1xi1> to vector<8x1xi1>
    %745 = vector.broadcast %744 : vector<8x1xi1> to vector<8x128xi1>
    %746 = arith.select %745, %741, %649 : vector<8x128xi1>, vector<8x128xf32>
    %747 = vector.shape_cast %743 : vector<8x1xi1> to vector<8x1xi1>
    %748 = vector.broadcast %747 : vector<8x1xi1> to vector<8x128xi1>
    %749 = arith.select %748, %739, %652 : vector<8x128xi1>, vector<8x128xf32>
    %750 = vector.broadcast %712 : vector<8x1xf32> to vector<8x128xf32>
    %751 = arith.mulf %750, %746 : vector<8x128xf32>
    %752 = arith.index_cast %c7_i32_194 : i32 to index
    %c0_204 = arith.constant 0 : index
    %c0_205 = arith.constant 0 : index
    %753 = vector.load %arg11[%752, %c0_204, %c0_205] : memref<8x8x128xf32, #tpu.memory_space<vmem>>, vector<1x8x128xf32>
    %754 = vector.shape_cast %753 : vector<1x8x128xf32> to vector<8x128xf32>
    %755 = vector.shape_cast %751 : vector<8x128xf32> to vector<1x8x128xf32>
    tpu.vector_store %arg11[%752, %c0_204, %c0_205], %755 {strides = array<i32>} : memref<8x8x128xf32, #tpu.memory_space<vmem>>, vector<1x8x128xf32>,
    %c7_i32_206 = arith.constant 7 : i32
    %756 = arith.subi %c7_i32_206, %c7_i32_194 : i32
    %c8_i32_207 = arith.constant 8 : i32
    %757 = arith.muli %756, %c8_i32_207 : i32
    %758 = tpu.assume_multiple %757, 8 : i32
    %759 = arith.index_cast %756 : i32 to index
    %c0_208 = arith.constant 0 : index
    %c0_209 = arith.constant 0 : index
    %760 = vector.load %arg4[%759, %c0_208, %c0_209] : memref<8x8x1xf32, #tpu.memory_space<vmem>>, vector<1x8x1xf32>
    %761 = vector.shape_cast %760 : vector<1x8x1xf32> to vector<8x1xf32>
    %762 = arith.index_cast %758 : i32 to index
    %c0_210 = arith.constant 0 : index
    %763 = vector.load %arg16[%762, %c0_210] : memref<64x512xf32, #tpu.memory_space<vmem>>, vector<8x512xf32>
    %cst_211 = arith.constant dense<0.000000e+00> : vector<8x512xf32>
    %764 = tpu.matmul %698, %20, %cst_211 {dimension_numbers = #tpu.dot_dimension_numbers<[1], [0], [0], [1], [0, 0, 1, 1], [], []>} : vector<8x128xf32>, vector<128x512xf32>, vector<8x512xf32> -> vector<8x512xf32>
    %765 = arith.addf %763, %764 : vector<8x512xf32>
    %766 = vector.extract_strided_slice %765 {offsets = [0, 0], sizes = [8, 128], strides = [1, 1]} : vector<8x512xf32> to vector<8x128xf32>
    %767 = arith.negf %766 : vector<8x128xf32>
    %768 = math.exp %767 : vector<8x128xf32>
    %cst_212 = arith.constant 1.000000e+00 : f32
    %769 = vector.broadcast %cst_212 : f32 to vector<8x128xf32>
    %770 = arith.addf %769, %768 : vector<8x128xf32>
    %771 = arith.divf %769, %770 : vector<8x128xf32>
    %772 = vector.extract_strided_slice %765 {offsets = [0, 128], sizes = [8, 128], strides = [1, 1]} : vector<8x512xf32> to vector<8x128xf32>
    %773 = arith.negf %772 : vector<8x128xf32>
    %774 = math.exp %773 : vector<8x128xf32>
    %cst_213 = arith.constant 1.000000e+00 : f32
    %775 = vector.broadcast %cst_213 : f32 to vector<8x128xf32>
    %776 = arith.addf %775, %774 : vector<8x128xf32>
    %777 = arith.divf %775, %776 : vector<8x128xf32>
    %778 = vector.extract_strided_slice %765 {offsets = [0, 256], sizes = [8, 128], strides = [1, 1]} : vector<8x512xf32> to vector<8x128xf32>
    %779 = math.tanh %778 : vector<8x128xf32>
    %780 = vector.extract_strided_slice %765 {offsets = [0, 384], sizes = [8, 128], strides = [1, 1]} : vector<8x512xf32> to vector<8x128xf32>
    %781 = arith.negf %780 : vector<8x128xf32>
    %782 = math.exp %781 : vector<8x128xf32>
    %cst_214 = arith.constant 1.000000e+00 : f32
    %783 = vector.broadcast %cst_214 : f32 to vector<8x128xf32>
    %784 = arith.addf %783, %782 : vector<8x128xf32>
    %785 = arith.divf %783, %784 : vector<8x128xf32>
    %786 = arith.mulf %777, %701 : vector<8x128xf32>
    %787 = arith.mulf %771, %779 : vector<8x128xf32>
    %788 = arith.addf %786, %787 : vector<8x128xf32>
    %789 = math.tanh %788 : vector<8x128xf32>
    %790 = arith.mulf %785, %789 : vector<8x128xf32>
    %cst_215 = arith.constant 5.000000e-01 : f32
    %791 = vector.broadcast %cst_215 : f32 to vector<8x1xf32>
    %792 = arith.cmpf ogt, %761, %791 : vector<8x1xf32>
    %793 = vector.shape_cast %792 : vector<8x1xi1> to vector<8x1xi1>
    %794 = vector.broadcast %793 : vector<8x1xi1> to vector<8x128xi1>
    %795 = arith.select %794, %790, %698 : vector<8x128xi1>, vector<8x128xf32>
    %796 = vector.shape_cast %792 : vector<8x1xi1> to vector<8x1xi1>
    %797 = vector.broadcast %796 : vector<8x1xi1> to vector<8x128xi1>
    %798 = arith.select %797, %788, %701 : vector<8x128xi1>, vector<8x128xf32>
    %799 = vector.broadcast %761 : vector<8x1xf32> to vector<8x128xf32>
    %800 = arith.mulf %799, %795 : vector<8x128xf32>
    %801 = arith.index_cast %756 : i32 to index
    %c0_216 = arith.constant 0 : index
    %c0_217 = arith.constant 0 : index
    %802 = vector.load %arg12[%801, %c0_216, %c0_217] : memref<8x8x128xf32, #tpu.memory_space<vmem>>, vector<1x8x128xf32>
    %803 = vector.shape_cast %802 : vector<1x8x128xf32> to vector<8x128xf32>
    %804 = vector.shape_cast %800 : vector<8x128xf32> to vector<1x8x128xf32>
    tpu.vector_store %arg12[%801, %c0_216, %c0_217], %804 {strides = array<i32>} : memref<8x8x128xf32, #tpu.memory_space<vmem>>, vector<1x8x128xf32>,
    %c8_i32_218 = arith.constant 8 : i32
    %c0_219 = arith.constant 0 : index
    %c0_220 = arith.constant 0 : index
    %c0_221 = arith.constant 0 : index
    %805 = vector.load %arg13[%c0_219, %c0_220, %c0_221] : memref<2x8x128xf32, #tpu.memory_space<vmem>>, vector<1x8x128xf32>
    %806 = vector.shape_cast %805 : vector<1x8x128xf32> to vector<8x128xf32>
    %807 = vector.shape_cast %746 : vector<8x128xf32> to vector<1x8x128xf32>
    tpu.vector_store %arg13[%c0_219, %c0_220, %c0_221], %807 {strides = array<i32>} : memref<2x8x128xf32, #tpu.memory_space<vmem>>, vector<1x8x128xf32>,
    %c0_222 = arith.constant 0 : index
    %c0_223 = arith.constant 0 : index
    %c0_224 = arith.constant 0 : index
    %808 = vector.load %arg14[%c0_222, %c0_223, %c0_224] : memref<2x8x128xf32, #tpu.memory_space<vmem>>, vector<1x8x128xf32>
    %809 = vector.shape_cast %808 : vector<1x8x128xf32> to vector<8x128xf32>
    %810 = vector.shape_cast %749 : vector<8x128xf32> to vector<1x8x128xf32>
    tpu.vector_store %arg14[%c0_222, %c0_223, %c0_224], %810 {strides = array<i32>} : memref<2x8x128xf32, #tpu.memory_space<vmem>>, vector<1x8x128xf32>,
    %c1_225 = arith.constant 1 : index
    %c0_226 = arith.constant 0 : index
    %c0_227 = arith.constant 0 : index
    %811 = vector.load %arg13[%c1_225, %c0_226, %c0_227] : memref<2x8x128xf32, #tpu.memory_space<vmem>>, vector<1x8x128xf32>
    %812 = vector.shape_cast %811 : vector<1x8x128xf32> to vector<8x128xf32>
    %813 = vector.shape_cast %795 : vector<8x128xf32> to vector<1x8x128xf32>
    tpu.vector_store %arg13[%c1_225, %c0_226, %c0_227], %813 {strides = array<i32>} : memref<2x8x128xf32, #tpu.memory_space<vmem>>, vector<1x8x128xf32>,
    %c1_228 = arith.constant 1 : index
    %c0_229 = arith.constant 0 : index
    %c0_230 = arith.constant 0 : index
    %814 = vector.load %arg14[%c1_228, %c0_229, %c0_230] : memref<2x8x128xf32, #tpu.memory_space<vmem>>, vector<1x8x128xf32>
    %815 = vector.shape_cast %814 : vector<1x8x128xf32> to vector<8x128xf32>
    %816 = vector.shape_cast %798 : vector<8x128xf32> to vector<1x8x128xf32>
    tpu.vector_store %arg14[%c1_228, %c0_229, %c0_230], %816 {strides = array<i32>} : memref<2x8x128xf32, #tpu.memory_space<vmem>>, vector<1x8x128xf32>,
    return
  }
  func.func @transform_0(%arg0: i32) -> (i32, i32, i32) {
    %c0_i32 = arith.constant 0 : i32
    %c0_i32_0 = arith.constant 0 : i32
    %c0_i32_1 = arith.constant 0 : i32
    return %arg0, %c0_i32, %c0_i32_0 : i32, i32, i32
  }
  func.func @transform_1(%arg0: i32) -> (i32, i32, i32) {
    %c1_i32 = arith.constant 1 : i32
    %0 = arith.subi %c1_i32, %arg0 : i32
    %c0_i32 = arith.constant 0 : i32
    %c0_i32_0 = arith.constant 0 : i32
    %c0_i32_1 = arith.constant 0 : i32
    return %0, %c0_i32, %c0_i32_0 : i32, i32, i32
  }
  func.func @transform_2(%arg0: i32) -> (i32, i32, i32) {
    %c0_i32 = arith.constant 0 : i32
    %c0_i32_0 = arith.constant 0 : i32
    %c0_i32_1 = arith.constant 0 : i32
    return %arg0, %c0_i32, %c0_i32_0 : i32, i32, i32
  }
  func.func @transform_3(%arg0: i32) -> (i32, i32, i32) {
    %c1_i32 = arith.constant 1 : i32
    %0 = arith.subi %c1_i32, %arg0 : i32
    %c0_i32 = arith.constant 0 : i32
    %c0_i32_0 = arith.constant 0 : i32
    %c0_i32_1 = arith.constant 0 : i32
    return %0, %c0_i32, %c0_i32_0 : i32, i32, i32
  }
  func.func @transform_4(%arg0: i32) -> (i32, i32) {
    %c0_i32 = arith.constant 0 : i32
    %c0_i32_0 = arith.constant 0 : i32
    %c0_i32_1 = arith.constant 0 : i32
    return %c0_i32, %c0_i32_0 : i32, i32
  }
  func.func @transform_5(%arg0: i32) -> (i32, i32) {
    %c0_i32 = arith.constant 0 : i32
    %c0_i32_0 = arith.constant 0 : i32
    %c0_i32_1 = arith.constant 0 : i32
    return %c0_i32, %c0_i32_0 : i32, i32
  }
  func.func @transform_6(%arg0: i32) -> (i32, i32) {
    %c0_i32 = arith.constant 0 : i32
    %c0_i32_0 = arith.constant 0 : i32
    %c0_i32_1 = arith.constant 0 : i32
    return %c0_i32, %c0_i32_0 : i32, i32
  }
  func.func @transform_7(%arg0: i32) -> (i32, i32) {
    %c0_i32 = arith.constant 0 : i32
    %c0_i32_0 = arith.constant 0 : i32
    %c0_i32_1 = arith.constant 0 : i32
    return %c0_i32, %c0_i32_0 : i32, i32
  }
  func.func @transform_8(%arg0: i32) -> (i32, i32) {
    %c0_i32 = arith.constant 0 : i32
    %c0_i32_0 = arith.constant 0 : i32
    %c0_i32_1 = arith.constant 0 : i32
    return %c0_i32, %c0_i32_0 : i32, i32
  }
  func.func @transform_9(%arg0: i32) -> (i32, i32) {
    %c0_i32 = arith.constant 0 : i32
    %c0_i32_0 = arith.constant 0 : i32
    %c0_i32_1 = arith.constant 0 : i32
    return %c0_i32, %c0_i32_0 : i32, i32
  }
  func.func @transform_10(%arg0: i32) -> (i32, i32, i32) {
    %c0_i32 = arith.constant 0 : i32
    %c0_i32_0 = arith.constant 0 : i32
    %c0_i32_1 = arith.constant 0 : i32
    return %arg0, %c0_i32, %c0_i32_0 : i32, i32, i32
  }
  func.func @transform_11(%arg0: i32) -> (i32, i32, i32) {
    %c1_i32 = arith.constant 1 : i32
    %0 = arith.subi %c1_i32, %arg0 : i32
    %c0_i32 = arith.constant 0 : i32
    %c0_i32_0 = arith.constant 0 : i32
    %c0_i32_1 = arith.constant 0 : i32
    return %0, %c0_i32, %c0_i32_0 : i32, i32, i32
  }
  func.func @transform_12(%arg0: i32) -> (i32, i32, i32) {
    %c0_i32 = arith.constant 0 : i32
    %c0_i32_0 = arith.constant 0 : i32
    %c0_i32_1 = arith.constant 0 : i32
    %c0_i32_2 = arith.constant 0 : i32
    return %c0_i32, %c0_i32_0, %c0_i32_1 : i32, i32, i32
  }
  func.func @transform_13(%arg0: i32) -> (i32, i32, i32) {
    %c0_i32 = arith.constant 0 : i32
    %c0_i32_0 = arith.constant 0 : i32
    %c0_i32_1 = arith.constant 0 : i32
    %c0_i32_2 = arith.constant 0 : i32
    return %c0_i32, %c0_i32_0, %c0_i32_1 : i32, i32, i32
  }
}

</mosaic_0001>

<bundles_post_ra>
// kernel: tpu_custom_call.1
= control target key start
LH: loop header
LB: loop body
LE: loop exit
PB: predicated region body
PF: predicated region fallthrough
CT: control target
= control target key end

     0   :  { %s8983_s0 = inlined_call_operand.vmem [shape: bf16[16,8,32], index: 0, kind: input, shape index: {}]   ;;  %s8984_s1 = inlined_call_operand.vmem [shape: bf16[16,8,32], index: 1, kind: input, shape index: {}]   ;;  %s8985_s2 = inlined_call_operand.vmem [shape: f32[16,8,1], index: 2, kind: input, shape index: {}]   ;;  %s8986_s3 = inlined_call_operand.vmem [shape: f32[16,8,1], index: 3, kind: input, shape index: {}]   ;;  %s8987_s4 = inlined_call_operand.vmem [shape: bf16[32,512], index: 4, kind: input, shape index: {}]   ;;  %s8988_s5 = inlined_call_operand.hbm [shape: f32[128,512], index: 5, kind: input, shape index: {}]   ;;  %s8989_s6 = inlined_call_operand.vmem [shape: f32[1,512], index: 6, kind: input, shape index: {}]   ;;  %s8990_s7 = inlined_call_operand.vmem [shape: bf16[32,512], index: 7, kind: input, shape index: {}]   ;;  %s8991_s8 = inlined_call_operand.hbm [shape: f32[128,512], index: 8, kind: input, shape index: {}]   ;;  %s8992_s9 = inlined_call_operand.vmem [shape: f32[1,512], index: 9, kind: input, shape index: {}]   ;;  %s8993_s10 = inlined_call_operand.hbm [shape: f32[16,8,128], index: 10, kind: output, shape index: {0}]   ;;  %s8994_s11 = inlined_call_operand.hbm [shape: f32[16,8,128], index: 11, kind: output, shape index: {1}]   ;;  %s8995_s12 = inlined_call_operand.hbm [shape: f32[2,8,128], index: 12, kind: output, shape index: {2}]   ;;  %s8996_s13 = inlined_call_operand.hbm [shape: f32[2,8,128], index: 13, kind: output, shape index: {3}]  }
   0x1   :  { %9410 = sst [smem:[#allocation196_spill]] %s8988_s5 }
   0x2   :  { %9411 = sst [smem:[#allocation197_spill]] %s8991_s8 }
   0x3   :  { %9412 = sst [smem:[#allocation198_spill]] %s8994_s11 }
   0x4   :  { %9413 = sst [smem:[#allocation199_spill]] %s8995_s12 }
   0x5   :  { %9414 = sst [smem:[#allocation200_spill]] %s8996_s13 }
   0x6   :  { %19 = vsyncpa [#allocation5], 0 }
   0x7   :  { %20 = vsyncpa [#allocation8], 0 }
   0x8   :  { %21 = vsyncpa [#allocation6], 0 }
   0x9   :  { %23 = vsyncpa [#allocation6 + $0x1], 0 }
   0xa   :  { %24 = vsyncpa [#allocation11], 0 }
   0xb   :  { %26 = vsyncpa [#allocation11 + $0x1], 0 }
   0xc   :  { %27 = vsyncpa [#allocation14], 0  ;;  %s5548_s25 = smov 0   ;;  %s5550_s26 = smov 0  }
   0xd   :  { %s5552_s27 = smov 0   ;;  %s5554_s28 = smov 0  }
   0xe   :  { %s5556_s29 = smov 0   ;;  %s5558_s30 = smov 0  }
   0xf   :  { %s5560_s14 = smov 0  }
  0x10 LB: > { %9415 = sst [smem:[#allocation21_spill]] %s5446_s26  ;;  %s5584_s15 = sadd.s32 4294967295, %s5466_s14   ;;  %s5466_s14 = sphi %s5560_s14, %s10336_s14   ;;  %s5462_s30 = sphi %s5558_s30, %s10341_s30   ;;  %s5458_s29 = sphi %s5556_s29, %s10343_s29   ;;  %s5454_s28 = sphi %s5554_s28, %s10342_s28   ;;  %s5450_s27 = sphi %s5552_s27, %s10339_s27   ;;  %s5446_s26 = sphi %s5550_s26, %s10338_s26   ;;  %s5442_s25 = sphi %s5548_s25, %s10337_s25  }
  0x11   : > { %9416 = sst [smem:[#allocation22_spill]] %s5450_s27  ;;  %s8997_s16 = sadd.s32 4294967294, %s5466_s14  }
  0x12   : > { %9417 = sst [smem:[#allocation23_spill]] %s5454_s28  ;;  %s5588_s17 = sadd.s32 1, %s5466_s14  }
  0x13   : > { %9418 = sst [smem:[#allocation24_spill]] %s5462_s30  ;;  %s274_s18 = sadd.s32 1, %s5462_s30 }
  0x14   : > { %9419 = sst [smem:[#allocation25_spill]] %s5466_s14  ;;  %s271_s19 = ssub.s32 %s5466_s14, %s5588_s17 }
  0x15   : > { %9420 = sst [smem:[#allocation26_spill]] %s5588_s17  ;;  %p284_p0 = scmp.ne.s32.totalorder %s5462_s30, %s5458_s29 }
  0x16   : > { %p272_p1 = scmp.eq.s32.totalorder %s271_s19, 0  ;;  %p285_p2 = scmp.eq.s32.totalorder %s5584_s15, 1 }
  0x17   : > { %p290_p3 = scmp.ne.s32.totalorder %s5458_s29, %s5454_s28  ;;  %p5600_p4 = scmp.eq.s32.totalorder %s8997_s16, 1 }
  0x18   : > { %s5605_s21 = scalar_select %p272_p1, %s5462_s30, %s274_s18  }
  0x19   : > { %p5609_p5 = por %p285_p2, %p284_p0  ;;  %p5615_p6 = por %p5600_p4, %p290_p3 }
  0x1a   : > { %9422 = sst [smem:[#allocation27_spill]] %s5605_s21  ;;  %s297_s24 = ssub.s32 1, %s5466_s14 }
  0x1b   : > { %s9424_s23 = scalar_select %p5615_p6, 1, 0 }
  0x1c   : > { %s298_s19 = ssub.s32 1, %s5588_s17  ;;  %s302_s28 = sadd.s32 1, %s5450_s27 }
  0x1d   : > { %9425 = sst [smem:[#allocation28_spill]] %s9424_s23  ;;  %s299_s16 = ssub.s32 %s297_s24, %s298_s19 }
  0x1e   : > { %p300_p7 = scmp.eq.s32.totalorder %s299_s16, 0  ;;  %p312_p8 = scmp.ne.s32.totalorder %s5450_s27, %s5446_s26 }
  0x1f   : > { %p318_p9 = scmp.ne.s32.totalorder %s5446_s26, %s5442_s25  ;;  %p4204_p10 = scmp.ge.s32.totalorder %s5466_s14, 1 }
  0x20   : > { %s5628_s18 = scalar_select %p300_p7, %s5450_s27, %s302_s28  }
  0x21   : > { %p5632_p11 = por %p312_p8, %p285_p2  ;;  %p5638_p12 = por %p318_p9, %p5600_p4 }
  0x22   : > { %9426 = sst [smem:[#allocation29_spill]] %s5628_s18  ;;  %p368_p13 = scmp.lt.s32.totalorder %s5466_s14, 3 }
  0x23   : > { %s9427_s21 = scalar_select %p5632_p11, 1, 0 }
  0x24   : > { %s9429_s30 = scalar_select %p5638_p12, 1, 0 }
  0x25   : > { %9428 = sst [smem:[#allocation30_spill]] %s9427_s21  ;;  %p4205_p0 = scmp.ne.s32.totalorder %s5584_s15, 0 }
  0x26   : > { %9430 = sst [smem:[#allocation31_spill]] %s9429_s30  ;;  %p4498_p1 = scmp.eq.s32.totalorder %s5584_s15, 0 }
  0x27   : > { %s9431_s5 = sld [smem:[#allocation196_spill]]  ;;  %p5648_p3 = pnand %p4204_p10, %p368_p13 }
  0x28   : > { %s5468_s20 = smov [#allocation4]   ;;  %s9433_s8 = sld [smem:[#allocation197_spill]] }
  0x29   : > { %p4484_p7 = pneg %p5648_p3  ;;  %s384_s19 = sshll.u32 %s5468_s20, 4  ;;  %s385_s19 = int_to_ptr.vmem [resolvable:$true] %s384_s19 }
  0x2a   : > { %s5469_s16 = smov [#allocation7]   ;;  %s5471_s30 = smov 32  }
  0x2b   : > { %p4485_p4 = pnand %p4498_p1, %p4484_p7  ;;  %s404_s24 = sshll.u32 %s5469_s16, 4  ;;  %s405_s24 = int_to_ptr.vmem [resolvable:$true] %s404_s24 }
  0x2c   : > { %463 = sbr.rel (%p5648_p3) target bundleno = 1615 (0x64f), region = 60 }
  0x2d   : > { %s382_s25 = sshll.u32 %s9431_s5, 4  ;;  %s5470_s5 = smov 512   ;;  %s383_s25 = int_to_ptr.hbm [resolvable:$true] %s382_s25 }
  0x2e   : > { %s402_s17 = sshll.u32 %s9433_s8, 4  ;;  %s403_s17 = int_to_ptr.hbm [resolvable:$true] %s402_s17 }
  0x2f   : > { %4487 = dma.hbm_to_vmem [thread:$0]  (!%p4485_p4), %s383_s25, 8192, %s385_s19, [#allocation5], %s5470_s5, %s5470_s5, %s5471_s30  }
  0x30   : > { %4490 = dma.hbm_to_vmem [thread:$0]  (!%p4485_p4), %s403_s17, 8192, %s405_s24, [#allocation8], %s5470_s5, %s5470_s5, %s5471_s30  }
  0x31   : > { %5417 = dma.done.wait (%p4498_p1), [#allocation5], 8192  }
  0x32   : > { %5419 = vsyncadd (%p4498_p1), [#allocation5], 4294959104 }
  0x33   : > { %5421 = dma.done.wait (%p4498_p1), [#allocation8], 8192  }
  0x34   : > { %5423 = vsyncadd (%p4498_p1), [#allocation8], 4294959104  ;;  %s9008_s5 = sand.u32 1, %s5458_s29   ;;  %s528_s27 = sand.u32 1, %s5446_s26  }
  0x35   : > { %s4211_s30 = sshll.u32 %s9008_s5, 6  ;;  %s4212_s17 = sshll.u32 %s528_s27, 6 }
  0x36   : > { %s4213_s18 = sshll.u32 %s5584_s15, 3  ;;  %s9011_s25 = ssub.s32 1, %s5584_s15 }
  0x37   : > { %p536_p8 = scmp.lt.s32.totalorder %s4213_s18, 15  ;;  %s4215_s28 = sshll.u32 %s9011_s25, 3 }
  0x38   : > { %p543_p9 = scmp.lt.s32.totalorder %s4215_s28, 15  ;;  %s5697_s16 = scalar_lea.vmem [#allocation9], %s4211_s30 }
  0x39   : > { %s10345_s18 = smov (!%p536_p8, %s4213_s18), 15 }
  0x3a   : > { %s10347_s28 = smov (!%p543_p9, %s4215_s28), 15  ;;  %s4214_s20 = sshll.u32 %s10345_s18, 2 }
  0x3b   : > { %s4218_s19 = sshll.u32 %s10345_s18, 3  ;;  %s5680_s8 = scalar_lea.vmem %s8983_s0, %s4214_s20 }
  0x3c   : > { %s4216_s23 = sshll.u32 %s10347_s28, 2  ;;  %s5690_s25 = scalar_lea.vmem %s8985_s2, %s4218_s19 }
  0x3d   : > { %s5685_s27 = scalar_lea.vmem %s8984_s1, %s4216_s23  ;;  %s4220_s12 = sshll.u32 %s10347_s28, 3 }
  0x3e   : > { %s5695_s18 = scalar_lea.vmem %s8986_s3, %s4220_s12  ;;  %s5699_s20 = scalar_lea.vmem [#allocation10], %s4212_s17 }
  0x3f   : > { %570 = sbr.rel (%p4205_p0) target bundleno = 73 (0x49), region = 72 }
  0x44   : > { %v5472_v0 = vmov 0.0  }
  0x45   : > { %571 = vst [vmem:[#allocation12] sm:$0xff] %v5472_v0 }
  0x46   : > { %572 = vst [vmem:[#allocation12 + $0x8] sm:$0xff] %v5472_v0 }
  0x47   : > { %573 = vst [vmem:[#allocation13] sm:$0xff] %v5472_v0 }
  0x48   : > { %574 = vst [vmem:[#allocation13 + $0x8] sm:$0xff] %v5472_v0 }
  0x49 PF: > { %v4256_v1 = vld [vmem:[%s8987_s4 + $0x20] sm:$0xf]  ;;  %v4452_v2 = vld [vmem:[%s8987_s4 + $0x2c] sm:$0xf0]  ;;  %v4450_v3 = vld [vmem:[%s8987_s4 + $0x24] sm:$0xf] }
  0x4a   : > { %v4257_v4 = vor.u32 %v4452_v2, %v4256_v1  ;;  %v4258_v5 = vld [vmem:[%s8987_s4 + $0x30] sm:$0xf0]  ;;  %v4264_v6 = vld [vmem:[%s8987_s4 + $0x28] sm:$0xf]  ;;  %v4453_v7 = vld [vmem:[%s8987_s4 + $0x34] sm:$0xf0] }
  0x4b   : > { %v4261_v8 = vor.u32 %v4450_v3, %v4258_v5  ;;  %v4265_v9 = vor.u32 %v4453_v7, %v4264_v6  ;;  %v4451_v10 = vld [vmem:[%s8987_s4 + $0x2c] sm:$0xf]  ;;  %v4266_v11 = vld [vmem:[%s8987_s4 + $0x38] sm:$0xf0]  ;;  %v4240_v12 = vld [vmem:[%s8987_s4] sm:$0xf] }
  0x4c   : > { %688 = vmatpush.bf16.msra.mxu0 %v4257_v4  ;;  %v4269_v13 = vor.u32 %v4451_v10, %v4266_v11  ;;  %v4448_v14 = vld [vmem:[%s8987_s4 + $0xc] sm:$0xf0]  ;;  %v4446_v15 = vld [vmem:[%s8987_s4 + $0x4] sm:$0xf]  ;;  %v4242_v16 = vld [vmem:[%s8987_s4 + $0x10] sm:$0xf0] }
  0x4d   : > { %717 = vmatpush.bf16.msra.mxu1 %v4261_v8  ;;  %746 = vmatpush.bf16.msra.mxu2 %v4265_v9  ;;  %v4241_v17 = vor.u32 %v4448_v14, %v4240_v12  ;;  %v4245_v18 = vor.u32 %v4446_v15, %v4242_v16  ;;  %v4248_v19 = vld [vmem:[%s8987_s4 + $0x8] sm:$0xf]  ;;  %v4449_v20 = vld [vmem:[%s8987_s4 + $0x14] sm:$0xf0]  ;;  %v4447_v21 = vld [vmem:[%s8987_s4 + $0xc] sm:$0xf] }
  0x4e   : > { %775 = vmatpush.bf16.msra.mxu3 %v4269_v13  ;;  %v4249_v22 = vor.u32 %v4449_v20, %v4248_v19  ;;  %v4250_v23 = vld [vmem:[%s8987_s4 + $0x18] sm:$0xf0]  ;;  %v4438_v24 = vld [vmem:[%s5680_s8] sm:$0xff]  ;;  %vm669_vm0 = vcmask 261120   ;;  %v4460_v27 = vld [vmem:[%s8990_s7 + $0x2c] sm:$0xf0] }
  0x4f   : > { %v4320_v25 = vld [vmem:[%s8990_s7 + $0x20] sm:$0xf]  ;;  %v4253_v26 = vor.u32 %v4447_v21, %v4250_v23  ;;  %v4458_v28 = vld [vmem:[%s8990_s7 + $0x24] sm:$0xf]  ;;  %v4322_v29 = vld [vmem:[%s8990_s7 + $0x30] sm:$0xf0] }
  0x50   : > { %689 = vmatpush.bf16.msra.mxu0 %v4241_v17  ;;  %v4321_v30 = vor.u32 %v4460_v27, %v4320_v25  ;;  %v4325_v31 = vor.u32 %v4458_v28, %v4322_v29  ;;  %v4459_v32 = vld [vmem:[%s8990_s7 + $0x2c] sm:$0xf]  ;;  %v4330_v33 = vld [vmem:[%s8990_s7 + $0x38] sm:$0xf0]  ;;  %v4328_v34 = vld [vmem:[%s8990_s7 + $0x28] sm:$0xf] }
  0x51   : > { %718 = vmatpush.bf16.msra.mxu1 %v4245_v18  ;;  %747 = vmatpush.bf16.msra.mxu2 %v4249_v22  ;;  %v4461_v35 = vld [vmem:[%s8990_s7 + $0x34] sm:$0xf0]  ;;  %v4333_v36 = vor.u32 %v4459_v32, %v4330_v33  ;;  %v4304_v38 = vld [vmem:[%s8990_s7] sm:$0xf]  ;;  %v4456_v39 = vld [vmem:[%s8990_s7 + $0xc] sm:$0xf0] }
  0x52   : > { %776 = vmatpush.bf16.msra.mxu3 %v4253_v26  ;;  %v4329_v37 = vor.u32 %v4461_v35, %v4328_v34  ;;  %v4454_v40 = vld [vmem:[%s8990_s7 + $0x4] sm:$0xf]  ;;  %v4305_v41 = vor.u32 %v4456_v39, %v4304_v38  ;;  %v4306_v42 = vld [vmem:[%s8990_s7 + $0x10] sm:$0xf0]  ;;  %v4455_v43 = vld [vmem:[%s8990_s7 + $0xc] sm:$0xf] }
  0x53   : > { %4270 = vmatmul.msk.bf16.vlgmr.msra.gmra.mxu0 %vm669_vm0, %v4438_v24  ;;  %v4314_v44 = vld [vmem:[%s8990_s7 + $0x18] sm:$0xf0]  ;;  %v4309_v45 = vor.u32 %v4454_v40, %v4306_v42  ;;  %v4312_v47 = vld [vmem:[%s8990_s7 + $0x8] sm:$0xf]  ;;  %v4457_v48 = vld [vmem:[%s8990_s7 + $0x14] sm:$0xf0] }
  0x54   : > { %926 = vmatpush.bf16.msrb.mxu0 %v4321_v30  ;;  %4274 = vmatmul.msk.bf16.vlgmr.msra.gmra.mxu1 %vm669_vm0, %v4438_v24  ;;  %v4317_v46 = vor.u32 %v4455_v43, %v4314_v44  ;;  %v4313_v49 = vor.u32 %v4457_v48, %v4312_v47  ;;  %v4439_v50 = vld [vmem:[%s5680_s8 + $0x8] sm:$0xff]  ;;  %v4440_v51 = vld [vmem:[%s5680_s8 + $0x10] sm:$0xff]  ;;  %v5814_v52 = vld [vmem:[#allocation4 + $0x1e0] sm:$0xff]  ;;  %v9013_v47 = vmov 0   ;;  %s3964_s12 = sshll.u32 %s5697_s16, 4  ;;  %s10325_s21 = sand.u32 1, %s5458_s29   ;;  %s8859_s12 = int_to_ptr.vmem [resolvable:$true] %s3964_s12 }
  0x55   : > { %955 = vmatpush.bf16.msrb.mxu1 %v4325_v31  ;;  %4278 = vmatmul.msk.bf16.vlgmr.msra.gmra.mxu2 %vm669_vm0, %v4438_v24  ;;  %v5816_v53 = vld [vmem:[#allocation4 + $0x1e8] sm:$0xff]  ;;  %v5818_v54 = vld [vmem:[#allocation4 + $0x1c0] sm:$0xff]  ;;  %v5824_v56 = vld [vmem:[#allocation4 + $0x1f8] sm:$0xff]  ;;  %s3947_s23 = scalar_lea.sflag [#allocation6], %s10325_s21  ;;  %s5296_s28 = scalar_lea.hbm %s8993_s10, 128 }
  0x56   : > { %4282 = vmatmul.msk.bf16.vlgmr.msra.gmra.mxu3 %vm669_vm0, %v4438_v24  ;;  %984 = vmatpush.bf16.msrb.mxu2 %v4329_v37  ;;  %v5822_v55 = vld [vmem:[#allocation4 + $0x1c8] sm:$0xff]  ;;  %v5826_v57 = vld [vmem:[#allocation4 + $0x1a0] sm:$0xff]  ;;  %v5831_v59 = vld [vmem:[#allocation4 + $0x1d8] sm:$0xff] }
  0x57   : > { %1013 = vmatpush.bf16.msrb.mxu3 %v4333_v36  ;;  %v5829_v58 = vld [vmem:[#allocation4 + $0x1a8] sm:$0xff]  ;;  %v5833_v60 = vld [vmem:[#allocation4 + $0x1f0] sm:$0xff]  ;;  %v5841_v62 = vld [vmem:[#allocation4 + $0x180] sm:$0xff]  ;;  %4573 = vset.pattern.permute.xlu0 %v9013_v47 }
  0x58   : > { %927 = vmatpush.bf16.msrb.mxu0 %v4305_v41  ;;  %v5837_v61 = vld [vmem:[#allocation4 + $0x1d0] sm:$0xff]  ;;  %v5843_v63 = vld [vmem:[#allocation4 + $0x188] sm:$0xff]  ;;  %v5845_v0 = vld [vmem:[#allocation4 + $0x1b8] sm:$0xff] }
  0x59   : > { %956 = vmatpush.bf16.msrb.mxu1 %v4309_v45  ;;  %v5849_v1 = vld [vmem:[#allocation4 + $0x1b0] sm:$0xff]  ;;  %v4441_v2 = vld [vmem:[%s5680_s8 + $0x18] sm:$0xff]  ;;  %v5865_v5 = vld [vmem:[#allocation4 + $0x160] sm:$0xff] }
  0x5a   : > { %985 = vmatpush.bf16.msrb.mxu2 %v4313_v49  ;;  %v5860_v3 = vld [vmem:[#allocation4 + $0x190] sm:$0xff]  ;;  %v5862_v4 = vld [vmem:[#allocation4 + $0x198] sm:$0xff]  ;;  %v5867_v6 = vld [vmem:[#allocation4 + $0x168] sm:$0xff] }
  0x5b   : > { %1014 = vmatpush.bf16.msrb.mxu3 %v4317_v46  ;;  %v5870_v7 = vld [vmem:[#allocation4 + $0x170] sm:$0xff]  ;;  %v5874_v8 = vld [vmem:[#allocation4 + $0x178] sm:$0xff]  ;;  %v5876_v9 = vld [vmem:[#allocation4 + $0x140] sm:$0xff] }
  0x5c   : > { %1210 = vmatpush.msra.mxu0 %v5814_v52  ;;  %v5878_v10 = vld [vmem:[#allocation4 + $0x148] sm:$0xff]  ;;  %v5882_v11 = vld [vmem:[#allocation4 + $0x150] sm:$0xff]  ;;  %v5884_v12 = vld [vmem:[#allocation4 + $0x120] sm:$0xff] }
  0x5d   : > { %1230 = vmatpush.msra.mxu1 %v5816_v53  ;;  %v5888_v13 = vld [vmem:[#allocation4 + $0x158] sm:$0xff]  ;;  %v5890_v14 = vld [vmem:[#allocation4 + $0x128] sm:$0xff]  ;;  %v5892_v15 = vld [vmem:[#allocation4 + $0x130] sm:$0xff] }
  0x5e   : > { %1211 = vmatpush.msra.mxu0 %v5818_v54  ;;  %1250 = vmatpush.msra.mxu2 %v5833_v60  ;;  %v5896_v16 = vld [vmem:[#allocation4 + $0x100] sm:$0xff]  ;;  %v5898_v17 = vld [vmem:[#allocation4 + $0x108] sm:$0xff]  ;;  %v5902_v18 = vld [vmem:[#allocation4 + $0x138] sm:$0xff] }
  0x5f   : > { %1270 = vmatpush.msra.mxu3 %v5824_v56  ;;  %1231 = vmatpush.msra.mxu1 %v5822_v55  ;;  %v5904_v19 = vld [vmem:[#allocation4 + $0x110] sm:$0xff]  ;;  %v5908_v20 = vld [vmem:[#allocation4 + $0xe0] sm:$0xff]  ;;  %v5910_v21 = vld [vmem:[#allocation4 + $0xe8] sm:$0xff] }
  0x60   : > { %1212 = vmatpush.msra.mxu0 %v5826_v57  ;;  %1251 = vmatpush.msra.mxu2 %v5837_v61  ;;  %v5914_v22 = vld [vmem:[#allocation4 + $0x118] sm:$0xff]  ;;  %v5916_v23 = vld [vmem:[#allocation4 + $0xf0] sm:$0xff]  ;;  %v5920_v24 = vld [vmem:[#allocation4 + $0xc0] sm:$0xff] }
  0x61   : > { %1271 = vmatpush.msra.mxu3 %v5831_v59  ;;  %1232 = vmatpush.msra.mxu1 %v5829_v58  ;;  %v5922_v25 = vld [vmem:[#allocation4 + $0xc8] sm:$0xff]  ;;  %v5926_v26 = vld [vmem:[#allocation4 + $0xf8] sm:$0xff]  ;;  %v5928_v27 = vld [vmem:[#allocation4 + $0xd0] sm:$0xff] }
  0x62   : > { %1213 = vmatpush.msra.mxu0 %v5841_v62  ;;  %1252 = vmatpush.msra.mxu2 %v5849_v1  ;;  %v4442_v28 = vld [vmem:[%s5685_s27] sm:$0xff]  ;;  %v5935_v30 = vld [vmem:[#allocation4 + $0xa8] sm:$0xff]  ;;  %v5939_v31 = vld [vmem:[#allocation4 + $0xd8] sm:$0xff] }
  0x63   : > { %4271 = vmatmul.msk.bf16.gmra.mxu0 %vm669_vm0, %v4439_v50  ;;  %1272 = vmatpush.msra.mxu3 %v5845_v0  ;;  %v5933_v29 = vld [vmem:[#allocation4 + $0xa0] sm:$0xff]  ;;  %v5945_v32 = vld [vmem:[#allocation4 + $0xb0] sm:$0xff]  ;;  %v5949_v33 = vld [vmem:[#allocation4 + $0xb8] sm:$0xff] }
  0x64   : > { %4275 = vmatmul.msk.bf16.gmra.mxu1 %vm669_vm0, %v4439_v50  ;;  %1253 = vmatpush.msra.mxu2 %v5860_v3  ;;  %v5953_v34 = vld [vmem:[#allocation4 + $0x80] sm:$0xff]  ;;  %v5955_v35 = vld [vmem:[#allocation4 + $0x88] sm:$0xff]  ;;  %v5957_v36 = vld [vmem:[#allocation4 + $0x90] sm:$0xff] }
  0x65   : > { %4279 = vmatmul.msk.bf16.gmra.mxu2 %vm669_vm0, %v4439_v50  ;;  %1233 = vmatpush.msra.mxu1 %v5843_v63  ;;  %v5961_v37 = vld [vmem:[#allocation4 + $0x98] sm:$0xff]  ;;  %v5963_v38 = vld [vmem:[#allocation4 + $0x60] sm:$0xff]  ;;  %v5967_v39 = vld [vmem:[#allocation4 + $0x68] sm:$0xff] }
  0x66   : > { %4283 = vmatmul.msk.bf16.gmra.mxu3 %vm669_vm0, %v4439_v50  ;;  %1214 = vmatpush.msra.mxu0 %v5865_v5  ;;  %v5969_v40 = vld [vmem:[#allocation4 + $0x70] sm:$0xff]  ;;  %v5973_v41 = vld [vmem:[#allocation4 + $0x78] sm:$0xff]  ;;  %v5977_v42 = vld [vmem:[#allocation4 + $0x40] sm:$0xff] }
  0x67   : > { %1234 = vmatpush.msra.mxu1 %v5867_v6  ;;  %1273 = vmatpush.msra.mxu3 %v5862_v4  ;;  %9434 = vst [vmem:[#allocation32_spill] sm:$0xff] %v5969_v40  ;;  %v5979_v43 = vld [vmem:[#allocation4 + $0x48] sm:$0xff]  ;;  %v5982_v44 = vld [vmem:[%s5690_s25] sm:$0xff]  ;;  %v5986_v45 = vld [vmem:[#allocation4 + $0x50] sm:$0xff] }
  0x68   : > { %1254 = vmatpush.msra.mxu2 %v5870_v7  ;;  %1215 = vmatpush.msra.mxu0 %v5876_v9  ;;  %9435 = vst [vmem:[#allocation33_spill] sm:$0xff] %v5973_v41  ;;  %v5988_v46 = vld [vmem:[#allocation4 + $0x58] sm:$0xff]  ;;  %vm1357_vm1 = vcmp.gt.f32.partialorder %v5982_v44, 0.5  ;;  %v5994_v49 = vld [vmem:[#allocation4 + $0x20] sm:$0xff]  ;;  %v5998_v50 = vld [vmem:[#allocation4 + $0x28] sm:$0xff] }
  0x69   : > { %1235 = vmatpush.msra.mxu1 %v5878_v10  ;;  %1274 = vmatpush.msra.mxu3 %v5874_v8  ;;  %9436 = vst [vmem:[#allocation34_spill] sm:$0xff] %v5977_v42  ;;  %v1358_v48 = vsel %vm1357_vm1, 1, %v9013_v47  ;;  %v6009_v47 = vld [vmem:[#allocation4 + $0x8] sm:$0xff] }
  0x6a   : > { %1255 = vmatpush.msra.mxu2 %v5882_v11  ;;  %1216 = vmatpush.msra.mxu0 %v5884_v12  ;;  %9437 = vst [vmem:[#allocation35_spill] sm:$0xff] %v5979_v43 }
  0x6b   : > { %1236 = vmatpush.msra.mxu1 %v5890_v14  ;;  %1275 = vmatpush.msra.mxu3 %v5888_v13  ;;  %9438 = vst [vmem:[#allocation36_spill] sm:$0xff] %v5982_v44  ;;  %v6011_v44 = vld [vmem:[#allocation4 + $0x10] sm:$0xff] }
  0x6c   : > { %1256 = vmatpush.msra.mxu2 %v5892_v15  ;;  %1217 = vmatpush.msra.mxu0 %v5896_v16  ;;  %9439 = vst [vmem:[#allocation37_spill] sm:$0xff] %v5986_v45 }
  0x6d   : > { %1237 = vmatpush.msra.mxu1 %v5898_v17  ;;  %1276 = vmatpush.msra.mxu3 %v5902_v18  ;;  %9440 = vst [vmem:[#allocation38_spill] sm:$0xff] %v5988_v46 }
  0x6e   : > { %1257 = vmatpush.msra.mxu2 %v5904_v19  ;;  %1218 = vmatpush.msra.mxu0 %v5908_v20  ;;  %9441 = vst [vmem:[#allocation39_spill] sm:$0xff] %v5994_v49 }
  0x6f   : > { %1238 = vmatpush.msra.mxu1 %v5910_v21  ;;  %1277 = vmatpush.msra.mxu3 %v5914_v22  ;;  %9442 = vst [vmem:[#allocation40_spill] sm:$0xff] %v5998_v50 }
  0x70   : > { %1258 = vmatpush.msra.mxu2 %v5916_v23  ;;  %1219 = vmatpush.msra.mxu0 %v5920_v24  ;;  %9446 = vst [vmem:[#allocation44_spill] sm:$0xff] %v6009_v47 }
  0x71   : > { %1239 = vmatpush.msra.mxu1 %v5922_v25  ;;  %1278 = vmatpush.msra.mxu3 %v5926_v26  ;;  %9447 = vst [vmem:[#allocation45_spill] sm:$0xff] %v6011_v44 }
  0x72   : > { %1259 = vmatpush.msra.mxu2 %v5928_v27  ;;  %1220 = vmatpush.msra.mxu0 %v5933_v29 }
  0x73   : > { %4272 = vmatmul.msk.bf16.gmra.mxu0 %vm669_vm0, %v4440_v51  ;;  %1240 = vmatpush.msra.mxu1 %v5935_v30 }
  0x74   : > { %4276 = vmatmul.msk.bf16.gmra.mxu1 %vm669_vm0, %v4440_v51  ;;  %1279 = vmatpush.msra.mxu3 %v5939_v31 }
  0x75   : > { %4280 = vmatmul.msk.bf16.gmra.mxu2 %vm669_vm0, %v4440_v51  ;;  %1221 = vmatpush.msra.mxu0 %v5953_v34 }
  0x76   : > { %4284 = vmatmul.msk.bf16.gmra.mxu3 %vm669_vm0, %v4440_v51  ;;  %1260 = vmatpush.msra.mxu2 %v5945_v32  ;;  %v6000_v51 = vld [vmem:[#allocation4 + $0x30] sm:$0xff] }
  0x77   : > { %1280 = vmatpush.msra.mxu3 %v5949_v33  ;;  %1241 = vmatpush.msra.mxu1 %v5955_v35  ;;  %9443 = vst [vmem:[#allocation41_spill] sm:$0xff] %v6000_v51 }
  0x78   : > { %1261 = vmatpush.msra.mxu2 %v5957_v36  ;;  %1222 = vmatpush.msra.mxu0 %v5963_v38 }
  0x79   : > { %1281 = vmatpush.msra.mxu3 %v5961_v37  ;;  %1242 = vmatpush.msra.mxu1 %v5967_v39 }
  0x7a   : > { %1262 = vmatpush.msra.mxu2 %v5969_v40  ;;  %1223 = vmatpush.msra.mxu0 %v5977_v42  ;;  %v4443_v42 = vld [vmem:[%s5685_s27 + $0x8] sm:$0xff]  ;;  %v6085_v40 = vld [vmem:[#allocation7 + $0x170] sm:$0xff] }
  0x7b   : > { %1282 = vmatpush.msra.mxu3 %v5973_v41  ;;  %1243 = vmatpush.msra.mxu1 %v5979_v43  ;;  %v6015_v43 = vld [vmem:[#allocation4 + $0x18] sm:$0xff]  ;;  %v6064_v41 = vld [vmem:[#allocation7 + $0x180] sm:$0xff]  ;;  %9469 = vst [vmem:[#allocation66_spill] sm:$0xff] %v6085_v40 }
  0x7c   : > { %1263 = vmatpush.msra.mxu2 %v5986_v45  ;;  %1360 = vperm.xlu0 %4573, %v1358_v48   ;;  %9448 = vst [vmem:[#allocation46_spill] sm:$0xff] %v6015_v43  ;;  %v6017_v45 = vld [vmem:[#allocation7 + $0x1e0] sm:$0xff]  ;;  %v6025_v48 = vld [vmem:[#allocation7 + $0x1e8] sm:$0xff] }
  0x7d   : > { %1283 = vmatpush.msra.mxu3 %v5988_v46  ;;  %1224 = vmatpush.msra.mxu0 %v5994_v49  ;;  %9449 = vst [vmem:[#allocation47_spill] sm:$0xff] %v6017_v45  ;;  %v6020_v46 = vld [vmem:[%s5695_s18 + $0x38] sm:$0xff]  ;;  %v6027_v49 = vld [vmem:[#allocation7 + $0x1f0] sm:$0xff] }
  0x7e   : > { %1244 = vmatpush.msra.mxu1 %v5998_v50  ;;  %1264 = vmatpush.msra.mxu2 %v6000_v51  ;;  %9450 = vst [vmem:[#allocation48_spill] sm:$0xff] %v6025_v48  ;;  %v6031_v51 = vld [vmem:[#allocation7 + $0x1f8] sm:$0xff]  ;;  %vm1528_vm2 = vcmp.gt.f32.partialorder %v6020_v46, 0.5 }
  0x7f   : > { %9451 = vst [vmem:[#allocation49_spill] sm:$0xff] %v6027_v49  ;;  %v6061_v50 = vld [vmem:[#allocation7 + $0x1b8] sm:$0xff] }
  0x80   : > { %1245 = vmatpush.msra.mxu1 %v6009_v47  ;;  %1265 = vmatpush.msra.mxu2 %v6011_v44  ;;  %9452 = vst [vmem:[#allocation50_spill] sm:$0xff] %v6031_v51  ;;  %v6042_v47 = vld [vmem:[#allocation7 + $0x1c8] sm:$0xff]  ;;  %v6044_v44 = vld [vmem:[#allocation7 + $0x1d0] sm:$0xff] }
  0x81   : > { %9454 = vst [vmem:[#allocation52_spill] sm:$0xff] %v6042_v47 }
  0x82   : > { %9455 = vst [vmem:[#allocation53_spill] sm:$0xff] %v6044_v44 }
  0x83   : > { %4273 = vmatmul.msk.bf16.gmra.mxu0 %vm669_vm0, %v4441_v2  ;;  %9461 = vst [vmem:[#allocation58_spill] sm:$0xff] %v6061_v50 }
  0x84   : > { %4277 = vmatmul.msk.bf16.gmra.mxu1 %vm669_vm0, %v4441_v2  ;;  %9462 = vst [vmem:[#allocation59_spill] sm:$0xff] %v6064_v41 }
  0x85   : > { %4281 = vmatmul.msk.bf16.gmra.mxu2 %vm669_vm0, %v4441_v2 }
  0x86   : > { %4285 = vmatmul.msk.bf16.gmra.mxu3 %vm669_vm0, %v4441_v2  ;;  %v6004_v2 = vld [vmem:[#allocation4 + $0x38] sm:$0xff] }
  0x87   : > { %9444 = vst [vmem:[#allocation42_spill] sm:$0xff] %v6004_v2  ;;  %1284 = vmatpush.msra.mxu3 %v6004_v2  ;;  %v6059_v2 = vld [vmem:[#allocation7 + $0x1b0] sm:$0xff] }
  0x88   : > { %9460 = vst [vmem:[#allocation57_spill] sm:$0xff] %v6059_v2 }
  0x89   : > { %1285 = vmatpush.msra.mxu3 %v6015_v43 }
  0x93   : > { %4334 = vmatmul.msk.bf16.vlgmr.msrb.gmra.mxu0 %vm669_vm0, %v4442_v28 }
  0x94   : > { %4338 = vmatmul.msk.bf16.vlgmr.msrb.gmra.mxu1 %vm669_vm0, %v4442_v28 }
  0x95   : > { %4342 = vmatmul.msk.bf16.vlgmr.msrb.gmra.mxu2 %vm669_vm0, %v4442_v28  ;;  %1401 = vmatpush.msrb.mxu1 %v6025_v48  ;;  %v9457_v48 = vmov 0  }
  0x96   : > { %4346 = vmatmul.msk.bf16.vlgmr.msrb.gmra.mxu3 %vm669_vm0, %v4442_v28  ;;  %v6006_v28 = vld [vmem:[#allocation4] sm:$0xff]  ;;  %1421 = vmatpush.msrb.mxu2 %v6027_v49  ;;  %v1529_v43 = vsel %vm1528_vm2, 1, %v9457_v48 }
  0x97   : > { %9445 = vst [vmem:[#allocation43_spill] sm:$0xff] %v6006_v28  ;;  %1225 = vmatpush.msra.mxu0 %v6006_v28  ;;  %v6038_v28 = vld [vmem:[#allocation7 + $0x1c0] sm:$0xff]  ;;  %1441 = vmatpush.msrb.mxu3 %v6031_v51  ;;  %v6055_v51 = vld [vmem:[#allocation7 + $0x1a8] sm:$0xff] }
  0x98   : > { %9453 = vst [vmem:[#allocation51_spill] sm:$0xff] %v6038_v28  ;;  %v6053_v49 = vld [vmem:[#allocation7 + $0x1a0] sm:$0xff]  ;;  %1402 = vmatpush.msrb.mxu1 %v6042_v47  ;;  %1422 = vmatpush.msrb.mxu2 %v6044_v44  ;;  %v6073_v47 = vld [vmem:[#allocation7 + $0x190] sm:$0xff]  ;;  %v6075_v44 = vld [vmem:[#allocation7 + $0x198] sm:$0xff] }
  0x99   : > { %1381 = vmatpush.msrb.mxu0 %v6017_v45  ;;  %v6048_v45 = vld [vmem:[#allocation7 + $0x1d8] sm:$0xff]  ;;  %9458 = vst [vmem:[#allocation55_spill] sm:$0xff] %v6053_v49  ;;  %1531 = vperm.xlu0 %4573, %v1529_v43   ;;  %v6081_v43 = vld [vmem:[#allocation7 + $0x168] sm:$0xff] }
  0x9a   : > { %9456 = vst [vmem:[#allocation54_spill] sm:$0xff] %v6048_v45  ;;  %1442 = vmatpush.msrb.mxu3 %v6048_v45  ;;  %1403 = vmatpush.msrb.mxu1 %v6055_v51  ;;  %v6079_v45 = vld [vmem:[#allocation7 + $0x160] sm:$0xff] }
  0x9b   : > { %1382 = vmatpush.msrb.mxu0 %v6038_v28  ;;  %9459 = vst [vmem:[#allocation56_spill] sm:$0xff] %v6055_v51  ;;  %v6069_v28 = vld [vmem:[%s5690_s25 + $0x18] sm:$0xff]  ;;  %1423 = vmatpush.msrb.mxu2 %v6059_v2  ;;  %v6094_v2 = vld [vmem:[#allocation7 + $0x148] sm:$0xff] }
  0x9c   : > { %9464 = vst [vmem:[#allocation61_spill] sm:$0xff] %v6069_v28  ;;  %1443 = vmatpush.msrb.mxu3 %v6061_v50  ;;  %vm2388_vm3 = vcmp.gt.f32.partialorder %v6069_v28, 0.5  ;;  %v6092_v50 = vld [vmem:[#allocation7 + $0x140] sm:$0xff]  ;;  %v6121_v51 = vld [vmem:[#allocation7 + $0x108] sm:$0xff]  ;;  %4575 = vset.pattern.permute.xlu2 %v9457_v48 }
  0x9d   : > { %1383 = vmatpush.msrb.mxu0 %v6053_v49  ;;  %9465 = vst [vmem:[#allocation62_spill] sm:$0xff] %v6073_v47  ;;  %v6087_v49 = vld [vmem:[#allocation7 + $0x178] sm:$0xff]  ;;  %1424 = vmatpush.msrb.mxu2 %v6073_v47  ;;  %v2389_v28 = vsel %vm2388_vm3, 1, %v9457_v48  ;;  %v4444_v47 = vld [vmem:[%s5685_s27 + $0x10] sm:$0xff] }
  0x9e   : > { %9466 = vst [vmem:[#allocation63_spill] sm:$0xff] %v6075_v44  ;;  %1444 = vmatpush.msrb.mxu3 %v6075_v44  ;;  %v6105_v44 = vld [vmem:[#allocation7 + $0x120] sm:$0xff]  ;;  %4574 = vset.pattern.permute.xlu1 %v9457_v48 }
  0x9f   : > { %9467 = vst [vmem:[#allocation64_spill] sm:$0xff] %v6079_v45  ;;  %1384 = vmatpush.msrb.mxu0 %v6064_v41  ;;  %v6100_v41 = vld [vmem:[#allocation7 + $0x158] sm:$0xff]  ;;  %1425 = vmatpush.msrb.mxu2 %v6085_v40 }
  0xa0   : > { %9468 = vst [vmem:[#allocation65_spill] sm:$0xff] %v6081_v43  ;;  %1445 = vmatpush.msrb.mxu3 %v6087_v49  ;;  %v6116_v40 = vld [vmem:[#allocation7 + $0x138] sm:$0xff] }
  0xa1   : > { %9470 = vst [vmem:[#allocation67_spill] sm:$0xff] %v6087_v49  ;;  %1385 = vmatpush.msrb.mxu0 %v6079_v45  ;;  %v6109_v45 = vld [vmem:[#allocation7 + $0x128] sm:$0xff]  ;;  %v6118_v49 = vld [vmem:[#allocation7 + $0x100] sm:$0xff]  ;;  %2391 = vperm.xlu0 %4573, %v2389_v28   ;;  %v6134_v28 = vld [vmem:[#allocation7 + $0x118] sm:$0xff] }
  0xa2   : > { %9471 = vst [vmem:[#allocation68_spill] sm:$0xff] %v6092_v50  ;;  %1446 = vmatpush.msrb.mxu3 %v6100_v41 }
  0xa3   : > { %4335 = vmatmul.msk.bf16.gmra.mxu0 %vm669_vm0, %v4443_v42  ;;  %9472 = vst [vmem:[#allocation69_spill] sm:$0xff] %v6094_v2 }
  0xa4   : > { %4339 = vmatmul.msk.bf16.gmra.mxu1 %vm669_vm0, %v4443_v42  ;;  %9474 = vst [vmem:[#allocation71_spill] sm:$0xff] %v6100_v41  ;;  %1386 = vmatpush.msrb.mxu0 %v6092_v50  ;;  %v6130_v41 = vld [vmem:[#allocation7 + $0x110] sm:$0xff]  ;;  %v4445_v50 = vld [vmem:[%s5685_s27 + $0x18] sm:$0xff] }
  0xa5   : > { %4343 = vmatmul.msk.bf16.gmra.mxu2 %vm669_vm0, %v4443_v42  ;;  %9475 = vst [vmem:[#allocation72_spill] sm:$0xff] %v6105_v44  ;;  %1447 = vmatpush.msrb.mxu3 %v6116_v40 }
  0xa6   : > { %4347 = vmatmul.msk.bf16.gmra.mxu3 %vm669_vm0, %v4443_v42  ;;  %v6066_v42 = vld [vmem:[#allocation7 + $0x188] sm:$0xff]  ;;  %9476 = vst [vmem:[#allocation73_spill] sm:$0xff] %v6109_v45  ;;  %1387 = vmatpush.msrb.mxu0 %v6105_v44  ;;  %v6136_v44 = vld [vmem:[#allocation7 + $0xe0] sm:$0xff] }
  0xa7   : > { %9463 = vst [vmem:[#allocation60_spill] sm:$0xff] %v6066_v42  ;;  %1404 = vmatpush.msrb.mxu1 %v6066_v42  ;;  %v6098_v42 = vld [vmem:[#allocation7 + $0x150] sm:$0xff]  ;;  %1448 = vmatpush.msrb.mxu3 %v6134_v28 }
  0xa8   : > { %9473 = vst [vmem:[#allocation70_spill] sm:$0xff] %v6098_v42  ;;  %1426 = vmatpush.msrb.mxu2 %v6098_v42  ;;  %1388 = vmatpush.msrb.mxu0 %v6118_v49  ;;  %v6155_v42 = vld [vmem:[#allocation7 + $0xd0] sm:$0xff] }
  0xa9   : > { %1405 = vmatpush.msrb.mxu1 %v6081_v43  ;;  %v6111_v43 = vld [vmem:[#allocation7 + $0x130] sm:$0xff]  ;;  %9478 = vst [vmem:[#allocation75_spill] sm:$0xff] %v6116_v40  ;;  %v6153_v40 = vld [vmem:[#allocation7 + $0xc8] sm:$0xff] }
  0xaa   : > { %9477 = vst [vmem:[#allocation74_spill] sm:$0xff] %v6111_v43  ;;  %1427 = vmatpush.msrb.mxu2 %v6111_v43  ;;  %v6140_v43 = vld [vmem:[#allocation7 + $0xe8] sm:$0xff]  ;;  %1389 = vmatpush.msrb.mxu0 %v6136_v44 }
  0xab   : > { %1406 = vmatpush.msrb.mxu1 %v6094_v2  ;;  %9479 = vst [vmem:[#allocation76_spill] sm:$0xff] %v6118_v49  ;;  %v6126_v2 = vld [vmem:[%s5695_s18 + $0x18] sm:$0xff] }
  0xac   : > { %9480 = vst [vmem:[#allocation77_spill] sm:$0xff] %v6121_v51  ;;  %vm2902_vm4 = vcmp.gt.f32.partialorder %v6126_v2, 0.5  ;;  %1428 = vmatpush.msrb.mxu2 %v6130_v41  ;;  %v6147_v49 = vld [vmem:[#allocation7 + $0xf8] sm:$0xff] }
  0xad   : > { %1407 = vmatpush.msrb.mxu1 %v6109_v45  ;;  %9481 = vst [vmem:[#allocation78_spill] sm:$0xff] %v6126_v2  ;;  %v6142_v45 = vld [vmem:[#allocation7 + $0xf0] sm:$0xff]  ;;  %v2903_v2 = vsel %vm2902_vm4, 1, %v9457_v48  ;;  %1449 = vmatpush.msrb.mxu3 %v6147_v49 }
  0xae   : > { %9482 = vst [vmem:[#allocation79_spill] sm:$0xff] %v6130_v41  ;;  %1429 = vmatpush.msrb.mxu2 %v6142_v45  ;;  %v6172_v41 = vld [vmem:[#allocation7 + $0xb8] sm:$0xff]  ;;  %2905 = vperm.xlu0 %4573, %v2903_v2   ;;  %v6190_v2 = vld [vmem:[#allocation7 + $0x60] sm:$0xff] }
  0xaf   : > { %1408 = vmatpush.msrb.mxu1 %v6121_v51  ;;  %9483 = vst [vmem:[#allocation80_spill] sm:$0xff] %v6134_v28  ;;  %v6149_v51 = vld [vmem:[#allocation7 + $0xc0] sm:$0xff] }
  0xb0   : > { %9484 = vst [vmem:[#allocation81_spill] sm:$0xff] %v6136_v44  ;;  %1390 = vmatpush.msrb.mxu0 %v6149_v51  ;;  %v6164_v28 = vld [vmem:[#allocation7 + $0xa0] sm:$0xff]  ;;  %v6166_v44 = vld [vmem:[#allocation7 + $0xa8] sm:$0xff]  ;;  %1430 = vmatpush.msrb.mxu2 %v6155_v42 }
  0xb1   : > { %9485 = vst [vmem:[#allocation82_spill] sm:$0xff] %v6140_v43  ;;  %1409 = vmatpush.msrb.mxu1 %v6140_v43  ;;  %v6170_v43 = vld [vmem:[#allocation7 + $0xb0] sm:$0xff] }
  0xb2   : > { %9486 = vst [vmem:[#allocation83_spill] sm:$0xff] %v6142_v45  ;;  %v6175_v45 = vld [vmem:[#allocation7 + $0x80] sm:$0xff]  ;;  %1391 = vmatpush.msrb.mxu0 %v6164_v28  ;;  %1431 = vmatpush.msrb.mxu2 %v6170_v43 }
  0xb3   : > { %4336 = vmatmul.msk.bf16.gmra.mxu0 %vm669_vm0, %v4444_v47  ;;  %9487 = vst [vmem:[#allocation84_spill] sm:$0xff] %v6147_v49  ;;  %1410 = vmatpush.msrb.mxu1 %v6153_v40  ;;  %v6177_v49 = vld [vmem:[#allocation7 + $0x88] sm:$0xff] }
  0xb4   : > { %4340 = vmatmul.msk.bf16.gmra.mxu1 %vm669_vm0, %v4444_v47  ;;  %9488 = vst [vmem:[#allocation85_spill] sm:$0xff] %v6149_v51  ;;  %v6180_v51 = vld [vmem:[%s5690_s25 + $0x30] sm:$0xff]  ;;  %1392 = vmatpush.msrb.mxu0 %v6175_v45 }
  0xb5   : > { %4344 = vmatmul.msk.bf16.gmra.mxu2 %vm669_vm0, %v4444_v47  ;;  %9489 = vst [vmem:[#allocation86_spill] sm:$0xff] %v6153_v40  ;;  %1411 = vmatpush.msrb.mxu1 %v6166_v44  ;;  %v6184_v40 = vld [vmem:[#allocation7 + $0x90] sm:$0xff]  ;;  %vm3415_vm5 = vcmp.gt.f32.partialorder %v6180_v51, 0.5 }
  0xb6   : > { %4348 = vmatmul.msk.bf16.gmra.mxu3 %vm669_vm0, %v4444_v47  ;;  %9490 = vst [vmem:[#allocation87_spill] sm:$0xff] %v6155_v42  ;;  %v6159_v47 = vld [vmem:[#allocation7 + $0xd8] sm:$0xff]  ;;  %1432 = vmatpush.msrb.mxu2 %v6184_v40 }
  0xb7   : > { %9491 = vst [vmem:[#allocation88_spill] sm:$0xff] %v6159_v47  ;;  %1450 = vmatpush.msrb.mxu3 %v6159_v47  ;;  %v6186_v42 = vld [vmem:[#allocation7 + $0x98] sm:$0xff]  ;;  %v6192_v47 = vld [vmem:[#allocation7 + $0x68] sm:$0xff]  ;;  %1412 = vmatpush.msrb.mxu1 %v6177_v49 }
  0xb8   : > { %9492 = vst [vmem:[#allocation89_spill] sm:$0xff] %v6164_v28  ;;  %v6196_v28 = vld [vmem:[#allocation7 + $0x70] sm:$0xff]  ;;  %1393 = vmatpush.msrb.mxu0 %v6190_v2 }
  0xb9   : > { %9493 = vst [vmem:[#allocation90_spill] sm:$0xff] %v6166_v44  ;;  %1451 = vmatpush.msrb.mxu3 %v6172_v41  ;;  %v6198_v44 = vld [vmem:[#allocation7 + $0x78] sm:$0xff]  ;;  %1413 = vmatpush.msrb.mxu1 %v6192_v47 }
  0xba   : > { %9494 = vst [vmem:[#allocation91_spill] sm:$0xff] %v6170_v43  ;;  %v6203_v43 = vld [vmem:[#allocation7 + $0x40] sm:$0xff]  ;;  %1433 = vmatpush.msrb.mxu2 %v6196_v28 }
  0xbb   : > { %9495 = vst [vmem:[#allocation92_spill] sm:$0xff] %v6172_v41  ;;  %1452 = vmatpush.msrb.mxu3 %v6186_v42  ;;  %v6205_v41 = vld [vmem:[#allocation7 + $0x48] sm:$0xff]  ;;  %1394 = vmatpush.msrb.mxu0 %v6203_v43 }
  0xbc   : > { %9496 = vst [vmem:[#allocation93_spill] sm:$0xff] %v6175_v45  ;;  %v6212_v45 = vld [vmem:[#allocation7 + $0x58] sm:$0xff]  ;;  %1414 = vmatpush.msrb.mxu1 %v6205_v41 }
  0xbd   : > { %9497 = vst [vmem:[#allocation94_spill] sm:$0xff] %v6177_v49  ;;  %v6210_v49 = vld [vmem:[#allocation7 + $0x50] sm:$0xff]  ;;  %1453 = vmatpush.msrb.mxu3 %v6198_v44 }
  0xbe   : > { %9498 = vst [vmem:[#allocation95_spill] sm:$0xff] %v6184_v40  ;;  %v3416_v40 = vsel %vm3415_vm5, 1, %v9457_v48  ;;  %1434 = vmatpush.msrb.mxu2 %v6210_v49 }
  0xbf   : > { %9499 = vst [vmem:[#allocation96_spill] sm:$0xff] %v6190_v2  ;;  %1454 = vmatpush.msrb.mxu3 %v6212_v45  ;;  %v6221_v2 = vld [vmem:[#allocation7 + $0x20] sm:$0xff]  ;;  %3418 = vperm.xlu0 %4573, %v3416_v40   ;;  %v6238_v40 = vld [vmem:[#allocation7 + $0x10] sm:$0xff] }
  0xc0   : > { %9500 = vst [vmem:[#allocation97_spill] sm:$0xff] %v6192_v47  ;;  %v6224_v47 = vld [vmem:[#allocation7 + $0x28] sm:$0xff]  ;;  %1395 = vmatpush.msrb.mxu0 %v6221_v2 }
  0xc1   : > { %9501 = vst [vmem:[#allocation98_spill] sm:$0xff] %v6196_v28  ;;  %v6226_v28 = vld [vmem:[#allocation7 + $0x30] sm:$0xff]  ;;  %1415 = vmatpush.msrb.mxu1 %v6224_v47 }
  0xc2   : > { %9502 = vst [vmem:[#allocation99_spill] sm:$0xff] %v6203_v43  ;;  %v6230_v43 = vld [vmem:[#allocation7 + $0x38] sm:$0xff]  ;;  %1435 = vmatpush.msrb.mxu2 %v6226_v28 }
  0xc3   : > { %9503 = vst [vmem:[#allocation100_spill] sm:$0xff] %v6205_v41  ;;  %4337 = vmatmul.msk.bf16.gmra.mxu0 %vm669_vm0, %v4445_v50  ;;  %v6232_v41 = vld [vmem:[#allocation7] sm:$0xff]  ;;  %1455 = vmatpush.msrb.mxu3 %v6230_v43 }
  0xc4   : > { %9504 = vst [vmem:[#allocation101_spill] sm:$0xff] %v6210_v49  ;;  %4341 = vmatmul.msk.bf16.gmra.mxu1 %vm669_vm0, %v4445_v50  ;;  %v6242_v49 = vld [vmem:[#allocation7 + $0x18] sm:$0xff]  ;;  %1396 = vmatpush.msrb.mxu0 %v6232_v41 }
  0xc5   : > { %9505 = vst [vmem:[#allocation102_spill] sm:$0xff] %v6212_v45  ;;  %4345 = vmatmul.msk.bf16.gmra.mxu2 %vm669_vm0, %v4445_v50  ;;  %v6236_v45 = vld [vmem:[#allocation7 + $0x8] sm:$0xff]  ;;  %1456 = vmatpush.msrb.mxu3 %v6242_v49 }
  0xc6   : > { %9506 = vst [vmem:[#allocation103_spill] sm:$0xff] %v6224_v47  ;;  %4349 = vmatmul.msk.bf16.gmra.mxu3 %vm669_vm0, %v4445_v50  ;;  %1416 = vmatpush.msrb.mxu1 %v6236_v45  ;;  %v4368_v47 = vld [vmem:[%s5690_s25 + $0x10] sm:$0xff] }
  0xc7   : > { %9507 = vst [vmem:[#allocation104_spill] sm:$0xff] %v6226_v28  ;;  %1436 = vmatpush.msrb.mxu2 %v6238_v40  ;;  %1538 = vperm.xlu0 %4573, %v6020_v46   ;;  %v6254_v28 = vld [vmem:[#allocation12] sm:$0xff]  ;;  %vm2044_vm6 = vcmp.gt.f32.partialorder %v4368_v47, 0.5 }
  0xc8   : > { %9508 = vst [vmem:[#allocation105_spill] sm:$0xff] %v6230_v43 }
  0xc9   : > { %9509 = vst [vmem:[#allocation106_spill] sm:$0xff] %v6238_v40  ;;  %v6277_v40 = vld [vmem:[%s5695_s18 + $0x20] sm:$0xff] }
  0xca   : > { %9510 = vst [vmem:[#allocation107_spill] sm:$0xff] %v6242_v49  ;;  %v6274_v49 = vld [vmem:[#allocation12 + $0x8] sm:$0xff]  ;;  %vm2560_vm12 = vcmp.gt.f32.partialorder %v6277_v40, 0.5 }
  0xcf   : > { %2054 = vperm.xlu0 %4573, %v4368_v47   ;;  %v9553_v47 = vld [vmem:[#allocation56_spill] sm:$0xff] }
  0xd0   : > { %v6252_v50 = vpop.f32.mrf.mxu0 }
  0xd1   : > { %9511 = vst [vmem:[#allocation108_spill] sm:$0xff] %v6252_v50  ;;  %v6257_v43 = vpop.f32.mrf.mxu1 }
  0xd2   : > { %9512 = vst [vmem:[#allocation109_spill] sm:$0xff] %v6257_v43 }
  0xd3   : > { %1226 = vmatmul.f32.vlgmr.msra.gmra.mxu0 %v6254_v28 }
  0xd4   : > { %1246 = vmatmul.f32.vlgmr.msra.gmra.mxu1 %v6254_v28  ;;  %1553 = vmatpush.msra.mxu0 %v5814_v52 }
  0xd5   : > { %1266 = vmatmul.f32.vlgmr.msra.gmra.mxu2 %v6254_v28  ;;  %1573 = vmatpush.msra.mxu1 %v5816_v53 }
  0xd6   : > { %1286 = vmatmul.f32.vlgmr.msra.gmra.mxu3 %v6254_v28  ;;  %1593 = vmatpush.msra.mxu2 %v5833_v60 }
  0xd7   : > { %1613 = vmatpush.msra.mxu3 %v5824_v56  ;;  %1554 = vmatpush.msra.mxu0 %v5818_v54  ;;  %v6304_v56 = vld [vmem:[%s5690_s25 + $0x28] sm:$0xff] }
  0xd8   : > { %v6266_v46 = vpop.f32.mrf.mxu2  ;;  %v6272_v50 = vpop.f32.mrf.mxu0  ;;  %1574 = vmatpush.msra.mxu1 %v5822_v55  ;;  %1594 = vmatpush.msra.mxu2 %v5837_v61  ;;  %vm3073_vm13 = vcmp.gt.f32.partialorder %v6304_v56, 0.5 }
  0xd9   : > { %v6270_v43 = vpop.f32.mrf.mxu3  ;;  %v6281_v52 = vpop.f32.mrf.mxu1  ;;  %1614 = vmatpush.msra.mxu3 %v5831_v59  ;;  %1555 = vmatpush.msra.mxu0 %v5826_v57 }
  0xda   : > { %1575 = vmatpush.msra.mxu1 %v5829_v58  ;;  %1595 = vmatpush.msra.mxu2 %v5849_v1  ;;  %v2045_v58 = vsel %vm2044_vm6, 1, %v9457_v48 }
  0xdb   : > { %1397 = vmatmul.f32.vlgmr.msrb.gmra.mxu0 %v6274_v49  ;;  %2570 = vperm.xlu0 %4573, %v6277_v40  }
  0xdc   : > { %1417 = vmatmul.f32.vlgmr.msrb.gmra.mxu1 %v6274_v49  ;;  %1556 = vmatpush.msra.mxu0 %v5841_v62  ;;  %v4403_v62 = vld [vmem:[%s5695_s18 + $0x10] sm:$0xff] }
  0xdd   : > { %1437 = vmatmul.f32.vlgmr.msrb.gmra.mxu2 %v6274_v49  ;;  %1615 = vmatpush.msra.mxu3 %v5845_v0  ;;  %v6336_v0 = vld [vmem:[%s5695_s18 + $0x28] sm:$0xff]  ;;  %vm3244_vm9 = vcmp.gt.f32.partialorder %v4403_v62, 0.5 }
  0xde   : > { %1457 = vmatmul.f32.vlgmr.msrb.gmra.mxu3 %v6274_v49  ;;  %1576 = vmatpush.msra.mxu1 %v5843_v63  ;;  %vm2216_vm7 = vcmp.gt.f32.partialorder %v6336_v0, 0.5 }
  0xdf   : > { %1596 = vmatpush.msra.mxu2 %v5860_v3  ;;  %1557 = vmatpush.msra.mxu0 %v5865_v5  ;;  %v2217_v1 = vsel %vm2216_vm7, 1, %v9457_v48 }
  0xe0   : > { %v6295_v53 = vpop.f32.mrf.mxu2  ;;  %v6301_v55 = vpop.f32.mrf.mxu0  ;;  %1616 = vmatpush.msra.mxu3 %v5862_v4  ;;  %1577 = vmatpush.msra.mxu1 %v5867_v6 }
  0xe1   : > { %v6299_v54 = vpop.f32.mrf.mxu3  ;;  %9513 = vst [vmem:[#allocation110_spill] sm:$0xff] %v6301_v55  ;;  %v6308_v57 = vpop.f32.mrf.mxu1  ;;  %1597 = vmatpush.msra.mxu2 %v5870_v7  ;;  %1558 = vmatpush.msra.mxu0 %v5876_v9  ;;  %v6363_v7 = vld [vmem:[%s5690_s25 + $0x20] sm:$0xff]  ;;  %v6889_v55 = vld [vmem:[%s5690_s25 + $0x38] sm:$0xff] }
  0xe2   : > { %9514 = vst [vmem:[#allocation111_spill] sm:$0xff] %v6308_v57  ;;  %1617 = vmatpush.msra.mxu3 %v5874_v8  ;;  %1578 = vmatpush.msra.mxu1 %v5878_v10  ;;  %vm2731_vm8 = vcmp.gt.f32.partialorder %v6363_v7, 0.5  ;;  %v9523_v9 = vld [vmem:[#allocation32_spill] sm:$0xff]  ;;  %v9524_v10 = vld [vmem:[#allocation33_spill] sm:$0xff] }
  0xe3   : > { %3083 = vperm.xlu0 %4573, %v6304_v56   ;;  %1598 = vmatpush.msra.mxu2 %v5882_v11  ;;  %v2732_v8 = vsel %vm2731_vm8, 1, %v9457_v48  ;;  %v9525_v11 = vld [vmem:[#allocation34_spill] sm:$0xff]  ;;  %v6885_v57 = vld [vmem:[#allocation4 + $0x80] sm:$0xff] }
  0xe4   : > { %2047 = vperm.xlu2 %4575, %v2045_v58   ;;  %1618 = vmatpush.msra.mxu3 %v5888_v13  ;;  %v9527_v13 = vld [vmem:[#allocation37_spill] sm:$0xff] }
  0xe5   : > { %1559 = vmatpush.msra.mxu0 %v5884_v12  ;;  %1579 = vmatpush.msra.mxu1 %v5890_v14  ;;  %v9526_v12 = vld [vmem:[#allocation35_spill] sm:$0xff]  ;;  %v9528_v14 = vld [vmem:[#allocation38_spill] sm:$0xff]  ;;  %v9554_v58 = vld [vmem:[#allocation57_spill] sm:$0xff] }
  0xe6   : > { %1599 = vmatpush.msra.mxu2 %v5892_v15  ;;  %1619 = vmatpush.msra.mxu3 %v5902_v18 }
  0xe7   : > { %1560 = vmatpush.msra.mxu0 %v5896_v16  ;;  %1580 = vmatpush.msra.mxu1 %v5898_v17  ;;  %v9530_v16 = vld [vmem:[#allocation39_spill] sm:$0xff]  ;;  %v9531_v17 = vld [vmem:[#allocation40_spill] sm:$0xff] }
  0xe8   : > { %v6322_v59 = vpop.f32.mrf.mxu2  ;;  %v6328_v61 = vpop.f32.mrf.mxu0  ;;  %1600 = vmatpush.msra.mxu2 %v5904_v19  ;;  %1620 = vmatpush.msra.mxu3 %v5914_v22 }
  0xe9   : > { %9515 = vst [vmem:[#allocation112_spill] sm:$0xff] %v6322_v59  ;;  %v6326_v60 = vpop.f32.mrf.mxu3  ;;  %v6333_v63 = vpop.f32.mrf.mxu1  ;;  %1561 = vmatpush.msra.mxu0 %v5908_v20  ;;  %1581 = vmatpush.msra.mxu1 %v5910_v21  ;;  %v9534_v20 = vld [vmem:[#allocation41_spill] sm:$0xff]  ;;  %v9535_v21 = vld [vmem:[#allocation42_spill] sm:$0xff] }
  0xea   : > { %9516 = vst [vmem:[#allocation113_spill] sm:$0xff] %v6326_v60  ;;  %1601 = vmatpush.msra.mxu2 %v5916_v23  ;;  %1621 = vmatpush.msra.mxu3 %v5926_v26  ;;  %v9537_v23 = vld [vmem:[#allocation43_spill] sm:$0xff]  ;;  %v9540_v26 = vld [vmem:[#allocation46_spill] sm:$0xff] }
  0xeb   : > { %9517 = vst [vmem:[#allocation114_spill] sm:$0xff] %v6328_v61  ;;  %3254 = vperm.xlu0 %4573, %v4403_v62   ;;  %1562 = vmatpush.msra.mxu0 %v5920_v24  ;;  %v9538_v24 = vld [vmem:[#allocation44_spill] sm:$0xff]  ;;  %v6854_v61 = vld [vmem:[#allocation4 + $0xf0] sm:$0xff]  ;;  %v6882_v60 = vld [vmem:[#allocation4 + $0xb8] sm:$0xff] }
  0xec   : > { %9518 = vst [vmem:[#allocation115_spill] sm:$0xff] %v6333_v63  ;;  %2219 = vperm.xlu2 %4575, %v2217_v1   ;;  %1582 = vmatpush.msra.mxu1 %v5922_v25  ;;  %v9539_v25 = vld [vmem:[#allocation45_spill] sm:$0xff]  ;;  %v9556_v1 = vld [vmem:[#allocation58_spill] sm:$0xff] }
  0xed   : > { %1602 = vmatpush.msra.mxu2 %v5928_v27  ;;  %1622 = vmatpush.msra.mxu3 %v5939_v31  ;;  %v3245_v27 = vsel %vm3244_vm9, 1, %v9457_v48  ;;  %v9543_v31 = vld [vmem:[#allocation49_spill] sm:$0xff]  ;;  %v6879_v59 = vld [vmem:[#allocation4 + $0xb0] sm:$0xff] }
  0xee   : > { %1563 = vmatpush.msra.mxu0 %v5933_v29  ;;  %1583 = vmatpush.msra.mxu1 %v5935_v30  ;;  %v9541_v29 = vld [vmem:[#allocation47_spill] sm:$0xff]  ;;  %v9542_v30 = vld [vmem:[#allocation48_spill] sm:$0xff]  ;;  %v6851_v63 = vld [vmem:[#allocation4 + $0xe8] sm:$0xff] }
  0xef   : > { %1603 = vmatpush.msra.mxu2 %v5945_v32  ;;  %1623 = vmatpush.msra.mxu3 %v5949_v33  ;;  %v9544_v32 = vld [vmem:[#allocation50_spill] sm:$0xff]  ;;  %v9545_v33 = vld [vmem:[#allocation51_spill] sm:$0xff] }
  0xf0   : > { %v6350_v3 = vpop.f32.mrf.mxu2  ;;  %v6356_v5 = vpop.f32.mrf.mxu0  ;;  %1564 = vmatpush.msra.mxu0 %v5953_v34  ;;  %1584 = vmatpush.msra.mxu1 %v5955_v35  ;;  %v9546_v34 = vld [vmem:[#allocation52_spill] sm:$0xff]  ;;  %v9547_v35 = vld [vmem:[#allocation53_spill] sm:$0xff] }
  0xf1   : > { %9519 = vst [vmem:[#allocation116_spill] sm:$0xff] %v6350_v3  ;;  %v6354_v4 = vpop.f32.mrf.mxu3  ;;  %v6360_v6 = vpop.f32.mrf.mxu1  ;;  %1604 = vmatpush.msra.mxu2 %v5957_v36  ;;  %1624 = vmatpush.msra.mxu3 %v5961_v37  ;;  %v9549_v37 = vld [vmem:[#allocation54_spill] sm:$0xff] }
  0xf2   : > { %9520 = vst [vmem:[#allocation117_spill] sm:$0xff] %v6354_v4  ;;  %1565 = vmatpush.msra.mxu0 %v5963_v38  ;;  %1585 = vmatpush.msra.mxu1 %v5967_v39  ;;  %v9550_v38 = vld [vmem:[#allocation55_spill] sm:$0xff] }
  0xf3   : > { %9521 = vst [vmem:[#allocation118_spill] sm:$0xff] %v6356_v5  ;;  %3425 = vperm.xlu0 %4573, %v6180_v51   ;;  %1605 = vmatpush.msra.mxu2 %v9523_v9  ;;  %v9558_v9 = vld [vmem:[#allocation60_spill] sm:$0xff] }
  0xf4   : > { %9522 = vst [vmem:[#allocation119_spill] sm:$0xff] %v6360_v6  ;;  %2734 = vperm.xlu2 %4575, %v2732_v8   ;;  %1625 = vmatpush.msra.mxu3 %v9524_v10  ;;  %v9557_v8 = vld [vmem:[#allocation59_spill] sm:$0xff]  ;;  %v9559_v10 = vld [vmem:[#allocation62_spill] sm:$0xff] }
  0xf5   : > { %1566 = vmatpush.msra.mxu0 %v9525_v11  ;;  %1586 = vmatpush.msra.mxu1 %v9526_v12  ;;  %v9560_v11 = vld [vmem:[#allocation63_spill] sm:$0xff]  ;;  %v9561_v12 = vld [vmem:[#allocation64_spill] sm:$0xff] }
  0xf6   : > { %1606 = vmatpush.msra.mxu2 %v9527_v13  ;;  %1626 = vmatpush.msra.mxu3 %v9528_v14  ;;  %v9562_v13 = vld [vmem:[#allocation36_spill] sm:$0xff]  ;;  %v9563_v14 = vld [vmem:[#allocation65_spill] sm:$0xff] }
  0xf7   : > { %1567 = vmatpush.msra.mxu0 %v9530_v16  ;;  %1587 = vmatpush.msra.mxu1 %v9531_v17  ;;  %v9564_v16 = vld [vmem:[#allocation66_spill] sm:$0xff]  ;;  %v9565_v17 = vld [vmem:[#allocation67_spill] sm:$0xff] }
  0xf8   : > { %v6378_v15 = vpop.f32.mrf.mxu2  ;;  %v6384_v19 = vpop.f32.mrf.mxu0  ;;  %1607 = vmatpush.msra.mxu2 %v9534_v20  ;;  %1627 = vmatpush.msra.mxu3 %v9535_v21  ;;  %v9566_v20 = vld [vmem:[#allocation68_spill] sm:$0xff]  ;;  %v9567_v21 = vld [vmem:[#allocation69_spill] sm:$0xff] }
  0xf9   : > { %9529 = vst [vmem:[#allocation32_spill] sm:$0xff] %v6378_v15  ;;  %v6382_v18 = vpop.f32.mrf.mxu3  ;;  %v6388_v22 = vpop.f32.mrf.mxu1  ;;  %1568 = vmatpush.msra.mxu0 %v9537_v23  ;;  %1588 = vmatpush.msra.mxu1 %v9538_v24  ;;  %v9569_v24 = vld [vmem:[#allocation70_spill] sm:$0xff] }
  0xfa   : > { %9532 = vst [vmem:[#allocation33_spill] sm:$0xff] %v6382_v18  ;;  %1608 = vmatpush.msra.mxu2 %v9539_v25  ;;  %1628 = vmatpush.msra.mxu3 %v9540_v26  ;;  %v9570_v25 = vld [vmem:[#allocation71_spill] sm:$0xff] }
  0xfb   : > { %9533 = vst [vmem:[#allocation34_spill] sm:$0xff] %v6384_v19  ;;  %1725 = vmatpush.msrb.mxu0 %v9541_v29  ;;  %1745 = vmatpush.msrb.mxu1 %v9542_v30  ;;  %v9573_v29 = vld [vmem:[#allocation72_spill] sm:$0xff]  ;;  %v9574_v30 = vld [vmem:[#allocation73_spill] sm:$0xff] }
  0xfc   : > { %9536 = vst [vmem:[#allocation35_spill] sm:$0xff] %v6388_v22  ;;  %3247 = vperm.xlu2 %4575, %v3245_v27   ;;  %1765 = vmatpush.msrb.mxu2 %v9543_v31 }
  0xfd   : > { %1785 = vmatpush.msrb.mxu3 %v9544_v32  ;;  %1726 = vmatpush.msrb.mxu0 %v9545_v33  ;;  %v9576_v32 = vld [vmem:[#allocation74_spill] sm:$0xff]  ;;  %v9577_v33 = vld [vmem:[#allocation75_spill] sm:$0xff] }
  0xfe   : > { %1746 = vmatpush.msrb.mxu1 %v9546_v34  ;;  %1766 = vmatpush.msrb.mxu2 %v9547_v35  ;;  %v838_v34 = vld [vmem:[%s8992_s9] sm:$0xf] }
  0xff   : > { %1786 = vmatpush.msrb.mxu3 %v9549_v37  ;;  %1727 = vmatpush.msrb.mxu0 %v9550_v38  ;;  %v9578_v35 = vld [vmem:[#allocation76_spill] sm:$0xff]  ;;  %v9579_v37 = vld [vmem:[#allocation77_spill] sm:$0xff]  ;;  %v9580_v38 = vld [vmem:[#allocation79_spill] sm:$0xff] }
 0x100   : > { %v6402_v36 = vpop.f32.mrf.mxu2  ;;  %v6408_v51 = vpop.f32.mrf.mxu0  ;;  %1747 = vmatpush.msrb.mxu1 %v9553_v47  ;;  %1767 = vmatpush.msrb.mxu2 %v9554_v58  ;;  %v9581_v47 = vld [vmem:[#allocation80_spill] sm:$0xff]  ;;  %v9582_v58 = vld [vmem:[#allocation81_spill] sm:$0xff] }
 0x101   : > { %9548 = vst [vmem:[#allocation37_spill] sm:$0xff] %v6402_v36  ;;  %v6406_v39 = vpop.f32.mrf.mxu3  ;;  %v6412_v62 = vpop.f32.mrf.mxu1  ;;  %1787 = vmatpush.msrb.mxu3 %v9556_v1  ;;  %1728 = vmatpush.msrb.mxu0 %v9557_v8  ;;  %v9583_v1 = vld [vmem:[#allocation82_spill] sm:$0xff]  ;;  %v6449_v8 = vperm.slane %v838_v34, 0 }
 0x102   : > { %9551 = vst [vmem:[#allocation38_spill] sm:$0xff] %v6406_v39  ;;  %1748 = vmatpush.msrb.mxu1 %v9558_v9  ;;  %1768 = vmatpush.msrb.mxu2 %v9559_v10  ;;  %v9584_v9 = vld [vmem:[#allocation83_spill] sm:$0xff]  ;;  %v9585_v10 = vld [vmem:[#allocation84_spill] sm:$0xff] }
 0x103   : > { %9552 = vst [vmem:[#allocation39_spill] sm:$0xff] %v6408_v51  ;;  %1788 = vmatpush.msrb.mxu3 %v9560_v11  ;;  %1729 = vmatpush.msrb.mxu0 %v9561_v12  ;;  %v6453_v11 = vperm.slane %v838_v34, 1  ;;  %v9586_v12 = vld [vmem:[#allocation85_spill] sm:$0xff]  ;;  %v9637_v51 = vld [vmem:[#allocation108_spill] sm:$0xff] }
 0x104   : > { %9555 = vst [vmem:[#allocation40_spill] sm:$0xff] %v6412_v62  ;;  %1367 = vperm.xlu2 %4575, %v9562_v13   ;;  %1749 = vmatpush.msrb.mxu1 %v9563_v14  ;;  %v9587_v13 = vld [vmem:[#allocation86_spill] sm:$0xff] }
 0x105   : > { %1769 = vmatpush.msrb.mxu2 %v9564_v16  ;;  %1789 = vmatpush.msrb.mxu3 %v9565_v17  ;;  %v9589_v16 = vld [vmem:[#allocation87_spill] sm:$0xff]  ;;  %v9590_v17 = vld [vmem:[#allocation88_spill] sm:$0xff]  ;;  %v4363_v62 = vld [vmem:[%s5695_s18 + $0x30] sm:$0xff] }
 0x106   : > { %1730 = vmatpush.msrb.mxu0 %v9566_v20  ;;  %1750 = vmatpush.msrb.mxu1 %v9567_v21  ;;  %vm1872_vm11 = vcmp.gt.f32.partialorder %v4363_v62, 0.5 }
 0x107   : > { %1770 = vmatpush.msrb.mxu2 %v9569_v24  ;;  %1790 = vmatpush.msrb.mxu3 %v9570_v25  ;;  %v9592_v24 = vld [vmem:[#allocation89_spill] sm:$0xff]  ;;  %v9593_v25 = vld [vmem:[#allocation90_spill] sm:$0xff] }
 0x108   : > { %v6426_v23 = vpop.f32.mrf.mxu2  ;;  %v6432_v27 = vpop.f32.mrf.mxu0  ;;  %1731 = vmatpush.msrb.mxu0 %v9573_v29  ;;  %1751 = vmatpush.msrb.mxu1 %v9574_v30  ;;  %9661 = vst [vmem:[#allocation90_spill] sm:$0xff] %v6851_v63 }
 0x109   : > { %9568 = vst [vmem:[#allocation41_spill] sm:$0xff] %v6426_v23  ;;  %v6430_v26 = vpop.f32.mrf.mxu3  ;;  %v6436_v31 = vpop.f32.mrf.mxu1  ;;  %1771 = vmatpush.msrb.mxu2 %v9576_v32  ;;  %1791 = vmatpush.msrb.mxu3 %v9577_v33  ;;  %v9595_v32 = vld [vmem:[#allocation91_spill] sm:$0xff]  ;;  %v9596_v33 = vld [vmem:[#allocation92_spill] sm:$0xff] }
 0x10a   : > { %9571 = vst [vmem:[#allocation42_spill] sm:$0xff] %v6430_v26  ;;  %1732 = vmatpush.msrb.mxu0 %v9578_v35  ;;  %1752 = vmatpush.msrb.mxu1 %v9579_v37  ;;  %v9598_v37 = vld [vmem:[#allocation93_spill] sm:$0xff] }
 0x10b   : > { %9572 = vst [vmem:[#allocation43_spill] sm:$0xff] %v6432_v27  ;;  %1772 = vmatpush.msrb.mxu2 %v9580_v38  ;;  %1792 = vmatpush.msrb.mxu3 %v9581_v47  ;;  %v9599_v38 = vld [vmem:[#allocation94_spill] sm:$0xff]  ;;  %v9600_v47 = vld [vmem:[#allocation95_spill] sm:$0xff] }
 0x10c   : > { %9575 = vst [vmem:[#allocation44_spill] sm:$0xff] %v6436_v31  ;;  %1733 = vmatpush.msrb.mxu0 %v9582_v58  ;;  %1753 = vmatpush.msrb.mxu1 %v9583_v1  ;;  %v6477_v58 = vperm.slane %v838_v34, 2  ;;  %v9601_v1 = vld [vmem:[#allocation96_spill] sm:$0xff] }
 0x10d   : > { %1773 = vmatpush.msrb.mxu2 %v9584_v9  ;;  %1793 = vmatpush.msrb.mxu3 %v9585_v10  ;;  %v9602_v9 = vld [vmem:[#allocation97_spill] sm:$0xff]  ;;  %v6481_v10 = vperm.slane %v838_v34, 3  ;;  %v9609_v34 = vld [vmem:[#allocation103_spill] sm:$0xff]  ;;  %9662 = vst [vmem:[#allocation91_spill] sm:$0xff] %v6854_v61 }
 0x10e   : > { %1734 = vmatpush.msrb.mxu0 %v9586_v12  ;;  %1754 = vmatpush.msrb.mxu1 %v9587_v13  ;;  %v9603_v12 = vld [vmem:[#allocation98_spill] sm:$0xff]  ;;  %v9604_v13 = vld [vmem:[#allocation99_spill] sm:$0xff] }
 0x10f   : > { %1774 = vmatpush.msrb.mxu2 %v9589_v16  ;;  %1794 = vmatpush.msrb.mxu3 %v9590_v17  ;;  %v9605_v16 = vld [vmem:[#allocation100_spill] sm:$0xff]  ;;  %9670 = vst [vmem:[#allocation99_spill] sm:$0xff] %v6879_v59 }
 0x110   : > { %v6457_v14 = vpop.f32.mrf.mxu2  ;;  %v929_v21 = vpop.f32.mrf.mxu0  ;;  %1735 = vmatpush.msrb.mxu0 %v9592_v24  ;;  %1755 = vmatpush.msrb.mxu1 %v9593_v25  ;;  %9671 = vst [vmem:[#allocation100_spill] sm:$0xff] %v6882_v60 }
 0x111   : > { %9588 = vst [vmem:[#allocation45_spill] sm:$0xff] %v6457_v14  ;;  %v6461_v20 = vpop.f32.mrf.mxu3  ;;  %v6466_v29 = vadd.f32 %v929_v21, %v6449_v8  ;;  %v958_v30 = vpop.f32.mrf.mxu1  ;;  %1775 = vmatpush.msrb.mxu2 %v9595_v32  ;;  %1795 = vmatpush.msrb.mxu3 %v9596_v33  ;;  %v9606_v21 = vld [vmem:[#allocation101_spill] sm:$0xff] }
 0x112   : > { %9591 = vst [vmem:[#allocation46_spill] sm:$0xff] %v6461_v20  ;;  %v6471_v35 = vadd.f32 %v958_v30, %v6453_v11  ;;  %1736 = vmatpush.msrb.mxu0 %v9598_v37  ;;  %1756 = vmatpush.msrb.mxu1 %v9599_v38  ;;  %v9612_v37 = vld [vmem:[#allocation104_spill] sm:$0xff]  ;;  %v9613_v38 = vld [vmem:[#allocation105_spill] sm:$0xff] }
 0x113   : > { %9594 = vst [vmem:[#allocation47_spill] sm:$0xff] %v6466_v29  ;;  %1776 = vmatpush.msrb.mxu2 %v9600_v47  ;;  %1796 = vmatpush.msrb.mxu3 %v6186_v42  ;;  %v9607_v42 = vld [vmem:[#allocation102_spill] sm:$0xff] }
 0x114   : > { %9597 = vst [vmem:[#allocation48_spill] sm:$0xff] %v6471_v35  ;;  %1737 = vmatpush.msrb.mxu0 %v9601_v1  ;;  %1757 = vmatpush.msrb.mxu1 %v9602_v9  ;;  %v9616_v1 = vld [vmem:[#allocation107_spill] sm:$0xff] }
 0x115   : > { %1777 = vmatpush.msrb.mxu2 %v9603_v12  ;;  %1797 = vmatpush.msrb.mxu3 %v6198_v44  ;;  %9672 = vst [vmem:[#allocation101_spill] sm:$0xff] %v6885_v57 }
 0x116   : > { %1738 = vmatpush.msrb.mxu0 %v9604_v13  ;;  %1758 = vmatpush.msrb.mxu1 %v9605_v16 }
 0x117   : > { %1778 = vmatpush.msrb.mxu2 %v9606_v21  ;;  %1798 = vmatpush.msrb.mxu3 %v9607_v42 }
 0x118   : > { %v987_v17 = vpop.f32.mrf.mxu2  ;;  %v931_v30 = vpop.f32.mrf.mxu0  ;;  %1739 = vmatpush.msrb.mxu0 %v6221_v2  ;;  %1759 = vmatpush.msrb.mxu1 %v9609_v34  ;;  %v9615_v2 = vld [vmem:[#allocation106_spill] sm:$0xff] }
 0x119   : > { %v6490_v24 = vadd.f32 %v987_v17, %v6477_v58  ;;  %v1016_v25 = vpop.f32.mrf.mxu3  ;;  %v6498_v32 = vadd.f32 %v931_v30, %v6449_v8  ;;  %v960_v33 = vpop.f32.mrf.mxu1  ;;  %1779 = vmatpush.msrb.mxu2 %v9612_v37  ;;  %1799 = vmatpush.msrb.mxu3 %v9613_v38 }
 0x11a   : > { %v6495_v44 = vadd.f32 %v1016_v25, %v6481_v10  ;;  %v6503_v47 = vadd.f32 %v960_v33, %v6453_v11  ;;  %1740 = vmatpush.msrb.mxu0 %v6232_v41  ;;  %1760 = vmatpush.msrb.mxu1 %v6236_v45 }
 0x11b   : > { %9608 = vst [vmem:[#allocation49_spill] sm:$0xff] %v6490_v24  ;;  %1780 = vmatpush.msrb.mxu2 %v9615_v2  ;;  %1800 = vmatpush.msrb.mxu3 %v9616_v1 }
 0x11c   : > { %9610 = vst [vmem:[#allocation50_spill] sm:$0xff] %v6495_v44  ;;  %1882 = vperm.xlu2 %4575, %v4363_v62  }
 0x11d   : > { %9611 = vst [vmem:[#allocation51_spill] sm:$0xff] %v6498_v32 }
 0x11e   : > { %9614 = vst [vmem:[#allocation52_spill] sm:$0xff] %v6503_v47 }
 0x120   : > { %v989_v9 = vpop.f32.mrf.mxu2  ;;  %v934_v16 = vpop.f32.mrf.mxu0 }
 0x121   : > { %v6510_v12 = vadd.f32 %v989_v9, %v6477_v58  ;;  %v1018_v13 = vpop.f32.mrf.mxu3  ;;  %v6516_v21 = vadd.f32 %v934_v16, %v6449_v8  ;;  %v963_v42 = vpop.f32.mrf.mxu1 }
 0x122   : > { %v6513_v17 = vadd.f32 %v1018_v13, %v6481_v10  ;;  %v6519_v41 = vadd.f32 %v963_v42, %v6453_v11 }
 0x123   : > { %9617 = vst [vmem:[#allocation53_spill] sm:$0xff] %v6510_v12  ;;  %v6570_v12 = vld [vmem:[%s5690_s25 + $0x8] sm:$0xff]  ;;  %s4462_s25 = sshll.u32 %s5584_s15, 6 }
 0x124   : > { %9618 = vst [vmem:[#allocation54_spill] sm:$0xff] %v6513_v17  ;;  %vm1700_vm10 = vcmp.gt.f32.partialorder %v6570_v12, 0.5  ;;  %s3963_s11 = scalar_lea.hbm %s8993_s10, %s4462_s25 }
 0x125   : > { %9619 = vst [vmem:[#allocation55_spill] sm:$0xff] %v6516_v21  ;;  %s3966_s13 = sshll.u32 %s3963_s11, 4  ;;  %s8861_s13 = int_to_ptr.hbm [resolvable:$true] %s3966_s13 }
 0x126   : > { %9620 = vst [vmem:[#allocation56_spill] sm:$0xff] %v6519_v41  ;;  %s5290_s5 = sshra.s32 %s8861_s13, 4  ;;  %s5291_s5 = int_to_ptr.hbm [resolvable:$true] %s5290_s5 }
 0x127   : > { %s5292_s30 = scalar_lea.hbm %s5291_s5, 64  ;;  %p5297_p1 = scmp.lt.s32.totalorder %s5291_s5, %s8993_s10 }
 0x128   : > { %v992_v45 = vpop.f32.mrf.mxu2  ;;  %v936_v34 = vpop.f32.mrf.mxu0  ;;  %p5293_p10 = scmp.ne.s32.totalorder %s5291_s5, %s5292_s30  ;;  %p5298_p3 = scmp.lt.s32.totalorder %s5296_s28, %s5292_s30 }
 0x129   : > { %v6522_v25 = vadd.f32 %v992_v45, %v6477_v58  ;;  %v1021_v30 = vpop.f32.mrf.mxu3  ;;  %v6528_v37 = vadd.f32 %v936_v34, %v6449_v8  ;;  %v965_v38 = vpop.f32.mrf.mxu1 }
 0x12a   : > { %v6525_v33 = vadd.f32 %v1021_v30, %v6481_v10  ;;  %v6531_v2 = vadd.f32 %v965_v38, %v6453_v11  ;;  %p5294_p13 = pnand %p5293_p10, %p5609_p5  ;;  %p5299_p7 = por %p5298_p3, %p5297_p1 }
 0x12b   : > { %9621 = vst [vmem:[#allocation57_spill] sm:$0xff] %v6522_v25 }
 0x12c   : > { %9622 = vst [vmem:[#allocation58_spill] sm:$0xff] %v6525_v33  ;;  %v9638_v33 = vld [vmem:[#allocation109_spill] sm:$0xff]  ;;  %p5295_p0 = pneg %p5294_p13 }
 0x12d   : > { %9623 = vst [vmem:[#allocation59_spill] sm:$0xff] %v6528_v37 }
 0x12e   : > { %9624 = vst [vmem:[#allocation60_spill] sm:$0xff] %v6531_v2  ;;  %p5300_p4 = pnand %p5299_p7, %p5295_p0 }
 0x130   : > { %v994_v1 = vpop.f32.mrf.mxu2  ;;  %v939_v16 = vpop.f32.mrf.mxu0 }
 0x131   : > { %v6534_v9 = vadd.f32 %v994_v1, %v6477_v58  ;;  %v1023_v13 = vpop.f32.mrf.mxu3  ;;  %v6540_v45 = vadd.f32 %v939_v16, %v6449_v8  ;;  %v968_v30 = vpop.f32.mrf.mxu1 }
 0x132   : > { %v6537_v42 = vadd.f32 %v1023_v13, %v6481_v10  ;;  %v6543_v34 = vadd.f32 %v968_v30, %v6453_v11 }
 0x133   : > { %9625 = vst [vmem:[#allocation62_spill] sm:$0xff] %v6534_v9 }
 0x134   : > { %9626 = vst [vmem:[#allocation63_spill] sm:$0xff] %v6537_v42 }
 0x135   : > { %9627 = vst [vmem:[#allocation64_spill] sm:$0xff] %v6540_v45 }
 0x136   : > { %9628 = vst [vmem:[#allocation36_spill] sm:$0xff] %v6543_v34 }
 0x138   : > { %v997_v24 = vpop.f32.mrf.mxu2  ;;  %v941_v1 = vpop.f32.mrf.mxu0 }
 0x139   : > { %v6546_v38 = vadd.f32 %v997_v24, %v6477_v58  ;;  %v1026_v44 = vpop.f32.mrf.mxu3  ;;  %v6552_v13 = vadd.f32 %v941_v1, %v6449_v8  ;;  %v970_v29 = vpop.f32.mrf.mxu1 }
 0x13a   : > { %v6549_v35 = vadd.f32 %v1026_v44, %v6481_v10  ;;  %v6555_v16 = vadd.f32 %v970_v29, %v6453_v11 }
 0x13b   : > { %9629 = vst [vmem:[#allocation65_spill] sm:$0xff] %v6546_v38 }
 0x13c   : > { %9630 = vst [vmem:[#allocation66_spill] sm:$0xff] %v6549_v35 }
 0x13d   : > { %9631 = vst [vmem:[#allocation67_spill] sm:$0xff] %v6552_v13  ;;  %v6873_v13 = vld [vmem:[#allocation4 + $0xa0] sm:$0xff] }
 0x13e   : > { %9632 = vst [vmem:[#allocation68_spill] sm:$0xff] %v6555_v16  ;;  %v6595_v42 = vpop.permute.xlu2 %2047  ;;  %v6870_v16 = vld [vmem:[#allocation4 + $0xd8] sm:$0xff] }
 0x13f   : > { %9640 = vst [vmem:[#allocation74_spill] sm:$0xff] %v6595_v42  ;;  %v6864_v42 = vld [vmem:[#allocation4 + $0xc8] sm:$0xff] }
 0x140   : > { %v999_v14 = vpop.f32.mrf.mxu2  ;;  %v944_v31 = vpop.f32.mrf.mxu0  ;;  %9665 = vst [vmem:[#allocation94_spill] sm:$0xff] %v6864_v42 }
 0x141   : > { %v6558_v30 = vadd.f32 %v999_v14, %v6477_v58  ;;  %v1028_v20 = vpop.f32.mrf.mxu3  ;;  %v6564_v27 = vadd.f32 %v944_v31, %v6449_v8  ;;  %v973_v44 = vpop.f32.mrf.mxu1  ;;  %v1701_v14 = vsel %vm1700_vm10, 1, %v9457_v48  ;;  %9667 = vst [vmem:[#allocation96_spill] sm:$0xff] %v6870_v16 }
 0x142   : > { %v6561_v24 = vadd.f32 %v1028_v20, %v6481_v10  ;;  %v6567_v1 = vadd.f32 %v973_v44, %v6453_v11  ;;  %v599_v20 = vld [vmem:[%s8989_s6] sm:$0xf]  ;;  %1703 = vperm.xlu1 %4574, %v1701_v14   ;;  %9668 = vst [vmem:[#allocation97_spill] sm:$0xff] %v6873_v13 }
 0x143   : > { %9633 = vst [vmem:[#allocation69_spill] sm:$0xff] %v6558_v30  ;;  %v6583_v23 = vperm.slane %v599_v20, 0  ;;  %v6585_v26 = vperm.slane %v599_v20, 1  ;;  %v6593_v22 = vperm.slane %v599_v20, 3  ;;  %v6861_v30 = vld [vmem:[#allocation4 + $0xc0] sm:$0xff] }
 0x144   : > { %9634 = vst [vmem:[#allocation70_spill] sm:$0xff] %v6561_v24  ;;  %v6867_v24 = vld [vmem:[#allocation4 + $0xd0] sm:$0xff] }
 0x145   : > { %9635 = vst [vmem:[#allocation71_spill] sm:$0xff] %v6583_v23  ;;  %v692_v25 = vadd.f32 %v9637_v51, %v6583_v23  ;;  %v721_v41 = vadd.f32 %v9638_v33, %v6585_v26  ;;  %v6597_v51 = vpop.permute.xlu0 %1360  ;;  %v9641_v33 = vld [vmem:[#allocation61_spill] sm:$0xff] }
 0x146   : > { %9636 = vst [vmem:[#allocation72_spill] sm:$0xff] %v6585_v26  ;;  %2398 = vperm.xlu2 %4575, %v9641_v33   ;;  %vm1362_vm7 = vcmp.eq.s32.totalorder %v6597_v51, 1 }
 0x147   : > { %9639 = vst [vmem:[#allocation73_spill] sm:$0xff] %v6593_v22 }
 0x148   : > { %v1002_v29 = vpop.f32.mrf.mxu2  ;;  %v946_v47 = vpop.f32.mrf.mxu0  ;;  %9664 = vst [vmem:[#allocation93_spill] sm:$0xff] %v6861_v30 }
 0x149   : > { %v6578_v17 = vadd.f32 %v1002_v29, %v6477_v58  ;;  %v1031_v31 = vpop.f32.mrf.mxu3  ;;  %v975_v32 = vpop.f32.mrf.mxu1  ;;  %v1873_v29 = vsel %vm1872_vm11, 1, %v9457_v48  ;;  %9666 = vst [vmem:[#allocation95_spill] sm:$0xff] %v6867_v24 }
 0x14a   : > { %v6581_v44 = vadd.f32 %v1031_v31, %v6481_v10  ;;  %1875 = vperm.xlu1 %4574, %v1873_v29  }
 0x150   : > { %v1227_v21 = vpop.f32.mrf.mxu0  ;;  %v1004_v19 = vpop.f32.mrf.mxu2 }
 0x151   : > { %v1033_v14 = vpop.f32.mrf.mxu3  ;;  %v1290_v31 = vadd.f32 %v1227_v21, %v692_v25  ;;  %v1247_v36 = vpop.f32.mrf.mxu1  ;;  %v779_v21 = vadd.f32 %v6270_v43, %v6593_v22  ;;  %v976_v25 = vadd.f32 %v975_v32, %v6453_v11 }
 0x152   : > { %v1291_v39 = vadd.f32 %v1247_v36, %v721_v41  ;;  %v947_v36 = vadd.f32 %v946_v47, %v6449_v8  ;;  %v2561_v41 = vsel %vm2560_vm12, 1, %v9457_v48  ;;  %v6612_v32 = vpop.permute.xlu2 %2219 }
 0x153   : > { %v4350_v9 = vmul.f32 -1.442695, %v1290_v31  ;;  %2563 = vperm.xlu1 %4574, %v2561_v41   ;;  %9643 = vst [vmem:[#allocation76_spill] sm:$0xff] %v6612_v32  ;;  %v6857_v32 = vld [vmem:[#allocation4 + $0xf8] sm:$0xff] }
 0x154   : > { %v4351_v62 = vmul.f32 -1.442695, %v1291_v39  ;;  %9663 = vst [vmem:[#allocation92_spill] sm:$0xff] %v6857_v32 }
 0x155   : > { %4576 = vpow2.f32 %v4350_v9 }
 0x156   : > { %4578 = vpow2.f32 %v4351_v62  ;;  %v6606_v62 = vperm.slane %v599_v20, 2  ;;  %v9644_v20 = vld [vmem:[#allocation78_spill] sm:$0xff] }
 0x157   : > { %2912 = vperm.xlu2 %4575, %v9644_v20  }
 0x158   : > { %v1398_v31 = vpop.f32.mrf.mxu0  ;;  %9642 = vst [vmem:[#allocation75_spill] sm:$0xff] %v6606_v62  ;;  %v1267_v47 = vpop.f32.mrf.mxu2 }
 0x159   : > { %v1287_v29 = vpop.f32.mrf.mxu3  ;;  %v1461_v9 = vadd.f32 %v1398_v31, %v947_v36  ;;  %v1418_v2 = vpop.f32.mrf.mxu1 }
 0x15a   : > { %v1293_v39 = vadd.f32 %v1287_v29, %v779_v21  ;;  %v1462_v40 = vadd.f32 %v1418_v2, %v976_v25  ;;  %v750_v21 = vadd.f32 %v6266_v46, %v6606_v62  ;;  %v1034_v2 = vadd.f32 %v1033_v14, %v6481_v10  ;;  %v6627_v10 = vld [vmem:[%s5695_s18 + $0x8] sm:$0xff]  ;;  %v6636_v20 = vpop.permute.xlu2 %2734 }
 0x15b   : > { %v4577_v37 = vpop.eup %4576  ;;  %v4354_v43 = vmul.f32 -1.442695, %v1461_v9  ;;  %9645 = vst [vmem:[#allocation77_spill] sm:$0xff] %v6636_v20  ;;  %vm3586_vm14 = vcmp.gt.f32.partialorder %v6627_v10, 0.5 }
 0x15c   : > { %v4352_v33 = vmul.f32 -1.442695, %v1293_v39  ;;  %v4579_v15 = vpop.eup %4578  ;;  %v6608_v18 = vadd.f32 1.0, %v4577_v37  ;;  %v4355_v11 = vmul.f32 -1.442695, %v1462_v40  ;;  %v6620_v37 = vpop.permute.xlu0 %1531  ;;  %v3074_v39 = vsel %vm3073_vm13, 1, %v9457_v48 }
 0x15d   : > { %v6610_v8 = vadd.f32 1.0, %v4579_v15  ;;  %v1292_v15 = vadd.f32 %v1267_v47, %v750_v21  ;;  %3076 = vperm.xlu1 %4574, %v3074_v39  }
 0x15e   : > { %4580 = vpow2.f32 %v4352_v33  ;;  %v1005_v33 = vadd.f32 %v1004_v19, %v6477_v58  ;;  %vm1303_vm2 = vweird.f32 %v6608_v18 }
 0x15f   : > { %4582 = vrcp.f32 %v6608_v18  ;;  %vm1322_vm1 = vweird.f32 %v6610_v8 }
 0x160   : > { %4584 = vrcp.f32 %v6610_v8 }
 0x161   : > { %4586 = vpow2.f32 %v4354_v43  ;;  %v1458_v36 = vpop.f32.mrf.mxu3 }
 0x162   : > { %4588 = vpow2.f32 %v4355_v11  ;;  %v1464_v41 = vadd.f32 %v1458_v36, %v1034_v2  ;;  %v1307_v11 = vand.u32 2147483647, %v6608_v18  ;;  %v1309_v36 = vand.u32 2147483648, %v6608_v18 }
 0x163   : > { %4590 = vtanh.f32 %v1292_v15  ;;  %v1328_v15 = vand.u32 2147483648, %v6610_v8 }
 0x164   : > { %v4581_v25 = vpop.eup %4580  ;;  %v4356_v29 = vmul.f32 -1.442695, %v1464_v41  ;;  %v1326_v41 = vand.u32 2147483647, %v6610_v8  ;;  %v6645_v39 = vpop.permute.xlu0 %2391  ;;  %v1310_v20 = vor.u32 1.1754944e-38, %v1309_v36  ;;  %vm1308_vm5 = vcmp.eq.f32.partialorder %v1307_v11, 8.507059e+37 }
 0x165   : > { %v4583_v46 = vpop.eup %4582  ;;  %v6623_v31 = vadd.f32 1.0, %v4581_v25  ;;  %v1438_v25 = vpop.f32.mrf.mxu2  ;;  %9646 = vst [vmem:[#allocation79_spill] sm:$0xff] %v6645_v39  ;;  %v1197_v39 = vld [vmem:[#allocation13] sm:$0xff] }
 0x166   : > { %v4585_v14 = vpop.eup %4584  ;;  %v1299_v9 = vmul.f32 %v4583_v46, %v6608_v18  ;;  %4592 = vpow2.f32 %v4356_v29  ;;  %vm1304_vm15 = vweird.f32 %v4583_v46  ;;  %v1463_v5 = vadd.f32 %v1438_v25, %v1005_v33 }
 0x167   : > { %v4587_v40 = vpop.eup %4586  ;;  %v1318_v43 = vmul.f32 %v4585_v14, %v6610_v8  ;;  %4594 = vrcp.f32 %v6623_v31  ;;  %vm1323_vm0 = vweird.f32 %v4585_v14  ;;  %vm1305_vm3 = vmor %vm1303_vm2, %vm1304_vm15  ;;  %vm1327_vm6 = vcmp.eq.f32.partialorder %v1326_v41, 8.507059e+37 }
 0x168   : > { %v4589_v56 = vpop.eup %4588  ;;  %v1300_v47 = vsub.f32 1.0, %v1299_v9  ;;  %v6634_v21 = vadd.f32 1.0, %v4587_v40  ;;  %v3587_v40 = vsel %vm3586_vm14, 1, %v9457_v48  ;;  %vm1324_vm4 = vmor %vm1322_vm1, %vm1323_vm0  ;;  %vm1342_vm8 = vweird.f32 %v6623_v31 }
 0x169   : > { %v1319_v2 = vsub.f32 1.0, %v1318_v43  ;;  %v6641_v19 = vadd.f32 1.0, %v4589_v56  ;;  %v4591_v29 = vpop.eup %4590  ;;  %3589 = vperm.xlu1 %4574, %v3587_v40  }
 0x16a   : > { %v1301_v58 = vmul.f32 %v4583_v46, %v1300_v47  ;;  %4596 = vrcp.f32 %v6634_v21  ;;  %vm1474_vm13 = vweird.f32 %v6634_v21 }
 0x16b   : > { %v1320_v9 = vmul.f32 %v4585_v14, %v1319_v2  ;;  %4598 = vrcp.f32 %v6641_v19  ;;  %v1329_v2 = vor.u32 1.1754944e-38, %v1328_v15  ;;  %v1499_v25 = vand.u32 2147483648, %v6641_v19 }
 0x16c   : > { %v4593_v43 = vpop.eup %4592  ;;  %v1302_v56 = vadd.f32 %v4583_v46, %v1301_v58  ;;  %v6672_v40 = vpop.permute.xlu0 %2905  ;;  %vm1493_vm14 = vweird.f32 %v6641_v19 }
 0x16d   : > { %v6651_v47 = vpop.eup %4594  ;;  %v1321_v6 = vadd.f32 %v4585_v14, %v1320_v9  ;;  %v6654_v38 = vadd.f32 1.0, %v4593_v43  ;;  %v1480_v9 = vand.u32 2147483648, %v6634_v21  ;;  %9648 = vst [vmem:[#allocation81_spill] sm:$0xff] %v6672_v40 }
 0x16e   : > { %v1306_v35 = vsel %vm1305_vm3, %v4583_v46, %v1302_v56  ;;  %v1338_v8 = vmul.f32 %v6651_v47, %v6623_v31  ;;  %vm1343_vm9 = vweird.f32 %v6651_v47 }
 0x16f   : > { %v1311_v58 = vsel %vm1308_vm5, %v1310_v20, %v1306_v35  ;;  %v1325_v18 = vsel %vm1324_vm4, %v4585_v14, %v1321_v6  ;;  %4600 = vrcp.f32 %v6654_v38  ;;  %v1348_v6 = vand.u32 2147483648, %v6623_v31  ;;  %v6665_v14 = vpop.permute.xlu2 %3247  ;;  %vm6687_vm12 = vmor %vm1342_vm8, %vm1343_vm9 }
 0x170   : > { %v4597_v34 = vpop.eup %4596  ;;  %v1330_v45 = vsel %vm1327_vm6, %v1329_v2, %v1325_v18  ;;  %v1353_v3 = vmul.f32 %v4591_v29, %v1311_v58  ;;  %v1339_v36 = vsub.f32 1.0, %v1338_v8  ;;  %4602 = vtanh.f32 %v1463_v5  ;;  %9647 = vst [vmem:[#allocation80_spill] sm:$0xff] %v6665_v14 }
 0x171   : > { %v4599_v33 = vpop.eup %4598  ;;  %v1352_v15 = vmul.f32 %v1330_v45, %v1197_v39  ;;  %v1470_v46 = vmul.f32 %v4597_v34, %v6634_v21  ;;  %v1478_v29 = vand.u32 2147483647, %v6634_v21  ;;  %vm1475_vm10 = vweird.f32 %v4597_v34  ;;  %1710 = vperm.xlu1 %4574, %v6570_v12  }
 0x172   : > { %v1340_v11 = vmul.f32 %v6651_v47, %v1339_v36  ;;  %v1489_v35 = vmul.f32 %v4599_v33, %v6641_v19  ;;  %v1346_v2 = vand.u32 2147483647, %v6623_v31  ;;  %vm1494_vm11 = vweird.f32 %v4599_v33  ;;  %vm1476_vm15 = vmor %vm1474_vm13, %vm1475_vm10 }
 0x173   : > { %v1354_v20 = vadd.f32 %v1353_v3, %v1352_v15  ;;  %v1471_v41 = vsub.f32 1.0, %v1470_v46  ;;  %v1497_v58 = vand.u32 2147483647, %v6641_v19  ;;  %v1481_v12 = vor.u32 1.1754944e-38, %v1480_v9  ;;  %vm1495_vm0 = vmor %vm1493_vm14, %vm1494_vm11 }
 0x174   : > { %v1341_v45 = vadd.f32 %v6651_v47, %v1340_v11  ;;  %v1490_v5 = vsub.f32 1.0, %v1489_v35  ;;  %v1500_v35 = vor.u32 1.1754944e-38, %v1499_v25  ;;  %vm1479_vm1 = vcmp.eq.f32.partialorder %v1478_v29, 8.507059e+37 }
 0x175   : > { %4604 = vtanh.f32 %v1354_v20  ;;  %v1472_v43 = vmul.f32 %v4597_v34, %v1471_v41  ;;  %v6676_v3 = vsel %vm1362_vm7, %v1354_v20, %v1197_v39  ;;  %v6678_v56 = vpop.eup %4600  ;;  %v1349_v39 = vor.u32 1.1754944e-38, %v1348_v6  ;;  %v1201_v20 = vld [vmem:[#allocation13 + $0x8] sm:$0xff] }
 0x176   : > { %v1491_v8 = vmul.f32 %v4599_v33, %v1490_v5  ;;  %v4603_v18 = vpop.eup %4602  ;;  %v1509_v46 = vmul.f32 %v6678_v56, %v6654_v38  ;;  %v1345_v31 = vsel %vm6687_vm12, %v6651_v47, %v1341_v45  ;;  %vm1347_vm2 = vcmp.eq.f32.partialorder %v1346_v2, 8.507059e+37  ;;  %v6821_v45 = vld [vmem:[#allocation4 + $0x158] sm:$0xff] }
 0x177   : > { %v1473_v15 = vadd.f32 %v4597_v34, %v1472_v43  ;;  %vm1498_vm3 = vcmp.eq.f32.partialorder %v1497_v58, 8.507059e+37  ;;  %v1368_v4 = vpop.permute.xlu2 %1367  ;;  %vm1533_vm4 = vcmp.eq.s32.totalorder %v6620_v37, 1  ;;  %vm1514_vm5 = vweird.f32 %v6678_v56  ;;  %v6745_v58 = vld [vmem:[#allocation4 + $0x1c0] sm:$0xff]  ;;  %v6803_v37 = vld [vmem:[#allocation4 + $0x168] sm:$0xff] }
 0x178   : > { %v1492_v11 = vadd.f32 %v4599_v33, %v1491_v8  ;;  %v1510_v41 = vsub.f32 1.0, %v1509_v46  ;;  %v1350_v8 = vsel %vm1347_vm2, %v1349_v39, %v1345_v31  ;;  %v1519_v51 = vand.u32 2147483648, %v6654_v38  ;;  %v6754_v46 = vld [vmem:[#allocation4 + $0x1d8] sm:$0xff] }
 0x179   : > { %v1477_v6 = vsel %vm1476_vm15, %v4597_v34, %v1473_v15  ;;  %2226 = vperm.xlu1 %4574, %v6336_v0   ;;  %vm1513_vm6 = vweird.f32 %v6654_v38  ;;  %v1517_v0 = vand.u32 2147483647, %v6654_v38  ;;  %v6739_v38 = vld [vmem:[#allocation4 + $0x1f8] sm:$0xff]  ;;  %v6751_v15 = vld [vmem:[#allocation4 + $0x1d0] sm:$0xff] }
 0x17a   : > { %v1482_v21 = vsel %vm1479_vm1, %v1481_v12, %v1477_v6  ;;  %v1496_v5 = vsel %vm1495_vm0, %v4599_v33, %v1492_v11  ;;  %v1511_v9 = vmul.f32 %v6678_v56, %v1510_v41  ;;  %v6707_v33 = vpop.permute.xlu0 %3418  ;;  %v1520_v39 = vor.u32 1.1754944e-38, %v1519_v51  ;;  %v6758_v12 = vld [vmem:[%s5695_s18] sm:$0xff]  ;;  %v6763_v11 = vld [vmem:[#allocation4 + $0x1a8] sm:$0xff]  ;;  %v6770_v41 = vld [vmem:[#allocation4 + $0x1b8] sm:$0xff] }
 0x17b   : > { %v4605_v43 = vpop.eup %4604  ;;  %v1501_v19 = vsel %vm1498_vm3, %v1500_v35, %v1496_v5  ;;  %v1524_v14 = vmul.f32 %v4603_v18, %v1482_v21  ;;  %9651 = vst [vmem:[#allocation82_spill] sm:$0xff] %v6707_v33  ;;  %v6748_v18 = vld [vmem:[#allocation4 + $0x1c8] sm:$0xff]  ;;  %vm1518_vm8 = vcmp.eq.f32.partialorder %v1517_v0, 8.507059e+37  ;;  %v6773_v21 = vld [vmem:[#allocation4 + $0x180] sm:$0xff]  ;;  %vm3927_vm9 = vcmp.gt.f32.partialorder %v6758_v12, 0.5  ;;  %v6818_v0 = vld [vmem:[#allocation4 + $0x150] sm:$0xff] }
 0x17c   : > { %v1523_v40 = vmul.f32 %v1501_v19, %v1201_v20  ;;  %v1356_v36 = vmul.f32 %v4605_v43, %v1350_v8  ;;  %v1512_v25 = vadd.f32 %v6678_v56, %v1511_v9  ;;  %v6777_v5 = vld [vmem:[#allocation4 + $0x188] sm:$0xff]  ;;  %v6788_v9 = vld [vmem:[#allocation4 + $0x198] sm:$0xff]  ;;  %v6791_v8 = vld [vmem:[#allocation4 + $0x160] sm:$0xff] }
 0x17d   : > { %v6815_v51 = vld [vmem:[#allocation4 + $0x148] sm:$0xff]  ;;  %v6848_v33 = vld [vmem:[#allocation4 + $0xe0] sm:$0xff] }
 0x17e   : > { %v1525_v47 = vadd.f32 %v1524_v14, %v1523_v40  ;;  %v6704_v34 = vsel %vm1362_vm7, %v1356_v36, %v6254_v28  ;;  %v6727_v14 = vld [vmem:[#allocation4 + $0x1e8] sm:$0xff]  ;;  %vm6732_vm7 = vmor %vm1513_vm6, %vm1514_vm5  ;;  %v6736_v40 = vld [vmem:[#allocation4 + $0x1f0] sm:$0xff]  ;;  %9660 = vst [vmem:[#allocation89_spill] sm:$0xff] %v6848_v33 }
 0x17f   : > { %v1370_v29 = vmul.f32 %v1368_v4, %v6704_v34  ;;  %1569 = vmatmul.f32.vlgmr.msra.gmra.mxu0 %v6704_v34  ;;  %1589 = vmatmul.f32.vlgmr.msra.gmra.mxu1 %v6704_v34  ;;  %v6724_v4 = vld [vmem:[#allocation4 + $0x1e0] sm:$0xff]  ;;  %v1516_v2 = vsel %vm6732_vm7, %v6678_v56, %v1512_v25  ;;  %v6809_v25 = vld [vmem:[#allocation4 + $0x178] sm:$0xff] }
 0x180   : > { %4606 = vtanh.f32 %v1525_v47  ;;  %1609 = vmatmul.f32.vlgmr.msra.gmra.mxu2 %v6704_v34  ;;  %1629 = vmatmul.f32.vlgmr.msra.gmra.mxu3 %v6704_v34  ;;  %v6719_v28 = vsel %vm1533_vm4, %v1525_v47, %v1201_v20  ;;  %v6760_v56 = vld [vmem:[#allocation4 + $0x1a0] sm:$0xff]  ;;  %v1521_v35 = vsel %vm1518_vm8, %v1520_v39, %v1516_v2  ;;  %v6767_v20 = vld [vmem:[#allocation4 + $0x1b0] sm:$0xff]  ;;  %v6827_v39 = vld [vmem:[#allocation4 + $0x128] sm:$0xff] }
 0x181   : > { %1371 = vst [vmem:[%s5697_s16] sm:$0xff] %v1370_v29  ;;  %1897 = vmatpush.msra.mxu0 %v6724_v4  ;;  %1917 = vmatpush.msra.mxu1 %v6727_v14  ;;  %v6806_v47 = vld [vmem:[#allocation4 + $0x170] sm:$0xff]  ;;  %v6812_v29 = vld [vmem:[#allocation4 + $0x140] sm:$0xff] }
 0x182   : > { %1937 = vmatpush.msra.mxu2 %v6736_v40  ;;  %1957 = vmatpush.msra.mxu3 %v6739_v38  ;;  %v1539_v43 = vpop.permute.xlu0 %1538  ;;  %v6824_v2 = vld [vmem:[#allocation4 + $0x120] sm:$0xff] }
 0x183   : > { %1898 = vmatpush.msra.mxu0 %v6745_v58  ;;  %1918 = vmatpush.msra.mxu1 %v6748_v18 }
 0x184   : > { %1938 = vmatpush.msra.mxu2 %v6751_v15  ;;  %1958 = vmatpush.msra.mxu3 %v6754_v46 }
 0x185   : > { %1899 = vmatpush.msra.mxu0 %v6760_v56  ;;  %1919 = vmatpush.msra.mxu1 %v6763_v11 }
 0x186   : > { %v4607_v31 = vpop.eup %4606  ;;  %2741 = vperm.xlu1 %4574, %v6363_v7   ;;  %1939 = vmatpush.msra.mxu2 %v6767_v20  ;;  %v6780_v7 = vld [vmem:[#allocation4 + $0x190] sm:$0xff] }
 0x187   : > { %v1527_v6 = vmul.f32 %v4607_v31, %v1521_v35  ;;  %1959 = vmatpush.msra.mxu3 %v6770_v41  ;;  %1900 = vmatpush.msra.mxu0 %v6773_v21  ;;  %v6830_v31 = vld [vmem:[#allocation4 + $0x130] sm:$0xff]  ;;  %v6833_v35 = vld [vmem:[#allocation4 + $0x138] sm:$0xff] }
 0x188   : > { %1920 = vmatpush.msra.mxu1 %v6777_v5  ;;  %1940 = vmatpush.msra.mxu2 %v6780_v7  ;;  %9654 = vst [vmem:[#allocation83_spill] sm:$0xff] %v6830_v31 }
 0x189   : > { %v6786_v19 = vsel %vm1533_vm4, %v1527_v6, %v6274_v49  ;;  %1960 = vmatpush.msra.mxu3 %v6788_v9  ;;  %1901 = vmatpush.msra.mxu0 %v6791_v8  ;;  %v3928_v49 = vsel %vm3927_vm9, 1, %v9457_v48  ;;  %9655 = vst [vmem:[#allocation84_spill] sm:$0xff] %v6833_v35  ;;  %v6836_v6 = vld [vmem:[#allocation4 + $0x100] sm:$0xff]  ;;  %vm3757_vm4 = vcmp.gt.f32.partialorder %v6889_v55, 0.5 }
 0x18a   : > { %v1541_v36 = vmul.f32 %v1539_v43, %v6786_v19  ;;  %1741 = vmatmul.f32.vlgmr.msrb.gmra.mxu0 %v6786_v19  ;;  %1761 = vmatmul.f32.vlgmr.msrb.gmra.mxu1 %v6786_v19  ;;  %9656 = vst [vmem:[#allocation85_spill] sm:$0xff] %v6836_v6  ;;  %v6839_v43 = vld [vmem:[#allocation4 + $0x108] sm:$0xff] }
 0x18b   : > { %1781 = vmatmul.f32.vlgmr.msrb.gmra.mxu2 %v6786_v19  ;;  %1801 = vmatmul.f32.vlgmr.msrb.gmra.mxu3 %v6786_v19  ;;  %9657 = vst [vmem:[#allocation86_spill] sm:$0xff] %v6839_v43 }
 0x18c   : > { %4357 = vst [vmem:[%s5699_s20 + $0x38] sm:$0xff] %v1541_v36  ;;  %1921 = vmatpush.msra.mxu1 %v6803_v37  ;;  %1941 = vmatpush.msra.mxu2 %v6806_v47  ;;  %v6842_v36 = vld [vmem:[#allocation4 + $0x110] sm:$0xff] }
 0x18d   : > { %1961 = vmatpush.msra.mxu3 %v6809_v25  ;;  %1902 = vmatpush.msra.mxu0 %v6812_v29  ;;  %9658 = vst [vmem:[#allocation87_spill] sm:$0xff] %v6842_v36 }
 0x18e   : > { %3930 = vperm.xlu1 %4574, %v3928_v49   ;;  %1922 = vmatpush.msra.mxu1 %v6815_v51  ;;  %v6845_v49 = vld [vmem:[#allocation4 + $0x118] sm:$0xff] }
 0x18f   : > { %1942 = vmatpush.msra.mxu2 %v6818_v0  ;;  %1962 = vmatpush.msra.mxu3 %v6821_v45  ;;  %9659 = vst [vmem:[#allocation88_spill] sm:$0xff] %v6845_v49 }
 0x190   : > { %1903 = vmatpush.msra.mxu0 %v6824_v2  ;;  %1923 = vmatpush.msra.mxu1 %v6827_v39 }
 0x191   : > { %1943 = vmatpush.msra.mxu2 %v6830_v31  ;;  %1963 = vmatpush.msra.mxu3 %v6833_v35 }
 0x192   : > { %1904 = vmatpush.msra.mxu0 %v6836_v6  ;;  %1924 = vmatpush.msra.mxu1 %v6839_v43 }
 0x193   : > { %1944 = vmatpush.msra.mxu2 %v6842_v36  ;;  %1964 = vmatpush.msra.mxu3 %v6845_v49 }
 0x194   : > { %1905 = vmatpush.msra.mxu0 %v6848_v33  ;;  %1925 = vmatpush.msra.mxu1 %v6851_v63 }
 0x195   : > { %1945 = vmatpush.msra.mxu2 %v6854_v61  ;;  %1965 = vmatpush.msra.mxu3 %v6857_v32 }
 0x196   : > { %3596 = vperm.xlu1 %4574, %v6627_v10   ;;  %1906 = vmatpush.msra.mxu0 %v6861_v30  ;;  %v6876_v10 = vld [vmem:[#allocation4 + $0xa8] sm:$0xff] }
 0x197   : > { %1926 = vmatpush.msra.mxu1 %v6864_v42  ;;  %1946 = vmatpush.msra.mxu2 %v6867_v24  ;;  %9669 = vst [vmem:[#allocation98_spill] sm:$0xff] %v6876_v10 }
 0x198   : > { %1966 = vmatpush.msra.mxu3 %v6870_v16  ;;  %1907 = vmatpush.msra.mxu0 %v6873_v13  ;;  %v6891_v16 = vld [vmem:[#allocation4 + $0x88] sm:$0xff]  ;;  %v6894_v13 = vld [vmem:[#allocation4 + $0x90] sm:$0xff] }
 0x199   : > { %1927 = vmatpush.msra.mxu1 %v6876_v10  ;;  %1947 = vmatpush.msra.mxu2 %v6879_v59  ;;  %9673 = vst [vmem:[#allocation102_spill] sm:$0xff] %v6891_v16  ;;  %v6897_v10 = vld [vmem:[#allocation4 + $0x98] sm:$0xff]  ;;  %v6900_v59 = vld [vmem:[#allocation4 + $0x60] sm:$0xff] }
 0x19a   : > { %1967 = vmatpush.msra.mxu3 %v6882_v60  ;;  %1908 = vmatpush.msra.mxu0 %v6885_v57  ;;  %9674 = vst [vmem:[#allocation103_spill] sm:$0xff] %v6894_v13  ;;  %v6903_v60 = vld [vmem:[#allocation4 + $0x68] sm:$0xff]  ;;  %v6906_v57 = vld [vmem:[#allocation4 + $0x70] sm:$0xff] }
 0x19b   : > { %1928 = vmatpush.msra.mxu1 %v6891_v16  ;;  %1948 = vmatpush.msra.mxu2 %v6894_v13  ;;  %9675 = vst [vmem:[#allocation104_spill] sm:$0xff] %v6897_v10  ;;  %v6910_v16 = vld [vmem:[#allocation4 + $0x78] sm:$0xff]  ;;  %v6913_v13 = vld [vmem:[#allocation4 + $0x40] sm:$0xff] }
 0x19c   : > { %1968 = vmatpush.msra.mxu3 %v6897_v10  ;;  %9676 = vst [vmem:[#allocation105_spill] sm:$0xff] %v6900_v59  ;;  %1909 = vmatpush.msra.mxu0 %v6900_v59  ;;  %v6916_v10 = vld [vmem:[#allocation4 + $0x48] sm:$0xff]  ;;  %v6919_v59 = vld [vmem:[#allocation4 + $0x50] sm:$0xff] }
 0x19d   : > { %9677 = vst [vmem:[#allocation106_spill] sm:$0xff] %v6903_v60  ;;  %1929 = vmatpush.msra.mxu1 %v6903_v60  ;;  %1949 = vmatpush.msra.mxu2 %v6906_v57  ;;  %v6922_v60 = vld [vmem:[#allocation4 + $0x58] sm:$0xff] }
 0x19e   : > { %9678 = vst [vmem:[#allocation107_spill] sm:$0xff] %v6906_v57  ;;  %3767 = vperm.xlu1 %4574, %v6889_v55   ;;  %1969 = vmatpush.msra.mxu3 %v6910_v16  ;;  %v6925_v57 = vld [vmem:[#allocation4 + $0x20] sm:$0xff]  ;;  %v3758_v55 = vsel %vm3757_vm4, 1, %v9457_v48 }
 0x19f   : > { %9679 = vst [vmem:[#allocation108_spill] sm:$0xff] %v6910_v16  ;;  %1910 = vmatpush.msra.mxu0 %v6913_v13  ;;  %1930 = vmatpush.msra.mxu1 %v6916_v10  ;;  %v6928_v16 = vld [vmem:[#allocation4 + $0x28] sm:$0xff] }
 0x1a0   : > { %9680 = vst [vmem:[#allocation109_spill] sm:$0xff] %v6913_v13  ;;  %1950 = vmatpush.msra.mxu2 %v6919_v59  ;;  %1970 = vmatpush.msra.mxu3 %v6922_v60  ;;  %v6931_v13 = vld [vmem:[#allocation4 + $0x30] sm:$0xff] }
 0x1a1   : > { %9681 = vst [vmem:[#allocation61_spill] sm:$0xff] %v6916_v10  ;;  %1911 = vmatpush.msra.mxu0 %v6925_v57  ;;  %1931 = vmatpush.msra.mxu1 %v6928_v16  ;;  %v6934_v10 = vld [vmem:[#allocation4 + $0x38] sm:$0xff] }
 0x1a2   : > { %9682 = vst [vmem:[#allocation78_spill] sm:$0xff] %v6919_v59  ;;  %1951 = vmatpush.msra.mxu2 %v6931_v13  ;;  %1971 = vmatpush.msra.mxu3 %v6934_v10  ;;  %v6937_v59 = vld [vmem:[#allocation4] sm:$0xff] }
 0x1a3   : > { %9683 = vst [vmem:[#allocation120_spill] sm:$0xff] %v6922_v60  ;;  %1912 = vmatpush.msra.mxu0 %v6937_v59  ;;  %v6940_v60 = vld [vmem:[#allocation4 + $0x8] sm:$0xff]  ;;  %3760 = vperm.xlu2 %4575, %v3758_v55  }
 0x1a4   : > { %9684 = vst [vmem:[#allocation121_spill] sm:$0xff] %v6925_v57  ;;  %1932 = vmatpush.msra.mxu1 %v6940_v60  ;;  %v6943_v57 = vld [vmem:[#allocation4 + $0x10] sm:$0xff] }
 0x1a5   : > { %9685 = vst [vmem:[#allocation122_spill] sm:$0xff] %v6928_v16  ;;  %1952 = vmatpush.msra.mxu2 %v6943_v57  ;;  %v6946_v16 = vld [vmem:[#allocation4 + $0x18] sm:$0xff] }
 0x1a6   : > { %9686 = vst [vmem:[#allocation123_spill] sm:$0xff] %v6931_v13  ;;  %1972 = vmatpush.msra.mxu3 %v6946_v16  ;;  %v6949_v13 = vld [vmem:[#allocation7 + $0x1e0] sm:$0xff] }
 0x1a7   : > { %9687 = vst [vmem:[#allocation124_spill] sm:$0xff] %v6934_v10  ;;  %2069 = vmatpush.msrb.mxu0 %v6949_v13  ;;  %v6952_v10 = vld [vmem:[#allocation7 + $0x1e8] sm:$0xff] }
 0x1a8   : > { %9688 = vst [vmem:[#allocation125_spill] sm:$0xff] %v6937_v59  ;;  %2089 = vmatpush.msrb.mxu1 %v6952_v10  ;;  %v6955_v59 = vld [vmem:[#allocation7 + $0x1f0] sm:$0xff] }
 0x1a9   : > { %9689 = vst [vmem:[#allocation126_spill] sm:$0xff] %v6940_v60  ;;  %2109 = vmatpush.msrb.mxu2 %v6955_v59  ;;  %v6958_v60 = vld [vmem:[#allocation7 + $0x1f8] sm:$0xff] }
 0x1aa   : > { %9690 = vst [vmem:[#allocation127_spill] sm:$0xff] %v6943_v57  ;;  %2129 = vmatpush.msrb.mxu3 %v6958_v60  ;;  %v6961_v57 = vld [vmem:[#allocation7 + $0x1c0] sm:$0xff] }
 0x1ab   : > { %9691 = vst [vmem:[#allocation128_spill] sm:$0xff] %v6946_v16  ;;  %2070 = vmatpush.msrb.mxu0 %v6961_v57  ;;  %v6964_v16 = vld [vmem:[#allocation7 + $0x1c8] sm:$0xff]  ;;  %3937 = vperm.xlu2 %4575, %v6758_v12  }
 0x1ac   : > { %9692 = vst [vmem:[#allocation129_spill] sm:$0xff] %v6949_v13  ;;  %2090 = vmatpush.msrb.mxu1 %v6964_v16  ;;  %v6967_v13 = vld [vmem:[#allocation7 + $0x1d0] sm:$0xff]  ;;  %v9763_v12 = vld [vmem:[#allocation85_spill] sm:$0xff] }
 0x1ad   : > { %9693 = vst [vmem:[#allocation130_spill] sm:$0xff] %v6952_v10  ;;  %2110 = vmatpush.msrb.mxu2 %v6967_v13  ;;  %v6970_v10 = vld [vmem:[#allocation7 + $0x1d8] sm:$0xff] }
 0x1ae   : > { %9694 = vst [vmem:[#allocation131_spill] sm:$0xff] %v6955_v59  ;;  %2130 = vmatpush.msrb.mxu3 %v6970_v10  ;;  %v6973_v59 = vld [vmem:[#allocation7 + $0x1a0] sm:$0xff] }
 0x1af   : > { %9695 = vst [vmem:[#allocation132_spill] sm:$0xff] %v6958_v60  ;;  %2071 = vmatpush.msrb.mxu0 %v6973_v59  ;;  %v6976_v60 = vld [vmem:[#allocation7 + $0x1a8] sm:$0xff] }
 0x1b0   : > { %9696 = vst [vmem:[#allocation133_spill] sm:$0xff] %v6961_v57  ;;  %2091 = vmatpush.msrb.mxu1 %v6976_v60  ;;  %v6979_v57 = vld [vmem:[#allocation7 + $0x1b0] sm:$0xff] }
 0x1b1   : > { %9697 = vst [vmem:[#allocation134_spill] sm:$0xff] %v6964_v16  ;;  %2111 = vmatpush.msrb.mxu2 %v6979_v57  ;;  %v6982_v16 = vld [vmem:[#allocation7 + $0x1b8] sm:$0xff] }
 0x1b2   : > { %9698 = vst [vmem:[#allocation135_spill] sm:$0xff] %v6967_v13  ;;  %2131 = vmatpush.msrb.mxu3 %v6982_v16  ;;  %v6985_v13 = vld [vmem:[#allocation7 + $0x180] sm:$0xff] }
 0x1b3   : > { %9699 = vst [vmem:[#allocation136_spill] sm:$0xff] %v6970_v10  ;;  %2072 = vmatpush.msrb.mxu0 %v6985_v13  ;;  %v6988_v10 = vld [vmem:[#allocation7 + $0x188] sm:$0xff] }
 0x1b4   : > { %9700 = vst [vmem:[#allocation137_spill] sm:$0xff] %v6973_v59  ;;  %2092 = vmatpush.msrb.mxu1 %v6988_v10  ;;  %v6991_v59 = vld [vmem:[#allocation7 + $0x190] sm:$0xff] }
 0x1b5   : > { %9701 = vst [vmem:[#allocation138_spill] sm:$0xff] %v6976_v60  ;;  %2112 = vmatpush.msrb.mxu2 %v6991_v59  ;;  %v6994_v60 = vld [vmem:[#allocation7 + $0x198] sm:$0xff] }
 0x1b6   : > { %9702 = vst [vmem:[#allocation139_spill] sm:$0xff] %v6979_v57  ;;  %2132 = vmatpush.msrb.mxu3 %v6994_v60  ;;  %v6997_v57 = vld [vmem:[#allocation7 + $0x160] sm:$0xff] }
 0x1b7   : > { %9703 = vst [vmem:[#allocation140_spill] sm:$0xff] %v6982_v16  ;;  %2073 = vmatpush.msrb.mxu0 %v6997_v57  ;;  %v7000_v16 = vld [vmem:[#allocation7 + $0x168] sm:$0xff] }
 0x1b8   : > { %9704 = vst [vmem:[#allocation141_spill] sm:$0xff] %v6985_v13  ;;  %2093 = vmatpush.msrb.mxu1 %v7000_v16  ;;  %v7003_v13 = vld [vmem:[#allocation7 + $0x170] sm:$0xff] }
 0x1b9   : > { %9705 = vst [vmem:[#allocation142_spill] sm:$0xff] %v6988_v10  ;;  %2113 = vmatpush.msrb.mxu2 %v7003_v13  ;;  %v7006_v10 = vld [vmem:[#allocation7 + $0x178] sm:$0xff] }
 0x1ba   : > { %9706 = vst [vmem:[#allocation143_spill] sm:$0xff] %v6991_v59  ;;  %2133 = vmatpush.msrb.mxu3 %v7006_v10  ;;  %v7009_v59 = vld [vmem:[#allocation7 + $0x140] sm:$0xff] }
 0x1bb   : > { %9707 = vst [vmem:[#allocation144_spill] sm:$0xff] %v6994_v60  ;;  %2074 = vmatpush.msrb.mxu0 %v7009_v59  ;;  %v7012_v60 = vld [vmem:[#allocation7 + $0x148] sm:$0xff] }
 0x1bc   : > { %9708 = vst [vmem:[#allocation145_spill] sm:$0xff] %v6997_v57  ;;  %2094 = vmatpush.msrb.mxu1 %v7012_v60  ;;  %v7015_v57 = vld [vmem:[#allocation7 + $0x150] sm:$0xff] }
 0x1bd   : > { %9709 = vst [vmem:[#allocation146_spill] sm:$0xff] %v7000_v16  ;;  %2114 = vmatpush.msrb.mxu2 %v7015_v57  ;;  %v7018_v16 = vld [vmem:[#allocation7 + $0x158] sm:$0xff] }
 0x1be   : > { %9710 = vst [vmem:[#allocation147_spill] sm:$0xff] %v7003_v13  ;;  %2134 = vmatpush.msrb.mxu3 %v7018_v16  ;;  %v7021_v13 = vld [vmem:[#allocation7 + $0x120] sm:$0xff] }
 0x1bf   : > { %9711 = vst [vmem:[#allocation148_spill] sm:$0xff] %v7006_v10  ;;  %2075 = vmatpush.msrb.mxu0 %v7021_v13  ;;  %v7024_v10 = vld [vmem:[#allocation7 + $0x128] sm:$0xff] }
 0x1c0   : > { %9712 = vst [vmem:[#allocation149_spill] sm:$0xff] %v7009_v59  ;;  %2095 = vmatpush.msrb.mxu1 %v7024_v10  ;;  %v7027_v59 = vld [vmem:[#allocation7 + $0x130] sm:$0xff] }
 0x1c1   : > { %9713 = vst [vmem:[#allocation150_spill] sm:$0xff] %v7012_v60  ;;  %2115 = vmatpush.msrb.mxu2 %v7027_v59  ;;  %v7030_v60 = vld [vmem:[#allocation7 + $0x138] sm:$0xff] }
 0x1c2   : > { %9714 = vst [vmem:[#allocation151_spill] sm:$0xff] %v7015_v57  ;;  %2135 = vmatpush.msrb.mxu3 %v7030_v60  ;;  %v7033_v57 = vld [vmem:[#allocation7 + $0x100] sm:$0xff] }
 0x1c3   : > { %9715 = vst [vmem:[#allocation152_spill] sm:$0xff] %v7018_v16  ;;  %2076 = vmatpush.msrb.mxu0 %v7033_v57  ;;  %v7036_v16 = vld [vmem:[#allocation7 + $0x108] sm:$0xff] }
 0x1c4   : > { %9716 = vst [vmem:[#allocation153_spill] sm:$0xff] %v7021_v13  ;;  %2096 = vmatpush.msrb.mxu1 %v7036_v16  ;;  %v7039_v13 = vld [vmem:[#allocation7 + $0x110] sm:$0xff] }
 0x1c5   : > { %9717 = vst [vmem:[#allocation154_spill] sm:$0xff] %v7024_v10  ;;  %2116 = vmatpush.msrb.mxu2 %v7039_v13  ;;  %v7042_v10 = vld [vmem:[#allocation7 + $0x118] sm:$0xff] }
 0x1c6   : > { %9718 = vst [vmem:[#allocation155_spill] sm:$0xff] %v7027_v59  ;;  %2136 = vmatpush.msrb.mxu3 %v7042_v10  ;;  %v7045_v59 = vld [vmem:[#allocation7 + $0xe0] sm:$0xff] }
 0x1c7   : > { %9719 = vst [vmem:[#allocation156_spill] sm:$0xff] %v7030_v60  ;;  %2077 = vmatpush.msrb.mxu0 %v7045_v59  ;;  %v7048_v60 = vld [vmem:[#allocation7 + $0xe8] sm:$0xff] }
 0x1c8   : > { %9720 = vst [vmem:[#allocation157_spill] sm:$0xff] %v7033_v57  ;;  %2097 = vmatpush.msrb.mxu1 %v7048_v60  ;;  %v7051_v57 = vld [vmem:[#allocation7 + $0xf0] sm:$0xff] }
 0x1c9   : > { %9721 = vst [vmem:[#allocation158_spill] sm:$0xff] %v7036_v16  ;;  %2117 = vmatpush.msrb.mxu2 %v7051_v57  ;;  %v7054_v16 = vld [vmem:[#allocation7 + $0xf8] sm:$0xff] }
 0x1ca   : > { %9722 = vst [vmem:[#allocation159_spill] sm:$0xff] %v7039_v13  ;;  %2137 = vmatpush.msrb.mxu3 %v7054_v16  ;;  %v7057_v13 = vld [vmem:[#allocation7 + $0xc0] sm:$0xff] }
 0x1cb   : > { %9723 = vst [vmem:[#allocation160_spill] sm:$0xff] %v7042_v10  ;;  %2078 = vmatpush.msrb.mxu0 %v7057_v13  ;;  %v7060_v10 = vld [vmem:[#allocation7 + $0xc8] sm:$0xff] }
 0x1cc   : > { %9724 = vst [vmem:[#allocation161_spill] sm:$0xff] %v7045_v59  ;;  %2098 = vmatpush.msrb.mxu1 %v7060_v10  ;;  %v7063_v59 = vld [vmem:[#allocation7 + $0xd0] sm:$0xff] }
 0x1cd   : > { %9725 = vst [vmem:[#allocation162_spill] sm:$0xff] %v7048_v60  ;;  %2118 = vmatpush.msrb.mxu2 %v7063_v59  ;;  %v7066_v60 = vld [vmem:[#allocation7 + $0xd8] sm:$0xff] }
 0x1ce   : > { %9726 = vst [vmem:[#allocation163_spill] sm:$0xff] %v7051_v57  ;;  %2138 = vmatpush.msrb.mxu3 %v7066_v60  ;;  %v7069_v57 = vld [vmem:[#allocation7 + $0xa0] sm:$0xff] }
 0x1cf   : > { %9727 = vst [vmem:[#allocation164_spill] sm:$0xff] %v7054_v16  ;;  %2079 = vmatpush.msrb.mxu0 %v7069_v57  ;;  %v7072_v16 = vld [vmem:[#allocation7 + $0xa8] sm:$0xff] }
 0x1d0   : > { %9728 = vst [vmem:[#allocation165_spill] sm:$0xff] %v7057_v13  ;;  %2099 = vmatpush.msrb.mxu1 %v7072_v16  ;;  %v7075_v13 = vld [vmem:[#allocation7 + $0xb0] sm:$0xff] }
 0x1d1   : > { %9729 = vst [vmem:[#allocation166_spill] sm:$0xff] %v7060_v10  ;;  %2119 = vmatpush.msrb.mxu2 %v7075_v13  ;;  %v7078_v10 = vld [vmem:[#allocation7 + $0xb8] sm:$0xff] }
 0x1d2   : > { %9730 = vst [vmem:[#allocation167_spill] sm:$0xff] %v7063_v59  ;;  %2139 = vmatpush.msrb.mxu3 %v7078_v10  ;;  %v7081_v59 = vld [vmem:[#allocation7 + $0x80] sm:$0xff] }
 0x1d3   : > { %9731 = vst [vmem:[#allocation168_spill] sm:$0xff] %v7066_v60  ;;  %2080 = vmatpush.msrb.mxu0 %v7081_v59  ;;  %v7084_v60 = vld [vmem:[#allocation7 + $0x88] sm:$0xff] }
 0x1d4   : > { %9732 = vst [vmem:[#allocation169_spill] sm:$0xff] %v7069_v57  ;;  %2100 = vmatpush.msrb.mxu1 %v7084_v60  ;;  %v7087_v57 = vld [vmem:[#allocation7 + $0x90] sm:$0xff] }
 0x1d5   : > { %9733 = vst [vmem:[#allocation170_spill] sm:$0xff] %v7072_v16  ;;  %2120 = vmatpush.msrb.mxu2 %v7087_v57  ;;  %v7090_v16 = vld [vmem:[#allocation7 + $0x98] sm:$0xff] }
 0x1d6   : > { %9734 = vst [vmem:[#allocation171_spill] sm:$0xff] %v7075_v13  ;;  %2140 = vmatpush.msrb.mxu3 %v7090_v16  ;;  %v7093_v13 = vld [vmem:[#allocation7 + $0x60] sm:$0xff] }
 0x1d7   : > { %9735 = vst [vmem:[#allocation172_spill] sm:$0xff] %v7078_v10  ;;  %2081 = vmatpush.msrb.mxu0 %v7093_v13  ;;  %v7096_v10 = vld [vmem:[#allocation7 + $0x68] sm:$0xff] }
 0x1d8   : > { %9736 = vst [vmem:[#allocation173_spill] sm:$0xff] %v7081_v59  ;;  %2101 = vmatpush.msrb.mxu1 %v7096_v10  ;;  %v7099_v59 = vld [vmem:[#allocation7 + $0x70] sm:$0xff] }
 0x1d9   : > { %9737 = vst [vmem:[#allocation174_spill] sm:$0xff] %v7084_v60  ;;  %2121 = vmatpush.msrb.mxu2 %v7099_v59  ;;  %v7102_v60 = vld [vmem:[#allocation7 + $0x78] sm:$0xff] }
 0x1da   : > { %9738 = vst [vmem:[#allocation175_spill] sm:$0xff] %v7087_v57  ;;  %2141 = vmatpush.msrb.mxu3 %v7102_v60  ;;  %v7105_v57 = vld [vmem:[#allocation7 + $0x40] sm:$0xff] }
 0x1db   : > { %9739 = vst [vmem:[#allocation176_spill] sm:$0xff] %v7090_v16  ;;  %2082 = vmatpush.msrb.mxu0 %v7105_v57  ;;  %v7108_v16 = vld [vmem:[#allocation7 + $0x48] sm:$0xff] }
 0x1dc   : > { %9740 = vst [vmem:[#allocation177_spill] sm:$0xff] %v7093_v13  ;;  %2102 = vmatpush.msrb.mxu1 %v7108_v16  ;;  %v7111_v13 = vld [vmem:[#allocation7 + $0x50] sm:$0xff] }
 0x1dd   : > { %9741 = vst [vmem:[#allocation178_spill] sm:$0xff] %v7096_v10  ;;  %2122 = vmatpush.msrb.mxu2 %v7111_v13  ;;  %v7114_v10 = vld [vmem:[#allocation7 + $0x58] sm:$0xff] }
 0x1de   : > { %9742 = vst [vmem:[#allocation179_spill] sm:$0xff] %v7099_v59  ;;  %2142 = vmatpush.msrb.mxu3 %v7114_v10  ;;  %v7117_v59 = vld [vmem:[#allocation7 + $0x20] sm:$0xff] }
 0x1df   : > { %9743 = vst [vmem:[#allocation180_spill] sm:$0xff] %v7102_v60  ;;  %2083 = vmatpush.msrb.mxu0 %v7117_v59  ;;  %v7120_v60 = vld [vmem:[#allocation7 + $0x28] sm:$0xff] }
 0x1e0   : > { %9744 = vst [vmem:[#allocation181_spill] sm:$0xff] %v7105_v57  ;;  %2103 = vmatpush.msrb.mxu1 %v7120_v60  ;;  %v7123_v57 = vld [vmem:[#allocation7 + $0x30] sm:$0xff] }
 0x1e1   : > { %9745 = vst [vmem:[#allocation182_spill] sm:$0xff] %v7108_v16  ;;  %2123 = vmatpush.msrb.mxu2 %v7123_v57  ;;  %v7126_v16 = vld [vmem:[#allocation7 + $0x38] sm:$0xff] }
 0x1e2   : > { %9746 = vst [vmem:[#allocation183_spill] sm:$0xff] %v7111_v13  ;;  %2143 = vmatpush.msrb.mxu3 %v7126_v16  ;;  %v7129_v13 = vld [vmem:[#allocation7] sm:$0xff] }
 0x1e3   : > { %9747 = vst [vmem:[#allocation184_spill] sm:$0xff] %v7114_v10  ;;  %2084 = vmatpush.msrb.mxu0 %v7129_v13  ;;  %v7132_v10 = vld [vmem:[#allocation7 + $0x8] sm:$0xff] }
 0x1e4   : > { %9748 = vst [vmem:[#allocation185_spill] sm:$0xff] %v7117_v59  ;;  %2104 = vmatpush.msrb.mxu1 %v7132_v10  ;;  %v7135_v59 = vld [vmem:[#allocation7 + $0x10] sm:$0xff] }
 0x1e5   : > { %9749 = vst [vmem:[#allocation186_spill] sm:$0xff] %v7120_v60  ;;  %2124 = vmatpush.msrb.mxu2 %v7135_v59  ;;  %v7138_v60 = vld [vmem:[#allocation7 + $0x18] sm:$0xff] }
 0x1e6   : > { %9750 = vst [vmem:[#allocation187_spill] sm:$0xff] %v7123_v57  ;;  %2144 = vmatpush.msrb.mxu3 %v7138_v60  ;;  %v7141_v57 = vpop.permute.xlu1 %1703 }
 0x1e7   : > { %9751 = vst [vmem:[#allocation188_spill] sm:$0xff] %v7126_v16  ;;  %v694_v16 = vadd.f32 %v6272_v50, %v6583_v23  ;;  %vm1705_vm2 = vcmp.eq.s32.totalorder %v7141_v57, 1 }
 0x1e8   : > { %9752 = vst [vmem:[#allocation189_spill] sm:$0xff] %v7129_v13  ;;  %v723_v13 = vadd.f32 %v6281_v52, %v6585_v26 }
 0x1e9   : > { %9753 = vst [vmem:[#allocation190_spill] sm:$0xff] %v7132_v10 }
 0x1ea   : > { %9754 = vst [vmem:[#allocation191_spill] sm:$0xff] %v7135_v59 }
 0x1eb   : > { %9755 = vst [vmem:[#allocation192_spill] sm:$0xff] %v7138_v60  ;;  %v781_v60 = vadd.f32 %v6299_v54, %v6593_v22 }
 0x1ee   : > { %v7147_v63 = vpop.permute.xlu1 %1875 }
 0x1fc   : > { %v1570_v24 = vpop.f32.mrf.mxu0  ;;  %v1590_v42 = vpop.f32.mrf.mxu1 }
 0x1fd   : > { %v1633_v30 = vadd.f32 %v1570_v24, %v694_v16  ;;  %v1634_v10 = vadd.f32 %v1590_v42, %v723_v13 }
 0x1ff   : > { %v4359_v32 = vmul.f32 -1.442695, %v1633_v30  ;;  %v4360_v61 = vmul.f32 -1.442695, %v1634_v10  ;;  %v7153_v30 = vpop.permute.xlu1 %2563 }
 0x200   : > { %9756 = vst [vmem:[#allocation193_spill] sm:$0xff] %v7153_v30 }
 0x201   : > { %4608 = vpow2.f32 %v4359_v32 }
 0x202   : > { %4610 = vpow2.f32 %v4360_v61 }
 0x203   : > { %v1630_v59 = vpop.f32.mrf.mxu3  ;;  %v1610_v54 = vpop.f32.mrf.mxu2 }
 0x204   : > { %v1636_v33 = vadd.f32 %v1630_v59, %v781_v60  ;;  %v752_v59 = vadd.f32 %v6295_v53, %v6606_v62 }
 0x206   : > { %v4361_v49 = vmul.f32 -1.442695, %v1636_v33  ;;  %v1635_v33 = vadd.f32 %v1610_v54, %v752_v59 }
 0x207   : > { %v4609_v50 = vpop.eup %4608  ;;  %v1742_v23 = vpop.f32.mrf.mxu0 }
 0x208   : > { %v1762_v36 = vpop.f32.mrf.mxu1  ;;  %v4611_v52 = vpop.eup %4610  ;;  %v1640_v26 = vadd.f32 1.0, %v4609_v50  ;;  %4612 = vpow2.f32 %v4361_v49  ;;  %v1805_v42 = vadd.f32 %v1742_v23, %v6564_v27 }
 0x209   : > { %v1806_v13 = vadd.f32 %v1762_v36, %v6567_v1  ;;  %v1659_v16 = vadd.f32 1.0, %v4611_v52 }
 0x20a   : > { %4614 = vrcp.f32 %v1640_v26  ;;  %v4364_v61 = vmul.f32 -1.442695, %v1805_v42  ;;  %v1650_v52 = vand.u32 2147483647, %v1640_v26  ;;  %v1652_v30 = vand.u32 2147483648, %v1640_v26 }
 0x20b   : > { %4616 = vrcp.f32 %v1659_v16  ;;  %v4365_v24 = vmul.f32 -1.442695, %v1806_v13  ;;  %v1669_v54 = vand.u32 2147483647, %v1659_v16  ;;  %vm1665_vm12 = vweird.f32 %v1659_v16 }
 0x20c   : > { %4618 = vpow2.f32 %v4364_v61  ;;  %v1671_v61 = vand.u32 2147483648, %v1659_v16  ;;  %vm1646_vm13 = vweird.f32 %v1640_v26  ;;  %vm1651_vm0 = vcmp.eq.f32.partialorder %v1650_v52, 8.507059e+37 }
 0x20d   : > { %4620 = vpow2.f32 %v4365_v24  ;;  %vm1670_vm1 = vcmp.eq.f32.partialorder %v1669_v54, 8.507059e+37 }
 0x20e   : > { %v4613_v60 = vpop.eup %4612  ;;  %v1802_v32 = vpop.f32.mrf.mxu3 }
 0x20f   : > { %v7157_v49 = vadd.f32 1.0, %v4613_v60  ;;  %v1808_v23 = vadd.f32 %v1802_v32, %v6581_v44  ;;  %v7161_v60 = vpop.permute.xlu1 %3076 }
 0x210   : > { %v4615_v27 = vpop.eup %4614  ;;  %9757 = vst [vmem:[#allocation194_spill] sm:$0xff] %v7161_v60 }
 0x211   : > { %v4617_v1 = vpop.eup %4616  ;;  %v1642_v36 = vmul.f32 %v4615_v27, %v1640_v26  ;;  %4622 = vrcp.f32 %v7157_v49  ;;  %v4366_v42 = vmul.f32 -1.442695, %v1808_v23  ;;  %vm1647_vm10 = vweird.f32 %v4615_v27  ;;  %v1782_v23 = vpop.f32.mrf.mxu2 }
 0x212   : > { %v1661_v10 = vmul.f32 %v4617_v1, %v1659_v16  ;;  %4624 = vtanh.f32 %v1635_v33  ;;  %v4619_v53 = vpop.eup %4618  ;;  %vm1666_vm11 = vweird.f32 %v4617_v1  ;;  %vm1648_vm14 = vmor %vm1646_vm13, %vm1647_vm10  ;;  %vm1685_vm3 = vweird.f32 %v7157_v49 }
 0x213   : > { %v1643_v50 = vsub.f32 1.0, %v1642_v36  ;;  %v4621_v59 = vpop.eup %4620  ;;  %v7163_v44 = vadd.f32 1.0, %v4619_v53  ;;  %4626 = vpow2.f32 %v4366_v42  ;;  %vm1667_vm15 = vmor %vm1665_vm12, %vm1666_vm11  ;;  %v1672_v53 = vor.u32 1.1754944e-38, %v1671_v61 }
 0x214   : > { %v1662_v13 = vsub.f32 1.0, %v1661_v10  ;;  %v7165_v62 = vadd.f32 1.0, %v4621_v59  ;;  %v1653_v10 = vor.u32 1.1754944e-38, %v1652_v30  ;;  %v1691_v54 = vand.u32 2147483648, %v7157_v49 }
 0x215   : > { %v1644_v24 = vmul.f32 %v4615_v27, %v1643_v50  ;;  %4628 = vrcp.f32 %v7163_v44  ;;  %vm1818_vm9 = vweird.f32 %v7163_v44 }
 0x216   : > { %v1663_v32 = vmul.f32 %v4617_v1, %v1662_v13  ;;  %4630 = vrcp.f32 %v7165_v62  ;;  %v1841_v48 = vand.u32 2147483647, %v7165_v62  ;;  %vm1837_vm11 = vweird.f32 %v7165_v62 }
 0x217   : > { %v7167_v36 = vpop.eup %4622  ;;  %v1645_v33 = vadd.f32 %v4615_v27, %v1644_v24  ;;  %v1807_v24 = vadd.f32 %v1782_v23, %v6578_v17  ;;  %v7183_v61 = vpop.permute.xlu1 %3589 }
 0x218   : > { %v1664_v60 = vadd.f32 %v4617_v1, %v1663_v32  ;;  %v1681_v50 = vmul.f32 %v7167_v36, %v7157_v49  ;;  %v4625_v42 = vpop.eup %4624  ;;  %9758 = vst [vmem:[#allocation195_spill] sm:$0xff] %v7183_v61  ;;  %vm1686_vm5 = vweird.f32 %v7167_v36  ;;  %v7636_v61 = vld [vmem:[#allocation4 + $0x58] sm:$0xff] }
 0x219   : > { %v1649_v13 = vsel %vm1648_vm14, %v4615_v27, %v1645_v33  ;;  %v4627_v22 = vpop.eup %4626  ;;  %v1689_v27 = vand.u32 2147483647, %v7157_v49  ;;  %4632 = vtanh.f32 %v1807_v24  ;;  %v1822_v33 = vand.u32 2147483647, %v7163_v44  ;;  %vm7200_vm6 = vmor %vm1685_vm3, %vm1686_vm5 }
 0x21a   : > { %v1654_v16 = vsel %vm1651_vm0, %v1653_v10, %v1649_v13  ;;  %v1668_v59 = vsel %vm1667_vm15, %v4617_v1, %v1664_v60  ;;  %v1682_v26 = vsub.f32 1.0, %v1681_v50  ;;  %v7176_v35 = vadd.f32 1.0, %v4627_v22 }
 0x21b   : > { %v1673_v43 = vsel %vm1670_vm1, %v1672_v53, %v1668_v59  ;;  %v1696_v30 = vmul.f32 %v4625_v42, %v1654_v16  ;;  %v4629_v31 = vpop.eup %4628  ;;  %v1824_v10 = vand.u32 2147483648, %v7163_v44  ;;  %v1843_v42 = vand.u32 2147483648, %v7165_v62 }
 0x21c   : > { %v1695_v32 = vmul.f32 %v1673_v43, %v6676_v3  ;;  %v1683_v6 = vmul.f32 %v7167_v36, %v1682_v26  ;;  %v4631_v1 = vpop.eup %4630  ;;  %v1814_v17 = vmul.f32 %v4629_v31, %v7163_v44  ;;  %4634 = vrcp.f32 %v7176_v35 }
 0x21d   : > { %v1833_v22 = vmul.f32 %v4631_v1, %v7165_v62  ;;  %vm1819_vm7 = vweird.f32 %v4629_v31  ;;  %vm1838_vm8 = vweird.f32 %v4631_v1  ;;  %v1692_v59 = vor.u32 1.1754944e-38, %v1691_v54 }
 0x21e   : > { %v1697_v52 = vadd.f32 %v1696_v30, %v1695_v32  ;;  %v1684_v43 = vadd.f32 %v7167_v36, %v1683_v6  ;;  %v1815_v60 = vsub.f32 1.0, %v1814_v17  ;;  %vm1690_vm10 = vcmp.eq.f32.partialorder %v1689_v27, 8.507059e+37  ;;  %vm1820_vm12 = vmor %vm1818_vm9, %vm1819_vm7 }
 0x21f   : > { %v1834_v23 = vsub.f32 1.0, %v1833_v22  ;;  %v4633_v16 = vpop.eup %4632  ;;  %vm1823_vm13 = vcmp.eq.f32.partialorder %v1822_v33, 8.507059e+37  ;;  %v1825_v24 = vor.u32 1.1754944e-38, %v1824_v10  ;;  %vm1839_vm14 = vmor %vm1837_vm11, %vm1838_vm8  ;;  %vm1842_vm15 = vcmp.eq.f32.partialorder %v1841_v48, 8.507059e+37  ;;  %v9786_v48 = vld [vmem:[#allocation108_spill] sm:$0xff] }
 0x220   : > { %4636 = vtanh.f32 %v1697_v52  ;;  %v7196_v6 = vsel %vm1705_vm2, %v1697_v52, %v6676_v3  ;;  %v1816_v53 = vmul.f32 %v4629_v31, %v1815_v60  ;;  %v1688_v3 = vsel %vm7200_vm6, %v7167_v36, %v1684_v43 }
 0x221   : > { %v1835_v13 = vmul.f32 %v4631_v1, %v1834_v23  ;;  %v1844_v52 = vor.u32 1.1754944e-38, %v1843_v42  ;;  %v1693_v43 = vsel %vm1690_vm10, %v1692_v59, %v1688_v3  ;;  %v1711_v23 = vpop.permute.xlu1 %1710  ;;  %vm1877_vm0 = vcmp.eq.s32.totalorder %v7147_v63, 1  ;;  %v9761_v63 = vld [vmem:[#allocation83_spill] sm:$0xff]  ;;  %v9787_v3 = vld [vmem:[#allocation109_spill] sm:$0xff]  ;;  %v9789_v59 = vld [vmem:[#allocation78_spill] sm:$0xff] }
 0x222   : > { %v1817_v49 = vadd.f32 %v4629_v31, %v1816_v53  ;;  %v4635_v26 = vpop.eup %4634  ;;  %v1863_v57 = vand.u32 2147483648, %v7176_v35  ;;  %v1861_v42 = vand.u32 2147483647, %v7176_v35  ;;  %v9784_v53 = vld [vmem:[#allocation106_spill] sm:$0xff] }
 0x223   : > { %v1836_v30 = vadd.f32 %v4631_v1, %v1835_v13  ;;  %v1853_v36 = vmul.f32 %v4635_v26, %v7176_v35  ;;  %vm1858_vm1 = vweird.f32 %v4635_v26  ;;  %v9785_v13 = vld [vmem:[#allocation107_spill] sm:$0xff] }
 0x224   : > { %v1821_v17 = vsel %vm1820_vm12, %v4629_v31, %v1817_v49  ;;  %vm1862_vm4 = vcmp.eq.f32.partialorder %v1861_v42, 8.507059e+37  ;;  %v9790_v49 = vld [vmem:[#allocation120_spill] sm:$0xff]  ;;  %v9812_v42 = vld [vmem:[#allocation142_spill] sm:$0xff] }
 0x225   : > { %v1826_v22 = vsel %vm1823_vm13, %v1825_v24, %v1821_v17  ;;  %v1840_v54 = vsel %vm1839_vm14, %v4631_v1, %v1836_v30  ;;  %v1854_v62 = vsub.f32 1.0, %v1853_v36  ;;  %v9792_v24 = vld [vmem:[#allocation122_spill] sm:$0xff]  ;;  %v9793_v30 = vld [vmem:[#allocation123_spill] sm:$0xff] }
 0x226   : > { %v4637_v32 = vpop.eup %4636  ;;  %v1845_v27 = vsel %vm1842_vm15, %v1844_v52, %v1840_v54  ;;  %v1868_v60 = vmul.f32 %v4633_v16, %v1826_v22  ;;  %v9788_v16 = vld [vmem:[#allocation61_spill] sm:$0xff]  ;;  %v9796_v17 = vld [vmem:[#allocation126_spill] sm:$0xff]  ;;  %v9797_v36 = vld [vmem:[#allocation127_spill] sm:$0xff] }
 0x227   : > { %v1699_v44 = vmul.f32 %v4637_v32, %v1693_v43  ;;  %v1867_v33 = vmul.f32 %v1845_v27, %v6719_v28  ;;  %v1855_v31 = vmul.f32 %v4635_v26, %v1854_v62  ;;  %v9794_v32 = vld [vmem:[#allocation124_spill] sm:$0xff]  ;;  %v9795_v52 = vld [vmem:[#allocation125_spill] sm:$0xff]  ;;  %v9800_v54 = vld [vmem:[#allocation130_spill] sm:$0xff] }
 0x228   : > { %v9798_v43 = vld [vmem:[#allocation128_spill] sm:$0xff]  ;;  %v9799_v22 = vld [vmem:[#allocation129_spill] sm:$0xff]  ;;  %v9804_v62 = vld [vmem:[#allocation134_spill] sm:$0xff] }
 0x229   : > { %v7217_v10 = vsel %vm1705_vm2, %v1699_v44, %v6704_v34  ;;  %v1869_v1 = vadd.f32 %v1868_v60, %v1867_v33  ;;  %v1856_v50 = vadd.f32 %v4635_v26, %v1855_v31  ;;  %vm1857_vm2 = vweird.f32 %v7176_v35  ;;  %v9783_v35 = vld [vmem:[#allocation105_spill] sm:$0xff]  ;;  %v9801_v44 = vld [vmem:[#allocation131_spill] sm:$0xff]  ;;  %v9802_v27 = vld [vmem:[#allocation132_spill] sm:$0xff] }
 0x22a   : > { %v1713_v55 = vmul.f32 %v1711_v23, %v7217_v10  ;;  %1913 = vmatmul.f32.vlgmr.msra.gmra.mxu0 %v7217_v10  ;;  %1933 = vmatmul.f32.vlgmr.msra.gmra.mxu1 %v7217_v10  ;;  %vm1859_vm3 = vmor %vm1857_vm2, %vm1858_vm1  ;;  %v9803_v60 = vld [vmem:[#allocation133_spill] sm:$0xff]  ;;  %v9805_v23 = vld [vmem:[#allocation135_spill] sm:$0xff] }
 0x22b   : > { %1953 = vmatmul.f32.vlgmr.msra.gmra.mxu2 %v7217_v10  ;;  %1973 = vmatmul.f32.vlgmr.msra.gmra.mxu3 %v7217_v10  ;;  %4638 = vtanh.f32 %v1869_v1  ;;  %v7234_v34 = vsel %vm1877_vm0, %v1869_v1, %v6719_v28  ;;  %v1864_v28 = vor.u32 1.1754944e-38, %v1863_v57  ;;  %v9806_v33 = vld [vmem:[#allocation136_spill] sm:$0xff]  ;;  %v9807_v31 = vld [vmem:[#allocation137_spill] sm:$0xff]  ;;  %v9809_v1 = vld [vmem:[#allocation139_spill] sm:$0xff] }
 0x22c   : > { %4362 = vst [vmem:[%s5697_s16 + $0x8] sm:$0xff] %v1713_v55  ;;  %2241 = vmatpush.msra.mxu0 %v6724_v4  ;;  %2261 = vmatpush.msra.mxu1 %v6727_v14  ;;  %v1860_v4 = vsel %vm1859_vm3, %v4635_v26, %v1856_v50  ;;  %v9791_v26 = vld [vmem:[#allocation121_spill] sm:$0xff]  ;;  %v9808_v55 = vld [vmem:[#allocation138_spill] sm:$0xff]  ;;  %v9810_v50 = vld [vmem:[#allocation140_spill] sm:$0xff] }
 0x22d   : > { %2281 = vmatpush.msra.mxu2 %v6736_v40  ;;  %2301 = vmatpush.msra.mxu3 %v6739_v38  ;;  %v1865_v40 = vsel %vm1862_vm4, %v1864_v28, %v1860_v4  ;;  %v1883_v38 = vpop.permute.xlu2 %1882  ;;  %v9811_v57 = vld [vmem:[#allocation141_spill] sm:$0xff]  ;;  %v9813_v4 = vld [vmem:[#allocation143_spill] sm:$0xff]  ;;  %v9814_v28 = vld [vmem:[#allocation144_spill] sm:$0xff] }
 0x22e   : > { %2242 = vmatpush.msra.mxu0 %v6745_v58  ;;  %2262 = vmatpush.msra.mxu1 %v6748_v18 }
 0x22f   : > { %2282 = vmatpush.msra.mxu2 %v6751_v15  ;;  %2302 = vmatpush.msra.mxu3 %v6754_v46  ;;  %v9762_v46 = vld [vmem:[#allocation84_spill] sm:$0xff] }
 0x230   : > { %2243 = vmatpush.msra.mxu0 %v6760_v56  ;;  %2263 = vmatpush.msra.mxu1 %v6763_v11  ;;  %v9764_v56 = vld [vmem:[#allocation86_spill] sm:$0xff]  ;;  %v9765_v11 = vld [vmem:[#allocation87_spill] sm:$0xff] }
 0x231   : > { %2283 = vmatpush.msra.mxu2 %v6767_v20  ;;  %2303 = vmatpush.msra.mxu3 %v6770_v41  ;;  %v4639_v14 = vpop.eup %4638  ;;  %v9766_v20 = vld [vmem:[#allocation88_spill] sm:$0xff]  ;;  %v9767_v41 = vld [vmem:[#allocation89_spill] sm:$0xff] }
 0x232   : > { %2244 = vmatpush.msra.mxu0 %v6773_v21  ;;  %2264 = vmatpush.msra.mxu1 %v6777_v5  ;;  %v1871_v58 = vmul.f32 %v4639_v14, %v1865_v40  ;;  %v9768_v21 = vld [vmem:[#allocation90_spill] sm:$0xff]  ;;  %v9769_v5 = vld [vmem:[#allocation91_spill] sm:$0xff]  ;;  %v9815_v14 = vld [vmem:[#allocation145_spill] sm:$0xff] }
 0x233   : > { %2284 = vmatpush.msra.mxu2 %v6780_v7  ;;  %2304 = vmatpush.msra.mxu3 %v6788_v9  ;;  %v9770_v7 = vld [vmem:[#allocation92_spill] sm:$0xff]  ;;  %v9772_v9 = vld [vmem:[#allocation94_spill] sm:$0xff] }
 0x234   : > { %2245 = vmatpush.msra.mxu0 %v6791_v8  ;;  %2265 = vmatpush.msra.mxu1 %v6803_v37  ;;  %v7257_v18 = vsel %vm1877_vm0, %v1871_v58, %v6786_v19  ;;  %v9771_v19 = vld [vmem:[#allocation93_spill] sm:$0xff]  ;;  %v9773_v8 = vld [vmem:[#allocation95_spill] sm:$0xff]  ;;  %v9774_v37 = vld [vmem:[#allocation96_spill] sm:$0xff] }
 0x235   : > { %2285 = vmatpush.msra.mxu2 %v6806_v47  ;;  %2305 = vmatpush.msra.mxu3 %v6809_v25  ;;  %v1885_v15 = vmul.f32 %v1883_v38, %v7257_v18  ;;  %v9775_v47 = vld [vmem:[#allocation97_spill] sm:$0xff]  ;;  %v9776_v25 = vld [vmem:[#allocation98_spill] sm:$0xff]  ;;  %v9817_v38 = vld [vmem:[#allocation147_spill] sm:$0xff] }
 0x236   : > { %2246 = vmatpush.msra.mxu0 %v6812_v29  ;;  %2105 = vmatmul.f32.vlgmr.msrb.gmra.mxu1 %v7257_v18  ;;  %v9777_v29 = vld [vmem:[#allocation99_spill] sm:$0xff]  ;;  %v9816_v40 = vld [vmem:[#allocation146_spill] sm:$0xff]  ;;  %v9818_v58 = vld [vmem:[#allocation148_spill] sm:$0xff] }
 0x237   : > { %2085 = vmatmul.f32.vlgmr.msrb.gmra.mxu0 %v7257_v18  ;;  %2125 = vmatmul.f32.vlgmr.msrb.gmra.mxu2 %v7257_v18  ;;  %4367 = vst [vmem:[%s5699_s20 + $0x30] sm:$0xff] %v1885_v15  ;;  %v9819_v15 = vld [vmem:[#allocation149_spill] sm:$0xff] }
 0x238   : > { %2145 = vmatmul.f32.vlgmr.msrb.gmra.mxu3 %v7257_v18  ;;  %2266 = vmatpush.msra.mxu1 %v6815_v51  ;;  %v9778_v51 = vld [vmem:[#allocation100_spill] sm:$0xff] }
 0x239   : > { %2286 = vmatpush.msra.mxu2 %v6818_v0  ;;  %2306 = vmatpush.msra.mxu3 %v6821_v45  ;;  %v9779_v0 = vld [vmem:[#allocation101_spill] sm:$0xff]  ;;  %v9780_v45 = vld [vmem:[#allocation102_spill] sm:$0xff] }
 0x23a   : > { %2247 = vmatpush.msra.mxu0 %v6824_v2  ;;  %2267 = vmatpush.msra.mxu1 %v6827_v39  ;;  %v9781_v2 = vld [vmem:[#allocation103_spill] sm:$0xff]  ;;  %v9782_v39 = vld [vmem:[#allocation104_spill] sm:$0xff] }
 0x23b   : > { %2287 = vmatpush.msra.mxu2 %v9761_v63  ;;  %2307 = vmatpush.msra.mxu3 %v9762_v46  ;;  %v9820_v63 = vld [vmem:[#allocation150_spill] sm:$0xff]  ;;  %v9821_v46 = vld [vmem:[#allocation151_spill] sm:$0xff]  ;;  %9902 = vst [vmem:[#allocation104_spill] sm:$0xff] %v7636_v61 }
 0x23c   : > { %2248 = vmatpush.msra.mxu0 %v9763_v12  ;;  %2268 = vmatpush.msra.mxu1 %v9764_v56  ;;  %v9822_v12 = vld [vmem:[#allocation152_spill] sm:$0xff]  ;;  %v9823_v56 = vld [vmem:[#allocation153_spill] sm:$0xff] }
 0x23d   : > { %2288 = vmatpush.msra.mxu2 %v9765_v11  ;;  %2308 = vmatpush.msra.mxu3 %v9766_v20  ;;  %v9824_v11 = vld [vmem:[#allocation154_spill] sm:$0xff]  ;;  %v9825_v20 = vld [vmem:[#allocation155_spill] sm:$0xff] }
 0x23e   : > { %2249 = vmatpush.msra.mxu0 %v9767_v41  ;;  %2269 = vmatpush.msra.mxu1 %v9768_v21  ;;  %v9826_v41 = vld [vmem:[#allocation156_spill] sm:$0xff]  ;;  %v9827_v21 = vld [vmem:[#allocation157_spill] sm:$0xff] }
 0x23f   : > { %2289 = vmatpush.msra.mxu2 %v9769_v5  ;;  %2309 = vmatpush.msra.mxu3 %v9770_v7  ;;  %v9828_v5 = vld [vmem:[#allocation158_spill] sm:$0xff]  ;;  %v9829_v7 = vld [vmem:[#allocation159_spill] sm:$0xff] }
 0x240   : > { %2250 = vmatpush.msra.mxu0 %v9771_v19  ;;  %2270 = vmatpush.msra.mxu1 %v9772_v9  ;;  %v9830_v19 = vld [vmem:[#allocation160_spill] sm:$0xff]  ;;  %v9831_v9 = vld [vmem:[#allocation161_spill] sm:$0xff] }
 0x241   : > { %2290 = vmatpush.msra.mxu2 %v9773_v8  ;;  %2310 = vmatpush.msra.mxu3 %v9774_v37  ;;  %v9832_v8 = vld [vmem:[#allocation162_spill] sm:$0xff]  ;;  %v9833_v37 = vld [vmem:[#allocation163_spill] sm:$0xff] }
 0x242   : > { %2251 = vmatpush.msra.mxu0 %v9775_v47  ;;  %2271 = vmatpush.msra.mxu1 %v9776_v25  ;;  %v9834_v47 = vld [vmem:[#allocation164_spill] sm:$0xff]  ;;  %v9835_v25 = vld [vmem:[#allocation165_spill] sm:$0xff] }
 0x243   : > { %2291 = vmatpush.msra.mxu2 %v9777_v29  ;;  %2311 = vmatpush.msra.mxu3 %v9778_v51  ;;  %v9836_v29 = vld [vmem:[#allocation166_spill] sm:$0xff]  ;;  %v9837_v51 = vld [vmem:[#allocation167_spill] sm:$0xff] }
 0x244   : > { %2252 = vmatpush.msra.mxu0 %v9779_v0  ;;  %2272 = vmatpush.msra.mxu1 %v9780_v45  ;;  %v9838_v0 = vld [vmem:[#allocation168_spill] sm:$0xff]  ;;  %v9839_v45 = vld [vmem:[#allocation169_spill] sm:$0xff] }
 0x245   : > { %2292 = vmatpush.msra.mxu2 %v9781_v2  ;;  %2312 = vmatpush.msra.mxu3 %v9782_v39  ;;  %v9840_v2 = vld [vmem:[#allocation170_spill] sm:$0xff]  ;;  %v9841_v39 = vld [vmem:[#allocation171_spill] sm:$0xff] }
 0x246   : > { %2253 = vmatpush.msra.mxu0 %v9783_v35  ;;  %2273 = vmatpush.msra.mxu1 %v9784_v53  ;;  %v9842_v35 = vld [vmem:[#allocation172_spill] sm:$0xff]  ;;  %v9843_v53 = vld [vmem:[#allocation173_spill] sm:$0xff] }
 0x247   : > { %2293 = vmatpush.msra.mxu2 %v9785_v13  ;;  %2313 = vmatpush.msra.mxu3 %v9786_v48  ;;  %v9844_v13 = vld [vmem:[#allocation174_spill] sm:$0xff]  ;;  %v9845_v48 = vld [vmem:[#allocation175_spill] sm:$0xff] }
 0x248   : > { %2254 = vmatpush.msra.mxu0 %v9787_v3  ;;  %2274 = vmatpush.msra.mxu1 %v9788_v16  ;;  %v9846_v3 = vld [vmem:[#allocation176_spill] sm:$0xff]  ;;  %v9847_v16 = vld [vmem:[#allocation177_spill] sm:$0xff] }
 0x249   : > { %2294 = vmatpush.msra.mxu2 %v9789_v59  ;;  %2314 = vmatpush.msra.mxu3 %v9790_v49  ;;  %v9848_v59 = vld [vmem:[#allocation178_spill] sm:$0xff]  ;;  %v9849_v49 = vld [vmem:[#allocation179_spill] sm:$0xff] }
 0x24a   : > { %2255 = vmatpush.msra.mxu0 %v9791_v26  ;;  %2275 = vmatpush.msra.mxu1 %v9792_v24  ;;  %v9850_v26 = vld [vmem:[#allocation180_spill] sm:$0xff]  ;;  %v9851_v24 = vld [vmem:[#allocation181_spill] sm:$0xff] }
 0x24b   : > { %2295 = vmatpush.msra.mxu2 %v9793_v30  ;;  %2315 = vmatpush.msra.mxu3 %v9794_v32  ;;  %v9852_v30 = vld [vmem:[#allocation182_spill] sm:$0xff]  ;;  %v9853_v32 = vld [vmem:[#allocation183_spill] sm:$0xff] }
 0x24c   : > { %2256 = vmatpush.msra.mxu0 %v9795_v52  ;;  %2276 = vmatpush.msra.mxu1 %v9796_v17  ;;  %v9854_v52 = vld [vmem:[#allocation184_spill] sm:$0xff]  ;;  %v9855_v17 = vld [vmem:[#allocation185_spill] sm:$0xff] }
 0x24d   : > { %2296 = vmatpush.msra.mxu2 %v9797_v36  ;;  %2316 = vmatpush.msra.mxu3 %v9798_v43  ;;  %v9856_v36 = vld [vmem:[#allocation186_spill] sm:$0xff]  ;;  %v9857_v43 = vld [vmem:[#allocation187_spill] sm:$0xff] }
 0x24e   : > { %2413 = vmatpush.msrb.mxu0 %v9799_v22  ;;  %2433 = vmatpush.msrb.mxu1 %v9800_v54  ;;  %v9858_v22 = vld [vmem:[#allocation188_spill] sm:$0xff]  ;;  %v9859_v54 = vld [vmem:[#allocation189_spill] sm:$0xff] }
 0x24f   : > { %2453 = vmatpush.msrb.mxu2 %v9801_v44  ;;  %2473 = vmatpush.msrb.mxu3 %v9802_v27  ;;  %v9860_v44 = vld [vmem:[#allocation190_spill] sm:$0xff]  ;;  %v9861_v27 = vld [vmem:[#allocation191_spill] sm:$0xff] }
 0x250   : > { %2414 = vmatpush.msrb.mxu0 %v9803_v60  ;;  %2434 = vmatpush.msrb.mxu1 %v9804_v62  ;;  %v9862_v60 = vld [vmem:[#allocation192_spill] sm:$0xff]  ;;  %v9863_v62 = vld [vmem:[#allocation71_spill] sm:$0xff] }
 0x251   : > { %2454 = vmatpush.msrb.mxu2 %v9805_v23  ;;  %2474 = vmatpush.msrb.mxu3 %v9806_v33  ;;  %v9864_v23 = vld [vmem:[#allocation110_spill] sm:$0xff] }
 0x252   : > { %2415 = vmatpush.msrb.mxu0 %v9807_v31  ;;  %2435 = vmatpush.msrb.mxu1 %v9808_v55  ;;  %v697_v33 = vadd.f32 %v9864_v23, %v9863_v62  ;;  %v9865_v31 = vld [vmem:[#allocation72_spill] sm:$0xff]  ;;  %v9866_v55 = vld [vmem:[#allocation111_spill] sm:$0xff] }
 0x253   : > { %2455 = vmatpush.msrb.mxu2 %v9809_v1  ;;  %2475 = vmatpush.msrb.mxu3 %v9810_v50  ;;  %v726_v1 = vadd.f32 %v9866_v55, %v9865_v31 }
 0x254   : > { %2416 = vmatpush.msrb.mxu0 %v9811_v57  ;;  %2436 = vmatpush.msrb.mxu1 %v9812_v42 }
 0x255   : > { %2456 = vmatpush.msrb.mxu2 %v9813_v4  ;;  %2476 = vmatpush.msrb.mxu3 %v9814_v28 }
 0x256   : > { %2417 = vmatpush.msrb.mxu0 %v9815_v14  ;;  %2437 = vmatpush.msrb.mxu1 %v9816_v40  ;;  %v9867_v40 = vld [vmem:[#allocation73_spill] sm:$0xff] }
 0x257   : > { %2457 = vmatpush.msrb.mxu2 %v9817_v38  ;;  %2477 = vmatpush.msrb.mxu3 %v9818_v58  ;;  %v9868_v38 = vld [vmem:[#allocation113_spill] sm:$0xff] }
 0x258   : > { %2418 = vmatpush.msrb.mxu0 %v9819_v15  ;;  %2438 = vmatpush.msrb.mxu1 %v9820_v63  ;;  %v784_v58 = vadd.f32 %v9868_v38, %v9867_v40 }
 0x259   : > { %2458 = vmatpush.msrb.mxu2 %v9821_v46  ;;  %2478 = vmatpush.msrb.mxu3 %v9822_v12 }
 0x25a   : > { %2419 = vmatpush.msrb.mxu0 %v9823_v56  ;;  %2439 = vmatpush.msrb.mxu1 %v9824_v11 }
 0x25b   : > { %2459 = vmatpush.msrb.mxu2 %v9825_v20  ;;  %2479 = vmatpush.msrb.mxu3 %v9826_v41 }
 0x25c   : > { %2420 = vmatpush.msrb.mxu0 %v9827_v21  ;;  %2440 = vmatpush.msrb.mxu1 %v9828_v5 }
 0x25d   : > { %2460 = vmatpush.msrb.mxu2 %v9829_v7  ;;  %2480 = vmatpush.msrb.mxu3 %v9830_v19  ;;  %v9869_v7 = vld [vmem:[#allocation75_spill] sm:$0xff]  ;;  %v9870_v19 = vld [vmem:[#allocation112_spill] sm:$0xff] }
 0x25e   : > { %2421 = vmatpush.msrb.mxu0 %v9831_v9  ;;  %2441 = vmatpush.msrb.mxu1 %v9832_v8  ;;  %v755_v9 = vadd.f32 %v9870_v19, %v9869_v7  ;;  %v9871_v8 = vld [vmem:[#allocation67_spill] sm:$0xff] }
 0x25f   : > { %2461 = vmatpush.msrb.mxu2 %v9833_v37  ;;  %2481 = vmatpush.msrb.mxu3 %v9834_v47  ;;  %v9872_v47 = vld [vmem:[#allocation68_spill] sm:$0xff] }
 0x260   : > { %2422 = vmatpush.msrb.mxu0 %v9835_v25  ;;  %2442 = vmatpush.msrb.mxu1 %v9836_v29 }
 0x261   : > { %2462 = vmatpush.msrb.mxu2 %v9837_v51  ;;  %2482 = vmatpush.msrb.mxu3 %v9838_v0 }
 0x262   : > { %2423 = vmatpush.msrb.mxu0 %v9839_v45  ;;  %2443 = vmatpush.msrb.mxu1 %v9840_v2 }
 0x263   : > { %2463 = vmatpush.msrb.mxu2 %v9841_v39  ;;  %2483 = vmatpush.msrb.mxu3 %v9842_v35 }
 0x264   : > { %2424 = vmatpush.msrb.mxu0 %v9843_v53  ;;  %2444 = vmatpush.msrb.mxu1 %v9844_v13 }
 0x265   : > { %2464 = vmatpush.msrb.mxu2 %v9845_v48  ;;  %2484 = vmatpush.msrb.mxu3 %v9846_v3 }
 0x266   : > { %2425 = vmatpush.msrb.mxu0 %v9847_v16  ;;  %2445 = vmatpush.msrb.mxu1 %v9848_v59  ;;  %v9873_v16 = vld [vmem:[#allocation70_spill] sm:$0xff] }
 0x267   : > { %2465 = vmatpush.msrb.mxu2 %v9849_v49  ;;  %2485 = vmatpush.msrb.mxu3 %v9850_v26 }
 0x268   : > { %2426 = vmatpush.msrb.mxu0 %v9851_v24  ;;  %2446 = vmatpush.msrb.mxu1 %v9852_v30 }
 0x269   : > { %2466 = vmatpush.msrb.mxu2 %v9853_v32  ;;  %2486 = vmatpush.msrb.mxu3 %v9854_v52 }
 0x26a   : > { %2427 = vmatpush.msrb.mxu0 %v9855_v17  ;;  %2447 = vmatpush.msrb.mxu1 %v9856_v36 }
 0x26b   : > { %2467 = vmatpush.msrb.mxu2 %v9857_v43  ;;  %2487 = vmatpush.msrb.mxu3 %v9858_v22 }
 0x26c   : > { %2428 = vmatpush.msrb.mxu0 %v9859_v54  ;;  %2448 = vmatpush.msrb.mxu1 %v9860_v44 }
 0x26d   : > { %2468 = vmatpush.msrb.mxu2 %v9861_v27  ;;  %2488 = vmatpush.msrb.mxu3 %v9862_v60 }
 0x2a7   : > { %v1914_v50 = vpop.f32.mrf.mxu0  ;;  %v1934_v57 = vpop.f32.mrf.mxu1 }
 0x2a8   : > { %v1977_v42 = vadd.f32 %v1914_v50, %v697_v33  ;;  %v1978_v4 = vadd.f32 %v1934_v57, %v726_v1 }
 0x2aa   : > { %v4369_v28 = vmul.f32 -1.442695, %v1977_v42  ;;  %v4370_v14 = vmul.f32 -1.442695, %v1978_v4 }
 0x2ac   : > { %4640 = vpow2.f32 %v4369_v28 }
 0x2ad   : > { %4642 = vpow2.f32 %v4370_v14 }
 0x2ae   : > { %v1974_v15 = vpop.f32.mrf.mxu3  ;;  %v1954_v5 = vpop.f32.mrf.mxu2 }
 0x2af   : > { %v1980_v63 = vadd.f32 %v1974_v15, %v784_v58  ;;  %v1979_v51 = vadd.f32 %v1954_v5, %v755_v9 }
 0x2b1   : > { %v4371_v46 = vmul.f32 -1.442695, %v1980_v63 }
 0x2b2   : > { %v4641_v12 = vpop.eup %4640 }
 0x2b3   : > { %v4643_v56 = vpop.eup %4642  ;;  %v1984_v11 = vadd.f32 1.0, %v4641_v12  ;;  %4644 = vpow2.f32 %v4371_v46  ;;  %v2106_v21 = vpop.f32.mrf.mxu1 }
 0x2b4   : > { %v2003_v20 = vadd.f32 1.0, %v4643_v56  ;;  %v2086_v41 = vpop.f32.mrf.mxu0  ;;  %v2150_v25 = vadd.f32 %v2106_v21, %v9872_v47  ;;  %v9875_v21 = vld [vmem:[#allocation69_spill] sm:$0xff]  ;;  %v7508_v47 = vld [vmem:[#allocation4 + $0x160] sm:$0xff] }
 0x2b5   : > { %4646 = vrcp.f32 %v1984_v11  ;;  %v2149_v37 = vadd.f32 %v2086_v41, %v9871_v8  ;;  %v1994_v24 = vand.u32 2147483647, %v1984_v11  ;;  %v1996_v30 = vand.u32 2147483648, %v1984_v11 }
 0x2b6   : > { %4648 = vrcp.f32 %v2003_v20  ;;  %v4375_v2 = vmul.f32 -1.442695, %v2150_v25  ;;  %v2015_v26 = vand.u32 2147483648, %v2003_v20  ;;  %v2013_v52 = vand.u32 2147483647, %v2003_v20 }
 0x2b7   : > { %v4374_v0 = vmul.f32 -1.442695, %v2149_v37  ;;  %vm1990_vm7 = vweird.f32 %v1984_v11  ;;  %vm2009_vm8 = vweird.f32 %v2003_v20  ;;  %vm1995_vm10 = vcmp.eq.f32.partialorder %v1994_v24, 8.507059e+37 }
 0x2b8   : > { %v1997_v60 = vor.u32 1.1754944e-38, %v1996_v30  ;;  %v2016_v1 = vor.u32 1.1754944e-38, %v2015_v26  ;;  %vm2014_vm12 = vcmp.eq.f32.partialorder %v2013_v52, 8.507059e+37 }
 0x2b9   : > { %v4645_v29 = vpop.eup %4644  ;;  %4650 = vpow2.f32 %v4374_v0 }
 0x2ba   : > { %v7384_v45 = vadd.f32 1.0, %v4645_v29  ;;  %v2126_v63 = vpop.f32.mrf.mxu2 }
 0x2bb   : > { %v4647_v39 = vpop.eup %4646  ;;  %v2146_v35 = vpop.f32.mrf.mxu3  ;;  %v2151_v5 = vadd.f32 %v2126_v63, %v9875_v21 }
 0x2bc   : > { %v4649_v53 = vpop.eup %4648  ;;  %v1986_v13 = vmul.f32 %v4647_v39, %v1984_v11  ;;  %4652 = vrcp.f32 %v7384_v45  ;;  %v2152_v59 = vadd.f32 %v2146_v35, %v9873_v16  ;;  %vm1991_vm5 = vweird.f32 %v4647_v39 }
 0x2bd   : > { %v2005_v48 = vmul.f32 %v4649_v53, %v2003_v20  ;;  %4654 = vtanh.f32 %v1979_v51  ;;  %vm2010_vm6 = vweird.f32 %v4649_v53  ;;  %vm1992_vm9 = vmor %vm1990_vm7, %vm1991_vm5  ;;  %v9874_v20 = vld [vmem:[#allocation74_spill] sm:$0xff]  ;;  %v2035_v19 = vand.u32 2147483648, %v7384_v45 }
 0x2be   : > { %v1987_v3 = vsub.f32 1.0, %v1986_v13  ;;  %4656 = vpow2.f32 %v4375_v2  ;;  %v4376_v17 = vmul.f32 -1.442695, %v2152_v59  ;;  %vm2011_vm11 = vmor %vm2009_vm8, %vm2010_vm6  ;;  %vm2049_vm13 = vcmp.eq.s32.totalorder %v9874_v20, 1  ;;  %v7474_v20 = vld [vmem:[#allocation4 + $0x1b0] sm:$0xff] }
 0x2bf   : > { %v2006_v49 = vsub.f32 1.0, %v2005_v48  ;;  %v4651_v36 = vpop.eup %4650  ;;  %vm2029_vm15 = vweird.f32 %v7384_v45  ;;  %v2033_v8 = vand.u32 2147483647, %v7384_v45  ;;  %v2036_v2 = vor.u32 1.1754944e-38, %v2035_v19  ;;  %v7487_v19 = vld [vmem:[#allocation4 + $0x180] sm:$0xff] }
 0x2c0   : > { %v1988_v32 = vmul.f32 %v4647_v39, %v1987_v3  ;;  %v7388_v44 = vadd.f32 1.0, %v4651_v36  ;;  %4658 = vpow2.f32 %v4376_v17  ;;  %v2055_v17 = vpop.permute.xlu0 %2054 }
 0x2c1   : > { %v2007_v43 = vmul.f32 %v4649_v53, %v2006_v49  ;;  %vm2034_vm3 = vcmp.eq.f32.partialorder %v2033_v8, 8.507059e+37  ;;  %v7612_v8 = vld [vmem:[#allocation4 + $0x98] sm:$0xff] }
 0x2c2   : > { %v4653_v22 = vpop.eup %4652  ;;  %v1989_v54 = vadd.f32 %v4647_v39, %v1988_v32  ;;  %4660 = vrcp.f32 %v7388_v44  ;;  %v2168_v29 = vand.u32 2147483648, %v7388_v44  ;;  %v2166_v35 = vand.u32 2147483647, %v7388_v44  ;;  %9894 = vst [vmem:[#allocation96_spill] sm:$0xff] %v7612_v8 }
 0x2c3   : > { %v4655_v27 = vpop.eup %4654  ;;  %v2008_v23 = vadd.f32 %v4649_v53, %v2007_v43  ;;  %v2025_v33 = vmul.f32 %v4653_v22, %v7384_v45  ;;  %vm2030_vm14 = vweird.f32 %v4653_v22  ;;  %vm2162_vm2 = vweird.f32 %v7388_v44 }
 0x2c4   : > { %v4657_v55 = vpop.eup %4656  ;;  %v1993_v50 = vsel %vm1992_vm9, %v4647_v39, %v1989_v54  ;;  %vm7405_vm0 = vmor %vm2029_vm15, %vm2030_vm14  ;;  %v2169_v3 = vor.u32 1.1754944e-38, %v2168_v29  ;;  %vm2167_vm6 = vcmp.eq.f32.partialorder %v2166_v35, 8.507059e+37 }
 0x2c5   : > { %v1998_v57 = vsel %vm1995_vm10, %v1997_v60, %v1993_v50  ;;  %v2012_v42 = vsel %vm2011_vm11, %v4649_v53, %v2008_v23  ;;  %v2026_v4 = vsub.f32 1.0, %v2025_v33  ;;  %v7392_v28 = vadd.f32 1.0, %v4657_v55  ;;  %v7439_v55 = vld [vmem:[#allocation4 + $0x1e0] sm:$0xff] }
 0x2c6   : > { %v2017_v14 = vsel %vm2014_vm12, %v2016_v1, %v2012_v42  ;;  %v2040_v38 = vmul.f32 %v4655_v27, %v1998_v57  ;;  %v4659_v46 = vpop.eup %4658  ;;  %v7442_v1 = vld [vmem:[#allocation4 + $0x1e8] sm:$0xff]  ;;  %v7446_v57 = vld [vmem:[#allocation4 + $0x1f0] sm:$0xff]  ;;  %v7449_v42 = vld [vmem:[#allocation4 + $0x1f8] sm:$0xff] }
 0x2c7   : > { %v2039_v58 = vmul.f32 %v2017_v14, %v7196_v6  ;;  %v2027_v15 = vmul.f32 %v4653_v22, %v2026_v4  ;;  %4662 = vrcp.f32 %v7392_v28  ;;  %v7396_v56 = vadd.f32 1.0, %v4659_v46  ;;  %v9878_v4 = vld [vmem:[#allocation76_spill] sm:$0xff]  ;;  %v7456_v14 = vld [vmem:[#allocation4 + $0x1c8] sm:$0xff] }
 0x2c8   : > { %v4661_v11 = vpop.eup %4660  ;;  %v2187_v48 = vand.u32 2147483648, %v7392_v28  ;;  %v2185_v26 = vand.u32 2147483647, %v7392_v28  ;;  %vm2181_vm7 = vweird.f32 %v7392_v28  ;;  %vm2221_vm10 = vcmp.eq.s32.totalorder %v9878_v4, 1  ;;  %v7467_v46 = vld [vmem:[#allocation4 + $0x1a0] sm:$0xff]  ;;  %v7597_v4 = vld [vmem:[#allocation4 + $0xb0] sm:$0xff] }
 0x2c9   : > { %v2041_v12 = vadd.f32 %v2040_v38, %v2039_v58  ;;  %v2028_v41 = vadd.f32 %v4653_v22, %v2027_v15  ;;  %v2158_v9 = vmul.f32 %v4661_v11, %v7388_v44  ;;  %vm2163_vm1 = vweird.f32 %v4661_v11  ;;  %v7459_v58 = vld [vmem:[#allocation4 + $0x1d0] sm:$0xff]  ;;  %v7462_v15 = vld [vmem:[#allocation4 + $0x1d8] sm:$0xff]  ;;  %9889 = vst [vmem:[#allocation91_spill] sm:$0xff] %v7597_v4 }
 0x2ca   : > { %vm2164_vm5 = vmor %vm2162_vm2, %vm2163_vm1  ;;  %v2188_v54 = vor.u32 1.1754944e-38, %v2187_v48  ;;  %vm2186_vm9 = vcmp.eq.f32.partialorder %v2185_v26, 8.507059e+37  ;;  %vm2201_vm12 = vweird.f32 %v7396_v56  ;;  %v7529_v48 = vld [vmem:[#allocation4 + $0x158] sm:$0xff]  ;;  %v2227_v26 = vpop.permute.xlu1 %2226 }
 0x2cb   : > { %4664 = vtanh.f32 %v2041_v12  ;;  %v2159_v25 = vsub.f32 1.0, %v2158_v9  ;;  %v7413_v51 = vsel %vm2049_vm13, %v2041_v12, %v7196_v6  ;;  %v2032_v45 = vsel %vm7405_vm0, %v4653_v22, %v2028_v41  ;;  %v7470_v12 = vld [vmem:[#allocation4 + $0x1a8] sm:$0xff]  ;;  %v7477_v41 = vld [vmem:[#allocation4 + $0x1b8] sm:$0xff] }
 0x2cc   : > { %4666 = vrcp.f32 %v7396_v56  ;;  %v2037_v16 = vsel %vm2034_vm3, %v2036_v2, %v2032_v45  ;;  %v7490_v9 = vld [vmem:[#allocation4 + $0x188] sm:$0xff]  ;;  %v7517_v45 = vld [vmem:[#allocation4 + $0x178] sm:$0xff]  ;;  %v7520_v2 = vld [vmem:[#allocation4 + $0x140] sm:$0xff] }
 0x2cd   : > { %v4663_v37 = vpop.eup %4662  ;;  %4668 = vtanh.f32 %v2151_v5  ;;  %v2160_v39 = vmul.f32 %v4661_v11, %v2159_v25  ;;  %v2205_v5 = vand.u32 2147483647, %v7396_v56  ;;  %v7511_v25 = vld [vmem:[#allocation4 + $0x168] sm:$0xff] }
 0x2ce   : > { %v2177_v0 = vmul.f32 %v4663_v37, %v7392_v28  ;;  %vm2182_vm4 = vweird.f32 %v4663_v37  ;;  %v7453_v28 = vld [vmem:[#allocation4 + $0x1c0] sm:$0xff] }
 0x2cf   : > { %v2161_v6 = vadd.f32 %v4661_v11, %v2160_v39  ;;  %vm2183_vm8 = vmor %vm2181_vm7, %vm2182_vm4  ;;  %vm2206_vm14 = vcmp.eq.f32.partialorder %v2205_v5, 8.507059e+37  ;;  %v7523_v39 = vld [vmem:[#allocation4 + $0x148] sm:$0xff]  ;;  %v7609_v5 = vld [vmem:[#allocation4 + $0x90] sm:$0xff] }
 0x2d0   : > { %v2178_v53 = vsub.f32 1.0, %v2177_v0  ;;  %v7514_v0 = vld [vmem:[#allocation4 + $0x170] sm:$0xff]  ;;  %9893 = vst [vmem:[#allocation95_spill] sm:$0xff] %v7609_v5 }
 0x2d1   : > { %v4665_v13 = vpop.eup %4664  ;;  %v2165_v30 = vsel %vm2164_vm5, %v4661_v11, %v2161_v6  ;;  %v2207_v11 = vand.u32 2147483648, %v7396_v56 }
 0x2d2   : > { %v7421_v59 = vpop.eup %4666  ;;  %v2179_v49 = vmul.f32 %v4663_v37, %v2178_v53  ;;  %v2043_v24 = vmul.f32 %v4665_v13, %v2037_v16  ;;  %v2170_v36 = vsel %vm2167_vm6, %v2169_v3, %v2165_v30  ;;  %v7526_v13 = vld [vmem:[#allocation4 + $0x150] sm:$0xff]  ;;  %v7532_v3 = vld [vmem:[#allocation4 + $0x120] sm:$0xff]  ;;  %v7535_v16 = vld [vmem:[#allocation4 + $0x128] sm:$0xff] }
 0x2d3   : > { %v2197_v32 = vmul.f32 %v7421_v59, %v7396_v56  ;;  %v4669_v52 = vpop.eup %4668  ;;  %vm2202_vm11 = vweird.f32 %v7421_v59  ;;  %v2208_v29 = vor.u32 1.1754944e-38, %v2207_v11  ;;  %v7549_v30 = vld [vmem:[#allocation4 + $0x100] sm:$0xff]  ;;  %v7606_v11 = vld [vmem:[#allocation4 + $0x88] sm:$0xff] }
 0x2d4   : > { %v2180_v43 = vadd.f32 %v4663_v37, %v2179_v49  ;;  %v7430_v22 = vsel %vm2049_vm13, %v2043_v24, %v7217_v10  ;;  %v2212_v44 = vmul.f32 %v4669_v52, %v2170_v36  ;;  %vm7495_vm13 = vmor %vm2201_vm12, %vm2202_vm11  ;;  %v7541_v49 = vld [vmem:[#allocation4 + $0x138] sm:$0xff]  ;;  %v7567_v36 = vld [vmem:[#allocation4 + $0xe0] sm:$0xff]  ;;  %9892 = vst [vmem:[#allocation94_spill] sm:$0xff] %v7606_v11 }
 0x2d5   : > { %v2198_v27 = vsub.f32 1.0, %v2197_v32  ;;  %v2057_v60 = vmul.f32 %v2055_v17, %v7430_v22  ;;  %2257 = vmatmul.f32.vlgmr.msra.gmra.mxu0 %v7430_v22  ;;  %2277 = vmatmul.f32.vlgmr.msra.gmra.mxu1 %v7430_v22  ;;  %v7552_v32 = vld [vmem:[#allocation4 + $0x108] sm:$0xff]  ;;  %v7564_v17 = vld [vmem:[#allocation4 + $0x118] sm:$0xff] }
 0x2d6   : > { %v2184_v23 = vsel %vm2183_vm8, %v4663_v37, %v2180_v43  ;;  %2297 = vmatmul.f32.vlgmr.msra.gmra.mxu2 %v7430_v22  ;;  %2317 = vmatmul.f32.vlgmr.msra.gmra.mxu3 %v7430_v22  ;;  %v7502_v37 = vld [vmem:[#allocation4 + $0x198] sm:$0xff]  ;;  %v7570_v43 = vld [vmem:[#allocation4 + $0xe8] sm:$0xff] }
 0x2d7   : > { %v2189_v33 = vsel %vm2186_vm9, %v2188_v54, %v2184_v23  ;;  %v2199_v10 = vmul.f32 %v7421_v59, %v2198_v27  ;;  %4372 = vst [vmem:[%s5697_s16 + $0x10] sm:$0xff] %v2057_v60  ;;  %2584 = vmatpush.msra.mxu0 %v7439_v55  ;;  %2604 = vmatpush.msra.mxu1 %v7442_v1  ;;  %v7573_v54 = vld [vmem:[#allocation4 + $0xf0] sm:$0xff]  ;;  %v7579_v27 = vld [vmem:[#allocation4 + $0xc0] sm:$0xff]  ;;  %v7582_v60 = vld [vmem:[#allocation4 + $0xc8] sm:$0xff] }
 0x2d8   : > { %v2211_v50 = vmul.f32 %v2189_v33, %v7234_v34  ;;  %2624 = vmatpush.msra.mxu2 %v7446_v57  ;;  %2644 = vmatpush.msra.mxu3 %v7449_v42  ;;  %9881 = vst [vmem:[#allocation83_spill] sm:$0xff] %v7573_v54  ;;  %v7585_v23 = vld [vmem:[#allocation4 + $0xd0] sm:$0xff]  ;;  %v7588_v33 = vld [vmem:[#allocation4 + $0xd8] sm:$0xff] }
 0x2d9   : > { %2585 = vmatpush.msra.mxu0 %v7453_v28  ;;  %2605 = vmatpush.msra.mxu1 %v7456_v14  ;;  %v2200_v63 = vadd.f32 %v7421_v59, %v2199_v10  ;;  %9883 = vst [vmem:[#allocation85_spill] sm:$0xff] %v7579_v27  ;;  %v7591_v10 = vld [vmem:[#allocation4 + $0xa0] sm:$0xff] }
 0x2da   : > { %v2213_v38 = vadd.f32 %v2212_v44, %v2211_v50  ;;  %2625 = vmatpush.msra.mxu2 %v7459_v58  ;;  %2645 = vmatpush.msra.mxu3 %v7462_v15  ;;  %v7576_v44 = vld [vmem:[#allocation4 + $0xf8] sm:$0xff]  ;;  %9884 = vst [vmem:[#allocation86_spill] sm:$0xff] %v7582_v60  ;;  %v7594_v50 = vld [vmem:[#allocation4 + $0xa8] sm:$0xff] }
 0x2db   : > { %2586 = vmatpush.msra.mxu0 %v7467_v46  ;;  %2606 = vmatpush.msra.mxu1 %v7470_v12  ;;  %v2204_v56 = vsel %vm7495_vm13, %v7421_v59, %v2200_v63  ;;  %v7538_v59 = vld [vmem:[#allocation4 + $0x130] sm:$0xff]  ;;  %9882 = vst [vmem:[#allocation84_spill] sm:$0xff] %v7576_v44  ;;  %v7603_v63 = vld [vmem:[#allocation4 + $0x80] sm:$0xff] }
 0x2dc   : > { %4670 = vtanh.f32 %v2213_v38  ;;  %2626 = vmatpush.msra.mxu2 %v7474_v20  ;;  %2646 = vmatpush.msra.mxu3 %v7477_v41  ;;  %v7483_v21 = vsel %vm2221_vm10, %v2213_v38, %v7234_v34  ;;  %v7499_v34 = vld [vmem:[#allocation4 + $0x190] sm:$0xff]  ;;  %v2209_v53 = vsel %vm2206_vm14, %v2208_v29, %v2204_v56  ;;  %9885 = vst [vmem:[#allocation87_spill] sm:$0xff] %v7585_v23  ;;  %v7600_v38 = vld [vmem:[#allocation4 + $0xb8] sm:$0xff]  ;;  %v7615_v56 = vld [vmem:[#allocation4 + $0x60] sm:$0xff] }
 0x2dd   : > { %2587 = vmatpush.msra.mxu0 %v7487_v19  ;;  %2607 = vmatpush.msra.mxu1 %v7490_v9  ;;  %9886 = vst [vmem:[#allocation88_spill] sm:$0xff] %v7588_v33  ;;  %v7618_v29 = vld [vmem:[#allocation4 + $0x68] sm:$0xff] }
 0x2de   : > { %2627 = vmatpush.msra.mxu2 %v7499_v34  ;;  %2647 = vmatpush.msra.mxu3 %v7502_v37  ;;  %9887 = vst [vmem:[#allocation89_spill] sm:$0xff] %v7591_v10 }
 0x2df   : > { %2588 = vmatpush.msra.mxu0 %v7508_v47  ;;  %2608 = vmatpush.msra.mxu1 %v7511_v25  ;;  %9888 = vst [vmem:[#allocation90_spill] sm:$0xff] %v7594_v50 }
 0x2e0   : > { %2628 = vmatpush.msra.mxu2 %v7514_v0  ;;  %2648 = vmatpush.msra.mxu3 %v7517_v45  ;;  %9890 = vst [vmem:[#allocation92_spill] sm:$0xff] %v7600_v38 }
 0x2e1   : > { %2589 = vmatpush.msra.mxu0 %v7520_v2  ;;  %2609 = vmatpush.msra.mxu1 %v7523_v39  ;;  %9891 = vst [vmem:[#allocation93_spill] sm:$0xff] %v7603_v63 }
 0x2e2   : > { %v4671_v35 = vpop.eup %4670  ;;  %2629 = vmatpush.msra.mxu2 %v7526_v13  ;;  %2649 = vmatpush.msra.mxu3 %v7529_v48  ;;  %9895 = vst [vmem:[#allocation97_spill] sm:$0xff] %v7615_v56 }
 0x2e3   : > { %v2215_v6 = vmul.f32 %v4671_v35, %v2209_v53  ;;  %2590 = vmatpush.msra.mxu0 %v7532_v3  ;;  %2610 = vmatpush.msra.mxu1 %v7535_v16  ;;  %9896 = vst [vmem:[#allocation98_spill] sm:$0xff] %v7618_v29  ;;  %v7621_v35 = vld [vmem:[#allocation4 + $0x70] sm:$0xff]  ;;  %v7624_v53 = vld [vmem:[#allocation4 + $0x78] sm:$0xff] }
 0x2e4   : > { %2630 = vmatpush.msra.mxu2 %v7538_v59  ;;  %2650 = vmatpush.msra.mxu3 %v7541_v49  ;;  %9897 = vst [vmem:[#allocation99_spill] sm:$0xff] %v7621_v35 }
 0x2e5   : > { %v7547_v24 = vsel %vm2221_vm10, %v2215_v6, %v7257_v18  ;;  %2591 = vmatpush.msra.mxu0 %v7549_v30  ;;  %2611 = vmatpush.msra.mxu1 %v7552_v32  ;;  %v7561_v18 = vld [vmem:[#allocation4 + $0x110] sm:$0xff]  ;;  %9898 = vst [vmem:[#allocation100_spill] sm:$0xff] %v7624_v53  ;;  %v7627_v6 = vld [vmem:[#allocation4 + $0x40] sm:$0xff] }
 0x2e6   : > { %v2229_v52 = vmul.f32 %v2227_v26, %v7547_v24  ;;  %2429 = vmatmul.f32.vlgmr.msrb.gmra.mxu0 %v7547_v24  ;;  %2449 = vmatmul.f32.vlgmr.msrb.gmra.mxu1 %v7547_v24  ;;  %9899 = vst [vmem:[#allocation101_spill] sm:$0xff] %v7627_v6  ;;  %v7630_v26 = vld [vmem:[#allocation4 + $0x48] sm:$0xff] }
 0x2e7   : > { %2469 = vmatmul.f32.vlgmr.msrb.gmra.mxu2 %v7547_v24  ;;  %2489 = vmatmul.f32.vlgmr.msrb.gmra.mxu3 %v7547_v24  ;;  %9900 = vst [vmem:[#allocation102_spill] sm:$0xff] %v7630_v26 }
 0x2e8   : > { %4377 = vst [vmem:[%s5699_s20 + $0x28] sm:$0xff] %v2229_v52  ;;  %2631 = vmatpush.msra.mxu2 %v7561_v18  ;;  %2651 = vmatpush.msra.mxu3 %v7564_v17  ;;  %v7633_v52 = vld [vmem:[#allocation4 + $0x50] sm:$0xff] }
 0x2e9   : > { %2592 = vmatpush.msra.mxu0 %v7567_v36  ;;  %2612 = vmatpush.msra.mxu1 %v7570_v43  ;;  %9901 = vst [vmem:[#allocation103_spill] sm:$0xff] %v7633_v52 }
 0x2ea   : > { %2632 = vmatpush.msra.mxu2 %v7573_v54  ;;  %2652 = vmatpush.msra.mxu3 %v7576_v44 }
 0x2eb   : > { %2593 = vmatpush.msra.mxu0 %v7579_v27  ;;  %2613 = vmatpush.msra.mxu1 %v7582_v60 }
 0x2ec   : > { %2633 = vmatpush.msra.mxu2 %v7585_v23  ;;  %2653 = vmatpush.msra.mxu3 %v7588_v33 }
 0x2ed   : > { %2594 = vmatpush.msra.mxu0 %v7591_v10  ;;  %2614 = vmatpush.msra.mxu1 %v7594_v50 }
 0x2ee   : > { %2634 = vmatpush.msra.mxu2 %v7597_v4  ;;  %2654 = vmatpush.msra.mxu3 %v7600_v38  ;;  %v9977_v38 = vld [vmem:[#allocation117_spill] sm:$0xff] }
 0x2ef   : > { %2595 = vmatpush.msra.mxu0 %v7603_v63  ;;  %2615 = vmatpush.msra.mxu1 %v7606_v11 }
 0x2f0   : > { %2635 = vmatpush.msra.mxu2 %v7609_v5  ;;  %2655 = vmatpush.msra.mxu3 %v7612_v8 }
 0x2f1   : > { %2596 = vmatpush.msra.mxu0 %v7615_v56  ;;  %2616 = vmatpush.msra.mxu1 %v7618_v29 }
 0x2f2   : > { %2636 = vmatpush.msra.mxu2 %v7621_v35  ;;  %2656 = vmatpush.msra.mxu3 %v7624_v53  ;;  %v7639_v35 = vld [vmem:[#allocation4 + $0x20] sm:$0xff]  ;;  %v7642_v53 = vld [vmem:[#allocation4 + $0x28] sm:$0xff] }
 0x2f3   : > { %2597 = vmatpush.msra.mxu0 %v7627_v6  ;;  %2617 = vmatpush.msra.mxu1 %v7630_v26  ;;  %9903 = vst [vmem:[#allocation105_spill] sm:$0xff] %v7639_v35  ;;  %v7645_v6 = vld [vmem:[#allocation4 + $0x30] sm:$0xff]  ;;  %v7648_v26 = vld [vmem:[#allocation4 + $0x38] sm:$0xff] }
 0x2f4   : > { %2637 = vmatpush.msra.mxu2 %v7633_v52  ;;  %2657 = vmatpush.msra.mxu3 %v7636_v61  ;;  %9904 = vst [vmem:[#allocation106_spill] sm:$0xff] %v7642_v53  ;;  %v7651_v52 = vld [vmem:[#allocation4] sm:$0xff]  ;;  %v7654_v61 = vld [vmem:[#allocation4 + $0x8] sm:$0xff] }
 0x2f5   : > { %2598 = vmatpush.msra.mxu0 %v7639_v35  ;;  %2618 = vmatpush.msra.mxu1 %v7642_v53  ;;  %9905 = vst [vmem:[#allocation107_spill] sm:$0xff] %v7645_v6  ;;  %v7657_v35 = vld [vmem:[#allocation4 + $0x10] sm:$0xff]  ;;  %v7660_v53 = vld [vmem:[#allocation4 + $0x18] sm:$0xff] }
 0x2f6   : > { %2638 = vmatpush.msra.mxu2 %v7645_v6  ;;  %9906 = vst [vmem:[#allocation108_spill] sm:$0xff] %v7648_v26  ;;  %2658 = vmatpush.msra.mxu3 %v7648_v26  ;;  %v7663_v6 = vld [vmem:[#allocation7 + $0x1e0] sm:$0xff]  ;;  %v7666_v26 = vld [vmem:[#allocation7 + $0x1e8] sm:$0xff] }
 0x2f7   : > { %9907 = vst [vmem:[#allocation109_spill] sm:$0xff] %v7651_v52  ;;  %2599 = vmatpush.msra.mxu0 %v7651_v52  ;;  %2619 = vmatpush.msra.mxu1 %v7654_v61  ;;  %v7669_v52 = vld [vmem:[#allocation7 + $0x1f0] sm:$0xff] }
 0x2f8   : > { %9908 = vst [vmem:[#allocation61_spill] sm:$0xff] %v7654_v61  ;;  %2639 = vmatpush.msra.mxu2 %v7657_v35  ;;  %2659 = vmatpush.msra.mxu3 %v7660_v53  ;;  %v7672_v61 = vld [vmem:[#allocation7 + $0x1f8] sm:$0xff] }
 0x2f9   : > { %9909 = vst [vmem:[#allocation78_spill] sm:$0xff] %v7657_v35  ;;  %2755 = vmatpush.msrb.mxu0 %v7663_v6  ;;  %2775 = vmatpush.msrb.mxu1 %v7666_v26  ;;  %v7675_v35 = vld [vmem:[#allocation7 + $0x1c0] sm:$0xff] }
 0x2fa   : > { %9910 = vst [vmem:[#allocation120_spill] sm:$0xff] %v7660_v53  ;;  %2795 = vmatpush.msrb.mxu2 %v7669_v52  ;;  %2815 = vmatpush.msrb.mxu3 %v7672_v61  ;;  %v7678_v53 = vld [vmem:[#allocation7 + $0x1c8] sm:$0xff] }
 0x2fb   : > { %9911 = vst [vmem:[#allocation121_spill] sm:$0xff] %v7663_v6  ;;  %2756 = vmatpush.msrb.mxu0 %v7675_v35  ;;  %2776 = vmatpush.msrb.mxu1 %v7678_v53  ;;  %v7681_v6 = vld [vmem:[#allocation7 + $0x1d0] sm:$0xff] }
 0x2fc   : > { %9912 = vst [vmem:[#allocation122_spill] sm:$0xff] %v7666_v26  ;;  %2796 = vmatpush.msrb.mxu2 %v7681_v6  ;;  %v7684_v26 = vld [vmem:[#allocation7 + $0x1d8] sm:$0xff] }
 0x2fd   : > { %9913 = vst [vmem:[#allocation123_spill] sm:$0xff] %v7669_v52  ;;  %2816 = vmatpush.msrb.mxu3 %v7684_v26  ;;  %v7687_v52 = vld [vmem:[#allocation7 + $0x1a0] sm:$0xff] }
 0x2fe   : > { %9914 = vst [vmem:[#allocation124_spill] sm:$0xff] %v7672_v61  ;;  %2757 = vmatpush.msrb.mxu0 %v7687_v52  ;;  %v7690_v61 = vld [vmem:[#allocation7 + $0x1a8] sm:$0xff] }
 0x2ff   : > { %9915 = vst [vmem:[#allocation125_spill] sm:$0xff] %v7675_v35  ;;  %2777 = vmatpush.msrb.mxu1 %v7690_v61  ;;  %v7693_v35 = vld [vmem:[#allocation7 + $0x1b0] sm:$0xff] }
 0x300   : > { %9916 = vst [vmem:[#allocation126_spill] sm:$0xff] %v7678_v53  ;;  %2797 = vmatpush.msrb.mxu2 %v7693_v35  ;;  %v7696_v53 = vld [vmem:[#allocation7 + $0x1b8] sm:$0xff] }
 0x301   : > { %9917 = vst [vmem:[#allocation127_spill] sm:$0xff] %v7681_v6  ;;  %2817 = vmatpush.msrb.mxu3 %v7696_v53  ;;  %v7699_v6 = vld [vmem:[#allocation7 + $0x180] sm:$0xff] }
 0x302   : > { %9918 = vst [vmem:[#allocation128_spill] sm:$0xff] %v7684_v26  ;;  %2758 = vmatpush.msrb.mxu0 %v7699_v6  ;;  %v7702_v26 = vld [vmem:[#allocation7 + $0x188] sm:$0xff] }
 0x303   : > { %9919 = vst [vmem:[#allocation129_spill] sm:$0xff] %v7687_v52  ;;  %2778 = vmatpush.msrb.mxu1 %v7702_v26  ;;  %v7705_v52 = vld [vmem:[#allocation7 + $0x190] sm:$0xff] }
 0x304   : > { %9920 = vst [vmem:[#allocation130_spill] sm:$0xff] %v7690_v61  ;;  %2798 = vmatpush.msrb.mxu2 %v7705_v52  ;;  %v7708_v61 = vld [vmem:[#allocation7 + $0x198] sm:$0xff] }
 0x305   : > { %9921 = vst [vmem:[#allocation131_spill] sm:$0xff] %v7693_v35  ;;  %2818 = vmatpush.msrb.mxu3 %v7708_v61  ;;  %v7711_v35 = vld [vmem:[#allocation7 + $0x160] sm:$0xff] }
 0x306   : > { %9922 = vst [vmem:[#allocation132_spill] sm:$0xff] %v7696_v53  ;;  %2759 = vmatpush.msrb.mxu0 %v7711_v35  ;;  %v7714_v53 = vld [vmem:[#allocation7 + $0x168] sm:$0xff] }
 0x307   : > { %9923 = vst [vmem:[#allocation133_spill] sm:$0xff] %v7699_v6  ;;  %2779 = vmatpush.msrb.mxu1 %v7714_v53  ;;  %v7717_v6 = vld [vmem:[#allocation7 + $0x170] sm:$0xff] }
 0x308   : > { %9924 = vst [vmem:[#allocation134_spill] sm:$0xff] %v7702_v26  ;;  %2799 = vmatpush.msrb.mxu2 %v7717_v6  ;;  %v7720_v26 = vld [vmem:[#allocation7 + $0x178] sm:$0xff] }
 0x309   : > { %9925 = vst [vmem:[#allocation135_spill] sm:$0xff] %v7705_v52  ;;  %2819 = vmatpush.msrb.mxu3 %v7720_v26  ;;  %v7723_v52 = vld [vmem:[#allocation7 + $0x140] sm:$0xff] }
 0x30a   : > { %9926 = vst [vmem:[#allocation136_spill] sm:$0xff] %v7708_v61  ;;  %2760 = vmatpush.msrb.mxu0 %v7723_v52  ;;  %v7726_v61 = vld [vmem:[#allocation7 + $0x148] sm:$0xff] }
 0x30b   : > { %9927 = vst [vmem:[#allocation137_spill] sm:$0xff] %v7711_v35  ;;  %2780 = vmatpush.msrb.mxu1 %v7726_v61  ;;  %v7729_v35 = vld [vmem:[#allocation7 + $0x150] sm:$0xff] }
 0x30c   : > { %9928 = vst [vmem:[#allocation138_spill] sm:$0xff] %v7714_v53  ;;  %2800 = vmatpush.msrb.mxu2 %v7729_v35  ;;  %v7732_v53 = vld [vmem:[#allocation7 + $0x158] sm:$0xff] }
 0x30d   : > { %9929 = vst [vmem:[#allocation139_spill] sm:$0xff] %v7717_v6  ;;  %2820 = vmatpush.msrb.mxu3 %v7732_v53  ;;  %v7735_v6 = vld [vmem:[#allocation7 + $0x120] sm:$0xff] }
 0x30e   : > { %9930 = vst [vmem:[#allocation140_spill] sm:$0xff] %v7720_v26  ;;  %2761 = vmatpush.msrb.mxu0 %v7735_v6  ;;  %v7738_v26 = vld [vmem:[#allocation7 + $0x128] sm:$0xff] }
 0x30f   : > { %9931 = vst [vmem:[#allocation141_spill] sm:$0xff] %v7723_v52  ;;  %2781 = vmatpush.msrb.mxu1 %v7738_v26  ;;  %v7741_v52 = vld [vmem:[#allocation7 + $0x130] sm:$0xff] }
 0x310   : > { %9932 = vst [vmem:[#allocation142_spill] sm:$0xff] %v7726_v61  ;;  %2801 = vmatpush.msrb.mxu2 %v7741_v52  ;;  %v7744_v61 = vld [vmem:[#allocation7 + $0x138] sm:$0xff] }
 0x311   : > { %9933 = vst [vmem:[#allocation143_spill] sm:$0xff] %v7729_v35  ;;  %2821 = vmatpush.msrb.mxu3 %v7744_v61  ;;  %v7747_v35 = vld [vmem:[#allocation7 + $0x100] sm:$0xff] }
 0x312   : > { %9934 = vst [vmem:[#allocation144_spill] sm:$0xff] %v7732_v53  ;;  %2762 = vmatpush.msrb.mxu0 %v7747_v35  ;;  %v7750_v53 = vld [vmem:[#allocation7 + $0x108] sm:$0xff] }
 0x313   : > { %9935 = vst [vmem:[#allocation145_spill] sm:$0xff] %v7735_v6  ;;  %2782 = vmatpush.msrb.mxu1 %v7750_v53  ;;  %v7753_v6 = vld [vmem:[#allocation7 + $0x110] sm:$0xff] }
 0x314   : > { %9936 = vst [vmem:[#allocation146_spill] sm:$0xff] %v7738_v26  ;;  %2802 = vmatpush.msrb.mxu2 %v7753_v6  ;;  %v7756_v26 = vld [vmem:[#allocation7 + $0x118] sm:$0xff] }
 0x315   : > { %9937 = vst [vmem:[#allocation147_spill] sm:$0xff] %v7741_v52  ;;  %2822 = vmatpush.msrb.mxu3 %v7756_v26  ;;  %v7759_v52 = vld [vmem:[#allocation7 + $0xe0] sm:$0xff] }
 0x316   : > { %9938 = vst [vmem:[#allocation148_spill] sm:$0xff] %v7744_v61  ;;  %2763 = vmatpush.msrb.mxu0 %v7759_v52  ;;  %v7762_v61 = vld [vmem:[#allocation7 + $0xe8] sm:$0xff] }
 0x317   : > { %9939 = vst [vmem:[#allocation149_spill] sm:$0xff] %v7747_v35  ;;  %2783 = vmatpush.msrb.mxu1 %v7762_v61  ;;  %v7765_v35 = vld [vmem:[#allocation7 + $0xf0] sm:$0xff] }
 0x318   : > { %9940 = vst [vmem:[#allocation150_spill] sm:$0xff] %v7750_v53  ;;  %2803 = vmatpush.msrb.mxu2 %v7765_v35  ;;  %v7768_v53 = vld [vmem:[#allocation7 + $0xf8] sm:$0xff] }
 0x319   : > { %9941 = vst [vmem:[#allocation151_spill] sm:$0xff] %v7753_v6  ;;  %2823 = vmatpush.msrb.mxu3 %v7768_v53  ;;  %v7771_v6 = vld [vmem:[#allocation7 + $0xc0] sm:$0xff] }
 0x31a   : > { %9942 = vst [vmem:[#allocation152_spill] sm:$0xff] %v7756_v26  ;;  %2764 = vmatpush.msrb.mxu0 %v7771_v6  ;;  %v7774_v26 = vld [vmem:[#allocation7 + $0xc8] sm:$0xff] }
 0x31b   : > { %9943 = vst [vmem:[#allocation153_spill] sm:$0xff] %v7759_v52  ;;  %2784 = vmatpush.msrb.mxu1 %v7774_v26  ;;  %v7777_v52 = vld [vmem:[#allocation7 + $0xd0] sm:$0xff] }
 0x31c   : > { %9944 = vst [vmem:[#allocation154_spill] sm:$0xff] %v7762_v61  ;;  %2804 = vmatpush.msrb.mxu2 %v7777_v52  ;;  %v7780_v61 = vld [vmem:[#allocation7 + $0xd8] sm:$0xff] }
 0x31d   : > { %9945 = vst [vmem:[#allocation155_spill] sm:$0xff] %v7765_v35  ;;  %2824 = vmatpush.msrb.mxu3 %v7780_v61  ;;  %v7783_v35 = vld [vmem:[#allocation7 + $0xa0] sm:$0xff] }
 0x31e   : > { %9946 = vst [vmem:[#allocation156_spill] sm:$0xff] %v7768_v53  ;;  %2765 = vmatpush.msrb.mxu0 %v7783_v35  ;;  %v7786_v53 = vld [vmem:[#allocation7 + $0xa8] sm:$0xff] }
 0x31f   : > { %9947 = vst [vmem:[#allocation157_spill] sm:$0xff] %v7771_v6  ;;  %2785 = vmatpush.msrb.mxu1 %v7786_v53  ;;  %v7789_v6 = vld [vmem:[#allocation7 + $0xb0] sm:$0xff] }
 0x320   : > { %9948 = vst [vmem:[#allocation158_spill] sm:$0xff] %v7774_v26  ;;  %2805 = vmatpush.msrb.mxu2 %v7789_v6  ;;  %v7792_v26 = vld [vmem:[#allocation7 + $0xb8] sm:$0xff] }
 0x321   : > { %9949 = vst [vmem:[#allocation159_spill] sm:$0xff] %v7777_v52  ;;  %2825 = vmatpush.msrb.mxu3 %v7792_v26  ;;  %v7795_v52 = vld [vmem:[#allocation7 + $0x80] sm:$0xff] }
 0x322   : > { %9950 = vst [vmem:[#allocation160_spill] sm:$0xff] %v7780_v61  ;;  %2766 = vmatpush.msrb.mxu0 %v7795_v52  ;;  %v7798_v61 = vld [vmem:[#allocation7 + $0x88] sm:$0xff] }
 0x323   : > { %9951 = vst [vmem:[#allocation161_spill] sm:$0xff] %v7783_v35  ;;  %2786 = vmatpush.msrb.mxu1 %v7798_v61  ;;  %v7801_v35 = vld [vmem:[#allocation7 + $0x90] sm:$0xff] }
 0x324   : > { %9952 = vst [vmem:[#allocation162_spill] sm:$0xff] %v7786_v53  ;;  %2806 = vmatpush.msrb.mxu2 %v7801_v35  ;;  %v7804_v53 = vld [vmem:[#allocation7 + $0x98] sm:$0xff] }
 0x325   : > { %9953 = vst [vmem:[#allocation163_spill] sm:$0xff] %v7789_v6  ;;  %2826 = vmatpush.msrb.mxu3 %v7804_v53  ;;  %v7807_v6 = vld [vmem:[#allocation7 + $0x60] sm:$0xff] }
 0x326   : > { %9954 = vst [vmem:[#allocation164_spill] sm:$0xff] %v7792_v26  ;;  %2767 = vmatpush.msrb.mxu0 %v7807_v6  ;;  %v7810_v26 = vld [vmem:[#allocation7 + $0x68] sm:$0xff] }
 0x327   : > { %9955 = vst [vmem:[#allocation165_spill] sm:$0xff] %v7795_v52  ;;  %2787 = vmatpush.msrb.mxu1 %v7810_v26  ;;  %v7813_v52 = vld [vmem:[#allocation7 + $0x70] sm:$0xff] }
 0x328   : > { %9956 = vst [vmem:[#allocation166_spill] sm:$0xff] %v7798_v61  ;;  %2807 = vmatpush.msrb.mxu2 %v7813_v52  ;;  %v7816_v61 = vld [vmem:[#allocation7 + $0x78] sm:$0xff] }
 0x329   : > { %9957 = vst [vmem:[#allocation167_spill] sm:$0xff] %v7801_v35  ;;  %2827 = vmatpush.msrb.mxu3 %v7816_v61  ;;  %v7819_v35 = vld [vmem:[#allocation7 + $0x40] sm:$0xff] }
 0x32a   : > { %9958 = vst [vmem:[#allocation168_spill] sm:$0xff] %v7804_v53  ;;  %2768 = vmatpush.msrb.mxu0 %v7819_v35  ;;  %v7822_v53 = vld [vmem:[#allocation7 + $0x48] sm:$0xff] }
 0x32b   : > { %9959 = vst [vmem:[#allocation169_spill] sm:$0xff] %v7807_v6  ;;  %2788 = vmatpush.msrb.mxu1 %v7822_v53  ;;  %v7825_v6 = vld [vmem:[#allocation7 + $0x50] sm:$0xff] }
 0x32c   : > { %9960 = vst [vmem:[#allocation170_spill] sm:$0xff] %v7810_v26  ;;  %2808 = vmatpush.msrb.mxu2 %v7825_v6  ;;  %v7828_v26 = vld [vmem:[#allocation7 + $0x58] sm:$0xff] }
 0x32d   : > { %9961 = vst [vmem:[#allocation171_spill] sm:$0xff] %v7813_v52  ;;  %2828 = vmatpush.msrb.mxu3 %v7828_v26  ;;  %v7831_v52 = vld [vmem:[#allocation7 + $0x20] sm:$0xff] }
 0x32e   : > { %9962 = vst [vmem:[#allocation172_spill] sm:$0xff] %v7816_v61  ;;  %2769 = vmatpush.msrb.mxu0 %v7831_v52  ;;  %v7834_v61 = vld [vmem:[#allocation7 + $0x28] sm:$0xff] }
 0x32f   : > { %9963 = vst [vmem:[#allocation173_spill] sm:$0xff] %v7819_v35  ;;  %2789 = vmatpush.msrb.mxu1 %v7834_v61  ;;  %v7837_v35 = vld [vmem:[#allocation7 + $0x30] sm:$0xff] }
 0x330   : > { %9964 = vst [vmem:[#allocation174_spill] sm:$0xff] %v7822_v53  ;;  %2809 = vmatpush.msrb.mxu2 %v7837_v35  ;;  %v7840_v53 = vld [vmem:[#allocation7 + $0x38] sm:$0xff] }
 0x331   : > { %9965 = vst [vmem:[#allocation175_spill] sm:$0xff] %v7825_v6  ;;  %2829 = vmatpush.msrb.mxu3 %v7840_v53  ;;  %v7843_v6 = vld [vmem:[#allocation7] sm:$0xff] }
 0x332   : > { %9966 = vst [vmem:[#allocation176_spill] sm:$0xff] %v7828_v26  ;;  %2770 = vmatpush.msrb.mxu0 %v7843_v6  ;;  %v7846_v26 = vld [vmem:[#allocation7 + $0x8] sm:$0xff] }
 0x333   : > { %9967 = vst [vmem:[#allocation177_spill] sm:$0xff] %v7831_v52  ;;  %2790 = vmatpush.msrb.mxu1 %v7846_v26  ;;  %v7849_v52 = vld [vmem:[#allocation7 + $0x10] sm:$0xff] }
 0x334   : > { %9968 = vst [vmem:[#allocation178_spill] sm:$0xff] %v7834_v61  ;;  %2810 = vmatpush.msrb.mxu2 %v7849_v52  ;;  %v7852_v61 = vld [vmem:[#allocation7 + $0x18] sm:$0xff] }
 0x335   : > { %9969 = vst [vmem:[#allocation179_spill] sm:$0xff] %v7837_v35  ;;  %2830 = vmatpush.msrb.mxu3 %v7852_v61  ;;  %v9975_v35 = vld [vmem:[#allocation114_spill] sm:$0xff] }
 0x336   : > { %9970 = vst [vmem:[#allocation180_spill] sm:$0xff] %v7840_v53  ;;  %v699_v29 = vadd.f32 %v9975_v35, %v9863_v62  ;;  %v9976_v53 = vld [vmem:[#allocation115_spill] sm:$0xff] }
 0x337   : > { %9971 = vst [vmem:[#allocation181_spill] sm:$0xff] %v7843_v6  ;;  %v728_v56 = vadd.f32 %v9976_v53, %v9865_v31 }
 0x338   : > { %9972 = vst [vmem:[#allocation182_spill] sm:$0xff] %v7846_v26 }
 0x339   : > { %9973 = vst [vmem:[#allocation183_spill] sm:$0xff] %v7849_v52  ;;  %v786_v52 = vadd.f32 %v9977_v38, %v9867_v40  ;;  %v9979_v38 = vld [vmem:[#allocation64_spill] sm:$0xff] }
 0x33a   : > { %9974 = vst [vmem:[#allocation184_spill] sm:$0xff] %v7852_v61 }
 0x352   : > { %v2258_v8 = vpop.f32.mrf.mxu0  ;;  %v2278_v6 = vpop.f32.mrf.mxu1 }
 0x353   : > { %v2321_v5 = vadd.f32 %v2258_v8, %v699_v29  ;;  %v2322_v11 = vadd.f32 %v2278_v6, %v728_v56  ;;  %v9978_v8 = vld [vmem:[#allocation116_spill] sm:$0xff] }
 0x355   : > { %v4379_v63 = vmul.f32 -1.442695, %v2321_v5  ;;  %v4380_v26 = vmul.f32 -1.442695, %v2322_v11  ;;  %v757_v5 = vadd.f32 %v9978_v8, %v9869_v7 }
 0x357   : > { %4672 = vpow2.f32 %v4379_v63 }
 0x358   : > { %4674 = vpow2.f32 %v4380_v26  ;;  %v9980_v26 = vld [vmem:[#allocation36_spill] sm:$0xff] }
 0x359   : > { %v2318_v4 = vpop.f32.mrf.mxu3  ;;  %v2298_v53 = vpop.f32.mrf.mxu2 }
 0x35a   : > { %v2324_v50 = vadd.f32 %v2318_v4, %v786_v52  ;;  %v2323_v29 = vadd.f32 %v2298_v53, %v757_v5 }
 0x35c   : > { %v4381_v61 = vmul.f32 -1.442695, %v2324_v50 }
 0x35d   : > { %v4673_v10 = vpop.eup %4672 }
 0x35e   : > { %v4675_v33 = vpop.eup %4674  ;;  %v2328_v35 = vadd.f32 1.0, %v4673_v10  ;;  %4676 = vpow2.f32 %v4381_v61 }
 0x35f   : > { %v2347_v62 = vadd.f32 1.0, %v4675_v33 }
 0x360   : > { %4678 = vrcp.f32 %v2328_v35  ;;  %v2338_v7 = vand.u32 2147483647, %v2328_v35  ;;  %v2340_v5 = vand.u32 2147483648, %v2328_v35  ;;  %vm2334_vm2 = vweird.f32 %v2328_v35 }
 0x361   : > { %4680 = vrcp.f32 %v2347_v62  ;;  %v2359_v53 = vand.u32 2147483648, %v2347_v62  ;;  %vm2353_vm1 = vweird.f32 %v2347_v62 }
 0x362   : > { %vm2339_vm4 = vcmp.eq.f32.partialorder %v2338_v7, 8.507059e+37 }
 0x363   : > { %v2430_v11 = vpop.f32.mrf.mxu0  ;;  %v2450_v63 = vpop.f32.mrf.mxu1 }
 0x364   : > { %v4677_v56 = vpop.eup %4676  ;;  %v2493_v6 = vadd.f32 %v2430_v11, %v9979_v38  ;;  %v2494_v4 = vadd.f32 %v2450_v63, %v9980_v26  ;;  %v9981_v38 = vld [vmem:[#allocation66_spill] sm:$0xff] }
 0x365   : > { %v7865_v50 = vadd.f32 1.0, %v4677_v56  ;;  %v2357_v56 = vand.u32 2147483647, %v2347_v62 }
 0x366   : > { %v4679_v52 = vpop.eup %4678  ;;  %v4384_v10 = vmul.f32 -1.442695, %v2493_v6  ;;  %v4385_v61 = vmul.f32 -1.442695, %v2494_v4 }
 0x367   : > { %v4681_v33 = vpop.eup %4680  ;;  %v2330_v40 = vmul.f32 %v4679_v52, %v2328_v35  ;;  %4682 = vrcp.f32 %v7865_v50  ;;  %vm2335_vm15 = vweird.f32 %v4679_v52  ;;  %vm2358_vm6 = vcmp.eq.f32.partialorder %v2357_v56, 8.507059e+37  ;;  %v9982_v56 = vld [vmem:[#allocation79_spill] sm:$0xff] }
 0x368   : > { %v2349_v31 = vmul.f32 %v4681_v33, %v2347_v62  ;;  %4684 = vtanh.f32 %v2323_v29  ;;  %vm2354_vm0 = vweird.f32 %v4681_v33  ;;  %vm2336_vm3 = vmor %vm2334_vm2, %vm2335_vm15  ;;  %vm2393_vm8 = vcmp.eq.s32.totalorder %v9982_v56, 1 }
 0x369   : > { %v2331_v8 = vsub.f32 1.0, %v2330_v40  ;;  %4686 = vpow2.f32 %v4384_v10  ;;  %vm2355_vm5 = vmor %vm2353_vm1, %vm2354_vm0  ;;  %vm2373_vm9 = vweird.f32 %v7865_v50 }
 0x36a   : > { %v2350_v23 = vsub.f32 1.0, %v2349_v31  ;;  %4688 = vpow2.f32 %v4385_v61  ;;  %v2490_v11 = vpop.f32.mrf.mxu3  ;;  %v2341_v31 = vor.u32 1.1754944e-38, %v2340_v5 }
 0x36b   : > { %v2332_v63 = vmul.f32 %v4679_v52, %v2331_v8  ;;  %v2496_v6 = vadd.f32 %v2490_v11, %v9981_v38  ;;  %v2360_v8 = vor.u32 1.1754944e-38, %v2359_v53  ;;  %v2470_v53 = vpop.f32.mrf.mxu2 }
 0x36c   : > { %v2351_v26 = vmul.f32 %v4681_v33, %v2350_v23 }
 0x36d   : > { %v4683_v4 = vpop.eup %4682  ;;  %v2333_v60 = vadd.f32 %v4679_v52, %v2332_v63  ;;  %v4386_v29 = vmul.f32 -1.442695, %v2496_v6 }
 0x36e   : > { %v4685_v40 = vpop.eup %4684  ;;  %v2352_v10 = vadd.f32 %v4681_v33, %v2351_v26  ;;  %v2369_v61 = vmul.f32 %v4683_v4, %v7865_v50  ;;  %vm2374_vm7 = vweird.f32 %v4683_v4 }
 0x36f   : > { %v4687_v27 = vpop.eup %4686  ;;  %v2337_v44 = vsel %vm2336_vm3, %v4679_v52, %v2333_v60  ;;  %4690 = vpow2.f32 %v4386_v29  ;;  %v9983_v29 = vld [vmem:[#allocation65_spill] sm:$0xff]  ;;  %vm2375_vm10 = vmor %vm2373_vm9, %vm2374_vm7 }
 0x370   : > { %v4689_v23 = vpop.eup %4688  ;;  %v2342_v11 = vsel %vm2339_vm4, %v2341_v31, %v2337_v44  ;;  %v2356_v38 = vsel %vm2355_vm5, %v4681_v33, %v2352_v10  ;;  %v2370_v62 = vsub.f32 1.0, %v2369_v61  ;;  %v2500_v63 = vadd.f32 1.0, %v4687_v27 }
 0x371   : > { %v2361_v35 = vsel %vm2358_vm6, %v2360_v8, %v2356_v38  ;;  %v2384_v6 = vmul.f32 %v4685_v40, %v2342_v11  ;;  %v7870_v54 = vadd.f32 1.0, %v4689_v23  ;;  %v2379_v44 = vand.u32 2147483648, %v7865_v50 }
 0x372   : > { %v2383_v7 = vmul.f32 %v2361_v35, %v7413_v51  ;;  %v2371_v5 = vmul.f32 %v4683_v4, %v2370_v62  ;;  %4692 = vrcp.f32 %v2500_v63  ;;  %v2377_v33 = vand.u32 2147483647, %v7865_v50 }
 0x373   : > { %4694 = vrcp.f32 %v7870_v54  ;;  %v2495_v40 = vadd.f32 %v2470_v53, %v9983_v29  ;;  %v2380_v11 = vor.u32 1.1754944e-38, %v2379_v44  ;;  %vm2506_vm14 = vweird.f32 %v2500_v63 }
 0x374   : > { %v2385_v26 = vadd.f32 %v2384_v6, %v2383_v7  ;;  %v2372_v52 = vadd.f32 %v4683_v4, %v2371_v5  ;;  %vm2378_vm11 = vcmp.eq.f32.partialorder %v2377_v33, 8.507059e+37  ;;  %v2531_v6 = vand.u32 2147483648, %v7870_v54 }
 0x375   : > { %v4691_v60 = vpop.eup %4690  ;;  %v2512_v7 = vand.u32 2147483648, %v2500_v63  ;;  %vm2525_vm15 = vweird.f32 %v7870_v54 }
 0x376   : > { %4696 = vtanh.f32 %v2385_v26  ;;  %v7876_v27 = vadd.f32 1.0, %v4691_v60  ;;  %v7884_v31 = vsel %vm2393_vm8, %v2385_v26, %v7413_v51  ;;  %v2376_v23 = vsel %vm2375_vm10, %v4683_v4, %v2372_v52  ;;  %v2399_v52 = vpop.permute.xlu2 %2398 }
 0x377   : > { %v2381_v51 = vsel %vm2378_vm11, %v2380_v11, %v2376_v23  ;;  %v2510_v26 = vand.u32 2147483647, %v2500_v63  ;;  %v2529_v4 = vand.u32 2147483647, %v7870_v54 }
 0x378   : > { %v4693_v10 = vpop.eup %4692  ;;  %4698 = vrcp.f32 %v7876_v27  ;;  %vm2545_vm6 = vweird.f32 %v7876_v27 }
 0x379   : > { %v4695_v61 = vpop.eup %4694  ;;  %v2502_v8 = vmul.f32 %v4693_v10, %v2500_v63  ;;  %4700 = vtanh.f32 %v2495_v40  ;;  %vm2507_vm12 = vweird.f32 %v4693_v10  ;;  %vm2511_vm2 = vcmp.eq.f32.partialorder %v2510_v26, 8.507059e+37  ;;  %v10012_v26 = vld [vmem:[#allocation61_spill] sm:$0xff] }
 0x37a   : > { %v2521_v38 = vmul.f32 %v4695_v61, %v7870_v54  ;;  %vm2526_vm13 = vweird.f32 %v4695_v61  ;;  %vm2508_vm0 = vmor %vm2506_vm14, %vm2507_vm12  ;;  %vm2530_vm3 = vcmp.eq.f32.partialorder %v2529_v4, 8.507059e+37  ;;  %v10016_v4 = vld [vmem:[#allocation122_spill] sm:$0xff] }
 0x37b   : > { %v2503_v62 = vsub.f32 1.0, %v2502_v8  ;;  %v2513_v8 = vor.u32 1.1754944e-38, %v2512_v7  ;;  %vm2527_vm1 = vmor %vm2525_vm15, %vm2526_vm13 }
 0x37c   : > { %v4697_v50 = vpop.eup %4696  ;;  %v2522_v35 = vsub.f32 1.0, %v2521_v38  ;;  %v2532_v38 = vor.u32 1.1754944e-38, %v2531_v6  ;;  %v10009_v6 = vld [vmem:[#allocation107_spill] sm:$0xff] }
 0x37d   : > { %v2504_v5 = vmul.f32 %v4693_v10, %v2503_v62  ;;  %v2387_v53 = vmul.f32 %v4697_v50, %v2381_v51  ;;  %v10010_v51 = vld [vmem:[#allocation108_spill] sm:$0xff] }
 0x37e   : > { %v7889_v60 = vpop.eup %4698  ;;  %v2523_v29 = vmul.f32 %v4695_v61, %v2522_v35 }
 0x37f   : > { %v2505_v44 = vadd.f32 %v4693_v10, %v2504_v5  ;;  %v2541_v33 = vmul.f32 %v7889_v60, %v7876_v27  ;;  %v7897_v40 = vsel %vm2393_vm8, %v2387_v53, %v7430_v22  ;;  %v4701_v63 = vpop.eup %4700  ;;  %vm2546_vm5 = vweird.f32 %v7889_v60  ;;  %v10011_v5 = vld [vmem:[#allocation109_spill] sm:$0xff]  ;;  %v10013_v53 = vld [vmem:[#allocation78_spill] sm:$0xff] }
 0x380   : > { %v2524_v23 = vadd.f32 %v4695_v61, %v2523_v29  ;;  %v2401_v11 = vmul.f32 %v2399_v52, %v7897_v40  ;;  %2600 = vmatmul.f32.vlgmr.msra.gmra.mxu0 %v7897_v40  ;;  %2620 = vmatmul.f32.vlgmr.msra.gmra.mxu1 %v7897_v40  ;;  %vm2547_vm7 = vmor %vm2545_vm6, %vm2546_vm5  ;;  %v10015_v29 = vld [vmem:[#allocation121_spill] sm:$0xff]  ;;  %v10017_v52 = vld [vmem:[#allocation123_spill] sm:$0xff] }
 0x381   : > { %v2509_v62 = vsel %vm2508_vm0, %v4693_v10, %v2505_v44  ;;  %v2542_v22 = vsub.f32 1.0, %v2541_v33  ;;  %2640 = vmatmul.f32.vlgmr.msra.gmra.mxu2 %v7897_v40  ;;  %2660 = vmatmul.f32.vlgmr.msra.gmra.mxu3 %v7897_v40  ;;  %v10018_v44 = vld [vmem:[#allocation124_spill] sm:$0xff]  ;;  %v10019_v33 = vld [vmem:[#allocation125_spill] sm:$0xff] }
 0x382   : > { %v2514_v54 = vsel %vm2511_vm2, %v2513_v8, %v2509_v62  ;;  %v2528_v56 = vsel %vm2527_vm1, %v4695_v61, %v2524_v23  ;;  %4382 = vst [vmem:[%s5697_s16 + $0x18] sm:$0xff] %v2401_v11  ;;  %2926 = vmatpush.msra.mxu0 %v7439_v55  ;;  %2946 = vmatpush.msra.mxu1 %v7442_v1  ;;  %v9984_v1 = vld [vmem:[#allocation193_spill] sm:$0xff]  ;;  %v10008_v61 = vld [vmem:[#allocation106_spill] sm:$0xff]  ;;  %v10021_v23 = vld [vmem:[#allocation127_spill] sm:$0xff] }
 0x383   : > { %v2533_v50 = vsel %vm2530_vm3, %v2532_v38, %v2528_v56  ;;  %v2556_v35 = vmul.f32 %v4701_v63, %v2514_v54  ;;  %v2543_v7 = vmul.f32 %v7889_v60, %v2542_v22  ;;  %2966 = vmatpush.msra.mxu2 %v7446_v57  ;;  %2986 = vmatpush.msra.mxu3 %v7449_v42  ;;  %vm2565_vm4 = vcmp.eq.s32.totalorder %v9984_v1, 1  ;;  %v10020_v8 = vld [vmem:[#allocation126_spill] sm:$0xff]  ;;  %v10022_v11 = vld [vmem:[#allocation128_spill] sm:$0xff]  ;;  %v10023_v63 = vld [vmem:[#allocation129_spill] sm:$0xff] }
 0x384   : > { %v2555_v10 = vmul.f32 %v2533_v50, %v7483_v21  ;;  %2927 = vmatpush.msra.mxu0 %v7453_v28  ;;  %2947 = vmatpush.msra.mxu1 %v7456_v14  ;;  %v2551_v42 = vand.u32 2147483648, %v7876_v27  ;;  %v2549_v14 = vand.u32 2147483647, %v7876_v27  ;;  %v10007_v27 = vld [vmem:[#allocation105_spill] sm:$0xff]  ;;  %v10024_v38 = vld [vmem:[#allocation130_spill] sm:$0xff]  ;;  %v10025_v62 = vld [vmem:[#allocation131_spill] sm:$0xff] }
 0x385   : > { %2967 = vmatpush.msra.mxu2 %v7459_v58  ;;  %2987 = vmatpush.msra.mxu3 %v7462_v15  ;;  %v2544_v57 = vadd.f32 %v7889_v60, %v2543_v7  ;;  %v10026_v22 = vld [vmem:[#allocation132_spill] sm:$0xff]  ;;  %v10027_v54 = vld [vmem:[#allocation133_spill] sm:$0xff]  ;;  %v10028_v56 = vld [vmem:[#allocation134_spill] sm:$0xff] }
 0x386   : > { %v2557_v55 = vadd.f32 %v2556_v35, %v2555_v10  ;;  %2928 = vmatpush.msra.mxu0 %v7467_v46  ;;  %2948 = vmatpush.msra.mxu1 %v7470_v12  ;;  %v2552_v15 = vor.u32 1.1754944e-38, %v2551_v42  ;;  %vm2550_vm8 = vcmp.eq.f32.partialorder %v2549_v14, 8.507059e+37  ;;  %v10029_v50 = vld [vmem:[#allocation135_spill] sm:$0xff]  ;;  %v10030_v35 = vld [vmem:[#allocation136_spill] sm:$0xff]  ;;  %v10031_v7 = vld [vmem:[#allocation137_spill] sm:$0xff] }
 0x387   : > { %2968 = vmatpush.msra.mxu2 %v7474_v20  ;;  %2988 = vmatpush.msra.mxu3 %v7477_v41  ;;  %v2548_v58 = vsel %vm2547_vm7, %v7889_v60, %v2544_v57  ;;  %v2571_v41 = vpop.permute.xlu0 %2570  ;;  %v10014_v60 = vld [vmem:[#allocation120_spill] sm:$0xff]  ;;  %v10032_v10 = vld [vmem:[#allocation138_spill] sm:$0xff]  ;;  %v10035_v57 = vld [vmem:[#allocation141_spill] sm:$0xff] }
 0x388   : > { %4702 = vtanh.f32 %v2557_v55  ;;  %2929 = vmatpush.msra.mxu0 %v7487_v19  ;;  %2949 = vmatpush.msra.mxu1 %v7490_v9  ;;  %v7930_v28 = vsel %vm2565_vm4, %v2557_v55, %v7483_v21  ;;  %v2553_v12 = vsel %vm2550_vm8, %v2552_v15, %v2548_v58  ;;  %v9985_v9 = vld [vmem:[#allocation83_spill] sm:$0xff]  ;;  %v10034_v1 = vld [vmem:[#allocation140_spill] sm:$0xff]  ;;  %v10036_v42 = vld [vmem:[#allocation142_spill] sm:$0xff] }
 0x389   : > { %2969 = vmatpush.msra.mxu2 %v7499_v34  ;;  %2989 = vmatpush.msra.mxu3 %v7502_v37  ;;  %v9986_v34 = vld [vmem:[#allocation84_spill] sm:$0xff]  ;;  %v9987_v37 = vld [vmem:[#allocation85_spill] sm:$0xff]  ;;  %v10033_v55 = vld [vmem:[#allocation139_spill] sm:$0xff] }
 0x38a   : > { %2930 = vmatpush.msra.mxu0 %v7508_v47  ;;  %2950 = vmatpush.msra.mxu1 %v7511_v25  ;;  %v9988_v47 = vld [vmem:[#allocation86_spill] sm:$0xff]  ;;  %v9989_v25 = vld [vmem:[#allocation87_spill] sm:$0xff]  ;;  %v10038_v58 = vld [vmem:[#allocation144_spill] sm:$0xff] }
 0x38b   : > { %2970 = vmatpush.msra.mxu2 %v7514_v0  ;;  %2990 = vmatpush.msra.mxu3 %v7517_v45  ;;  %v9990_v0 = vld [vmem:[#allocation88_spill] sm:$0xff]  ;;  %v9991_v45 = vld [vmem:[#allocation89_spill] sm:$0xff]  ;;  %v10037_v14 = vld [vmem:[#allocation143_spill] sm:$0xff] }
 0x38c   : > { %2931 = vmatpush.msra.mxu0 %v7520_v2  ;;  %2951 = vmatpush.msra.mxu1 %v7523_v39  ;;  %v9992_v2 = vld [vmem:[#allocation90_spill] sm:$0xff]  ;;  %v9993_v39 = vld [vmem:[#allocation91_spill] sm:$0xff]  ;;  %v10039_v15 = vld [vmem:[#allocation145_spill] sm:$0xff] }
 0x38d   : > { %2971 = vmatpush.msra.mxu2 %v7526_v13  ;;  %2991 = vmatpush.msra.mxu3 %v7529_v48  ;;  %v9994_v13 = vld [vmem:[#allocation92_spill] sm:$0xff]  ;;  %v9995_v48 = vld [vmem:[#allocation93_spill] sm:$0xff] }
 0x38e   : > { %v4703_v46 = vpop.eup %4702  ;;  %2932 = vmatpush.msra.mxu0 %v7532_v3  ;;  %2952 = vmatpush.msra.mxu1 %v7535_v16  ;;  %v9996_v3 = vld [vmem:[#allocation94_spill] sm:$0xff]  ;;  %v9997_v16 = vld [vmem:[#allocation95_spill] sm:$0xff] }
 0x38f   : > { %v2559_v20 = vmul.f32 %v4703_v46, %v2553_v12  ;;  %2972 = vmatpush.msra.mxu2 %v7538_v59  ;;  %2992 = vmatpush.msra.mxu3 %v7541_v49  ;;  %v9998_v59 = vld [vmem:[#allocation96_spill] sm:$0xff]  ;;  %v9999_v49 = vld [vmem:[#allocation97_spill] sm:$0xff]  ;;  %v10040_v46 = vld [vmem:[#allocation146_spill] sm:$0xff] }
 0x390   : > { %2933 = vmatpush.msra.mxu0 %v7549_v30  ;;  %2953 = vmatpush.msra.mxu1 %v7552_v32  ;;  %v10001_v30 = vld [vmem:[#allocation99_spill] sm:$0xff]  ;;  %v10002_v32 = vld [vmem:[#allocation100_spill] sm:$0xff] }
 0x391   : > { %v7954_v21 = vsel %vm2565_vm4, %v2559_v20, %v7547_v24  ;;  %2973 = vmatpush.msra.mxu2 %v7561_v18  ;;  %2993 = vmatpush.msra.mxu3 %v7564_v17  ;;  %v10000_v24 = vld [vmem:[#allocation98_spill] sm:$0xff]  ;;  %v10003_v18 = vld [vmem:[#allocation101_spill] sm:$0xff]  ;;  %v10041_v12 = vld [vmem:[#allocation147_spill] sm:$0xff] }
 0x392   : > { %v2573_v19 = vmul.f32 %v2571_v41, %v7954_v21  ;;  %2771 = vmatmul.f32.vlgmr.msrb.gmra.mxu0 %v7954_v21  ;;  %2791 = vmatmul.f32.vlgmr.msrb.gmra.mxu1 %v7954_v21  ;;  %v10004_v17 = vld [vmem:[#allocation102_spill] sm:$0xff]  ;;  %v10042_v20 = vld [vmem:[#allocation148_spill] sm:$0xff]  ;;  %v10043_v41 = vld [vmem:[#allocation149_spill] sm:$0xff] }
 0x393   : > { %2811 = vmatmul.f32.vlgmr.msrb.gmra.mxu2 %v7954_v21  ;;  %2831 = vmatmul.f32.vlgmr.msrb.gmra.mxu3 %v7954_v21 }
 0x394   : > { %4387 = vst [vmem:[%s5699_s20 + $0x20] sm:$0xff] %v2573_v19  ;;  %2934 = vmatpush.msra.mxu0 %v7567_v36  ;;  %2954 = vmatpush.msra.mxu1 %v7570_v43  ;;  %v10005_v36 = vld [vmem:[#allocation103_spill] sm:$0xff]  ;;  %v10006_v43 = vld [vmem:[#allocation104_spill] sm:$0xff]  ;;  %v10044_v19 = vld [vmem:[#allocation150_spill] sm:$0xff] }
 0x395   : > { %2974 = vmatpush.msra.mxu2 %v9985_v9  ;;  %2994 = vmatpush.msra.mxu3 %v9986_v34  ;;  %v10045_v9 = vld [vmem:[#allocation151_spill] sm:$0xff]  ;;  %v10046_v34 = vld [vmem:[#allocation152_spill] sm:$0xff] }
 0x396   : > { %2935 = vmatpush.msra.mxu0 %v9987_v37  ;;  %2955 = vmatpush.msra.mxu1 %v9988_v47  ;;  %v10047_v37 = vld [vmem:[#allocation153_spill] sm:$0xff]  ;;  %v10048_v47 = vld [vmem:[#allocation154_spill] sm:$0xff] }
 0x397   : > { %2975 = vmatpush.msra.mxu2 %v9989_v25  ;;  %2995 = vmatpush.msra.mxu3 %v9990_v0  ;;  %v10049_v25 = vld [vmem:[#allocation155_spill] sm:$0xff]  ;;  %v10050_v0 = vld [vmem:[#allocation156_spill] sm:$0xff] }
 0x398   : > { %2936 = vmatpush.msra.mxu0 %v9991_v45  ;;  %2956 = vmatpush.msra.mxu1 %v9992_v2  ;;  %v10051_v45 = vld [vmem:[#allocation157_spill] sm:$0xff]  ;;  %v10052_v2 = vld [vmem:[#allocation158_spill] sm:$0xff] }
 0x399   : > { %2976 = vmatpush.msra.mxu2 %v9993_v39  ;;  %2996 = vmatpush.msra.mxu3 %v9994_v13  ;;  %v10053_v39 = vld [vmem:[#allocation159_spill] sm:$0xff]  ;;  %v10054_v13 = vld [vmem:[#allocation160_spill] sm:$0xff] }
 0x39a   : > { %2937 = vmatpush.msra.mxu0 %v9995_v48  ;;  %2957 = vmatpush.msra.mxu1 %v9996_v3  ;;  %v10055_v48 = vld [vmem:[#allocation161_spill] sm:$0xff]  ;;  %v10056_v3 = vld [vmem:[#allocation162_spill] sm:$0xff] }
 0x39b   : > { %2977 = vmatpush.msra.mxu2 %v9997_v16  ;;  %2997 = vmatpush.msra.mxu3 %v9998_v59  ;;  %v10057_v16 = vld [vmem:[#allocation163_spill] sm:$0xff]  ;;  %v10058_v59 = vld [vmem:[#allocation164_spill] sm:$0xff] }
 0x39c   : > { %2938 = vmatpush.msra.mxu0 %v9999_v49  ;;  %2958 = vmatpush.msra.mxu1 %v10000_v24  ;;  %v10059_v49 = vld [vmem:[#allocation165_spill] sm:$0xff]  ;;  %v10060_v24 = vld [vmem:[#allocation166_spill] sm:$0xff] }
 0x39d   : > { %2978 = vmatpush.msra.mxu2 %v10001_v30  ;;  %2998 = vmatpush.msra.mxu3 %v10002_v32  ;;  %v10061_v30 = vld [vmem:[#allocation167_spill] sm:$0xff]  ;;  %v10062_v32 = vld [vmem:[#allocation168_spill] sm:$0xff] }
 0x39e   : > { %2939 = vmatpush.msra.mxu0 %v10003_v18  ;;  %2959 = vmatpush.msra.mxu1 %v10004_v17  ;;  %v10063_v18 = vld [vmem:[#allocation169_spill] sm:$0xff]  ;;  %v10064_v17 = vld [vmem:[#allocation170_spill] sm:$0xff] }
 0x39f   : > { %2979 = vmatpush.msra.mxu2 %v10005_v36  ;;  %2999 = vmatpush.msra.mxu3 %v10006_v43  ;;  %v10065_v36 = vld [vmem:[#allocation171_spill] sm:$0xff]  ;;  %v10066_v43 = vld [vmem:[#allocation172_spill] sm:$0xff] }
 0x3a0   : > { %2940 = vmatpush.msra.mxu0 %v10007_v27  ;;  %2960 = vmatpush.msra.mxu1 %v10008_v61  ;;  %v10067_v27 = vld [vmem:[#allocation173_spill] sm:$0xff]  ;;  %v10068_v61 = vld [vmem:[#allocation174_spill] sm:$0xff] }
 0x3a1   : > { %2980 = vmatpush.msra.mxu2 %v10009_v6  ;;  %3000 = vmatpush.msra.mxu3 %v10010_v51  ;;  %v10069_v6 = vld [vmem:[#allocation175_spill] sm:$0xff]  ;;  %v10070_v51 = vld [vmem:[#allocation176_spill] sm:$0xff] }
 0x3a2   : > { %2941 = vmatpush.msra.mxu0 %v10011_v5  ;;  %2961 = vmatpush.msra.mxu1 %v10012_v26  ;;  %v10071_v5 = vld [vmem:[#allocation177_spill] sm:$0xff]  ;;  %v10072_v26 = vld [vmem:[#allocation178_spill] sm:$0xff] }
 0x3a3   : > { %2981 = vmatpush.msra.mxu2 %v10013_v53  ;;  %3001 = vmatpush.msra.mxu3 %v10014_v60  ;;  %v10073_v53 = vld [vmem:[#allocation179_spill] sm:$0xff]  ;;  %v10074_v60 = vld [vmem:[#allocation180_spill] sm:$0xff] }
 0x3a4   : > { %3097 = vmatpush.msrb.mxu0 %v10015_v29  ;;  %3117 = vmatpush.msrb.mxu1 %v10016_v4  ;;  %v10075_v29 = vld [vmem:[#allocation181_spill] sm:$0xff]  ;;  %v10076_v4 = vld [vmem:[#allocation182_spill] sm:$0xff] }
 0x3a5   : > { %3137 = vmatpush.msrb.mxu2 %v10017_v52  ;;  %3157 = vmatpush.msrb.mxu3 %v10018_v44  ;;  %v10077_v52 = vld [vmem:[#allocation183_spill] sm:$0xff]  ;;  %v10078_v44 = vld [vmem:[#allocation184_spill] sm:$0xff] }
 0x3a6   : > { %3098 = vmatpush.msrb.mxu0 %v10019_v33  ;;  %3118 = vmatpush.msrb.mxu1 %v10020_v8  ;;  %v10079_v33 = vld [vmem:[#allocation71_spill] sm:$0xff]  ;;  %v10080_v8 = vld [vmem:[#allocation118_spill] sm:$0xff] }
 0x3a7   : > { %3138 = vmatpush.msrb.mxu2 %v10021_v23  ;;  %3158 = vmatpush.msrb.mxu3 %v10022_v11  ;;  %v702_v23 = vadd.f32 %v10080_v8, %v10079_v33  ;;  %v10081_v11 = vld [vmem:[#allocation72_spill] sm:$0xff] }
 0x3a8   : > { %3099 = vmatpush.msrb.mxu0 %v10023_v63  ;;  %3119 = vmatpush.msrb.mxu1 %v10024_v38  ;;  %v10082_v63 = vld [vmem:[#allocation119_spill] sm:$0xff] }
 0x3a9   : > { %3139 = vmatpush.msrb.mxu2 %v10025_v62  ;;  %3159 = vmatpush.msrb.mxu3 %v10026_v22  ;;  %v731_v38 = vadd.f32 %v10082_v63, %v10081_v11 }
 0x3aa   : > { %3100 = vmatpush.msrb.mxu0 %v10027_v54  ;;  %3120 = vmatpush.msrb.mxu1 %v10028_v56 }
 0x3ab   : > { %3140 = vmatpush.msrb.mxu2 %v10029_v50  ;;  %3160 = vmatpush.msrb.mxu3 %v10030_v35 }
 0x3ac   : > { %3101 = vmatpush.msrb.mxu0 %v10031_v7  ;;  %3121 = vmatpush.msrb.mxu1 %v10032_v10  ;;  %v10083_v7 = vld [vmem:[#allocation73_spill] sm:$0xff] }
 0x3ad   : > { %3141 = vmatpush.msrb.mxu2 %v10033_v55  ;;  %3161 = vmatpush.msrb.mxu3 %v10034_v1  ;;  %v10084_v10 = vld [vmem:[#allocation33_spill] sm:$0xff] }
 0x3ae   : > { %3102 = vmatpush.msrb.mxu0 %v10035_v57  ;;  %3122 = vmatpush.msrb.mxu1 %v10036_v42  ;;  %v789_v55 = vadd.f32 %v10084_v10, %v10083_v7 }
 0x3af   : > { %3142 = vmatpush.msrb.mxu2 %v10037_v14  ;;  %3162 = vmatpush.msrb.mxu3 %v10038_v58 }
 0x3b0   : > { %3103 = vmatpush.msrb.mxu0 %v10039_v15  ;;  %3123 = vmatpush.msrb.mxu1 %v10040_v46 }
 0x3b1   : > { %3143 = vmatpush.msrb.mxu2 %v10041_v12  ;;  %3163 = vmatpush.msrb.mxu3 %v10042_v20  ;;  %v10085_v20 = vld [vmem:[#allocation75_spill] sm:$0xff] }
 0x3b2   : > { %3104 = vmatpush.msrb.mxu0 %v10043_v41  ;;  %3124 = vmatpush.msrb.mxu1 %v10044_v19  ;;  %v10086_v41 = vld [vmem:[#allocation32_spill] sm:$0xff] }
 0x3b3   : > { %3144 = vmatpush.msrb.mxu2 %v10045_v9  ;;  %3164 = vmatpush.msrb.mxu3 %v10046_v34  ;;  %v760_v19 = vadd.f32 %v10086_v41, %v10085_v20 }
 0x3b4   : > { %3105 = vmatpush.msrb.mxu0 %v10047_v37  ;;  %3125 = vmatpush.msrb.mxu1 %v10048_v47 }
 0x3b5   : > { %3145 = vmatpush.msrb.mxu2 %v10049_v25  ;;  %3165 = vmatpush.msrb.mxu3 %v10050_v0  ;;  %v10087_v0 = vld [vmem:[#allocation59_spill] sm:$0xff] }
 0x3b6   : > { %3106 = vmatpush.msrb.mxu0 %v10051_v45  ;;  %3126 = vmatpush.msrb.mxu1 %v10052_v2  ;;  %v10088_v2 = vld [vmem:[#allocation60_spill] sm:$0xff] }
 0x3b7   : > { %3146 = vmatpush.msrb.mxu2 %v10053_v39  ;;  %3166 = vmatpush.msrb.mxu3 %v10054_v13 }
 0x3b8   : > { %3107 = vmatpush.msrb.mxu0 %v10055_v48  ;;  %3127 = vmatpush.msrb.mxu1 %v10056_v3 }
 0x3b9   : > { %3147 = vmatpush.msrb.mxu2 %v10057_v16  ;;  %3167 = vmatpush.msrb.mxu3 %v10058_v59 }
 0x3ba   : > { %3108 = vmatpush.msrb.mxu0 %v10059_v49  ;;  %3128 = vmatpush.msrb.mxu1 %v10060_v24 }
 0x3bb   : > { %3148 = vmatpush.msrb.mxu2 %v10061_v30  ;;  %3168 = vmatpush.msrb.mxu3 %v10062_v32 }
 0x3bc   : > { %3109 = vmatpush.msrb.mxu0 %v10063_v18  ;;  %3129 = vmatpush.msrb.mxu1 %v10064_v17 }
 0x3bd   : > { %3149 = vmatpush.msrb.mxu2 %v10065_v36  ;;  %3169 = vmatpush.msrb.mxu3 %v10066_v43 }
 0x3be   : > { %3110 = vmatpush.msrb.mxu0 %v10067_v27  ;;  %3130 = vmatpush.msrb.mxu1 %v10068_v61 }
 0x3bf   : > { %3150 = vmatpush.msrb.mxu2 %v10069_v6  ;;  %3170 = vmatpush.msrb.mxu3 %v10070_v51  ;;  %v10089_v6 = vld [vmem:[#allocation63_spill] sm:$0xff] }
 0x3c0   : > { %3111 = vmatpush.msrb.mxu0 %v10071_v5  ;;  %3131 = vmatpush.msrb.mxu1 %v10072_v26 }
 0x3c1   : > { %3151 = vmatpush.msrb.mxu2 %v10073_v53  ;;  %3171 = vmatpush.msrb.mxu3 %v10074_v60 }
 0x3c2   : > { %3112 = vmatpush.msrb.mxu0 %v10075_v29  ;;  %3132 = vmatpush.msrb.mxu1 %v10076_v4 }
 0x3c3   : > { %3152 = vmatpush.msrb.mxu2 %v10077_v52  ;;  %3172 = vmatpush.msrb.mxu3 %v10078_v44 }
 0x3fd   : > { %v2601_v62 = vpop.f32.mrf.mxu0  ;;  %v2621_v22 = vpop.f32.mrf.mxu1 }
 0x3fe   : > { %v2664_v54 = vadd.f32 %v2601_v62, %v702_v23  ;;  %v2665_v56 = vadd.f32 %v2621_v22, %v731_v38 }
 0x400   : > { %v4389_v50 = vmul.f32 -1.442695, %v2664_v54  ;;  %v4390_v35 = vmul.f32 -1.442695, %v2665_v56 }
 0x402   : > { %4704 = vpow2.f32 %v4389_v50 }
 0x403   : > { %4706 = vpow2.f32 %v4390_v35 }
 0x404   : > { %v2661_v1 = vpop.f32.mrf.mxu3  ;;  %v2641_v12 = vpop.f32.mrf.mxu2 }
 0x405   : > { %v2667_v57 = vadd.f32 %v2661_v1, %v789_v55  ;;  %v2666_v47 = vadd.f32 %v2641_v12, %v760_v19 }
 0x407   : > { %v4391_v42 = vmul.f32 -1.442695, %v2667_v57 }
 0x408   : > { %v4705_v14 = vpop.eup %4704 }
 0x409   : > { %v4707_v58 = vpop.eup %4706  ;;  %v2671_v15 = vadd.f32 1.0, %v4705_v14  ;;  %4708 = vpow2.f32 %v4391_v42  ;;  %v10090_v42 = vld [vmem:[#allocation77_spill] sm:$0xff] }
 0x40a   : > { %v2690_v46 = vadd.f32 1.0, %v4707_v58  ;;  %vm2736_vm2 = vcmp.eq.s32.totalorder %v10090_v42, 1 }
 0x40b   : > { %4710 = vrcp.f32 %v2671_v15  ;;  %v2681_v18 = vand.u32 2147483647, %v2671_v15  ;;  %v2683_v17 = vand.u32 2147483648, %v2671_v15  ;;  %vm2677_vm11 = vweird.f32 %v2671_v15 }
 0x40c   : > { %4712 = vrcp.f32 %v2690_v46  ;;  %v2702_v32 = vand.u32 2147483648, %v2690_v46  ;;  %v2700_v43 = vand.u32 2147483647, %v2690_v46  ;;  %vm2696_vm12 = vweird.f32 %v2690_v46 }
 0x40d   : > { %v2684_v53 = vor.u32 1.1754944e-38, %v2683_v17  ;;  %vm2682_vm15 = vcmp.eq.f32.partialorder %v2681_v18, 8.507059e+37 }
 0x40e   : > { %v2703_v52 = vor.u32 1.1754944e-38, %v2702_v32  ;;  %vm2701_vm0 = vcmp.eq.f32.partialorder %v2700_v43, 8.507059e+37 }
 0x40f   : > { %v4709_v9 = vpop.eup %4708  ;;  %v2772_v34 = vpop.f32.mrf.mxu0 }
 0x410   : > { %v2792_v37 = vpop.f32.mrf.mxu1  ;;  %v8068_v25 = vadd.f32 1.0, %v4709_v9  ;;  %v2835_v45 = vadd.f32 %v2772_v34, %v10087_v0 }
 0x411   : > { %v2836_v39 = vadd.f32 %v2792_v37, %v10088_v2  ;;  %v4711_v13 = vpop.eup %4710  ;;  %v10091_v37 = vld [vmem:[#allocation62_spill] sm:$0xff] }
 0x412   : > { %v4713_v48 = vpop.eup %4712  ;;  %v2673_v3 = vmul.f32 %v4711_v13, %v2671_v15  ;;  %4714 = vrcp.f32 %v8068_v25  ;;  %v4394_v49 = vmul.f32 -1.442695, %v2835_v45  ;;  %vm2678_vm9 = vweird.f32 %v4711_v13 }
 0x413   : > { %v2692_v16 = vmul.f32 %v4713_v48, %v2690_v46  ;;  %4716 = vtanh.f32 %v2666_v47  ;;  %v4395_v24 = vmul.f32 -1.442695, %v2836_v39  ;;  %vm2697_vm10 = vweird.f32 %v4713_v48  ;;  %vm2679_vm13 = vmor %vm2677_vm11, %vm2678_vm9 }
 0x414   : > { %v2674_v59 = vsub.f32 1.0, %v2673_v3  ;;  %4718 = vpow2.f32 %v4394_v49  ;;  %vm2698_vm14 = vmor %vm2696_vm12, %vm2697_vm10  ;;  %v2722_v14 = vand.u32 2147483648, %v8068_v25  ;;  %vm2716_vm3 = vweird.f32 %v8068_v25 }
 0x415   : > { %v2693_v30 = vsub.f32 1.0, %v2692_v16  ;;  %4720 = vpow2.f32 %v4395_v24  ;;  %v2720_v15 = vand.u32 2147483647, %v8068_v25 }
 0x416   : > { %v2675_v36 = vmul.f32 %v4711_v13, %v2674_v59  ;;  %v2832_v27 = vpop.f32.mrf.mxu3  ;;  %v2812_v46 = vpop.f32.mrf.mxu2  ;;  %v2723_v34 = vor.u32 1.1754944e-38, %v2722_v14  ;;  %v8170_v14 = vld [vmem:[#allocation4 + $0x180] sm:$0xff] }
 0x417   : > { %v2694_v61 = vmul.f32 %v4713_v48, %v2693_v30  ;;  %v2838_v51 = vadd.f32 %v2832_v27, %v10089_v6  ;;  %v2837_v47 = vadd.f32 %v2812_v46, %v10091_v37  ;;  %vm2721_vm5 = vcmp.eq.f32.partialorder %v2720_v15, 8.507059e+37  ;;  %v2742_v59 = vpop.permute.xlu1 %2741  ;;  %v10096_v15 = vld [vmem:[#allocation81_spill] sm:$0xff]  ;;  %v8186_v37 = vld [vmem:[#allocation4 + $0x160] sm:$0xff]  ;;  %v8247_v27 = vld [vmem:[#allocation4 + $0x118] sm:$0xff] }
 0x418   : > { %v4715_v5 = vpop.eup %4714  ;;  %v2676_v26 = vadd.f32 %v4711_v13, %v2675_v36 }
 0x419   : > { %v2695_v60 = vadd.f32 %v4713_v48, %v2694_v61  ;;  %v2712_v29 = vmul.f32 %v4715_v5, %v8068_v25  ;;  %v4717_v4 = vpop.eup %4716  ;;  %v4396_v8 = vmul.f32 -1.442695, %v2838_v51  ;;  %vm2717_vm1 = vweird.f32 %v4715_v5  ;;  %v8123_v51 = vld [vmem:[#allocation4 + $0x1e0] sm:$0xff] }
 0x41a   : > { %v2680_v44 = vsel %vm2679_vm13, %v4711_v13, %v2676_v26  ;;  %v4719_v62 = vpop.eup %4718  ;;  %vm2718_vm4 = vmor %vm2716_vm3, %vm2717_vm1  ;;  %v2913_v26 = vpop.permute.xlu2 %2912 }
 0x41b   : > { %v2685_v23 = vsel %vm2682_vm15, %v2684_v53, %v2680_v44  ;;  %v2699_v63 = vsel %vm2698_vm14, %v4713_v48, %v2695_v60  ;;  %v2713_v38 = vsub.f32 1.0, %v2712_v29  ;;  %4722 = vpow2.f32 %v4396_v8  ;;  %v4721_v56 = vpop.eup %4720 }
 0x41c   : > { %v2704_v22 = vsel %vm2701_vm0, %v2703_v52, %v2699_v63  ;;  %v2727_v54 = vmul.f32 %v4717_v4, %v2685_v23  ;;  %v8076_v10 = vadd.f32 1.0, %v4719_v62  ;;  %v8078_v55 = vadd.f32 1.0, %v4721_v56  ;;  %v8136_v4 = vld [vmem:[#allocation4 + $0x1f0] sm:$0xff]  ;;  %v8139_v52 = vld [vmem:[#allocation4 + $0x1f8] sm:$0xff]  ;;  %v8144_v63 = vld [vmem:[#allocation4 + $0x1c0] sm:$0xff] }
 0x41d   : > { %v2726_v50 = vmul.f32 %v2704_v22, %v7884_v31  ;;  %v2714_v35 = vmul.f32 %v4715_v5, %v2713_v38  ;;  %v8147_v38 = vld [vmem:[#allocation4 + $0x1c8] sm:$0xff]  ;;  %v8151_v56 = vld [vmem:[#allocation4 + $0x1d0] sm:$0xff]  ;;  %vm2907_vm14 = vcmp.eq.s32.totalorder %v10096_v15, 1  ;;  %v8297_v15 = vld [vmem:[#allocation4 + $0x80] sm:$0xff] }
 0x41e   : > { %4724 = vrcp.f32 %v8076_v10  ;;  %v2873_v3 = vand.u32 2147483648, %v8078_v55  ;;  %v2854_v16 = vand.u32 2147483648, %v8076_v10  ;;  %v2852_v24 = vand.u32 2147483647, %v8076_v10  ;;  %10112 = vst [vmem:[#allocation68_spill] sm:$0xff] %v8297_v15 }
 0x41f   : > { %v2728_v1 = vadd.f32 %v2727_v54, %v2726_v50  ;;  %v2715_v57 = vadd.f32 %v4715_v5, %v2714_v35  ;;  %4726 = vrcp.f32 %v8078_v55  ;;  %v2871_v17 = vand.u32 2147483647, %v8078_v55  ;;  %v8154_v50 = vld [vmem:[#allocation4 + $0x1d8] sm:$0xff] }
 0x420   : > { %vm2848_vm8 = vweird.f32 %v8076_v10  ;;  %vm2867_vm9 = vweird.f32 %v8078_v55  ;;  %v2855_v61 = vor.u32 1.1754944e-38, %v2854_v16  ;;  %v2874_v53 = vor.u32 1.1754944e-38, %v2873_v3  ;;  %v8226_v16 = vld [vmem:[#allocation4 + $0x120] sm:$0xff] }
 0x421   : > { %4728 = vtanh.f32 %v2728_v1  ;;  %v4723_v58 = vpop.eup %4722  ;;  %v8089_v12 = vsel %vm2736_vm2, %v2728_v1, %v7884_v31  ;;  %v2719_v19 = vsel %vm2718_vm4, %v4715_v5, %v2715_v57  ;;  %v8126_v5 = vld [vmem:[#allocation4 + $0x1e8] sm:$0xff]  ;;  %vm2853_vm12 = vcmp.eq.f32.partialorder %v2852_v24, 8.507059e+37  ;;  %v8164_v1 = vld [vmem:[#allocation4 + $0x1b0] sm:$0xff]  ;;  %v8167_v57 = vld [vmem:[#allocation4 + $0x1b8] sm:$0xff] }
 0x422   : > { %v8091_v41 = vadd.f32 1.0, %v4723_v58  ;;  %v2724_v39 = vsel %vm2721_vm5, %v2723_v34, %v2719_v19  ;;  %vm2872_vm13 = vcmp.eq.f32.partialorder %v2871_v17, 8.507059e+37  ;;  %v8173_v58 = vld [vmem:[#allocation4 + $0x188] sm:$0xff]  ;;  %v8179_v19 = vld [vmem:[#allocation4 + $0x190] sm:$0xff]  ;;  %v8235_v24 = vld [vmem:[#allocation4 + $0x138] sm:$0xff] }
 0x423   : > { %v8238_v17 = vld [vmem:[#allocation4 + $0x100] sm:$0xff] }
 0x424   : > { %v4725_v9 = vpop.eup %4724  ;;  %4730 = vrcp.f32 %v8091_v41  ;;  %v2893_v34 = vand.u32 2147483648, %v8091_v41  ;;  %vm2887_vm0 = vweird.f32 %v8091_v41 }
 0x425   : > { %v4727_v0 = vpop.eup %4726  ;;  %v2844_v45 = vmul.f32 %v4725_v9, %v8076_v10  ;;  %4732 = vtanh.f32 %v2837_v47  ;;  %vm2849_vm6 = vweird.f32 %v4725_v9  ;;  %v8158_v10 = vld [vmem:[#allocation4 + $0x1a0] sm:$0xff]  ;;  %v8189_v47 = vld [vmem:[#allocation4 + $0x168] sm:$0xff] }
 0x426   : > { %v2863_v2 = vmul.f32 %v4727_v0, %v8078_v55  ;;  %vm2868_vm7 = vweird.f32 %v4727_v0  ;;  %vm8118_vm10 = vmor %vm2848_vm8, %vm2849_vm6  ;;  %v8161_v55 = vld [vmem:[#allocation4 + $0x1a8] sm:$0xff]  ;;  %v2894_v3 = vor.u32 1.1754944e-38, %v2893_v34  ;;  %v8303_v34 = vld [vmem:[#allocation4 + $0x90] sm:$0xff] }
 0x427   : > { %v4729_v25 = vpop.eup %4728  ;;  %v2845_v31 = vsub.f32 1.0, %v2844_v45  ;;  %vm8130_vm11 = vmor %vm2867_vm9, %vm2868_vm7  ;;  %v2891_v45 = vand.u32 2147483647, %v8091_v41  ;;  %10114 = vst [vmem:[#allocation74_spill] sm:$0xff] %v8303_v34 }
 0x428   : > { %v2730_v13 = vmul.f32 %v4729_v25, %v2724_v39  ;;  %v2864_v48 = vsub.f32 1.0, %v2863_v2  ;;  %v8199_v25 = vld [vmem:[#allocation4 + $0x170] sm:$0xff]  ;;  %v8202_v2 = vld [vmem:[#allocation4 + $0x178] sm:$0xff]  ;;  %v8309_v39 = vld [vmem:[#allocation4 + $0x60] sm:$0xff] }
 0x429   : > { %v2846_v49 = vmul.f32 %v4725_v9, %v2845_v31  ;;  %v8214_v31 = vld [vmem:[#allocation4 + $0x148] sm:$0xff]  ;;  %10116 = vst [vmem:[#allocation76_spill] sm:$0xff] %v8309_v39 }
 0x42a   : > { %v8103_v30 = vsel %vm2736_vm2, %v2730_v13, %v7897_v40  ;;  %v8105_v32 = vpop.eup %4730  ;;  %v2865_v18 = vmul.f32 %v4727_v0, %v2864_v48  ;;  %v8220_v13 = vld [vmem:[#allocation4 + $0x150] sm:$0xff]  ;;  %v8223_v48 = vld [vmem:[#allocation4 + $0x158] sm:$0xff]  ;;  %vm2892_vm2 = vcmp.eq.f32.partialorder %v2891_v45, 8.507059e+37 }
 0x42b   : > { %v2744_v36 = vmul.f32 %v2742_v59, %v8103_v30  ;;  %2942 = vmatmul.f32.vlgmr.msra.gmra.mxu0 %v8103_v30  ;;  %2962 = vmatmul.f32.vlgmr.msra.gmra.mxu1 %v8103_v30  ;;  %v2847_v43 = vadd.f32 %v4725_v9, %v2846_v49  ;;  %v2883_v40 = vmul.f32 %v8105_v32, %v8091_v41  ;;  %v4733_v44 = vpop.eup %4732  ;;  %vm2888_vm15 = vweird.f32 %v8105_v32  ;;  %v8229_v59 = vld [vmem:[#allocation4 + $0x128] sm:$0xff]  ;;  %v8232_v49 = vld [vmem:[#allocation4 + $0x130] sm:$0xff]  ;;  %v8306_v45 = vld [vmem:[#allocation4 + $0x98] sm:$0xff] }
 0x42c   : > { %2982 = vmatmul.f32.vlgmr.msra.gmra.mxu2 %v8103_v30  ;;  %3002 = vmatmul.f32.vlgmr.msra.gmra.mxu3 %v8103_v30  ;;  %v2866_v6 = vadd.f32 %v4727_v0, %v2865_v18  ;;  %vm8207_vm1 = vmor %vm2887_vm0, %vm2888_vm15  ;;  %10115 = vst [vmem:[#allocation69_spill] sm:$0xff] %v8306_v45 }
 0x42d   : > { %4392 = vst [vmem:[%s5697_s16 + $0x20] sm:$0xff] %v2744_v36  ;;  %3268 = vmatpush.msra.mxu0 %v8123_v51  ;;  %3288 = vmatpush.msra.mxu1 %v8126_v5  ;;  %v2851_v60 = vsel %vm8118_vm10, %v4725_v9, %v2847_v43  ;;  %v2884_v29 = vsub.f32 1.0, %v2883_v40  ;;  %v8182_v9 = vld [vmem:[#allocation4 + $0x198] sm:$0xff]  ;;  %v8241_v36 = vld [vmem:[#allocation4 + $0x108] sm:$0xff]  ;;  %v8244_v40 = vld [vmem:[#allocation4 + $0x110] sm:$0xff] }
 0x42e   : > { %3308 = vmatpush.msra.mxu2 %v8136_v4  ;;  %3328 = vmatpush.msra.mxu3 %v8139_v52  ;;  %v2856_v8 = vsel %vm2853_vm12, %v2855_v61, %v2851_v60  ;;  %v2870_v23 = vsel %vm8130_vm11, %v4727_v0, %v2866_v6  ;;  %v8250_v61 = vld [vmem:[#allocation4 + $0xe0] sm:$0xff]  ;;  %v8253_v6 = vld [vmem:[#allocation4 + $0xe8] sm:$0xff]  ;;  %v8261_v60 = vld [vmem:[#allocation4 + $0xf0] sm:$0xff] }
 0x42f   : > { %3269 = vmatpush.msra.mxu0 %v8144_v63  ;;  %3289 = vmatpush.msra.mxu1 %v8147_v38  ;;  %v2875_v62 = vsel %vm2872_vm13, %v2874_v53, %v2870_v23  ;;  %v2898_v22 = vmul.f32 %v4733_v44, %v2856_v8  ;;  %v2885_v54 = vmul.f32 %v8105_v32, %v2884_v29  ;;  %v8264_v29 = vld [vmem:[#allocation4 + $0xf8] sm:$0xff]  ;;  %v8276_v8 = vld [vmem:[#allocation4 + $0xc8] sm:$0xff]  ;;  %v8279_v23 = vld [vmem:[#allocation4 + $0xd0] sm:$0xff] }
 0x430   : > { %3309 = vmatpush.msra.mxu2 %v8151_v56  ;;  %3329 = vmatpush.msra.mxu3 %v8154_v50  ;;  %v2897_v35 = vmul.f32 %v2875_v62, %v7930_v28  ;;  %10099 = vst [vmem:[#allocation185_spill] sm:$0xff] %v8250_v61  ;;  %v8282_v62 = vld [vmem:[#allocation4 + $0xd8] sm:$0xff] }
 0x431   : > { %3270 = vmatpush.msra.mxu0 %v8158_v10  ;;  %3290 = vmatpush.msra.mxu1 %v8161_v55  ;;  %v2886_v46 = vadd.f32 %v8105_v32, %v2885_v54  ;;  %10100 = vst [vmem:[#allocation186_spill] sm:$0xff] %v8253_v6  ;;  %v8288_v54 = vld [vmem:[#allocation4 + $0xa8] sm:$0xff] }
 0x432   : > { %3310 = vmatpush.msra.mxu2 %v8164_v1  ;;  %3330 = vmatpush.msra.mxu3 %v8167_v57  ;;  %v2899_v42 = vadd.f32 %v2898_v22, %v2897_v35  ;;  %10102 = vst [vmem:[#allocation188_spill] sm:$0xff] %v8261_v60  ;;  %v8285_v22 = vld [vmem:[#allocation4 + $0xa0] sm:$0xff]  ;;  %v8291_v35 = vld [vmem:[#allocation4 + $0xb0] sm:$0xff] }
 0x433   : > { %3271 = vmatpush.msra.mxu0 %v8170_v14  ;;  %3291 = vmatpush.msra.mxu1 %v8173_v58  ;;  %v2890_v41 = vsel %vm8207_vm1, %v8105_v32, %v2886_v46  ;;  %10103 = vst [vmem:[#allocation189_spill] sm:$0xff] %v8264_v29  ;;  %v8300_v46 = vld [vmem:[#allocation4 + $0x88] sm:$0xff] }
 0x434   : > { %3311 = vmatpush.msra.mxu2 %v8179_v19  ;;  %3331 = vmatpush.msra.mxu3 %v8182_v9  ;;  %4734 = vtanh.f32 %v2899_v42  ;;  %v8195_v0 = vsel %vm2907_vm14, %v2899_v42, %v7930_v28  ;;  %v8211_v28 = vld [vmem:[#allocation4 + $0x140] sm:$0xff]  ;;  %v2895_v18 = vsel %vm2892_vm2, %v2894_v3, %v2890_v41  ;;  %10105 = vst [vmem:[#allocation191_spill] sm:$0xff] %v8276_v8  ;;  %v8294_v42 = vld [vmem:[#allocation4 + $0xb8] sm:$0xff]  ;;  %v8312_v41 = vld [vmem:[#allocation4 + $0x68] sm:$0xff] }
 0x435   : > { %3272 = vmatpush.msra.mxu0 %v8186_v37  ;;  %3292 = vmatpush.msra.mxu1 %v8189_v47  ;;  %10106 = vst [vmem:[#allocation192_spill] sm:$0xff] %v8279_v23  ;;  %v8315_v3 = vld [vmem:[#allocation4 + $0x70] sm:$0xff] }
 0x436   : > { %3312 = vmatpush.msra.mxu2 %v8199_v25  ;;  %3332 = vmatpush.msra.mxu3 %v8202_v2  ;;  %10107 = vst [vmem:[#allocation110_spill] sm:$0xff] %v8282_v62 }
 0x437   : > { %3273 = vmatpush.msra.mxu0 %v8211_v28  ;;  %3293 = vmatpush.msra.mxu1 %v8214_v31  ;;  %10108 = vst [vmem:[#allocation111_spill] sm:$0xff] %v8285_v22 }
 0x438   : > { %3313 = vmatpush.msra.mxu2 %v8220_v13  ;;  %3333 = vmatpush.msra.mxu3 %v8223_v48  ;;  %10109 = vst [vmem:[#allocation113_spill] sm:$0xff] %v8288_v54 }
 0x439   : > { %3274 = vmatpush.msra.mxu0 %v8226_v16  ;;  %3294 = vmatpush.msra.mxu1 %v8229_v59  ;;  %10110 = vst [vmem:[#allocation112_spill] sm:$0xff] %v8291_v35 }
 0x43a   : > { %3314 = vmatpush.msra.mxu2 %v8232_v49  ;;  %3334 = vmatpush.msra.mxu3 %v8235_v24  ;;  %v4735_v32 = vpop.eup %4734  ;;  %10111 = vst [vmem:[#allocation67_spill] sm:$0xff] %v8294_v42 }
 0x43b   : > { %3275 = vmatpush.msra.mxu0 %v8238_v17  ;;  %3295 = vmatpush.msra.mxu1 %v8241_v36  ;;  %v2901_v43 = vmul.f32 %v4735_v32, %v2895_v18  ;;  %10113 = vst [vmem:[#allocation70_spill] sm:$0xff] %v8300_v46  ;;  %v8318_v32 = vld [vmem:[#allocation4 + $0x78] sm:$0xff]  ;;  %v8321_v18 = vld [vmem:[#allocation4 + $0x40] sm:$0xff] }
 0x43c   : > { %3315 = vmatpush.msra.mxu2 %v8244_v40  ;;  %3335 = vmatpush.msra.mxu3 %v8247_v27  ;;  %10117 = vst [vmem:[#allocation114_spill] sm:$0xff] %v8312_v41 }
 0x43d   : > { %3276 = vmatpush.msra.mxu0 %v8250_v61  ;;  %3296 = vmatpush.msra.mxu1 %v8253_v6  ;;  %v8259_v53 = vsel %vm2907_vm14, %v2901_v43, %v7954_v21  ;;  %v8273_v21 = vld [vmem:[#allocation4 + $0xc0] sm:$0xff]  ;;  %10118 = vst [vmem:[#allocation115_spill] sm:$0xff] %v8315_v3  ;;  %v8324_v43 = vld [vmem:[#allocation4 + $0x48] sm:$0xff] }
 0x43e   : > { %10101 = vst [vmem:[#allocation187_spill] sm:$0xff] %v8259_v53  ;;  %3316 = vmatpush.msra.mxu2 %v8261_v60  ;;  %3336 = vmatpush.msra.mxu3 %v8264_v29  ;;  %v2915_v44 = vmul.f32 %v2913_v26, %v8259_v53  ;;  %v8327_v26 = vld [vmem:[#allocation4 + $0x50] sm:$0xff] }
 0x43f   : > { %3113 = vmatmul.f32.vlgmr.msrb.gmra.mxu0 %v8259_v53  ;;  %3133 = vmatmul.f32.vlgmr.msrb.gmra.mxu1 %v8259_v53  ;;  %10104 = vst [vmem:[#allocation190_spill] sm:$0xff] %v8273_v21 }
 0x440   : > { %3153 = vmatmul.f32.vlgmr.msrb.gmra.mxu2 %v8259_v53  ;;  %3173 = vmatmul.f32.vlgmr.msrb.gmra.mxu3 %v8259_v53  ;;  %4397 = vst [vmem:[%s5699_s20 + $0x18] sm:$0xff] %v2915_v44  ;;  %v8330_v44 = vld [vmem:[#allocation4 + $0x58] sm:$0xff] }
 0x441   : > { %3277 = vmatpush.msra.mxu0 %v8273_v21  ;;  %3297 = vmatpush.msra.mxu1 %v8276_v8  ;;  %10119 = vst [vmem:[#allocation117_spill] sm:$0xff] %v8318_v32 }
 0x442   : > { %3317 = vmatpush.msra.mxu2 %v8279_v23  ;;  %3337 = vmatpush.msra.mxu3 %v8282_v62  ;;  %10120 = vst [vmem:[#allocation116_spill] sm:$0xff] %v8321_v18 }
 0x443   : > { %3278 = vmatpush.msra.mxu0 %v8285_v22  ;;  %3298 = vmatpush.msra.mxu1 %v8288_v54  ;;  %10121 = vst [vmem:[#allocation64_spill] sm:$0xff] %v8324_v43 }
 0x444   : > { %3318 = vmatpush.msra.mxu2 %v8291_v35  ;;  %3338 = vmatpush.msra.mxu3 %v8294_v42  ;;  %10122 = vst [vmem:[#allocation36_spill] sm:$0xff] %v8327_v26  ;;  %v10198_v42 = vld [vmem:[#allocation38_spill] sm:$0xff] }
 0x445   : > { %3279 = vmatpush.msra.mxu0 %v8297_v15  ;;  %3299 = vmatpush.msra.mxu1 %v8300_v46  ;;  %10123 = vst [vmem:[#allocation66_spill] sm:$0xff] %v8330_v44 }
 0x446   : > { %3319 = vmatpush.msra.mxu2 %v8303_v34  ;;  %3339 = vmatpush.msra.mxu3 %v8306_v45 }
 0x447   : > { %3280 = vmatpush.msra.mxu0 %v8309_v39  ;;  %3300 = vmatpush.msra.mxu1 %v8312_v41 }
 0x448   : > { %3320 = vmatpush.msra.mxu2 %v8315_v3  ;;  %3340 = vmatpush.msra.mxu3 %v8318_v32  ;;  %v8333_v3 = vld [vmem:[#allocation4 + $0x20] sm:$0xff]  ;;  %v8336_v32 = vld [vmem:[#allocation4 + $0x28] sm:$0xff] }
 0x449   : > { %3281 = vmatpush.msra.mxu0 %v8321_v18  ;;  %3301 = vmatpush.msra.mxu1 %v8324_v43  ;;  %10124 = vst [vmem:[#allocation79_spill] sm:$0xff] %v8333_v3  ;;  %v8339_v18 = vld [vmem:[#allocation4 + $0x30] sm:$0xff]  ;;  %v8342_v43 = vld [vmem:[#allocation4 + $0x38] sm:$0xff] }
 0x44a   : > { %3321 = vmatpush.msra.mxu2 %v8327_v26  ;;  %3341 = vmatpush.msra.mxu3 %v8330_v44  ;;  %10125 = vst [vmem:[#allocation65_spill] sm:$0xff] %v8336_v32  ;;  %v8345_v26 = vld [vmem:[#allocation4] sm:$0xff]  ;;  %v8348_v44 = vld [vmem:[#allocation4 + $0x8] sm:$0xff] }
 0x44b   : > { %3282 = vmatpush.msra.mxu0 %v8333_v3  ;;  %3302 = vmatpush.msra.mxu1 %v8336_v32  ;;  %10126 = vst [vmem:[#allocation193_spill] sm:$0xff] %v8339_v18  ;;  %v8351_v3 = vld [vmem:[#allocation4 + $0x10] sm:$0xff]  ;;  %v8354_v32 = vld [vmem:[#allocation4 + $0x18] sm:$0xff] }
 0x44c   : > { %3322 = vmatpush.msra.mxu2 %v8339_v18  ;;  %10127 = vst [vmem:[#allocation83_spill] sm:$0xff] %v8342_v43  ;;  %3342 = vmatpush.msra.mxu3 %v8342_v43  ;;  %v8357_v18 = vld [vmem:[#allocation7 + $0x1e0] sm:$0xff]  ;;  %v8360_v43 = vld [vmem:[#allocation7 + $0x1e8] sm:$0xff] }
 0x44d   : > { %10128 = vst [vmem:[#allocation84_spill] sm:$0xff] %v8345_v26  ;;  %3283 = vmatpush.msra.mxu0 %v8345_v26  ;;  %3303 = vmatpush.msra.mxu1 %v8348_v44  ;;  %v8363_v26 = vld [vmem:[#allocation7 + $0x1f0] sm:$0xff] }
 0x44e   : > { %10129 = vst [vmem:[#allocation85_spill] sm:$0xff] %v8348_v44  ;;  %3323 = vmatpush.msra.mxu2 %v8351_v3  ;;  %3343 = vmatpush.msra.mxu3 %v8354_v32  ;;  %v8366_v44 = vld [vmem:[#allocation7 + $0x1f8] sm:$0xff] }
 0x44f   : > { %10130 = vst [vmem:[#allocation86_spill] sm:$0xff] %v8351_v3  ;;  %3439 = vmatpush.msrb.mxu0 %v8357_v18  ;;  %3459 = vmatpush.msrb.mxu1 %v8360_v43  ;;  %v8369_v3 = vld [vmem:[#allocation7 + $0x1c0] sm:$0xff] }
 0x450   : > { %10131 = vst [vmem:[#allocation87_spill] sm:$0xff] %v8354_v32  ;;  %3479 = vmatpush.msrb.mxu2 %v8363_v26  ;;  %3499 = vmatpush.msrb.mxu3 %v8366_v44  ;;  %v8372_v32 = vld [vmem:[#allocation7 + $0x1c8] sm:$0xff] }
 0x451   : > { %10132 = vst [vmem:[#allocation88_spill] sm:$0xff] %v8357_v18  ;;  %3440 = vmatpush.msrb.mxu0 %v8369_v3  ;;  %3460 = vmatpush.msrb.mxu1 %v8372_v32  ;;  %v8375_v18 = vld [vmem:[#allocation7 + $0x1d0] sm:$0xff] }
 0x452   : > { %10133 = vst [vmem:[#allocation89_spill] sm:$0xff] %v8360_v43  ;;  %3480 = vmatpush.msrb.mxu2 %v8375_v18  ;;  %v8378_v43 = vld [vmem:[#allocation7 + $0x1d8] sm:$0xff] }
 0x453   : > { %10134 = vst [vmem:[#allocation90_spill] sm:$0xff] %v8363_v26  ;;  %3500 = vmatpush.msrb.mxu3 %v8378_v43  ;;  %v8381_v26 = vld [vmem:[#allocation7 + $0x1a0] sm:$0xff] }
 0x454   : > { %10135 = vst [vmem:[#allocation91_spill] sm:$0xff] %v8366_v44  ;;  %3441 = vmatpush.msrb.mxu0 %v8381_v26  ;;  %v8384_v44 = vld [vmem:[#allocation7 + $0x1a8] sm:$0xff] }
 0x455   : > { %10136 = vst [vmem:[#allocation92_spill] sm:$0xff] %v8369_v3  ;;  %3461 = vmatpush.msrb.mxu1 %v8384_v44  ;;  %v8387_v3 = vld [vmem:[#allocation7 + $0x1b0] sm:$0xff] }
 0x456   : > { %10137 = vst [vmem:[#allocation93_spill] sm:$0xff] %v8372_v32  ;;  %3481 = vmatpush.msrb.mxu2 %v8387_v3  ;;  %v8390_v32 = vld [vmem:[#allocation7 + $0x1b8] sm:$0xff] }
 0x457   : > { %10138 = vst [vmem:[#allocation94_spill] sm:$0xff] %v8375_v18  ;;  %3501 = vmatpush.msrb.mxu3 %v8390_v32  ;;  %v8393_v18 = vld [vmem:[#allocation7 + $0x180] sm:$0xff] }
 0x458   : > { %10139 = vst [vmem:[#allocation95_spill] sm:$0xff] %v8378_v43  ;;  %3442 = vmatpush.msrb.mxu0 %v8393_v18  ;;  %v8396_v43 = vld [vmem:[#allocation7 + $0x188] sm:$0xff] }
 0x459   : > { %10140 = vst [vmem:[#allocation96_spill] sm:$0xff] %v8381_v26  ;;  %3462 = vmatpush.msrb.mxu1 %v8396_v43  ;;  %v8399_v26 = vld [vmem:[#allocation7 + $0x190] sm:$0xff] }
 0x45a   : > { %10141 = vst [vmem:[#allocation97_spill] sm:$0xff] %v8384_v44  ;;  %3482 = vmatpush.msrb.mxu2 %v8399_v26  ;;  %v8402_v44 = vld [vmem:[#allocation7 + $0x198] sm:$0xff] }
 0x45b   : > { %10142 = vst [vmem:[#allocation98_spill] sm:$0xff] %v8387_v3  ;;  %3502 = vmatpush.msrb.mxu3 %v8402_v44  ;;  %v8405_v3 = vld [vmem:[#allocation7 + $0x160] sm:$0xff] }
 0x45c   : > { %10143 = vst [vmem:[#allocation99_spill] sm:$0xff] %v8390_v32  ;;  %3443 = vmatpush.msrb.mxu0 %v8405_v3  ;;  %v8408_v32 = vld [vmem:[#allocation7 + $0x168] sm:$0xff] }
 0x45d   : > { %10144 = vst [vmem:[#allocation100_spill] sm:$0xff] %v8393_v18  ;;  %3463 = vmatpush.msrb.mxu1 %v8408_v32  ;;  %v8411_v18 = vld [vmem:[#allocation7 + $0x170] sm:$0xff] }
 0x45e   : > { %10145 = vst [vmem:[#allocation101_spill] sm:$0xff] %v8396_v43  ;;  %3483 = vmatpush.msrb.mxu2 %v8411_v18  ;;  %v8414_v43 = vld [vmem:[#allocation7 + $0x178] sm:$0xff] }
 0x45f   : > { %10146 = vst [vmem:[#allocation102_spill] sm:$0xff] %v8399_v26  ;;  %3503 = vmatpush.msrb.mxu3 %v8414_v43  ;;  %v8417_v26 = vld [vmem:[#allocation7 + $0x140] sm:$0xff] }
 0x460   : > { %10147 = vst [vmem:[#allocation103_spill] sm:$0xff] %v8402_v44  ;;  %3444 = vmatpush.msrb.mxu0 %v8417_v26  ;;  %v8420_v44 = vld [vmem:[#allocation7 + $0x148] sm:$0xff] }
 0x461   : > { %10148 = vst [vmem:[#allocation104_spill] sm:$0xff] %v8405_v3  ;;  %3464 = vmatpush.msrb.mxu1 %v8420_v44  ;;  %v8423_v3 = vld [vmem:[#allocation7 + $0x150] sm:$0xff] }
 0x462   : > { %10149 = vst [vmem:[#allocation105_spill] sm:$0xff] %v8408_v32  ;;  %3484 = vmatpush.msrb.mxu2 %v8423_v3  ;;  %v8426_v32 = vld [vmem:[#allocation7 + $0x158] sm:$0xff] }
 0x463   : > { %10150 = vst [vmem:[#allocation106_spill] sm:$0xff] %v8411_v18  ;;  %3504 = vmatpush.msrb.mxu3 %v8426_v32  ;;  %v8429_v18 = vld [vmem:[#allocation7 + $0x120] sm:$0xff] }
 0x464   : > { %10151 = vst [vmem:[#allocation107_spill] sm:$0xff] %v8414_v43  ;;  %3445 = vmatpush.msrb.mxu0 %v8429_v18  ;;  %v8432_v43 = vld [vmem:[#allocation7 + $0x128] sm:$0xff] }
 0x465   : > { %10152 = vst [vmem:[#allocation108_spill] sm:$0xff] %v8417_v26  ;;  %3465 = vmatpush.msrb.mxu1 %v8432_v43  ;;  %v8435_v26 = vld [vmem:[#allocation7 + $0x130] sm:$0xff] }
 0x466   : > { %10153 = vst [vmem:[#allocation109_spill] sm:$0xff] %v8420_v44  ;;  %3485 = vmatpush.msrb.mxu2 %v8435_v26  ;;  %v8438_v44 = vld [vmem:[#allocation7 + $0x138] sm:$0xff] }
 0x467   : > { %10154 = vst [vmem:[#allocation61_spill] sm:$0xff] %v8423_v3  ;;  %3505 = vmatpush.msrb.mxu3 %v8438_v44  ;;  %v8441_v3 = vld [vmem:[#allocation7 + $0x100] sm:$0xff] }
 0x468   : > { %10155 = vst [vmem:[#allocation78_spill] sm:$0xff] %v8426_v32  ;;  %3446 = vmatpush.msrb.mxu0 %v8441_v3  ;;  %v8444_v32 = vld [vmem:[#allocation7 + $0x108] sm:$0xff] }
 0x469   : > { %10156 = vst [vmem:[#allocation120_spill] sm:$0xff] %v8429_v18  ;;  %3466 = vmatpush.msrb.mxu1 %v8444_v32  ;;  %v8447_v18 = vld [vmem:[#allocation7 + $0x110] sm:$0xff] }
 0x46a   : > { %10157 = vst [vmem:[#allocation121_spill] sm:$0xff] %v8432_v43  ;;  %3486 = vmatpush.msrb.mxu2 %v8447_v18  ;;  %v8450_v43 = vld [vmem:[#allocation7 + $0x118] sm:$0xff] }
 0x46b   : > { %10158 = vst [vmem:[#allocation122_spill] sm:$0xff] %v8435_v26  ;;  %3506 = vmatpush.msrb.mxu3 %v8450_v43  ;;  %v8453_v26 = vld [vmem:[#allocation7 + $0xe0] sm:$0xff] }
 0x46c   : > { %10159 = vst [vmem:[#allocation123_spill] sm:$0xff] %v8438_v44  ;;  %3447 = vmatpush.msrb.mxu0 %v8453_v26  ;;  %v8456_v44 = vld [vmem:[#allocation7 + $0xe8] sm:$0xff] }
 0x46d   : > { %10160 = vst [vmem:[#allocation124_spill] sm:$0xff] %v8441_v3  ;;  %3467 = vmatpush.msrb.mxu1 %v8456_v44  ;;  %v8459_v3 = vld [vmem:[#allocation7 + $0xf0] sm:$0xff] }
 0x46e   : > { %10161 = vst [vmem:[#allocation125_spill] sm:$0xff] %v8444_v32  ;;  %3487 = vmatpush.msrb.mxu2 %v8459_v3  ;;  %v8462_v32 = vld [vmem:[#allocation7 + $0xf8] sm:$0xff] }
 0x46f   : > { %10162 = vst [vmem:[#allocation126_spill] sm:$0xff] %v8447_v18  ;;  %3507 = vmatpush.msrb.mxu3 %v8462_v32  ;;  %v8465_v18 = vld [vmem:[#allocation7 + $0xc0] sm:$0xff] }
 0x470   : > { %10163 = vst [vmem:[#allocation127_spill] sm:$0xff] %v8450_v43  ;;  %3448 = vmatpush.msrb.mxu0 %v8465_v18  ;;  %v8468_v43 = vld [vmem:[#allocation7 + $0xc8] sm:$0xff] }
 0x471   : > { %10164 = vst [vmem:[#allocation128_spill] sm:$0xff] %v8453_v26  ;;  %3468 = vmatpush.msrb.mxu1 %v8468_v43  ;;  %v8471_v26 = vld [vmem:[#allocation7 + $0xd0] sm:$0xff] }
 0x472   : > { %10165 = vst [vmem:[#allocation129_spill] sm:$0xff] %v8456_v44  ;;  %3488 = vmatpush.msrb.mxu2 %v8471_v26  ;;  %v8474_v44 = vld [vmem:[#allocation7 + $0xd8] sm:$0xff] }
 0x473   : > { %10166 = vst [vmem:[#allocation130_spill] sm:$0xff] %v8459_v3  ;;  %3508 = vmatpush.msrb.mxu3 %v8474_v44  ;;  %v8477_v3 = vld [vmem:[#allocation7 + $0xa0] sm:$0xff] }
 0x474   : > { %10167 = vst [vmem:[#allocation131_spill] sm:$0xff] %v8462_v32  ;;  %3449 = vmatpush.msrb.mxu0 %v8477_v3  ;;  %v8480_v32 = vld [vmem:[#allocation7 + $0xa8] sm:$0xff] }
 0x475   : > { %10168 = vst [vmem:[#allocation132_spill] sm:$0xff] %v8465_v18  ;;  %3469 = vmatpush.msrb.mxu1 %v8480_v32  ;;  %v8483_v18 = vld [vmem:[#allocation7 + $0xb0] sm:$0xff] }
 0x476   : > { %10169 = vst [vmem:[#allocation133_spill] sm:$0xff] %v8468_v43  ;;  %3489 = vmatpush.msrb.mxu2 %v8483_v18  ;;  %v8486_v43 = vld [vmem:[#allocation7 + $0xb8] sm:$0xff] }
 0x477   : > { %10170 = vst [vmem:[#allocation134_spill] sm:$0xff] %v8471_v26  ;;  %3509 = vmatpush.msrb.mxu3 %v8486_v43  ;;  %v8489_v26 = vld [vmem:[#allocation7 + $0x80] sm:$0xff] }
 0x478   : > { %10171 = vst [vmem:[#allocation135_spill] sm:$0xff] %v8474_v44  ;;  %3450 = vmatpush.msrb.mxu0 %v8489_v26  ;;  %v8492_v44 = vld [vmem:[#allocation7 + $0x88] sm:$0xff] }
 0x479   : > { %10172 = vst [vmem:[#allocation136_spill] sm:$0xff] %v8477_v3  ;;  %3470 = vmatpush.msrb.mxu1 %v8492_v44  ;;  %v8495_v3 = vld [vmem:[#allocation7 + $0x90] sm:$0xff] }
 0x47a   : > { %10173 = vst [vmem:[#allocation137_spill] sm:$0xff] %v8480_v32  ;;  %3490 = vmatpush.msrb.mxu2 %v8495_v3  ;;  %v8498_v32 = vld [vmem:[#allocation7 + $0x98] sm:$0xff] }
 0x47b   : > { %10174 = vst [vmem:[#allocation138_spill] sm:$0xff] %v8483_v18  ;;  %3510 = vmatpush.msrb.mxu3 %v8498_v32  ;;  %v8501_v18 = vld [vmem:[#allocation7 + $0x60] sm:$0xff] }
 0x47c   : > { %10175 = vst [vmem:[#allocation139_spill] sm:$0xff] %v8486_v43  ;;  %3451 = vmatpush.msrb.mxu0 %v8501_v18  ;;  %v8504_v43 = vld [vmem:[#allocation7 + $0x68] sm:$0xff] }
 0x47d   : > { %10176 = vst [vmem:[#allocation140_spill] sm:$0xff] %v8489_v26  ;;  %3471 = vmatpush.msrb.mxu1 %v8504_v43  ;;  %v8507_v26 = vld [vmem:[#allocation7 + $0x70] sm:$0xff] }
 0x47e   : > { %10177 = vst [vmem:[#allocation141_spill] sm:$0xff] %v8492_v44  ;;  %3491 = vmatpush.msrb.mxu2 %v8507_v26  ;;  %v8510_v44 = vld [vmem:[#allocation7 + $0x78] sm:$0xff] }
 0x47f   : > { %10178 = vst [vmem:[#allocation142_spill] sm:$0xff] %v8495_v3  ;;  %3511 = vmatpush.msrb.mxu3 %v8510_v44  ;;  %v8513_v3 = vld [vmem:[#allocation7 + $0x40] sm:$0xff] }
 0x480   : > { %10179 = vst [vmem:[#allocation143_spill] sm:$0xff] %v8498_v32  ;;  %3452 = vmatpush.msrb.mxu0 %v8513_v3  ;;  %v8516_v32 = vld [vmem:[#allocation7 + $0x48] sm:$0xff] }
 0x481   : > { %10180 = vst [vmem:[#allocation144_spill] sm:$0xff] %v8501_v18  ;;  %3472 = vmatpush.msrb.mxu1 %v8516_v32  ;;  %v8519_v18 = vld [vmem:[#allocation7 + $0x50] sm:$0xff] }
 0x482   : > { %10181 = vst [vmem:[#allocation145_spill] sm:$0xff] %v8504_v43  ;;  %3492 = vmatpush.msrb.mxu2 %v8519_v18  ;;  %v8522_v43 = vld [vmem:[#allocation7 + $0x58] sm:$0xff] }
 0x483   : > { %10182 = vst [vmem:[#allocation146_spill] sm:$0xff] %v8507_v26  ;;  %3512 = vmatpush.msrb.mxu3 %v8522_v43  ;;  %v8525_v26 = vld [vmem:[#allocation7 + $0x20] sm:$0xff] }
 0x484   : > { %10183 = vst [vmem:[#allocation147_spill] sm:$0xff] %v8510_v44  ;;  %3453 = vmatpush.msrb.mxu0 %v8525_v26  ;;  %v8528_v44 = vld [vmem:[#allocation7 + $0x28] sm:$0xff] }
 0x485   : > { %10184 = vst [vmem:[#allocation148_spill] sm:$0xff] %v8513_v3  ;;  %3473 = vmatpush.msrb.mxu1 %v8528_v44  ;;  %v8531_v3 = vld [vmem:[#allocation7 + $0x30] sm:$0xff] }
 0x486   : > { %10185 = vst [vmem:[#allocation149_spill] sm:$0xff] %v8516_v32  ;;  %3493 = vmatpush.msrb.mxu2 %v8531_v3  ;;  %v8534_v32 = vld [vmem:[#allocation7 + $0x38] sm:$0xff] }
 0x487   : > { %10186 = vst [vmem:[#allocation150_spill] sm:$0xff] %v8519_v18  ;;  %3513 = vmatpush.msrb.mxu3 %v8534_v32  ;;  %v8537_v18 = vld [vmem:[#allocation7] sm:$0xff] }
 0x488   : > { %10187 = vst [vmem:[#allocation151_spill] sm:$0xff] %v8522_v43  ;;  %3454 = vmatpush.msrb.mxu0 %v8537_v18  ;;  %v8540_v43 = vld [vmem:[#allocation7 + $0x8] sm:$0xff] }
 0x489   : > { %10188 = vst [vmem:[#allocation152_spill] sm:$0xff] %v8525_v26  ;;  %3474 = vmatpush.msrb.mxu1 %v8540_v43  ;;  %v8543_v26 = vld [vmem:[#allocation7 + $0x10] sm:$0xff] }
 0x48a   : > { %10189 = vst [vmem:[#allocation153_spill] sm:$0xff] %v8528_v44  ;;  %3494 = vmatpush.msrb.mxu2 %v8543_v26  ;;  %v8546_v44 = vld [vmem:[#allocation7 + $0x18] sm:$0xff] }
 0x48b   : > { %10190 = vst [vmem:[#allocation154_spill] sm:$0xff] %v8531_v3  ;;  %3514 = vmatpush.msrb.mxu3 %v8546_v44  ;;  %v10196_v3 = vld [vmem:[#allocation34_spill] sm:$0xff] }
 0x48c   : > { %10191 = vst [vmem:[#allocation155_spill] sm:$0xff] %v8534_v32  ;;  %v704_v41 = vadd.f32 %v10196_v3, %v10079_v33  ;;  %v10197_v32 = vld [vmem:[#allocation35_spill] sm:$0xff] }
 0x48d   : > { %10192 = vst [vmem:[#allocation156_spill] sm:$0xff] %v8537_v18  ;;  %v733_v39 = vadd.f32 %v10197_v32, %v10081_v11 }
 0x48e   : > { %10193 = vst [vmem:[#allocation157_spill] sm:$0xff] %v8540_v43 }
 0x48f   : > { %10194 = vst [vmem:[#allocation158_spill] sm:$0xff] %v8543_v26  ;;  %v791_v26 = vadd.f32 %v10198_v42, %v10083_v7 }
 0x490   : > { %10195 = vst [vmem:[#allocation159_spill] sm:$0xff] %v8546_v44 }
 0x4a8   : > { %v2943_v45 = vpop.f32.mrf.mxu0  ;;  %v2963_v18 = vpop.f32.mrf.mxu1 }
 0x4a9   : > { %v3006_v34 = vadd.f32 %v2943_v45, %v704_v41  ;;  %v3007_v46 = vadd.f32 %v2963_v18, %v733_v39  ;;  %v10199_v45 = vld [vmem:[#allocation37_spill] sm:$0xff] }
 0x4ab   : > { %v4399_v15 = vmul.f32 -1.442695, %v3006_v34  ;;  %v4400_v43 = vmul.f32 -1.442695, %v3007_v46  ;;  %v762_v34 = vadd.f32 %v10199_v45, %v10085_v20 }
 0x4ad   : > { %4736 = vpow2.f32 %v4399_v15 }
 0x4ae   : > { %4738 = vpow2.f32 %v4400_v43 }
 0x4af   : > { %v3003_v35 = vpop.f32.mrf.mxu3  ;;  %v2983_v32 = vpop.f32.mrf.mxu2 }
 0x4b0   : > { %v3009_v54 = vadd.f32 %v3003_v35, %v791_v26  ;;  %v3008_v15 = vadd.f32 %v2983_v32, %v762_v34 }
 0x4b2   : > { %v4401_v44 = vmul.f32 -1.442695, %v3009_v54 }
 0x4b3   : > { %v4737_v22 = vpop.eup %4736 }
 0x4b4   : > { %v4739_v53 = vpop.eup %4738  ;;  %v3013_v3 = vadd.f32 1.0, %v4737_v22  ;;  %4740 = vpow2.f32 %v4401_v44  ;;  %v10201_v44 = vld [vmem:[#allocation56_spill] sm:$0xff] }
 0x4b5   : > { %v3032_v33 = vadd.f32 1.0, %v4739_v53  ;;  %v10200_v53 = vld [vmem:[#allocation55_spill] sm:$0xff] }
 0x4b6   : > { %4742 = vrcp.f32 %v3013_v3  ;;  %v3023_v20 = vand.u32 2147483647, %v3013_v3  ;;  %v3025_v32 = vand.u32 2147483648, %v3013_v3  ;;  %vm3019_vm6 = vweird.f32 %v3013_v3 }
 0x4b7   : > { %4744 = vrcp.f32 %v3032_v33  ;;  %v3044_v45 = vand.u32 2147483648, %v3032_v33  ;;  %v3042_v8 = vand.u32 2147483647, %v3032_v33  ;;  %vm3038_vm5 = vweird.f32 %v3032_v33 }
 0x4b8   : > { %vm3024_vm9 = vcmp.eq.f32.partialorder %v3023_v20, 8.507059e+37 }
 0x4b9   : > { %vm3043_vm10 = vcmp.eq.f32.partialorder %v3042_v8, 8.507059e+37 }
 0x4ba   : > { %v4741_v46 = vpop.eup %4740 }
 0x4bb   : > { %v8557_v39 = vadd.f32 1.0, %v4741_v46 }
 0x4bc   : > { %v4743_v42 = vpop.eup %4742  ;;  %v3114_v41 = vpop.f32.mrf.mxu0 }
 0x4bd   : > { %v3134_v18 = vpop.f32.mrf.mxu1  ;;  %v4745_v35 = vpop.eup %4744  ;;  %v3015_v54 = vmul.f32 %v4743_v42, %v3013_v3  ;;  %4746 = vrcp.f32 %v8557_v39  ;;  %v3177_v26 = vadd.f32 %v3114_v41, %v10200_v53  ;;  %vm3020_vm3 = vweird.f32 %v4743_v42 }
 0x4be   : > { %v3034_v22 = vmul.f32 %v4745_v35, %v3032_v33  ;;  %4748 = vtanh.f32 %v3008_v15  ;;  %v3178_v7 = vadd.f32 %v3134_v18, %v10201_v44  ;;  %vm3039_vm4 = vweird.f32 %v4745_v35  ;;  %vm3021_vm7 = vmor %vm3019_vm6, %vm3020_vm3 }
 0x4bf   : > { %v3016_v43 = vsub.f32 1.0, %v3015_v54  ;;  %v4404_v46 = vmul.f32 -1.442695, %v3177_v26  ;;  %v3026_v41 = vor.u32 1.1754944e-38, %v3025_v32  ;;  %vm3040_vm8 = vmor %vm3038_vm5, %vm3039_vm4  ;;  %v3064_v8 = vand.u32 2147483648, %v8557_v39 }
 0x4c0   : > { %v3035_v11 = vsub.f32 1.0, %v3034_v22  ;;  %v4405_v62 = vmul.f32 -1.442695, %v3178_v7  ;;  %vm3058_vm12 = vweird.f32 %v8557_v39 }
 0x4c1   : > { %v3017_v34 = vmul.f32 %v4743_v42, %v3016_v43  ;;  %4750 = vpow2.f32 %v4404_v46  ;;  %v3045_v43 = vor.u32 1.1754944e-38, %v3044_v45 }
 0x4c2   : > { %v3036_v23 = vmul.f32 %v4745_v35, %v3035_v11  ;;  %4752 = vpow2.f32 %v4405_v62  ;;  %v10202_v11 = vld [vmem:[#allocation58_spill] sm:$0xff] }
 0x4c3   : > { %v4747_v21 = vpop.eup %4746  ;;  %v3018_v29 = vadd.f32 %v4743_v42, %v3017_v34  ;;  %v3174_v15 = vpop.f32.mrf.mxu3 }
 0x4c4   : > { %v3037_v18 = vadd.f32 %v4745_v35, %v3036_v23  ;;  %v3054_v54 = vmul.f32 %v4747_v21, %v8557_v39  ;;  %v4749_v22 = vpop.eup %4748  ;;  %v3180_v7 = vadd.f32 %v3174_v15, %v10202_v11  ;;  %vm3059_vm11 = vweird.f32 %v4747_v21 }
 0x4c5   : > { %v3022_v53 = vsel %vm3021_vm7, %v4743_v42, %v3018_v29  ;;  %v3062_v42 = vand.u32 2147483647, %v8557_v39  ;;  %vm3060_vm14 = vmor %vm3058_vm12, %vm3059_vm11 }
 0x4c6   : > { %v3027_v26 = vsel %vm3024_vm9, %v3026_v41, %v3022_v53  ;;  %v3041_v44 = vsel %vm3040_vm8, %v4745_v35, %v3037_v18  ;;  %v3055_v33 = vsub.f32 1.0, %v3054_v54  ;;  %v4406_v46 = vmul.f32 -1.442695, %v3180_v7  ;;  %v10203_v35 = vld [vmem:[#allocation194_spill] sm:$0xff]  ;;  %v3154_v18 = vpop.f32.mrf.mxu2  ;;  %v10204_v53 = vld [vmem:[#allocation57_spill] sm:$0xff] }
 0x4c7   : > { %v3046_v3 = vsel %vm3043_vm10, %v3045_v43, %v3041_v44  ;;  %v3069_v34 = vmul.f32 %v4749_v22, %v3027_v26  ;;  %v4751_v60 = vpop.eup %4750  ;;  %vm3078_vm13 = vcmp.eq.s32.totalorder %v10203_v35, 1  ;;  %v3065_v41 = vor.u32 1.1754944e-38, %v3064_v8  ;;  %v3084_v44 = vpop.permute.xlu0 %3083 }
 0x4c8   : > { %v3068_v32 = vmul.f32 %v3046_v3, %v8089_v12  ;;  %v3056_v23 = vmul.f32 %v4747_v21, %v3055_v33  ;;  %4754 = vpow2.f32 %v4406_v46  ;;  %v4753_v62 = vpop.eup %4752  ;;  %v8565_v61 = vadd.f32 1.0, %v4751_v60 }
 0x4c9   : > { %v8567_v20 = vadd.f32 1.0, %v4753_v62  ;;  %vm3063_vm15 = vcmp.eq.f32.partialorder %v3062_v42, 8.507059e+37  ;;  %v3179_v11 = vadd.f32 %v3154_v18, %v10204_v53  ;;  %v10218_v18 = vld [vmem:[#allocation67_spill] sm:$0xff]  ;;  %v10223_v53 = vld [vmem:[#allocation76_spill] sm:$0xff] }
 0x4ca   : > { %v3070_v6 = vadd.f32 %v3069_v34, %v3068_v32  ;;  %v3057_v29 = vadd.f32 %v4747_v21, %v3056_v23  ;;  %v3196_v46 = vand.u32 2147483648, %v8565_v61  ;;  %v3194_v62 = vand.u32 2147483647, %v8565_v61 }
 0x4cb   : > { %v3213_v8 = vand.u32 2147483647, %v8567_v20  ;;  %vm3190_vm2 = vweird.f32 %v8565_v61  ;;  %vm3209_vm3 = vweird.f32 %v8567_v20 }
 0x4cc   : > { %4756 = vtanh.f32 %v3070_v6  ;;  %v3061_v45 = vsel %vm3060_vm14, %v4747_v21, %v3057_v29  ;;  %v8578_v15 = vsel %vm3078_vm13, %v3070_v6, %v8089_v12  ;;  %vm3195_vm6 = vcmp.eq.f32.partialorder %v3194_v62, 8.507059e+37  ;;  %v10237_v62 = vld [vmem:[#allocation86_spill] sm:$0xff] }
 0x4cd   : > { %4758 = vrcp.f32 %v8565_v61  ;;  %v3066_v22 = vsel %vm3063_vm15, %v3065_v41, %v3061_v45  ;;  %vm3214_vm7 = vcmp.eq.f32.partialorder %v3213_v8, 8.507059e+37  ;;  %v10217_v41 = vld [vmem:[#allocation112_spill] sm:$0xff] }
 0x4ce   : > { %4760 = vrcp.f32 %v8567_v20  ;;  %v4755_v60 = vpop.eup %4754  ;;  %v10239_v8 = vld [vmem:[#allocation88_spill] sm:$0xff] }
 0x4cf   : > { %v8580_v54 = vadd.f32 1.0, %v4755_v60 }
 0x4d1   : > { %4762 = vrcp.f32 %v8580_v54  ;;  %vm3229_vm10 = vweird.f32 %v8580_v54 }
 0x4d2   : > { %v4757_v39 = vpop.eup %4756  ;;  %4764 = vtanh.f32 %v3179_v11  ;;  %v10224_v11 = vld [vmem:[#allocation114_spill] sm:$0xff] }
 0x4d3   : > { %v4759_v43 = vpop.eup %4758  ;;  %v3072_v7 = vmul.f32 %v4757_v39, %v3066_v22  ;;  %v10220_v39 = vld [vmem:[#allocation70_spill] sm:$0xff] }
 0x4d4   : > { %v4761_v26 = vpop.eup %4760  ;;  %v3186_v21 = vmul.f32 %v4759_v43, %v8565_v61  ;;  %vm3191_vm0 = vweird.f32 %v4759_v43  ;;  %v10221_v22 = vld [vmem:[#allocation74_spill] sm:$0xff] }
 0x4d5   : > { %v3205_v12 = vmul.f32 %v4761_v26, %v8567_v20  ;;  %v8589_v6 = vsel %vm3078_vm13, %v3072_v7, %v8103_v30  ;;  %v3215_v30 = vand.u32 2147483648, %v8567_v20  ;;  %vm3210_vm1 = vweird.f32 %v4761_v26  ;;  %vm3192_vm4 = vmor %vm3190_vm2, %vm3191_vm0  ;;  %v10225_v7 = vld [vmem:[#allocation115_spill] sm:$0xff] }
 0x4d6   : > { %v3187_v33 = vsub.f32 1.0, %v3186_v21  ;;  %v3086_v3 = vmul.f32 %v3084_v44, %v8589_v6  ;;  %3284 = vmatmul.f32.vlgmr.msra.gmra.mxu0 %v8589_v6  ;;  %3304 = vmatmul.f32.vlgmr.msra.gmra.mxu1 %v8589_v6  ;;  %vm3211_vm5 = vmor %vm3209_vm3, %vm3210_vm1  ;;  %v10227_v21 = vld [vmem:[#allocation116_spill] sm:$0xff] }
 0x4d7   : > { %v3206_v34 = vsub.f32 1.0, %v3205_v12  ;;  %3324 = vmatmul.f32.vlgmr.msra.gmra.mxu2 %v8589_v6  ;;  %3344 = vmatmul.f32.vlgmr.msra.gmra.mxu3 %v8589_v6  ;;  %v8597_v32 = vpop.eup %4762  ;;  %v10228_v44 = vld [vmem:[#allocation64_spill] sm:$0xff] }
 0x4d8   : > { %v3188_v23 = vmul.f32 %v4759_v43, %v3187_v33  ;;  %4402 = vst [vmem:[%s5697_s16 + $0x28] sm:$0xff] %v3086_v3  ;;  %3610 = vmatpush.msra.mxu0 %v8123_v51  ;;  %3630 = vmatpush.msra.mxu1 %v8126_v5  ;;  %v3225_v42 = vmul.f32 %v8597_v32, %v8580_v54  ;;  %v3197_v51 = vor.u32 1.1754944e-38, %v3196_v46  ;;  %vm3230_vm9 = vweird.f32 %v8597_v32  ;;  %v10229_v12 = vld [vmem:[#allocation36_spill] sm:$0xff]  ;;  %v10230_v33 = vld [vmem:[#allocation66_spill] sm:$0xff]  ;;  %v10231_v3 = vld [vmem:[#allocation79_spill] sm:$0xff] }
 0x4d9   : > { %v3207_v29 = vmul.f32 %v4761_v26, %v3206_v34  ;;  %3650 = vmatpush.msra.mxu2 %v8136_v4  ;;  %3670 = vmatpush.msra.mxu3 %v8139_v52  ;;  %v3216_v4 = vor.u32 1.1754944e-38, %v3215_v30  ;;  %vm3231_vm11 = vmor %vm3229_vm10, %vm3230_vm9  ;;  %v10232_v34 = vld [vmem:[#allocation65_spill] sm:$0xff]  ;;  %v10235_v30 = vld [vmem:[#allocation84_spill] sm:$0xff] }
 0x4da   : > { %v3189_v35 = vadd.f32 %v4759_v43, %v3188_v23  ;;  %3611 = vmatpush.msra.mxu0 %v8144_v63  ;;  %3631 = vmatpush.msra.mxu1 %v8147_v38  ;;  %v3226_v60 = vsub.f32 1.0, %v3225_v42  ;;  %v4765_v63 = vpop.eup %4764  ;;  %v10233_v46 = vld [vmem:[#allocation193_spill] sm:$0xff] }
 0x4db   : > { %v3208_v5 = vadd.f32 %v4761_v26, %v3207_v29  ;;  %3651 = vmatpush.msra.mxu2 %v8151_v56  ;;  %3671 = vmatpush.msra.mxu3 %v8154_v50  ;;  %v10236_v23 = vld [vmem:[#allocation85_spill] sm:$0xff]  ;;  %v10238_v29 = vld [vmem:[#allocation87_spill] sm:$0xff] }
 0x4dc   : > { %v3193_v52 = vsel %vm3192_vm4, %v4759_v43, %v3189_v35  ;;  %3612 = vmatpush.msra.mxu0 %v8158_v10  ;;  %3632 = vmatpush.msra.mxu1 %v8161_v55  ;;  %v3227_v50 = vmul.f32 %v8597_v32, %v3226_v60  ;;  %v10222_v43 = vld [vmem:[#allocation69_spill] sm:$0xff]  ;;  %v10241_v35 = vld [vmem:[#allocation90_spill] sm:$0xff] }
 0x4dd   : > { %v3198_v38 = vsel %vm3195_vm6, %v3197_v51, %v3193_v52  ;;  %v3212_v61 = vsel %vm3211_vm5, %v4761_v26, %v3208_v5  ;;  %3652 = vmatpush.msra.mxu2 %v8164_v1  ;;  %3672 = vmatpush.msra.mxu3 %v8167_v57  ;;  %v10205_v1 = vld [vmem:[#allocation80_spill] sm:$0xff]  ;;  %v10226_v26 = vld [vmem:[#allocation117_spill] sm:$0xff]  ;;  %v10242_v51 = vld [vmem:[#allocation91_spill] sm:$0xff] }
 0x4de   : > { %v3217_v56 = vsel %vm3214_vm7, %v3216_v4, %v3212_v61  ;;  %v3240_v20 = vmul.f32 %v4765_v63, %v3198_v38  ;;  %3613 = vmatpush.msra.mxu0 %v8170_v14  ;;  %3633 = vmatpush.msra.mxu1 %v8173_v58  ;;  %vm3249_vm8 = vcmp.eq.s32.totalorder %v10205_v1, 1  ;;  %v3228_v57 = vadd.f32 %v8597_v32, %v3227_v50  ;;  %v10240_v42 = vld [vmem:[#allocation89_spill] sm:$0xff]  ;;  %v10243_v5 = vld [vmem:[#allocation92_spill] sm:$0xff]  ;;  %v10245_v4 = vld [vmem:[#allocation94_spill] sm:$0xff] }
 0x4df   : > { %v3239_v10 = vmul.f32 %v3217_v56, %v8195_v0  ;;  %3653 = vmatpush.msra.mxu2 %v8179_v19  ;;  %3673 = vmatpush.msra.mxu3 %v8182_v9  ;;  %v3235_v14 = vand.u32 2147483648, %v8580_v54  ;;  %v3233_v19 = vand.u32 2147483647, %v8580_v54  ;;  %v10219_v54 = vld [vmem:[#allocation68_spill] sm:$0xff]  ;;  %v10244_v60 = vld [vmem:[#allocation93_spill] sm:$0xff]  ;;  %v10246_v52 = vld [vmem:[#allocation95_spill] sm:$0xff] }
 0x4e0   : > { %3614 = vmatpush.msra.mxu0 %v8186_v37  ;;  %3634 = vmatpush.msra.mxu1 %v8189_v47  ;;  %v3232_v9 = vsel %vm3231_vm11, %v8597_v32, %v3228_v57  ;;  %v10206_v47 = vld [vmem:[#allocation185_spill] sm:$0xff]  ;;  %v10234_v32 = vld [vmem:[#allocation83_spill] sm:$0xff]  ;;  %v10247_v63 = vld [vmem:[#allocation96_spill] sm:$0xff] }
 0x4e1   : > { %v3241_v55 = vadd.f32 %v3240_v20, %v3239_v10  ;;  %3654 = vmatpush.msra.mxu2 %v8199_v25  ;;  %3674 = vmatpush.msra.mxu3 %v8202_v2  ;;  %v3236_v37 = vor.u32 1.1754944e-38, %v3235_v14  ;;  %vm3234_vm12 = vcmp.eq.f32.partialorder %v3233_v19, 8.507059e+37  ;;  %v10248_v38 = vld [vmem:[#allocation97_spill] sm:$0xff]  ;;  %v10249_v61 = vld [vmem:[#allocation98_spill] sm:$0xff]  ;;  %v10250_v56 = vld [vmem:[#allocation99_spill] sm:$0xff] }
 0x4e2   : > { %3615 = vmatpush.msra.mxu0 %v8211_v28  ;;  %3635 = vmatpush.msra.mxu1 %v8214_v31  ;;  %v10208_v28 = vld [vmem:[#allocation188_spill] sm:$0xff]  ;;  %v10209_v31 = vld [vmem:[#allocation189_spill] sm:$0xff]  ;;  %v10253_v10 = vld [vmem:[#allocation102_spill] sm:$0xff] }
 0x4e3   : > { %4766 = vtanh.f32 %v3241_v55  ;;  %3655 = vmatpush.msra.mxu2 %v8220_v13  ;;  %3675 = vmatpush.msra.mxu3 %v8223_v48  ;;  %v8642_v58 = vsel %vm3249_vm8, %v3241_v55, %v8195_v0  ;;  %v10207_v0 = vld [vmem:[#allocation186_spill] sm:$0xff]  ;;  %v3237_v2 = vsel %vm3234_vm12, %v3236_v37, %v3232_v9  ;;  %v10251_v20 = vld [vmem:[#allocation100_spill] sm:$0xff]  ;;  %v10252_v50 = vld [vmem:[#allocation101_spill] sm:$0xff] }
 0x4e4   : > { %3616 = vmatpush.msra.mxu0 %v8226_v16  ;;  %3636 = vmatpush.msra.mxu1 %v8229_v59  ;;  %v10210_v48 = vld [vmem:[#allocation190_spill] sm:$0xff]  ;;  %v10211_v16 = vld [vmem:[#allocation191_spill] sm:$0xff]  ;;  %v10212_v59 = vld [vmem:[#allocation192_spill] sm:$0xff] }
 0x4e5   : > { %3656 = vmatpush.msra.mxu2 %v8232_v49  ;;  %3676 = vmatpush.msra.mxu3 %v8235_v24  ;;  %v10213_v49 = vld [vmem:[#allocation110_spill] sm:$0xff]  ;;  %v3255_v24 = vpop.permute.xlu0 %3254  ;;  %v10254_v55 = vld [vmem:[#allocation103_spill] sm:$0xff]  ;;  %v10255_v1 = vld [vmem:[#allocation104_spill] sm:$0xff] }
 0x4e6   : > { %3617 = vmatpush.msra.mxu0 %v8238_v17  ;;  %3637 = vmatpush.msra.mxu1 %v8241_v36  ;;  %v10214_v17 = vld [vmem:[#allocation187_spill] sm:$0xff]  ;;  %v10256_v57 = vld [vmem:[#allocation105_spill] sm:$0xff]  ;;  %v10257_v14 = vld [vmem:[#allocation106_spill] sm:$0xff] }
 0x4e7   : > { %3657 = vmatpush.msra.mxu2 %v8244_v40  ;;  %3677 = vmatpush.msra.mxu3 %v8247_v27  ;;  %v10215_v40 = vld [vmem:[#allocation111_spill] sm:$0xff]  ;;  %v10216_v27 = vld [vmem:[#allocation113_spill] sm:$0xff]  ;;  %v10259_v9 = vld [vmem:[#allocation108_spill] sm:$0xff] }
 0x4e8   : > { %3618 = vmatpush.msra.mxu0 %v10206_v47  ;;  %3638 = vmatpush.msra.mxu1 %v10207_v0  ;;  %v10258_v19 = vld [vmem:[#allocation107_spill] sm:$0xff]  ;;  %v10260_v37 = vld [vmem:[#allocation109_spill] sm:$0xff]  ;;  %v10262_v0 = vld [vmem:[#allocation78_spill] sm:$0xff] }
 0x4e9   : > { %v4767_v25 = vpop.eup %4766  ;;  %3658 = vmatpush.msra.mxu2 %v10208_v28  ;;  %3678 = vmatpush.msra.mxu3 %v10209_v31  ;;  %v10261_v47 = vld [vmem:[#allocation61_spill] sm:$0xff]  ;;  %v10265_v28 = vld [vmem:[#allocation122_spill] sm:$0xff]  ;;  %v10266_v31 = vld [vmem:[#allocation123_spill] sm:$0xff] }
 0x4ea   : > { %v3243_v13 = vmul.f32 %v4767_v25, %v3237_v2  ;;  %3619 = vmatpush.msra.mxu0 %v10210_v48  ;;  %3639 = vmatpush.msra.mxu1 %v10211_v16  ;;  %v10263_v25 = vld [vmem:[#allocation120_spill] sm:$0xff]  ;;  %v10264_v2 = vld [vmem:[#allocation121_spill] sm:$0xff]  ;;  %v10269_v16 = vld [vmem:[#allocation126_spill] sm:$0xff] }
 0x4eb   : > { %3659 = vmatpush.msra.mxu2 %v10212_v59  ;;  %3679 = vmatpush.msra.mxu3 %v10213_v49  ;;  %v10268_v48 = vld [vmem:[#allocation125_spill] sm:$0xff]  ;;  %v10270_v59 = vld [vmem:[#allocation127_spill] sm:$0xff]  ;;  %v10271_v49 = vld [vmem:[#allocation128_spill] sm:$0xff] }
 0x4ec   : > { %v8666_v36 = vsel %vm3249_vm8, %v3243_v13, %v10214_v17  ;;  %3620 = vmatpush.msra.mxu0 %v10215_v40  ;;  %3640 = vmatpush.msra.mxu1 %v10216_v27  ;;  %v10267_v13 = vld [vmem:[#allocation124_spill] sm:$0xff]  ;;  %v10273_v17 = vld [vmem:[#allocation130_spill] sm:$0xff]  ;;  %v10274_v40 = vld [vmem:[#allocation131_spill] sm:$0xff] }
 0x4ed   : > { %v3257_v45 = vmul.f32 %v3255_v24, %v8666_v36  ;;  %3455 = vmatmul.f32.vlgmr.msrb.gmra.mxu0 %v8666_v36  ;;  %3475 = vmatmul.f32.vlgmr.msrb.gmra.mxu1 %v8666_v36  ;;  %v10272_v24 = vld [vmem:[#allocation129_spill] sm:$0xff]  ;;  %v10275_v27 = vld [vmem:[#allocation132_spill] sm:$0xff] }
 0x4ee   : > { %3495 = vmatmul.f32.vlgmr.msrb.gmra.mxu2 %v8666_v36  ;;  %3515 = vmatmul.f32.vlgmr.msrb.gmra.mxu3 %v8666_v36 }
 0x4ef   : > { %4407 = vst [vmem:[%s5699_s20 + $0x10] sm:$0xff] %v3257_v45  ;;  %3660 = vmatpush.msra.mxu2 %v10217_v41  ;;  %3680 = vmatpush.msra.mxu3 %v10218_v18  ;;  %v10276_v45 = vld [vmem:[#allocation133_spill] sm:$0xff]  ;;  %v10277_v41 = vld [vmem:[#allocation134_spill] sm:$0xff]  ;;  %v10278_v18 = vld [vmem:[#allocation135_spill] sm:$0xff] }
 0x4f0   : > { %3621 = vmatpush.msra.mxu0 %v10219_v54  ;;  %3641 = vmatpush.msra.mxu1 %v10220_v39  ;;  %v10279_v54 = vld [vmem:[#allocation136_spill] sm:$0xff]  ;;  %v10280_v39 = vld [vmem:[#allocation137_spill] sm:$0xff] }
 0x4f1   : > { %3661 = vmatpush.msra.mxu2 %v10221_v22  ;;  %3681 = vmatpush.msra.mxu3 %v10222_v43  ;;  %v10281_v22 = vld [vmem:[#allocation138_spill] sm:$0xff]  ;;  %v10282_v43 = vld [vmem:[#allocation139_spill] sm:$0xff] }
 0x4f2   : > { %3622 = vmatpush.msra.mxu0 %v10223_v53  ;;  %3642 = vmatpush.msra.mxu1 %v10224_v11  ;;  %v10283_v53 = vld [vmem:[#allocation140_spill] sm:$0xff]  ;;  %v10284_v11 = vld [vmem:[#allocation141_spill] sm:$0xff] }
 0x4f3   : > { %3662 = vmatpush.msra.mxu2 %v10225_v7  ;;  %3682 = vmatpush.msra.mxu3 %v10226_v26  ;;  %v10285_v7 = vld [vmem:[#allocation142_spill] sm:$0xff]  ;;  %v10286_v26 = vld [vmem:[#allocation143_spill] sm:$0xff] }
 0x4f4   : > { %3623 = vmatpush.msra.mxu0 %v10227_v21  ;;  %3643 = vmatpush.msra.mxu1 %v10228_v44  ;;  %v10287_v21 = vld [vmem:[#allocation144_spill] sm:$0xff]  ;;  %v10288_v44 = vld [vmem:[#allocation145_spill] sm:$0xff] }
 0x4f5   : > { %3663 = vmatpush.msra.mxu2 %v10229_v12  ;;  %3683 = vmatpush.msra.mxu3 %v10230_v33  ;;  %v10289_v12 = vld [vmem:[#allocation146_spill] sm:$0xff]  ;;  %v10290_v33 = vld [vmem:[#allocation147_spill] sm:$0xff] }
 0x4f6   : > { %3624 = vmatpush.msra.mxu0 %v10231_v3  ;;  %3644 = vmatpush.msra.mxu1 %v10232_v34  ;;  %v10291_v3 = vld [vmem:[#allocation148_spill] sm:$0xff]  ;;  %v10292_v34 = vld [vmem:[#allocation149_spill] sm:$0xff] }
 0x4f7   : > { %3664 = vmatpush.msra.mxu2 %v10233_v46  ;;  %3684 = vmatpush.msra.mxu3 %v10234_v32  ;;  %v10293_v46 = vld [vmem:[#allocation150_spill] sm:$0xff]  ;;  %v10294_v32 = vld [vmem:[#allocation151_spill] sm:$0xff] }
 0x4f8   : > { %3625 = vmatpush.msra.mxu0 %v10235_v30  ;;  %3645 = vmatpush.msra.mxu1 %v10236_v23  ;;  %v10295_v30 = vld [vmem:[#allocation152_spill] sm:$0xff]  ;;  %v10296_v23 = vld [vmem:[#allocation153_spill] sm:$0xff] }
 0x4f9   : > { %3665 = vmatpush.msra.mxu2 %v10237_v62  ;;  %3685 = vmatpush.msra.mxu3 %v10238_v29  ;;  %v10297_v62 = vld [vmem:[#allocation154_spill] sm:$0xff]  ;;  %v10298_v29 = vld [vmem:[#allocation155_spill] sm:$0xff] }
 0x4fa   : > { %3780 = vmatpush.msrb.mxu0 %v10239_v8  ;;  %3800 = vmatpush.msrb.mxu1 %v10240_v42  ;;  %v10299_v8 = vld [vmem:[#allocation156_spill] sm:$0xff]  ;;  %v10300_v42 = vld [vmem:[#allocation157_spill] sm:$0xff] }
 0x4fb   : > { %3820 = vmatpush.msrb.mxu2 %v10241_v35  ;;  %3840 = vmatpush.msrb.mxu3 %v10242_v51  ;;  %v10301_v35 = vld [vmem:[#allocation158_spill] sm:$0xff]  ;;  %v10302_v51 = vld [vmem:[#allocation159_spill] sm:$0xff] }
 0x4fc   : > { %3781 = vmatpush.msrb.mxu0 %v10243_v5  ;;  %3801 = vmatpush.msrb.mxu1 %v10244_v60  ;;  %v10303_v5 = vld [vmem:[#allocation71_spill] sm:$0xff] }
 0x4fd   : > { %3821 = vmatpush.msrb.mxu2 %v10245_v4  ;;  %3841 = vmatpush.msrb.mxu3 %v10246_v52  ;;  %v10304_v60 = vld [vmem:[#allocation39_spill] sm:$0xff]  ;;  %v10305_v52 = vld [vmem:[#allocation72_spill] sm:$0xff] }
 0x4fe   : > { %3782 = vmatpush.msrb.mxu0 %v10247_v63  ;;  %3802 = vmatpush.msrb.mxu1 %v10248_v38  ;;  %v707_v4 = vadd.f32 %v10304_v60, %v10303_v5  ;;  %v10306_v63 = vld [vmem:[#allocation40_spill] sm:$0xff] }
 0x4ff   : > { %3822 = vmatpush.msrb.mxu2 %v10249_v61  ;;  %3842 = vmatpush.msrb.mxu3 %v10250_v56  ;;  %v736_v38 = vadd.f32 %v10306_v63, %v10305_v52 }
 0x500   : > { %3783 = vmatpush.msrb.mxu0 %v10251_v20  ;;  %3803 = vmatpush.msrb.mxu1 %v10252_v50 }
 0x501   : > { %3823 = vmatpush.msrb.mxu2 %v10253_v10  ;;  %3843 = vmatpush.msrb.mxu3 %v10254_v55 }
 0x502   : > { %3784 = vmatpush.msrb.mxu0 %v10255_v1  ;;  %3804 = vmatpush.msrb.mxu1 %v10256_v57  ;;  %v10307_v1 = vld [vmem:[#allocation73_spill] sm:$0xff]  ;;  %v10308_v57 = vld [vmem:[#allocation42_spill] sm:$0xff] }
 0x503   : > { %3824 = vmatpush.msrb.mxu2 %v10257_v14  ;;  %3844 = vmatpush.msrb.mxu3 %v10258_v19  ;;  %v794_v14 = vadd.f32 %v10308_v57, %v10307_v1 }
 0x504   : > { %3785 = vmatpush.msrb.mxu0 %v10259_v9  ;;  %3805 = vmatpush.msrb.mxu1 %v10260_v37 }
 0x505   : > { %3825 = vmatpush.msrb.mxu2 %v10261_v47  ;;  %3845 = vmatpush.msrb.mxu3 %v10262_v0 }
 0x506   : > { %3786 = vmatpush.msrb.mxu0 %v10263_v25  ;;  %3806 = vmatpush.msrb.mxu1 %v10264_v2 }
 0x507   : > { %3826 = vmatpush.msrb.mxu2 %v10265_v28  ;;  %3846 = vmatpush.msrb.mxu3 %v10266_v31  ;;  %v10309_v31 = vld [vmem:[#allocation75_spill] sm:$0xff] }
 0x508   : > { %3787 = vmatpush.msrb.mxu0 %v10267_v13  ;;  %3807 = vmatpush.msrb.mxu1 %v10268_v48  ;;  %v10310_v13 = vld [vmem:[#allocation41_spill] sm:$0xff] }
 0x509   : > { %3827 = vmatpush.msrb.mxu2 %v10269_v16  ;;  %3847 = vmatpush.msrb.mxu3 %v10270_v59  ;;  %v765_v48 = vadd.f32 %v10310_v13, %v10309_v31 }
 0x50a   : > { %3788 = vmatpush.msrb.mxu0 %v10271_v49  ;;  %3808 = vmatpush.msrb.mxu1 %v10272_v24 }
 0x50b   : > { %3828 = vmatpush.msrb.mxu2 %v10273_v17  ;;  %3848 = vmatpush.msrb.mxu3 %v10274_v40 }
 0x50c   : > { %3789 = vmatpush.msrb.mxu0 %v10275_v27  ;;  %3809 = vmatpush.msrb.mxu1 %v10276_v45 }
 0x50d   : > { %3829 = vmatpush.msrb.mxu2 %v10277_v41  ;;  %3849 = vmatpush.msrb.mxu3 %v10278_v18 }
 0x50e   : > { %3790 = vmatpush.msrb.mxu0 %v10279_v54  ;;  %3810 = vmatpush.msrb.mxu1 %v10280_v39 }
 0x50f   : > { %3830 = vmatpush.msrb.mxu2 %v10281_v22  ;;  %3850 = vmatpush.msrb.mxu3 %v10282_v43  ;;  %v10311_v43 = vld [vmem:[#allocation51_spill] sm:$0xff] }
 0x510   : > { %3791 = vmatpush.msrb.mxu0 %v10283_v53  ;;  %3811 = vmatpush.msrb.mxu1 %v10284_v11  ;;  %v10312_v11 = vld [vmem:[#allocation52_spill] sm:$0xff] }
 0x511   : > { %3831 = vmatpush.msrb.mxu2 %v10285_v7  ;;  %3851 = vmatpush.msrb.mxu3 %v10286_v26 }
 0x512   : > { %3792 = vmatpush.msrb.mxu0 %v10287_v21  ;;  %3812 = vmatpush.msrb.mxu1 %v10288_v44 }
 0x513   : > { %3832 = vmatpush.msrb.mxu2 %v10289_v12  ;;  %3852 = vmatpush.msrb.mxu3 %v10290_v33 }
 0x514   : > { %3793 = vmatpush.msrb.mxu0 %v10291_v3  ;;  %3813 = vmatpush.msrb.mxu1 %v10292_v34 }
 0x515   : > { %3833 = vmatpush.msrb.mxu2 %v10293_v46  ;;  %3853 = vmatpush.msrb.mxu3 %v10294_v32 }
 0x516   : > { %3794 = vmatpush.msrb.mxu0 %v10295_v30  ;;  %3814 = vmatpush.msrb.mxu1 %v10296_v23 }
 0x517   : > { %3834 = vmatpush.msrb.mxu2 %v10297_v62  ;;  %3854 = vmatpush.msrb.mxu3 %v10298_v29 }
 0x518   : > { %3795 = vmatpush.msrb.mxu0 %v10299_v8  ;;  %3815 = vmatpush.msrb.mxu1 %v10300_v42 }
 0x519   : > { %3835 = vmatpush.msrb.mxu2 %v10301_v35  ;;  %3855 = vmatpush.msrb.mxu3 %v10302_v51 }
 0x553   : > { %v3285_v61 = vpop.f32.mrf.mxu0  ;;  %v3305_v56 = vpop.f32.mrf.mxu1 }
 0x554   : > { %v3348_v20 = vadd.f32 %v3285_v61, %v707_v4  ;;  %v3349_v50 = vadd.f32 %v3305_v56, %v736_v38  ;;  %v10313_v38 = vld [vmem:[#allocation54_spill] sm:$0xff] }
 0x556   : > { %v4409_v10 = vmul.f32 -1.442695, %v3348_v20  ;;  %v4410_v55 = vmul.f32 -1.442695, %v3349_v50 }
 0x558   : > { %4768 = vpow2.f32 %v4409_v10 }
 0x559   : > { %4770 = vpow2.f32 %v4410_v55  ;;  %v10314_v55 = vld [vmem:[#allocation82_spill] sm:$0xff] }
 0x55a   : > { %v3345_v19 = vpop.f32.mrf.mxu3  ;;  %v3325_v28 = vpop.f32.mrf.mxu2  ;;  %vm3420_vm5 = vcmp.eq.s32.totalorder %v10314_v55, 1 }
 0x55b   : > { %v3351_v9 = vadd.f32 %v3345_v19, %v794_v14  ;;  %v3350_v59 = vadd.f32 %v3325_v28, %v765_v48 }
 0x55d   : > { %v4411_v37 = vmul.f32 -1.442695, %v3351_v9 }
 0x55e   : > { %v4769_v47 = vpop.eup %4768 }
 0x55f   : > { %v4771_v0 = vpop.eup %4770  ;;  %v3355_v25 = vadd.f32 1.0, %v4769_v47  ;;  %4772 = vpow2.f32 %v4411_v37 }
 0x560   : > { %v3374_v2 = vadd.f32 1.0, %v4771_v0 }
 0x561   : > { %4774 = vrcp.f32 %v3355_v25  ;;  %v3365_v41 = vand.u32 2147483647, %v3355_v25  ;;  %v3367_v22 = vand.u32 2147483648, %v3355_v25  ;;  %vm3361_vm0 = vweird.f32 %v3355_v25 }
 0x562   : > { %4776 = vrcp.f32 %v3374_v2  ;;  %v3386_v26 = vand.u32 2147483648, %v3374_v2  ;;  %v3384_v44 = vand.u32 2147483647, %v3374_v2  ;;  %vm3380_vm15 = vweird.f32 %v3374_v2 }
 0x563   : > { %v3368_v32 = vor.u32 1.1754944e-38, %v3367_v22  ;;  %vm3366_vm3 = vcmp.eq.f32.partialorder %v3365_v41, 8.507059e+37 }
 0x564   : > { %v3387_v29 = vor.u32 1.1754944e-38, %v3386_v26  ;;  %vm3385_vm4 = vcmp.eq.f32.partialorder %v3384_v44, 8.507059e+37 }
 0x565   : > { %v4773_v16 = vpop.eup %4772 }
 0x566   : > { %v8770_v49 = vadd.f32 1.0, %v4773_v16 }
 0x567   : > { %v4775_v24 = vpop.eup %4774 }
 0x568   : > { %v4777_v17 = vpop.eup %4776  ;;  %v3357_v40 = vmul.f32 %v4775_v24, %v3355_v25  ;;  %4778 = vrcp.f32 %v8770_v49  ;;  %vm3362_vm13 = vweird.f32 %v4775_v24  ;;  %v3406_v37 = vand.u32 2147483648, %v8770_v49 }
 0x569   : > { %v3376_v27 = vmul.f32 %v4777_v17, %v3374_v2  ;;  %4780 = vtanh.f32 %v3350_v59  ;;  %vm3381_vm14 = vweird.f32 %v4777_v17  ;;  %vm3363_vm1 = vmor %vm3361_vm0, %vm3362_vm13  ;;  %vm3400_vm7 = vweird.f32 %v8770_v49 }
 0x56a   : > { %v3358_v45 = vsub.f32 1.0, %v3357_v40  ;;  %v3456_v18 = vpop.f32.mrf.mxu0  ;;  %v3476_v54 = vpop.f32.mrf.mxu1  ;;  %vm3382_vm2 = vmor %vm3380_vm15, %vm3381_vm14  ;;  %v3404_v25 = vand.u32 2147483647, %v8770_v49  ;;  %v3407_v28 = vor.u32 1.1754944e-38, %v3406_v37  ;;  %v10315_v40 = vld [vmem:[#allocation53_spill] sm:$0xff] }
 0x56b   : > { %v3377_v39 = vsub.f32 1.0, %v3376_v27  ;;  %v3519_v53 = vadd.f32 %v3456_v18, %v10311_v43  ;;  %v3520_v7 = vadd.f32 %v3476_v54, %v10312_v11 }
 0x56c   : > { %v3359_v21 = vmul.f32 %v4775_v24, %v3358_v45  ;;  %vm3405_vm9 = vcmp.eq.f32.partialorder %v3404_v25, 8.507059e+37  ;;  %v10318_v25 = vld [vmem:[#allocation44_spill] sm:$0xff] }
 0x56d   : > { %v3378_v12 = vmul.f32 %v4777_v17, %v3377_v39  ;;  %v4414_v33 = vmul.f32 -1.442695, %v3519_v53  ;;  %v4415_v3 = vmul.f32 -1.442695, %v3520_v7 }
 0x56e   : > { %v4779_v34 = vpop.eup %4778  ;;  %v3360_v46 = vadd.f32 %v4775_v24, %v3359_v21 }
 0x56f   : > { %v3379_v30 = vadd.f32 %v4777_v17, %v3378_v12  ;;  %v3396_v23 = vmul.f32 %v4779_v34, %v8770_v49  ;;  %4782 = vpow2.f32 %v4414_v33  ;;  %v4781_v62 = vpop.eup %4780  ;;  %vm3401_vm6 = vweird.f32 %v4779_v34  ;;  %v3426_v49 = vpop.permute.xlu0 %3425 }
 0x570   : > { %v3364_v8 = vsel %vm3363_vm1, %v4775_v24, %v3360_v46  ;;  %4784 = vpow2.f32 %v4415_v3  ;;  %vm3402_vm8 = vmor %vm3400_vm7, %vm3401_vm6 }
 0x571   : > { %v3369_v42 = vsel %vm3366_vm3, %v3368_v32, %v3364_v8  ;;  %v3383_v35 = vsel %vm3382_vm2, %v4777_v17, %v3379_v30  ;;  %v3397_v51 = vsub.f32 1.0, %v3396_v23  ;;  %v3516_v60 = vpop.f32.mrf.mxu3  ;;  %v3496_v13 = vpop.f32.mrf.mxu2 }
 0x572   : > { %v3388_v4 = vsel %vm3385_vm4, %v3387_v29, %v3383_v35  ;;  %v3411_v63 = vmul.f32 %v4781_v62, %v3369_v42  ;;  %v3522_v61 = vadd.f32 %v3516_v60, %v10313_v38  ;;  %v3521_v27 = vadd.f32 %v3496_v13, %v10315_v40 }
 0x573   : > { %v3410_v56 = vmul.f32 %v3388_v4, %v8578_v15  ;;  %v3398_v20 = vmul.f32 %v4779_v34, %v3397_v51  ;;  %v10316_v4 = vld [vmem:[#allocation195_spill] sm:$0xff] }
 0x574   : > { %v4416_v50 = vmul.f32 -1.442695, %v3522_v61  ;;  %vm3591_vm2 = vcmp.eq.s32.totalorder %v10316_v4, 1 }
 0x575   : > { %v4783_v10 = vpop.eup %4782  ;;  %v3412_v57 = vadd.f32 %v3411_v63, %v3410_v56  ;;  %v3399_v19 = vadd.f32 %v4779_v34, %v3398_v20  ;;  %v8801_v63 = vpop.permute.xlu1 %3930 }
 0x576   : > { %v4785_v14 = vpop.eup %4784  ;;  %v3526_v9 = vadd.f32 1.0, %v4783_v10  ;;  %4786 = vpow2.f32 %v4416_v50 }
 0x577   : > { %4788 = vtanh.f32 %v3412_v57  ;;  %v3545_v47 = vadd.f32 1.0, %v4785_v14  ;;  %v8783_v0 = vsel %vm3420_vm5, %v3412_v57, %v8578_v15  ;;  %v3403_v2 = vsel %vm3402_vm8, %v4779_v34, %v3399_v19 }
 0x578   : > { %4790 = vrcp.f32 %v3526_v9  ;;  %v3408_v24 = vsel %vm3405_vm9, %v3407_v28, %v3403_v2  ;;  %v3538_v43 = vand.u32 2147483648, %v3526_v9  ;;  %v3536_v26 = vand.u32 2147483647, %v3526_v9 }
 0x579   : > { %4792 = vrcp.f32 %v3545_v47  ;;  %v3557_v11 = vand.u32 2147483648, %v3545_v47  ;;  %v3555_v21 = vand.u32 2147483647, %v3545_v47  ;;  %vm3532_vm12 = vweird.f32 %v3526_v9 }
 0x57a   : > { %vm3551_vm13 = vweird.f32 %v3545_v47  ;;  %v3539_v33 = vor.u32 1.1754944e-38, %v3538_v43  ;;  %vm3537_vm0 = vcmp.eq.f32.partialorder %v3536_v26, 8.507059e+37  ;;  %v738_v2 = vadd.f32 %v10318_v25, %v10305_v52 }
 0x57b   : > { %v3558_v46 = vor.u32 1.1754944e-38, %v3557_v11  ;;  %vm3556_vm1 = vcmp.eq.f32.partialorder %v3555_v21, 8.507059e+37 }
 0x57c   : > { %v4787_v48 = vpop.eup %4786 }
 0x57d   : > { %v4789_v16 = vpop.eup %4788  ;;  %v3565_v59 = vadd.f32 1.0, %v4787_v48  ;;  %v3597_v19 = vpop.permute.xlu1 %3596 }
 0x57e   : > { %v4791_v17 = vpop.eup %4790  ;;  %v3414_v15 = vmul.f32 %v4789_v16, %v3408_v24  ;;  %v10319_v24 = vld [vmem:[#allocation46_spill] sm:$0xff] }
 0x57f   : > { %v4793_v45 = vpop.eup %4792  ;;  %v3528_v41 = vmul.f32 %v4791_v17, %v3526_v9  ;;  %4794 = vrcp.f32 %v3565_v59  ;;  %vm3533_vm10 = vweird.f32 %v4791_v17  ;;  %v3577_v61 = vand.u32 2147483648, %v3565_v59 }
 0x580   : > { %v3547_v18 = vmul.f32 %v4793_v45, %v3545_v47  ;;  %v8791_v39 = vsel %vm3420_vm5, %v3414_v15, %v8589_v6  ;;  %4796 = vtanh.f32 %v3521_v27  ;;  %vm3552_vm11 = vweird.f32 %v4793_v45  ;;  %vm3534_vm14 = vmor %vm3532_vm12, %vm3533_vm10 }
 0x581   : > { %v3529_v54 = vsub.f32 1.0, %v3528_v41  ;;  %v3428_v53 = vmul.f32 %v3426_v49, %v8791_v39  ;;  %3626 = vmatmul.f32.vlgmr.msra.gmra.mxu0 %v8791_v39  ;;  %3646 = vmatmul.f32.vlgmr.msra.gmra.mxu1 %v8791_v39  ;;  %vm3553_vm15 = vmor %vm3551_vm13, %vm3552_vm11  ;;  %vm3571_vm4 = vweird.f32 %v3565_v59  ;;  %v3575_v20 = vand.u32 2147483647, %v3565_v59  ;;  %v10320_v49 = vld [vmem:[#allocation45_spill] sm:$0xff] }
 0x582   : > { %v3548_v22 = vsub.f32 1.0, %v3547_v18  ;;  %3666 = vmatmul.f32.vlgmr.msra.gmra.mxu2 %v8791_v39  ;;  %3686 = vmatmul.f32.vlgmr.msra.gmra.mxu3 %v8791_v39  ;;  %v3578_v10 = vor.u32 1.1754944e-38, %v3577_v61 }
 0x583   : > { %v3530_v7 = vmul.f32 %v4791_v17, %v3529_v54  ;;  %4412 = vst [vmem:[%s5697_s16 + $0x30] sm:$0xff] %v3428_v53  ;;  %vm3576_vm6 = vcmp.eq.f32.partialorder %v3575_v20, 8.507059e+37  ;;  %v767_v54 = vadd.f32 %v10320_v49, %v10309_v31 }
 0x584   : > { %v3549_v6 = vmul.f32 %v4793_v45, %v3548_v22 }
 0x585   : > { %v4795_v44 = vpop.eup %4794  ;;  %v3531_v12 = vadd.f32 %v4791_v17, %v3530_v7 }
 0x586   : > { %v3550_v3 = vadd.f32 %v4793_v45, %v3549_v6  ;;  %v3567_v34 = vmul.f32 %v4795_v44, %v3565_v59  ;;  %v4797_v30 = vpop.eup %4796  ;;  %vm3572_vm3 = vweird.f32 %v4795_v44 }
 0x587   : > { %v3535_v32 = vsel %vm3534_vm14, %v4791_v17, %v3531_v12  ;;  %vm3573_vm5 = vmor %vm3571_vm4, %vm3572_vm3  ;;  %v796_v17 = vadd.f32 %v10319_v24, %v10307_v1  ;;  %v10321_v12 = vld [vmem:[#allocation47_spill] sm:$0xff] }
 0x588   : > { %v3540_v23 = vsel %vm3537_vm0, %v3539_v33, %v3535_v32  ;;  %v3554_v62 = vsel %vm3553_vm15, %v4793_v45, %v3550_v3  ;;  %v3568_v29 = vsub.f32 1.0, %v3567_v34  ;;  %v10322_v3 = vld [vmem:[#allocation48_spill] sm:$0xff] }
 0x589   : > { %v3559_v8 = vsel %vm3556_vm1, %v3558_v46, %v3554_v62  ;;  %v3582_v42 = vmul.f32 %v4797_v30, %v3540_v23 }
 0x58a   : > { %v3581_v35 = vmul.f32 %v3559_v8, %v8642_v58  ;;  %v3569_v51 = vmul.f32 %v4795_v44, %v3568_v29 }
 0x58c   : > { %v3583_v60 = vadd.f32 %v3582_v42, %v3581_v35  ;;  %v3570_v38 = vadd.f32 %v4795_v44, %v3569_v51 }
 0x58e   : > { %4798 = vtanh.f32 %v3583_v60  ;;  %v8806_v56 = vsel %vm3591_vm2, %v3583_v60, %v8642_v58  ;;  %v3574_v50 = vsel %vm3573_vm5, %v4795_v44, %v3570_v38  ;;  %v10317_v58 = vld [vmem:[#allocation43_spill] sm:$0xff] }
 0x58f   : > { %v3579_v57 = vsel %vm3576_vm6, %v3578_v10, %v3574_v50  ;;  %v709_v47 = vadd.f32 %v10317_v58, %v10303_v5  ;;  %v10323_v58 = vld [vmem:[#allocation50_spill] sm:$0xff] }
 0x594   : > { %v4799_v55 = vpop.eup %4798 }
 0x595   : > { %v3585_v14 = vmul.f32 %v4799_v55, %v3579_v57 }
 0x597   : > { %v8811_v9 = vsel %vm3591_vm2, %v3585_v14, %v8666_v36 }
 0x598   : > { %v3599_v37 = vmul.f32 %v3597_v19, %v8811_v9  ;;  %3796 = vmatmul.f32.vlgmr.msrb.gmra.mxu0 %v8811_v9  ;;  %3816 = vmatmul.f32.vlgmr.msrb.gmra.mxu1 %v8811_v9 }
 0x599   : > { %3836 = vmatmul.f32.vlgmr.msrb.gmra.mxu2 %v8811_v9  ;;  %3856 = vmatmul.f32.vlgmr.msrb.gmra.mxu3 %v8811_v9 }
 0x59a   : > { %4417 = vst [vmem:[%s5699_s20 + $0x8] sm:$0xff] %v3599_v37 }
 0x5fe   : > { %v3627_v28 = vpop.f32.mrf.mxu0  ;;  %v3647_v36 = vpop.f32.mrf.mxu1 }
 0x5ff   : > { %v3690_v13 = vadd.f32 %v3627_v28, %v709_v47  ;;  %v3691_v48 = vadd.f32 %v3647_v36, %v738_v2 }
 0x601   : > { %v4419_v16 = vmul.f32 -1.442695, %v3690_v13  ;;  %v4420_v59 = vmul.f32 -1.442695, %v3691_v48 }
 0x603   : > { %4800 = vpow2.f32 %v4419_v16 }
 0x604   : > { %4802 = vpow2.f32 %v4420_v59 }
 0x605   : > { %v3687_v40 = vpop.f32.mrf.mxu3  ;;  %v3667_v52 = vpop.f32.mrf.mxu2 }
 0x606   : > { %v3693_v27 = vadd.f32 %v3687_v40, %v796_v17  ;;  %v3692_v43 = vadd.f32 %v3667_v52, %v767_v54  ;;  %v3761_v40 = vpop.permute.xlu2 %3760 }
 0x607   : > { %vm3762_vm1 = vcmp.eq.s32.totalorder %v3761_v40, 1 }
 0x608   : > { %v4421_v15 = vmul.f32 -1.442695, %v3693_v27 }
 0x609   : > { %v4801_v45 = vpop.eup %4800 }
 0x60a   : > { %v4803_v41 = vpop.eup %4802  ;;  %v3697_v5 = vadd.f32 1.0, %v4801_v45  ;;  %4804 = vpow2.f32 %v4421_v15 }
 0x60b   : > { %v3716_v18 = vadd.f32 1.0, %v4803_v41 }
 0x60c   : > { %4806 = vrcp.f32 %v3697_v5  ;;  %v3707_v32 = vand.u32 2147483647, %v3697_v5  ;;  %v3709_v30 = vand.u32 2147483648, %v3697_v5  ;;  %vm3703_vm10 = vweird.f32 %v3697_v5 }
 0x60d   : > { %4808 = vrcp.f32 %v3716_v18  ;;  %v3728_v31 = vand.u32 2147483648, %v3716_v18  ;;  %v3726_v42 = vand.u32 2147483647, %v3716_v18  ;;  %vm3722_vm9 = vweird.f32 %v3716_v18 }
 0x60e   : > { %v3710_v60 = vor.u32 1.1754944e-38, %v3709_v30  ;;  %vm3708_vm13 = vcmp.eq.f32.partialorder %v3707_v32, 8.507059e+37 }
 0x60f   : > { %v3729_v20 = vor.u32 1.1754944e-38, %v3728_v31  ;;  %vm3727_vm14 = vcmp.eq.f32.partialorder %v3726_v42, 8.507059e+37 }
 0x610   : > { %v4805_v22 = vpop.eup %4804 }
 0x611   : > { %v8827_v53 = vadd.f32 1.0, %v4805_v22 }
 0x612   : > { %v4807_v1 = vpop.eup %4806 }
 0x613   : > { %v4809_v11 = vpop.eup %4808  ;;  %v3699_v7 = vmul.f32 %v4807_v1, %v3697_v5  ;;  %4810 = vrcp.f32 %v8827_v53  ;;  %vm3704_vm7 = vweird.f32 %v4807_v1  ;;  %v3748_v17 = vand.u32 2147483648, %v8827_v53 }
 0x614   : > { %v3718_v26 = vmul.f32 %v4809_v11, %v3716_v18  ;;  %4812 = vtanh.f32 %v3692_v43  ;;  %vm3723_vm8 = vweird.f32 %v4809_v11  ;;  %vm3705_vm11 = vmor %vm3703_vm10, %vm3704_vm7  ;;  %vm3742_vm0 = vweird.f32 %v8827_v53 }
 0x615   : > { %v3797_v6 = vpop.f32.mrf.mxu0  ;;  %v3817_v21 = vpop.f32.mrf.mxu1  ;;  %v3700_v44 = vsub.f32 1.0, %v3699_v7  ;;  %vm3724_vm12 = vmor %vm3722_vm9, %vm3723_vm8  ;;  %v3746_v27 = vand.u32 2147483647, %v8827_v53  ;;  %v3749_v41 = vor.u32 1.1754944e-38, %v3748_v17 }
 0x616   : > { %v3860_v33 = vadd.f32 %v3797_v6, %v10321_v12  ;;  %v3861_v34 = vadd.f32 %v3817_v21, %v10322_v3  ;;  %v3719_v46 = vsub.f32 1.0, %v3718_v26  ;;  %v3768_v7 = vpop.permute.xlu1 %3767 }
 0x617   : > { %v3701_v23 = vmul.f32 %v4807_v1, %v3700_v44  ;;  %vm3747_vm3 = vcmp.eq.f32.partialorder %v3746_v27, 8.507059e+37 }
 0x618   : > { %v4423_v62 = vmul.f32 -1.442695, %v3860_v33  ;;  %v4424_v29 = vmul.f32 -1.442695, %v3861_v34  ;;  %v3720_v8 = vmul.f32 %v4809_v11, %v3719_v46 }
 0x619   : > { %v4811_v35 = vpop.eup %4810  ;;  %v3702_v51 = vadd.f32 %v4807_v1, %v3701_v23 }
 0x61a   : > { %4814 = vpow2.f32 %v4423_v62  ;;  %v3721_v4 = vadd.f32 %v4809_v11, %v3720_v8  ;;  %v3738_v38 = vmul.f32 %v4811_v35, %v8827_v53  ;;  %v4813_v61 = vpop.eup %4812  ;;  %vm3743_vm15 = vweird.f32 %v4811_v35  ;;  %v10324_v53 = vld [vmem:[#allocation49_spill] sm:$0xff] }
 0x61b   : > { %4816 = vpow2.f32 %v4424_v29  ;;  %v3706_v50 = vsel %vm3705_vm11, %v4807_v1, %v3702_v51  ;;  %vm3744_vm2 = vmor %vm3742_vm0, %vm3743_vm15 }
 0x61c   : > { %v3857_v10 = vpop.f32.mrf.mxu3  ;;  %v3711_v55 = vsel %vm3708_vm13, %v3710_v60, %v3706_v50  ;;  %v3725_v57 = vsel %vm3724_vm12, %v4809_v11, %v3721_v4  ;;  %v3739_v14 = vsub.f32 1.0, %v3738_v38  ;;  %v3837_v5 = vpop.f32.mrf.mxu2 }
 0x61d   : > { %v3730_v19 = vsel %vm3727_vm14, %v3729_v20, %v3725_v57  ;;  %v3753_v37 = vmul.f32 %v4813_v61, %v3711_v55  ;;  %v3863_v47 = vadd.f32 %v3857_v10, %v10323_v58  ;;  %v3862_v1 = vadd.f32 %v3837_v5, %v10324_v53 }
 0x61e   : > { %v3752_v25 = vmul.f32 %v3730_v19, %v8783_v0  ;;  %v3740_v2 = vmul.f32 %v4811_v35, %v3739_v14 }
 0x61f   : > { %v4425_v36 = vmul.f32 -1.442695, %v3863_v47 }
 0x620   : > { %v4815_v28 = vpop.eup %4814  ;;  %v3754_v48 = vadd.f32 %v3753_v37, %v3752_v25  ;;  %v3741_v59 = vadd.f32 %v4811_v35, %v3740_v2 }
 0x621   : > { %v4817_v13 = vpop.eup %4816  ;;  %v8835_v16 = vadd.f32 1.0, %v4815_v28  ;;  %4818 = vpow2.f32 %v4425_v36 }
 0x622   : > { %v8837_v24 = vadd.f32 1.0, %v4817_v13  ;;  %4820 = vtanh.f32 %v3754_v48  ;;  %v3745_v15 = vsel %vm3744_vm2, %v4811_v35, %v3741_v59  ;;  %v3764_v45 = vsel %vm3762_vm1, %v3754_v48, %v8783_v0 }
 0x623   : > { %4822 = vrcp.f32 %v8835_v16  ;;  %3943 = vst [vmem:[#allocation13] sm:$0xff] %v3764_v45  ;;  %v3750_v49 = vsel %vm3747_vm3, %v3749_v41, %v3745_v15  ;;  %v3879_v33 = vand.u32 2147483648, %v8835_v16  ;;  %v3877_v34 = vand.u32 2147483647, %v8835_v16 }
 0x624   : > { %4824 = vrcp.f32 %v8837_v24  ;;  %v3898_v3 = vand.u32 2147483648, %v8837_v24  ;;  %v3896_v31 = vand.u32 2147483647, %v8837_v24 }
 0x627   : > { %v4819_v18 = vpop.eup %4818 }
 0x628   : > { %v4821_v52 = vpop.eup %4820  ;;  %v8850_v54 = vadd.f32 1.0, %v4819_v18 }
 0x629   : > { %v4823_v22 = vpop.eup %4822  ;;  %v3756_v43 = vmul.f32 %v4821_v52, %v3750_v49 }
 0x62a   : > { %v4825_v0 = vpop.eup %4824  ;;  %v3869_v11 = vmul.f32 %v4823_v22, %v8835_v16  ;;  %4826 = vrcp.f32 %v8850_v54  ;;  %vm3874_vm4 = vweird.f32 %v4823_v22 }
 0x62b   : > { %v3763_v26 = vsel %vm3762_vm1, %v3756_v43, %v8791_v39  ;;  %v3888_v6 = vmul.f32 %v4825_v0, %v8837_v24  ;;  %4828 = vtanh.f32 %v3862_v1  ;;  %vm3893_vm5 = vweird.f32 %v4825_v0 }
 0x62c   : > { %v3770_v21 = vmul.f32 %v3768_v7, %v3763_v26  ;;  %3942 = vst [vmem:[#allocation12] sm:$0xff] %v3763_v26  ;;  %v3870_v44 = vsub.f32 1.0, %v3869_v11 }
 0x62d   : > { %v3889_v12 = vsub.f32 1.0, %v3888_v6 }
 0x62e   : > { %4422 = vst [vmem:[%s5697_s16 + $0x38] sm:$0xff] %v3770_v21  ;;  %v3871_v39 = vmul.f32 %v4823_v22, %v3870_v44 }
 0x62f   : > { %v3890_v46 = vmul.f32 %v4825_v0, %v3889_v12 }
 0x630   : > { %5303 = shalt.err (!%p5300_p4)
}
 0x631   : > { %s5474_s27 = smov 128   ;;  %s5475_s24 = smov 8   ;;  %v4827_v32 = vpop.eup %4826  ;;  %v3872_v30 = vadd.f32 %v4823_v22, %v3871_v39  ;;  %vm3873_vm6 = vweird.f32 %v8835_v16  ;;  %vm3892_vm7 = vweird.f32 %v8837_v24  ;;  %v3880_v23 = vor.u32 1.1754944e-38, %v3879_v33  ;;  %v3938_v2 = vpop.permute.xlu2 %3937 }
 0x632   : > { %4472 = dma.vmem_to_hbm [thread:$0]  (%p5609_p5), %s8859_s12, 1024, %s8861_s13, %s3947_s23, %s5474_s27, %s5474_s27, %s5475_s24   ;;  %vm3875_vm8 = vmor %vm3873_vm6, %vm3874_vm4  ;;  %v3891_v62 = vadd.f32 %v4825_v0, %v3890_v46  ;;  %v3908_v29 = vmul.f32 %v4827_v32, %v8850_v54  ;;  %v3899_v8 = vor.u32 1.1754944e-38, %v3898_v3  ;;  %vm3878_vm10 = vcmp.eq.f32.partialorder %v3877_v34, 8.507059e+37  ;;  %v4829_v35 = vpop.eup %4828 }
 0x633   : > { %vm3894_vm9 = vmor %vm3892_vm7, %vm3893_vm5  ;;  %v3876_v42 = vsel %vm3875_vm8, %v4823_v22, %v3872_v30  ;;  %vm3897_vm11 = vcmp.eq.f32.partialorder %v3896_v31, 8.507059e+37  ;;  %s5476_s22 = smov [#allocation13]   ;;  %s10326_s14 = sld [smem:[#allocation200_spill]]  ;;  %vm3932_vm12 = vcmp.eq.s32.totalorder %v8801_v63, 1  ;;  %vm3913_vm13 = vweird.f32 %v4827_v32 }
 0x634   : > { %v3881_v51 = vsel %vm3878_vm10, %v3880_v23, %v3876_v42  ;;  %v3895_v60 = vsel %vm3894_vm9, %v4825_v0, %v3891_v62  ;;  %v3909_v4 = vsub.f32 1.0, %v3908_v29  ;;  %s4010_s26 = sshll.u32 %s5476_s22, 4  ;;  %v3918_v57 = vand.u32 2147483648, %v8850_v54  ;;  %s10327_s12 = ssub.s32 1, %s5584_s15  ;;  %s4011_s26 = int_to_ptr.vmem [resolvable:$true] %s4010_s26 }
 0x635   : > { %v3900_v38 = vsel %vm3897_vm11, %v3899_v8, %v3895_v60  ;;  %v3923_v61 = vmul.f32 %v4829_v35, %v3881_v51  ;;  %vm3912_vm14 = vweird.f32 %v8850_v54  ;;  %v3916_v19 = vand.u32 2147483647, %v8850_v54  ;;  %s4463_s13 = sshll.u32 %s10327_s12, 6  ;;  %s10328_s5 = sld [smem:[#allocation198_spill]] }
 0x636   : > { %v3922_v20 = vmul.f32 %v3900_v38, %v8806_v56  ;;  %v3910_v50 = vmul.f32 %v4827_v32, %v3909_v4  ;;  %vm3914_vm15 = vmor %vm3912_vm14, %vm3913_vm13  ;;  %v3919_v58 = vor.u32 1.1754944e-38, %v3918_v57  ;;  %s3951_s16 = sand.u32 1, %s5584_s15   ;;  %s3982_s17 = sshll.u32 %s5699_s20, 4  ;;  %s3983_s17 = int_to_ptr.vmem [resolvable:$true] %s3982_s17 }
 0x637   : > { %vm3917_vm0 = vcmp.eq.f32.partialorder %v3916_v19, 8.507059e+37  ;;  %s5477_s19 = smov [#allocation12]   ;;  %s10329_s25 = sld [smem:[#allocation199_spill]] }
 0x638   : > { %v3924_v10 = vadd.f32 %v3923_v61, %v3922_v20  ;;  %v3911_v55 = vadd.f32 %v4827_v32, %v3910_v50  ;;  %s8916_s8 = sshll.u32 %s5477_s19, 4  ;;  %s3997_s8 = int_to_ptr.vmem [resolvable:$true] %s8916_s8 }
 0x639   : > { %s4012_s11 = sshll.u32 %s10326_s14, 4  ;;  %s4013_s11 = int_to_ptr.hbm [resolvable:$true] %s4012_s11 }
 0x63a   : > { %4830 = vtanh.f32 %v3924_v10  ;;  %v3934_v14 = vsel %vm3932_vm12, %v3924_v10, %v8806_v56  ;;  %v3915_v37 = vsel %vm3914_vm15, %v4827_v32, %v3911_v55 }
 0x63b   : > { %3945 = vst [vmem:[#allocation13 + $0x8] sm:$0xff] %v3934_v14  ;;  %s3981_s30 = scalar_lea.hbm %s10328_s5, %s4463_s13  ;;  %v3920_v47 = vsel %vm3917_vm0, %v3919_v58, %v3915_v37 }
 0x63c   : > { %4477 = dma.vmem_to_hbm [thread:$0]  (%p285_p2), %s4011_s26, 256, %s4013_s11, [#allocation14], %s5474_s27, %s5474_s27, %s5475_s24  }
 0x63d   : > { %s8914_s28 = sshll.u32 %s3981_s30, 4  ;;  %s3998_s14 = sshll.u32 %s10329_s25, 4  ;;  %s3985_s28 = int_to_ptr.hbm [resolvable:$true] %s8914_s28  ;;  %s3999_s14 = int_to_ptr.hbm [resolvable:$true] %s3998_s14 }
 0x63e   : > { %s3952_s11 = scalar_lea.sflag [#allocation11], %s3951_s16  ;;  %s5346_s12 = sshra.s32 %s3985_s28, 4  ;;  %s5347_s12 = int_to_ptr.hbm [resolvable:$true] %s5346_s12 }
 0x63f   : > { %s5348_s13 = scalar_lea.hbm %s5347_s12, 64  ;;  %s5352_s30 = scalar_lea.hbm %s10328_s5, 128 }
 0x640   : > { %v4831_v56 = vpop.eup %4830  ;;  %p5349_p5 = scmp.ne.s32.totalorder %s5347_s12, %s5348_s13  ;;  %p5353_p10 = scmp.lt.s32.totalorder %s5347_s12, %s10328_s5 }
 0x641   : > { %v3926_v25 = vmul.f32 %v4831_v56, %v3920_v47  ;;  %p5354_p13 = scmp.lt.s32.totalorder %s5352_s30, %s5348_s13 }
 0x642   : > { %p5350_p8 = pnand %p5349_p5, %p5632_p11 }
 0x643   : > { %v3933_v28 = vsel %vm3932_vm12, %v3926_v25, %v8811_v9  ;;  %p5355_p0 = por %p5354_p13, %p5353_p10 }
 0x644   : > { %v3940_v36 = vmul.f32 %v3938_v2, %v3933_v28  ;;  %3944 = vst [vmem:[#allocation12 + $0x8] sm:$0xff] %v3933_v28  ;;  %p5351_p9 = pneg %p5350_p8 }
 0x646   : > { %3941 = vst [vmem:[%s5699_s20] sm:$0xff] %v3940_v36  ;;  %p5356_p1 = pnand %p5355_p0, %p5351_p9 }
 0x648   : > { %5359 = shalt.err (!%p5356_p1)
}
 0x649   : > { %4473 = dma.vmem_to_hbm [thread:$0]  (%p5632_p11), %s3983_s17, 1024, %s3985_s28, %s3952_s11, %s5474_s27, %s5474_s27, %s5475_s24  }
 0x64a   : > { %4475 = dma.vmem_to_hbm [thread:$0]  (%p285_p2), %s3997_s8, 256, %s3999_s14, [#allocation11], %s5474_s27, %s5474_s27, %s5475_s24  }
 0x64b   : > { %5425 = dma.done.wait (%p285_p2), [#allocation11], 256  }
 0x64c   : > { %5427 = vsyncadd (%p285_p2), [#allocation11], 4294967040 }
 0x64d   : > { %5429 = dma.done.wait (%p285_p2), [#allocation14], 256  }
 0x64e   : > { %5431 = vsyncadd (%p285_p2), [#allocation14], 4294967040 }
 0x64f PF: > { %s10331_s20 = sld [smem:[#allocation25_spill]] }
 0x650   : > { %s10332_s16 = sld [smem:[#allocation23_spill]] }
 0x655   : > { %p4506_p11 = scmp.ge.s32.totalorder %s10331_s20, 2 }
 0x656   : > { %s4037_s28 = sand.u32 1, %s10332_s16  }
 0x657   : > { %p4492_p3 = pnand %p4506_p11, %p5615_p6  ;;  %s4038_s27 = scalar_lea.sflag [#allocation6], %s4037_s28 }
 0x659   : > { %p4493_p7 = pneg %p4492_p3 }
 0x65b   : > { %5433 = dma.done.wait (%p4493_p7), %s4038_s27, 1024  }
 0x65c   : > { %5435 = vsyncadd (%p4493_p7), %s4038_s27, 4294966272  ;;  %s10334_s24 = sadd.s32 4294967294, %s10331_s20   ;;  %p4495_p4 = pnand %p4506_p11, %p5638_p12 }
 0x65d   : > { %s4047_s26 = sand.u32 1, %s10334_s24  }
 0x65e   : > { %p4496_p5 = pneg %p4495_p4  ;;  %s4048_s15 = scalar_lea.sflag [#allocation11], %s4047_s26 }
 0x660   : > { %5437 = dma.done.wait (%p4496_p5), %s4048_s15, 1024  }
 0x661   : > { %5439 = vsyncadd (%p4496_p5), %s4048_s15, 4294966272  ;;  %s10336_s14 = sld [smem:[#allocation26_spill]]  ;;  %s10342_s28 = smov %s5458_s29 }
 0x662   : > { %s10337_s25 = sld [smem:[#allocation21_spill]] }
 0x663   : > { %s10338_s26 = sld [smem:[#allocation22_spill]] }
 0x664   : > { %s10339_s27 = sld [smem:[#allocation29_spill]] }
 0x665   : > { %s10340_s18 = sld [smem:[#allocation24_spill]] }
 0x666   : > { %s10341_s30 = sld [smem:[#allocation27_spill]] }
 0x667   : > { %p30_p2 = scmp.ge.s32.totalorder %s10336_s14, 4  }
 0x669   :  { %32 = sbr.rel (!%p30_p2) target bundleno = 16 (0x10), region = 196 }
 0x66b   : > { %s10343_s29 = smov %s10340_s18 }
 0x66e   :  { %4054 = vsyncpa [#allocation5], 1 }
 0x66f   :  { %4056 = vsyncpa [#allocation5 + $0x1], 1 }
 0x670   :  { %4057 = vsyncpa [#allocation8], 1 }
 0x671   :  { %4058 = vsyncpa [#allocation6], 1 }
 0x672   :  { %4060 = vsyncpa [#allocation6 + $0x1], 1 }
 0x673   :  { %4061 = vsyncpa [#allocation11], 1 }
 0x674   :  { %4063 = vsyncpa [#allocation11 + $0x1], 1 }
 0x675   :  { %4064 = vsyncpa [#allocation14], 1 }

</bundles_post_ra>
